<compile_context>
chip_gen: v7x
topology: tpu7x:2x2x1
jax: 0.10.0
libtpu: 0.0.40
codegen_flags: <defaults>
</compile_context>

<pallas_src>
import math
import functools

import jax
import jax.numpy as jnp
from jax.experimental import pallas as pl
from jax.experimental.pallas import tpu as pltpu

NEG_INF = -1e9  # large-negative stand-in for -inf


# ----------------------------------------------------------------------------
# Fused whole-model kernel
# ----------------------------------------------------------------------------
def _seq2seq_kernel(
    # activations / masks
    src_ref, tgt_ref, src_bias_ref, tgt_bias_ref, mem_bias_ref,
    # encoder stack (stacked over layers)
    e_wqkv_ref, e_bqkv_ref, e_wo_ref, e_bo_ref,
    e_w1_ref, e_b1_ref, e_w2_ref, e_b2_ref, e_ln_ref,
    # decoder stack (stacked over layers)
    d_wqkv_ref, d_bqkv_ref, d_wos_ref, d_bos_ref,
    d_wqc_ref, d_bqc_ref, d_wkvc_ref, d_bkvc_ref, d_woc_ref, d_boc_ref,
    d_w1_ref, d_b1_ref, d_w2_ref, d_b2_ref, d_ln_ref,
    # generator
    gen_w_ref, gen_b_ref,
    # output
    out_ref,
    *, nhead, B, Ss, St, eps):
    """Full transformer forward (post-LN, ReLU FFN) for one batch of sequences."""
    E = src_ref.shape[-1]
    Dh = E // nhead
    scale = 1.0 / math.sqrt(Dh)
    n_enc = e_wqkv_ref.shape[0]
    n_dec = d_wqkv_ref.shape[0]
    bf16 = jnp.bfloat16
    f32 = jnp.float32

    def layer_norm(y, g, b):
        mu = jnp.mean(y, axis=-1, keepdims=True)
        var = jnp.mean((y - mu) ** 2, axis=-1, keepdims=True)
        return (y - mu) * jax.lax.rsqrt(var + eps) * g + b

    def attention(q, k, v, bias, Sq, Sk):
        """q:(B*Sq,E) k,v:(B*Sk,E) f32; bias:(B,Sq,Sk) f32 -> ctx (B*Sq,E) f32."""
        q16 = q.astype(bf16)
        k16 = k.astype(bf16)
        v16 = v.astype(bf16)
        rows = []
        for b in range(B):                                   # tiny, unrolled
            qb = q16[b * Sq:(b + 1) * Sq, :]
            kb = k16[b * Sk:(b + 1) * Sk, :]
            vb = v16[b * Sk:(b + 1) * Sk, :]
            bias_b = bias[b]                                 # (Sq, Sk)
            heads = []
            for h in range(nhead):                           # tiny, unrolled
                sl = slice(h * Dh, (h + 1) * Dh)
                s = jax.lax.dot_general(qb[:, sl], kb[:, sl],
                                        (((1,), (1,)), ((), ())),
                                        preferred_element_type=f32)
                s = s * scale + bias_b
                m = jnp.max(s, axis=-1, keepdims=True)
                p = jnp.exp(s - m)
                p = p * pl.reciprocal(jnp.sum(p, axis=-1, keepdims=True), approx=True)
                heads.append(jnp.dot(p.astype(bf16), vb[:, sl],
                                     preferred_element_type=f32))
            rows.append(jnp.concatenate(heads, axis=-1))     # (Sq, E)
        return jnp.concatenate(rows, axis=0)                 # (B*Sq, E)

    def self_attn(x, wqkv, bqkv, wo, bo, bias, S):
        qkv = jnp.dot(x.astype(bf16), wqkv, preferred_element_type=f32) + bqkv
        ctx = attention(qkv[:, :E], qkv[:, E:2 * E], qkv[:, 2 * E:], bias, S, S)
        return jnp.dot(ctx.astype(bf16), wo, preferred_element_type=f32) + bo

    def cross_attn(x, mem, wq, bq, wkv, bkv, wo, bo, bias, Sq, Sk):
        q = jnp.dot(x.astype(bf16), wq, preferred_element_type=f32) + bq
        kv = jnp.dot(mem.astype(bf16), wkv, preferred_element_type=f32) + bkv
        ctx = attention(q, kv[:, :E], kv[:, E:], bias, Sq, Sk)
        return jnp.dot(ctx.astype(bf16), wo, preferred_element_type=f32) + bo

    def ffn(x, w1, b1, w2, b2):
        h = jnp.maximum(jnp.dot(x.astype(bf16), w1, preferred_element_type=f32) + b1, 0.0)
        return jnp.dot(h.astype(bf16), w2, preferred_element_type=f32) + b2

    # ----------------------------- encoder -----------------------------
    x = src_ref[...]                                          # (B*Ss, E) f32
    src_bias = src_bias_ref[...]                              # (B, Ss, Ss)
    for l in range(n_enc):                                    # unrolled, weights resident
        ln = e_ln_ref[l]                                      # (4, E): g1,b1,g2,b2
        a = self_attn(x, e_wqkv_ref[l], e_bqkv_ref[l], e_wo_ref[l], e_bo_ref[l],
                      src_bias, Ss)
        x = layer_norm(x + a, ln[0:1], ln[1:2])
        f = ffn(x, e_w1_ref[l], e_b1_ref[l], e_w2_ref[l], e_b2_ref[l])
        x = layer_norm(x + f, ln[2:3], ln[3:4])
    memory = x                                                # (B*Ss, E)

    # ----------------------------- decoder -----------------------------
    y = tgt_ref[...]                                          # (B*St, E) f32
    tgt_bias = tgt_bias_ref[...]                              # (B, St, St)
    mem_bias = mem_bias_ref[...]                              # (B, St, Ss)
    for l in range(n_dec):
        ln = d_ln_ref[l]                                      # (6, E): g1,b1,g2,b2,g3,b3
        a = self_attn(y, d_wqkv_ref[l], d_bqkv_ref[l], d_wos_ref[l], d_bos_ref[l],
                      tgt_bias, St)
        y = layer_norm(y + a, ln[0:1], ln[1:2])
        c = cross_attn(y, memory, d_wqc_ref[l], d_bqc_ref[l], d_wkvc_ref[l],
                       d_bkvc_ref[l], d_woc_ref[l], d_boc_ref[l], mem_bias, St, Ss)
        y = layer_norm(y + c, ln[2:3], ln[3:4])
        f = ffn(y, d_w1_ref[l], d_b1_ref[l], d_w2_ref[l], d_b2_ref[l])
        y = layer_norm(y + f, ln[4:5], ln[5:6])

    # -------------------- generator, written as (St, B, V) --------------------
    logits = jnp.dot(y.astype(bf16), gen_w_ref[...],
                     preferred_element_type=f32) + gen_b_ref[...]      # (B*St, V)
    out = jnp.concatenate(
        [logits[b * St:(b + 1) * St, :][:, None, :] for b in range(B)], axis=1)
    out_ref[...] = out                                                  # (St, B, V)


# ----------------------------------------------------------------------------
# Wrapper: embeddings / positional encoding / mask conversion in JAX glue,
# everything else in the single fused Pallas kernel.
# ----------------------------------------------------------------------------
def positional_table(maxlen, emb_size):
    den = jnp.exp(-jnp.arange(0, emb_size, 2, dtype=jnp.float32)
                  * math.log(10000.0) / emb_size)
    pos = jnp.arange(0, maxlen, dtype=jnp.float32)[:, None]
    pe = jnp.zeros((maxlen, emb_size), jnp.float32)
    pe = pe.at[:, 0::2].set(jnp.sin(pos * den))
    pe = pe.at[:, 1::2].set(jnp.cos(pos * den))
    return pe  # (maxlen, E)


def _attn_bias(attn_mask, pad_mask, B, Sq, Sk):
    """Combine an (Sq,Sk) attention mask with a (B,Sk) key-padding mask -> (B,Sq,Sk)."""
    if attn_mask is None:
        base = jnp.zeros((Sq, Sk), jnp.float32)
    else:
        am = jnp.asarray(attn_mask)
        base = (jnp.where(am, NEG_INF, 0.0).astype(jnp.float32)
                if am.dtype == jnp.bool_ else am.astype(jnp.float32))
    if pad_mask is None:
        pad = jnp.zeros((B, 1, Sk), jnp.float32)
    else:
        pad = jnp.where(jnp.asarray(pad_mask), NEG_INF, 0.0).astype(jnp.float32)
        pad = pad.reshape(B, 1, Sk)
    return base[None, :, :] + pad


@functools.partial(jax.jit, static_argnames=("nhead",))
def seq2seq_forward(params, src, trg, src_mask, tgt_mask,
                    src_padding_mask, tgt_padding_mask, memory_key_padding_mask,
                    *, nhead):
    E = params['src_emb'].shape[1]
    V = params['gen_w'].shape[1]
    Ss, B = src.shape
    St = trg.shape[0]
    assert E % nhead == 0
    pe = params['pos_table']

    # Token embedding gather + positional encoding (dropout = identity, eval mode).
    src_x = (jnp.take(params['src_emb'], src.T, axis=0) * math.sqrt(E)
             + pe[None, :Ss, :]).reshape(B * Ss, E)
    tgt_x = (jnp.take(params['tgt_emb'], trg.T, axis=0) * math.sqrt(E)
             + pe[None, :St, :]).reshape(B * St, E)

    src_bias = _attn_bias(src_mask, src_padding_mask, B, Ss, Ss)
    tgt_bias = _attn_bias(tgt_mask, tgt_padding_mask, B, St, St)
    mem_bias = _attn_bias(None, memory_key_padding_mask, B, St, Ss)  # memory_mask=None

    enc, dec = params['enc'], params['dec']
    args = (src_x, tgt_x, src_bias, tgt_bias, mem_bias,
            enc['wqkv'], enc['bqkv'], enc['wo'], enc['bo'],
            enc['w1'], enc['b1'], enc['w2'], enc['b2'], enc['ln'],
            dec['wqkv'], dec['bqkv'], dec['wos'], dec['bos'],
            dec['wqc'], dec['bqc'], dec['wkvc'], dec['bkvc'], dec['woc'], dec['boc'],
            dec['w1'], dec['b1'], dec['w2'], dec['b2'], dec['ln'],
            params['gen_w'], params['gen_b'])

    kern = functools.partial(_seq2seq_kernel, nhead=nhead, B=B, Ss=Ss, St=St, eps=1e-5)
    vmem = pl.BlockSpec(memory_space=pltpu.MemorySpace.VMEM)  # whole array resident in VMEM
    return pl.pallas_call(
        kern,
        out_shape=jax.ShapeDtypeStruct((St, B, V), jnp.float32),
        in_specs=[vmem] * len(args),
        out_specs=vmem,
    )(*args)


# ----------------------------------------------------------------------------
# Deterministic parameter initialization (shapes from the PyTorch __init__).
# Matmul weights are pre-cast to bf16 (f32 accumulation in-kernel).
# ----------------------------------------------------------------------------
def init_params(key, num_enc, num_dec, emb_size, dim_feedforward,
                src_vocab, tgt_vocab, maxlen=5000):
    E, F = emb_size, dim_feedforward
    keys = iter(jax.random.split(key, 128))

    def w(shape, scale=0.02, dtype=jnp.float32):
        return (scale * jax.random.normal(next(keys), shape, jnp.float32)).astype(dtype)

    def ln_stack(L, n_norms):
        row = jnp.concatenate([jnp.stack([jnp.ones((E,), jnp.float32),
                                          jnp.zeros((E,), jnp.float32)])
                               for _ in range(n_norms)], axis=0)        # (2*n, E)
        return jnp.tile(row[None], (L, 1, 1))                           # (L, 2*n, E)

    enc = dict(
        wqkv=w((num_enc, E, 3 * E), dtype=jnp.bfloat16),
        bqkv=w((num_enc, 1, 3 * E)),
        wo=w((num_enc, E, E), dtype=jnp.bfloat16),
        bo=w((num_enc, 1, E)),
        w1=w((num_enc, E, F), dtype=jnp.bfloat16),
        b1=w((num_enc, 1, F)),
        w2=w((num_enc, F, E), dtype=jnp.bfloat16),
        b2=w((num_enc, 1, E)),
        ln=ln_stack(num_enc, 2),
    )
    dec = dict(
        wqkv=w((num_dec, E, 3 * E), dtype=jnp.bfloat16),
        bqkv=w((num_dec, 1, 3 * E)),
        wos=w((num_dec, E, E), dtype=jnp.bfloat16),
        bos=w((num_dec, 1, E)),
        wqc=w((num_dec, E, E), dtype=jnp.bfloat16),
        bqc=w((num_dec, 1, E)),
        wkvc=w((num_dec, E, 2 * E), dtype=jnp.bfloat16),
        bkvc=w((num_dec, 1, 2 * E)),
        woc=w((num_dec, E, E), dtype=jnp.bfloat16),
        boc=w((num_dec, 1, E)),
        w1=w((num_dec, E, F), dtype=jnp.bfloat16),
        b1=w((num_dec, 1, F)),
        w2=w((num_dec, F, E), dtype=jnp.bfloat16),
        b2=w((num_dec, 1, E)),
        ln=ln_stack(num_dec, 3),
    )
    return dict(
        src_emb=w((src_vocab, E), 1.0),
        tgt_emb=w((tgt_vocab, E), 1.0),
        pos_table=positional_table(maxlen, E),
        enc=enc,
        dec=dec,
        gen_w=w((E, tgt_vocab), dtype=jnp.bfloat16),
        gen_b=w((1, tgt_vocab)),
    )


# ----------------------------------------------------------------------------
if __name__ == "__main__":
    NHEAD = 4
    EMB = 32
    FFN = 64
    NUM_ENC = 2
    NUM_DEC = 2
    SRC_VOCAB = 50
    TGT_VOCAB = 56
    S_SRC, S_TGT, B = 8, 6, 2

    key = jax.random.PRNGKey(0)
    k_param, k_src, k_tgt = jax.random.split(key, 3)

    params = init_params(k_param, NUM_ENC, NUM_DEC, EMB, FFN,
                         SRC_VOCAB, TGT_VOCAB, maxlen=64)

    src = jax.random.randint(k_src, (S_SRC, B), 0, SRC_VOCAB, dtype=jnp.int32)
    trg = jax.random.randint(k_tgt, (S_TGT, B), 0, TGT_VOCAB, dtype=jnp.int32)

    # src_mask: additive float mask (all zeros); tgt_mask: causal mask
    src_mask = jnp.zeros((S_SRC, S_SRC), jnp.float32)
    tgt_mask = jnp.where(jnp.triu(jnp.ones((S_TGT, S_TGT), bool), k=1),
                         NEG_INF, 0.0).astype(jnp.float32)
    # padding masks: True = padded token (ignored as attention key)
    src_padding_mask = jnp.zeros((B, S_SRC), bool).at[1, S_SRC - 1].set(True)
    tgt_padding_mask = jnp.zeros((B, S_TGT), bool)
    memory_key_padding_mask = src_padding_mask

    # TODO(synk): dropout layers are identity (eval mode); training-mode dropout not ported.
    out = seq2seq_forward(params, src, trg, src_mask, tgt_mask,
                          src_padding_mask, tgt_padding_mask,
                          memory_key_padding_mask, nhead=NHEAD)
    jax.block_until_ready(out)
    assert out.shape == (S_TGT, B, TGT_VOCAB), out.shape
    assert bool(jnp.all(jnp.isfinite(out)))
    print("KERNEL_OK")
</pallas_src>

<mosaic_0001>
module attributes {stable_mosaic.version = 11 : i64} {
  func.func @_seq2seq_kernel(%arg0: memref<16x32xf32, #tpu.memory_space<vmem>>, %arg1: memref<12x32xf32, #tpu.memory_space<vmem>>, %arg2: memref<2x8x8xf32, #tpu.memory_space<vmem>>, %arg3: memref<2x6x6xf32, #tpu.memory_space<vmem>>, %arg4: memref<2x6x8xf32, #tpu.memory_space<vmem>>, %arg5: memref<2x32x96xbf16, #tpu.memory_space<vmem>>, %arg6: memref<2x1x96xf32, #tpu.memory_space<vmem>>, %arg7: memref<2x32x32xbf16, #tpu.memory_space<vmem>>, %arg8: memref<2x1x32xf32, #tpu.memory_space<vmem>>, %arg9: memref<2x32x64xbf16, #tpu.memory_space<vmem>>, %arg10: memref<2x1x64xf32, #tpu.memory_space<vmem>>, %arg11: memref<2x64x32xbf16, #tpu.memory_space<vmem>>, %arg12: memref<2x1x32xf32, #tpu.memory_space<vmem>>, %arg13: memref<2x4x32xf32, #tpu.memory_space<vmem>>, %arg14: memref<2x32x96xbf16, #tpu.memory_space<vmem>>, %arg15: memref<2x1x96xf32, #tpu.memory_space<vmem>>, %arg16: memref<2x32x32xbf16, #tpu.memory_space<vmem>>, %arg17: memref<2x1x32xf32, #tpu.memory_space<vmem>>, %arg18: memref<2x32x32xbf16, #tpu.memory_space<vmem>>, %arg19: memref<2x1x32xf32, #tpu.memory_space<vmem>>, %arg20: memref<2x32x64xbf16, #tpu.memory_space<vmem>>, %arg21: memref<2x1x64xf32, #tpu.memory_space<vmem>>, %arg22: memref<2x32x32xbf16, #tpu.memory_space<vmem>>, %arg23: memref<2x1x32xf32, #tpu.memory_space<vmem>>, %arg24: memref<2x32x64xbf16, #tpu.memory_space<vmem>>, %arg25: memref<2x1x64xf32, #tpu.memory_space<vmem>>, %arg26: memref<2x64x32xbf16, #tpu.memory_space<vmem>>, %arg27: memref<2x1x32xf32, #tpu.memory_space<vmem>>, %arg28: memref<2x6x32xf32, #tpu.memory_space<vmem>>, %arg29: memref<32x56xbf16, #tpu.memory_space<vmem>>, %arg30: memref<1x56xf32, #tpu.memory_space<vmem>>, %arg31: memref<6x2x56xf32, #tpu.memory_space<vmem>>) attributes {dimension_semantics = [], scalar_prefetch = 0 : i64, scratch_operands = 0 : i64, tpu.core_type = #tpu.core_type<tc>} {
    %c0 = arith.constant 0 : index
    %c0_0 = arith.constant 0 : index
    %0 = vector.load %arg0[%c0, %c0_0] : memref<16x32xf32, #tpu.memory_space<vmem>>, vector<16x32xf32>
    %c0_1 = arith.constant 0 : index
    %c0_2 = arith.constant 0 : index
    %c0_3 = arith.constant 0 : index
    %1 = vector.load %arg2[%c0_1, %c0_2, %c0_3] : memref<2x8x8xf32, #tpu.memory_space<vmem>>, vector<2x8x8xf32>
    %c0_4 = arith.constant 0 : index
    %c0_5 = arith.constant 0 : index
    %c0_6 = arith.constant 0 : index
    %2 = vector.load %arg13[%c0_4, %c0_5, %c0_6] : memref<2x4x32xf32, #tpu.memory_space<vmem>>, vector<1x4x32xf32>
    %3 = vector.shape_cast %2 : vector<1x4x32xf32> to vector<4x32xf32>
    %c0_7 = arith.constant 0 : index
    %c0_8 = arith.constant 0 : index
    %c0_9 = arith.constant 0 : index
    %4 = vector.load %arg5[%c0_7, %c0_8, %c0_9] : memref<2x32x96xbf16, #tpu.memory_space<vmem>>, vector<1x32x96xbf16>
    %5 = vector.shape_cast %4 : vector<1x32x96xbf16> to vector<32x96xbf16>
    %c0_10 = arith.constant 0 : index
    %c0_11 = arith.constant 0 : index
    %c0_12 = arith.constant 0 : index
    %6 = vector.load %arg6[%c0_10, %c0_11, %c0_12] : memref<2x1x96xf32, #tpu.memory_space<vmem>>, vector<1x1x96xf32>
    %7 = vector.shape_cast %6 : vector<1x1x96xf32> to vector<1x96xf32>
    %c0_13 = arith.constant 0 : index
    %c0_14 = arith.constant 0 : index
    %c0_15 = arith.constant 0 : index
    %8 = vector.load %arg7[%c0_13, %c0_14, %c0_15] : memref<2x32x32xbf16, #tpu.memory_space<vmem>>, vector<1x32x32xbf16>
    %9 = vector.shape_cast %8 : vector<1x32x32xbf16> to vector<32x32xbf16>
    %c0_16 = arith.constant 0 : index
    %c0_17 = arith.constant 0 : index
    %c0_18 = arith.constant 0 : index
    %10 = vector.load %arg8[%c0_16, %c0_17, %c0_18] : memref<2x1x32xf32, #tpu.memory_space<vmem>>, vector<1x1x32xf32>
    %11 = vector.shape_cast %10 : vector<1x1x32xf32> to vector<1x32xf32>
    %12 = arith.truncf %0 : vector<16x32xf32> to vector<16x32xbf16>
    %cst = arith.constant dense<0.000000e+00> : vector<16x96xf32>
    %13 = tpu.matmul %12, %5, %cst {dimension_numbers = #tpu.dot_dimension_numbers<[1], [0], [0], [1], [0, 0, 1, 1], [], []>} : vector<16x32xbf16>, vector<32x96xbf16>, vector<16x96xf32> -> vector<16x96xf32>
    %14 = vector.broadcast %7 : vector<1x96xf32> to vector<16x96xf32>
    %15 = arith.addf %13, %14 : vector<16x96xf32>
    %16 = vector.extract_strided_slice %15 {offsets = [0, 0], sizes = [16, 32], strides = [1, 1]} : vector<16x96xf32> to vector<16x32xf32>
    %17 = vector.extract_strided_slice %15 {offsets = [0, 32], sizes = [16, 32], strides = [1, 1]} : vector<16x96xf32> to vector<16x32xf32>
    %18 = vector.extract_strided_slice %15 {offsets = [0, 64], sizes = [16, 32], strides = [1, 1]} : vector<16x96xf32> to vector<16x32xf32>
    %19 = arith.truncf %16 : vector<16x32xf32> to vector<16x32xbf16>
    %20 = arith.truncf %17 : vector<16x32xf32> to vector<16x32xbf16>
    %21 = arith.truncf %18 : vector<16x32xf32> to vector<16x32xbf16>
    %22 = vector.extract_strided_slice %19 {offsets = [0, 0], sizes = [8, 32], strides = [1, 1]} : vector<16x32xbf16> to vector<8x32xbf16>
    %23 = vector.extract_strided_slice %20 {offsets = [0, 0], sizes = [8, 32], strides = [1, 1]} : vector<16x32xbf16> to vector<8x32xbf16>
    %24 = vector.extract_strided_slice %21 {offsets = [0, 0], sizes = [8, 32], strides = [1, 1]} : vector<16x32xbf16> to vector<8x32xbf16>
    %25 = vector.extract_strided_slice %1 {offsets = [0, 0, 0], sizes = [1, 8, 8], strides = [1, 1, 1]} : vector<2x8x8xf32> to vector<1x8x8xf32>
    %26 = vector.shape_cast %25 : vector<1x8x8xf32> to vector<8x8xf32>
    %27 = vector.extract_strided_slice %22 {offsets = [0, 0], sizes = [8, 8], strides = [1, 1]} : vector<8x32xbf16> to vector<8x8xbf16>
    %28 = vector.extract_strided_slice %23 {offsets = [0, 0], sizes = [8, 8], strides = [1, 1]} : vector<8x32xbf16> to vector<8x8xbf16>
    %cst_19 = arith.constant dense<0.000000e+00> : vector<8x8xf32>
    %29 = tpu.matmul %27, %28, %cst_19 {dimension_numbers = #tpu.dot_dimension_numbers<[1], [1], [0], [0], [0, 0, 1, 0], [], []>} : vector<8x8xbf16>, vector<8x8xbf16>, vector<8x8xf32> -> vector<8x8xf32>
    %cst_20 = arith.constant 0.353553385 : f32
    %30 = vector.broadcast %cst_20 : f32 to vector<8x8xf32>
    %31 = arith.mulf %29, %30 : vector<8x8xf32>
    %32 = arith.addf %31, %26 : vector<8x8xf32>
    %cst_21 = arith.constant dense<0xFF800000> : vector<8xf32>
    %33 = vector.multi_reduction <maximumf>, %32, %cst_21 [1] : vector<8x8xf32> to vector<8xf32>
    %34 = vector.shape_cast %33 : vector<8xf32> to vector<8x1xf32>
    %35 = vector.broadcast %34 : vector<8x1xf32> to vector<8x8xf32>
    %36 = arith.subf %32, %35 : vector<8x8xf32>
    %37 = math.exp %36 : vector<8x8xf32>
    %cst_22 = arith.constant dense<0.000000e+00> : vector<8xf32>
    %38 = vector.multi_reduction <add>, %37, %cst_22 [1] : vector<8x8xf32> to vector<8xf32>
    %39 = vector.shape_cast %38 : vector<8xf32> to vector<8x1xf32>
    %40 = tpu.reciprocal %39 {approx = true} : vector<8x1xf32> -> vector<8x1xf32>
    %41 = vector.broadcast %40 : vector<8x1xf32> to vector<8x8xf32>
    %42 = arith.mulf %37, %41 : vector<8x8xf32>
    %43 = arith.truncf %42 : vector<8x8xf32> to vector<8x8xbf16>
    %44 = vector.extract_strided_slice %24 {offsets = [0, 0], sizes = [8, 8], strides = [1, 1]} : vector<8x32xbf16> to vector<8x8xbf16>
    %cst_23 = arith.constant dense<0.000000e+00> : vector<8x8xf32>
    %45 = tpu.matmul %43, %44, %cst_23 {dimension_numbers = #tpu.dot_dimension_numbers<[1], [0], [0], [1], [0, 0, 1, 1], [], []>} : vector<8x8xbf16>, vector<8x8xbf16>, vector<8x8xf32> -> vector<8x8xf32>
    %46 = vector.extract_strided_slice %22 {offsets = [0, 8], sizes = [8, 8], strides = [1, 1]} : vector<8x32xbf16> to vector<8x8xbf16>
    %47 = vector.extract_strided_slice %23 {offsets = [0, 8], sizes = [8, 8], strides = [1, 1]} : vector<8x32xbf16> to vector<8x8xbf16>
    %cst_24 = arith.constant dense<0.000000e+00> : vector<8x8xf32>
    %48 = tpu.matmul %46, %47, %cst_24 {dimension_numbers = #tpu.dot_dimension_numbers<[1], [1], [0], [0], [0, 0, 1, 0], [], []>} : vector<8x8xbf16>, vector<8x8xbf16>, vector<8x8xf32> -> vector<8x8xf32>
    %cst_25 = arith.constant 0.353553385 : f32
    %49 = vector.broadcast %cst_25 : f32 to vector<8x8xf32>
    %50 = arith.mulf %48, %49 : vector<8x8xf32>
    %51 = arith.addf %50, %26 : vector<8x8xf32>
    %cst_26 = arith.constant dense<0xFF800000> : vector<8xf32>
    %52 = vector.multi_reduction <maximumf>, %51, %cst_26 [1] : vector<8x8xf32> to vector<8xf32>
    %53 = vector.shape_cast %52 : vector<8xf32> to vector<8x1xf32>
    %54 = vector.broadcast %53 : vector<8x1xf32> to vector<8x8xf32>
    %55 = arith.subf %51, %54 : vector<8x8xf32>
    %56 = math.exp %55 : vector<8x8xf32>
    %cst_27 = arith.constant dense<0.000000e+00> : vector<8xf32>
    %57 = vector.multi_reduction <add>, %56, %cst_27 [1] : vector<8x8xf32> to vector<8xf32>
    %58 = vector.shape_cast %57 : vector<8xf32> to vector<8x1xf32>
    %59 = tpu.reciprocal %58 {approx = true} : vector<8x1xf32> -> vector<8x1xf32>
    %60 = vector.broadcast %59 : vector<8x1xf32> to vector<8x8xf32>
    %61 = arith.mulf %56, %60 : vector<8x8xf32>
    %62 = arith.truncf %61 : vector<8x8xf32> to vector<8x8xbf16>
    %63 = vector.extract_strided_slice %24 {offsets = [0, 8], sizes = [8, 8], strides = [1, 1]} : vector<8x32xbf16> to vector<8x8xbf16>
    %cst_28 = arith.constant dense<0.000000e+00> : vector<8x8xf32>
    %64 = tpu.matmul %62, %63, %cst_28 {dimension_numbers = #tpu.dot_dimension_numbers<[1], [0], [0], [1], [0, 0, 1, 1], [], []>} : vector<8x8xbf16>, vector<8x8xbf16>, vector<8x8xf32> -> vector<8x8xf32>
    %65 = vector.extract_strided_slice %22 {offsets = [0, 16], sizes = [8, 8], strides = [1, 1]} : vector<8x32xbf16> to vector<8x8xbf16>
    %66 = vector.extract_strided_slice %23 {offsets = [0, 16], sizes = [8, 8], strides = [1, 1]} : vector<8x32xbf16> to vector<8x8xbf16>
    %cst_29 = arith.constant dense<0.000000e+00> : vector<8x8xf32>
    %67 = tpu.matmul %65, %66, %cst_29 {dimension_numbers = #tpu.dot_dimension_numbers<[1], [1], [0], [0], [0, 0, 1, 0], [], []>} : vector<8x8xbf16>, vector<8x8xbf16>, vector<8x8xf32> -> vector<8x8xf32>
    %cst_30 = arith.constant 0.353553385 : f32
    %68 = vector.broadcast %cst_30 : f32 to vector<8x8xf32>
    %69 = arith.mulf %67, %68 : vector<8x8xf32>
    %70 = arith.addf %69, %26 : vector<8x8xf32>
    %cst_31 = arith.constant dense<0xFF800000> : vector<8xf32>
    %71 = vector.multi_reduction <maximumf>, %70, %cst_31 [1] : vector<8x8xf32> to vector<8xf32>
    %72 = vector.shape_cast %71 : vector<8xf32> to vector<8x1xf32>
    %73 = vector.broadcast %72 : vector<8x1xf32> to vector<8x8xf32>
    %74 = arith.subf %70, %73 : vector<8x8xf32>
    %75 = math.exp %74 : vector<8x8xf32>
    %cst_32 = arith.constant dense<0.000000e+00> : vector<8xf32>
    %76 = vector.multi_reduction <add>, %75, %cst_32 [1] : vector<8x8xf32> to vector<8xf32>
    %77 = vector.shape_cast %76 : vector<8xf32> to vector<8x1xf32>
    %78 = tpu.reciprocal %77 {approx = true} : vector<8x1xf32> -> vector<8x1xf32>
    %79 = vector.broadcast %78 : vector<8x1xf32> to vector<8x8xf32>
    %80 = arith.mulf %75, %79 : vector<8x8xf32>
    %81 = arith.truncf %80 : vector<8x8xf32> to vector<8x8xbf16>
    %82 = vector.extract_strided_slice %24 {offsets = [0, 16], sizes = [8, 8], strides = [1, 1]} : vector<8x32xbf16> to vector<8x8xbf16>
    %cst_33 = arith.constant dense<0.000000e+00> : vector<8x8xf32>
    %83 = tpu.matmul %81, %82, %cst_33 {dimension_numbers = #tpu.dot_dimension_numbers<[1], [0], [0], [1], [0, 0, 1, 1], [], []>} : vector<8x8xbf16>, vector<8x8xbf16>, vector<8x8xf32> -> vector<8x8xf32>
    %84 = vector.extract_strided_slice %22 {offsets = [0, 24], sizes = [8, 8], strides = [1, 1]} : vector<8x32xbf16> to vector<8x8xbf16>
    %85 = vector.extract_strided_slice %23 {offsets = [0, 24], sizes = [8, 8], strides = [1, 1]} : vector<8x32xbf16> to vector<8x8xbf16>
    %cst_34 = arith.constant dense<0.000000e+00> : vector<8x8xf32>
    %86 = tpu.matmul %84, %85, %cst_34 {dimension_numbers = #tpu.dot_dimension_numbers<[1], [1], [0], [0], [0, 0, 1, 0], [], []>} : vector<8x8xbf16>, vector<8x8xbf16>, vector<8x8xf32> -> vector<8x8xf32>
    %cst_35 = arith.constant 0.353553385 : f32
    %87 = vector.broadcast %cst_35 : f32 to vector<8x8xf32>
    %88 = arith.mulf %86, %87 : vector<8x8xf32>
    %89 = arith.addf %88, %26 : vector<8x8xf32>
    %cst_36 = arith.constant dense<0xFF800000> : vector<8xf32>
    %90 = vector.multi_reduction <maximumf>, %89, %cst_36 [1] : vector<8x8xf32> to vector<8xf32>
    %91 = vector.shape_cast %90 : vector<8xf32> to vector<8x1xf32>
    %92 = vector.broadcast %91 : vector<8x1xf32> to vector<8x8xf32>
    %93 = arith.subf %89, %92 : vector<8x8xf32>
    %94 = math.exp %93 : vector<8x8xf32>
    %cst_37 = arith.constant dense<0.000000e+00> : vector<8xf32>
    %95 = vector.multi_reduction <add>, %94, %cst_37 [1] : vector<8x8xf32> to vector<8xf32>
    %96 = vector.shape_cast %95 : vector<8xf32> to vector<8x1xf32>
    %97 = tpu.reciprocal %96 {approx = true} : vector<8x1xf32> -> vector<8x1xf32>
    %98 = vector.broadcast %97 : vector<8x1xf32> to vector<8x8xf32>
    %99 = arith.mulf %94, %98 : vector<8x8xf32>
    %100 = arith.truncf %99 : vector<8x8xf32> to vector<8x8xbf16>
    %101 = vector.extract_strided_slice %24 {offsets = [0, 24], sizes = [8, 8], strides = [1, 1]} : vector<8x32xbf16> to vector<8x8xbf16>
    %cst_38 = arith.constant dense<0.000000e+00> : vector<8x8xf32>
    %102 = tpu.matmul %100, %101, %cst_38 {dimension_numbers = #tpu.dot_dimension_numbers<[1], [0], [0], [1], [0, 0, 1, 1], [], []>} : vector<8x8xbf16>, vector<8x8xbf16>, vector<8x8xf32> -> vector<8x8xf32>
    %103 = tpu.concatenate %45, %64, %83, %102 in 1 : vector<8x8xf32>, vector<8x8xf32>, vector<8x8xf32>, vector<8x8xf32> -> vector<8x32xf32>
    %104 = vector.extract_strided_slice %19 {offsets = [8, 0], sizes = [8, 32], strides = [1, 1]} : vector<16x32xbf16> to vector<8x32xbf16>
    %105 = vector.extract_strided_slice %20 {offsets = [8, 0], sizes = [8, 32], strides = [1, 1]} : vector<16x32xbf16> to vector<8x32xbf16>
    %106 = vector.extract_strided_slice %21 {offsets = [8, 0], sizes = [8, 32], strides = [1, 1]} : vector<16x32xbf16> to vector<8x32xbf16>
    %107 = vector.extract_strided_slice %1 {offsets = [1, 0, 0], sizes = [1, 8, 8], strides = [1, 1, 1]} : vector<2x8x8xf32> to vector<1x8x8xf32>
    %108 = vector.shape_cast %107 : vector<1x8x8xf32> to vector<8x8xf32>
    %109 = vector.extract_strided_slice %104 {offsets = [0, 0], sizes = [8, 8], strides = [1, 1]} : vector<8x32xbf16> to vector<8x8xbf16>
    %110 = vector.extract_strided_slice %105 {offsets = [0, 0], sizes = [8, 8], strides = [1, 1]} : vector<8x32xbf16> to vector<8x8xbf16>
    %cst_39 = arith.constant dense<0.000000e+00> : vector<8x8xf32>
    %111 = tpu.matmul %109, %110, %cst_39 {dimension_numbers = #tpu.dot_dimension_numbers<[1], [1], [0], [0], [0, 0, 1, 0], [], []>} : vector<8x8xbf16>, vector<8x8xbf16>, vector<8x8xf32> -> vector<8x8xf32>
    %cst_40 = arith.constant 0.353553385 : f32
    %112 = vector.broadcast %cst_40 : f32 to vector<8x8xf32>
    %113 = arith.mulf %111, %112 : vector<8x8xf32>
    %114 = arith.addf %113, %108 : vector<8x8xf32>
    %cst_41 = arith.constant dense<0xFF800000> : vector<8xf32>
    %115 = vector.multi_reduction <maximumf>, %114, %cst_41 [1] : vector<8x8xf32> to vector<8xf32>
    %116 = vector.shape_cast %115 : vector<8xf32> to vector<8x1xf32>
    %117 = vector.broadcast %116 : vector<8x1xf32> to vector<8x8xf32>
    %118 = arith.subf %114, %117 : vector<8x8xf32>
    %119 = math.exp %118 : vector<8x8xf32>
    %cst_42 = arith.constant dense<0.000000e+00> : vector<8xf32>
    %120 = vector.multi_reduction <add>, %119, %cst_42 [1] : vector<8x8xf32> to vector<8xf32>
    %121 = vector.shape_cast %120 : vector<8xf32> to vector<8x1xf32>
    %122 = tpu.reciprocal %121 {approx = true} : vector<8x1xf32> -> vector<8x1xf32>
    %123 = vector.broadcast %122 : vector<8x1xf32> to vector<8x8xf32>
    %124 = arith.mulf %119, %123 : vector<8x8xf32>
    %125 = arith.truncf %124 : vector<8x8xf32> to vector<8x8xbf16>
    %126 = vector.extract_strided_slice %106 {offsets = [0, 0], sizes = [8, 8], strides = [1, 1]} : vector<8x32xbf16> to vector<8x8xbf16>
    %cst_43 = arith.constant dense<0.000000e+00> : vector<8x8xf32>
    %127 = tpu.matmul %125, %126, %cst_43 {dimension_numbers = #tpu.dot_dimension_numbers<[1], [0], [0], [1], [0, 0, 1, 1], [], []>} : vector<8x8xbf16>, vector<8x8xbf16>, vector<8x8xf32> -> vector<8x8xf32>
    %128 = vector.extract_strided_slice %104 {offsets = [0, 8], sizes = [8, 8], strides = [1, 1]} : vector<8x32xbf16> to vector<8x8xbf16>
    %129 = vector.extract_strided_slice %105 {offsets = [0, 8], sizes = [8, 8], strides = [1, 1]} : vector<8x32xbf16> to vector<8x8xbf16>
    %cst_44 = arith.constant dense<0.000000e+00> : vector<8x8xf32>
    %130 = tpu.matmul %128, %129, %cst_44 {dimension_numbers = #tpu.dot_dimension_numbers<[1], [1], [0], [0], [0, 0, 1, 0], [], []>} : vector<8x8xbf16>, vector<8x8xbf16>, vector<8x8xf32> -> vector<8x8xf32>
    %cst_45 = arith.constant 0.353553385 : f32
    %131 = vector.broadcast %cst_45 : f32 to vector<8x8xf32>
    %132 = arith.mulf %130, %131 : vector<8x8xf32>
    %133 = arith.addf %132, %108 : vector<8x8xf32>
    %cst_46 = arith.constant dense<0xFF800000> : vector<8xf32>
    %134 = vector.multi_reduction <maximumf>, %133, %cst_46 [1] : vector<8x8xf32> to vector<8xf32>
    %135 = vector.shape_cast %134 : vector<8xf32> to vector<8x1xf32>
    %136 = vector.broadcast %135 : vector<8x1xf32> to vector<8x8xf32>
    %137 = arith.subf %133, %136 : vector<8x8xf32>
    %138 = math.exp %137 : vector<8x8xf32>
    %cst_47 = arith.constant dense<0.000000e+00> : vector<8xf32>
    %139 = vector.multi_reduction <add>, %138, %cst_47 [1] : vector<8x8xf32> to vector<8xf32>
    %140 = vector.shape_cast %139 : vector<8xf32> to vector<8x1xf32>
    %141 = tpu.reciprocal %140 {approx = true} : vector<8x1xf32> -> vector<8x1xf32>
    %142 = vector.broadcast %141 : vector<8x1xf32> to vector<8x8xf32>
    %143 = arith.mulf %138, %142 : vector<8x8xf32>
    %144 = arith.truncf %143 : vector<8x8xf32> to vector<8x8xbf16>
    %145 = vector.extract_strided_slice %106 {offsets = [0, 8], sizes = [8, 8], strides = [1, 1]} : vector<8x32xbf16> to vector<8x8xbf16>
    %cst_48 = arith.constant dense<0.000000e+00> : vector<8x8xf32>
    %146 = tpu.matmul %144, %145, %cst_48 {dimension_numbers = #tpu.dot_dimension_numbers<[1], [0], [0], [1], [0, 0, 1, 1], [], []>} : vector<8x8xbf16>, vector<8x8xbf16>, vector<8x8xf32> -> vector<8x8xf32>
    %147 = vector.extract_strided_slice %104 {offsets = [0, 16], sizes = [8, 8], strides = [1, 1]} : vector<8x32xbf16> to vector<8x8xbf16>
    %148 = vector.extract_strided_slice %105 {offsets = [0, 16], sizes = [8, 8], strides = [1, 1]} : vector<8x32xbf16> to vector<8x8xbf16>
    %cst_49 = arith.constant dense<0.000000e+00> : vector<8x8xf32>
    %149 = tpu.matmul %147, %148, %cst_49 {dimension_numbers = #tpu.dot_dimension_numbers<[1], [1], [0], [0], [0, 0, 1, 0], [], []>} : vector<8x8xbf16>, vector<8x8xbf16>, vector<8x8xf32> -> vector<8x8xf32>
    %cst_50 = arith.constant 0.353553385 : f32
    %150 = vector.broadcast %cst_50 : f32 to vector<8x8xf32>
    %151 = arith.mulf %149, %150 : vector<8x8xf32>
    %152 = arith.addf %151, %108 : vector<8x8xf32>
    %cst_51 = arith.constant dense<0xFF800000> : vector<8xf32>
    %153 = vector.multi_reduction <maximumf>, %152, %cst_51 [1] : vector<8x8xf32> to vector<8xf32>
    %154 = vector.shape_cast %153 : vector<8xf32> to vector<8x1xf32>
    %155 = vector.broadcast %154 : vector<8x1xf32> to vector<8x8xf32>
    %156 = arith.subf %152, %155 : vector<8x8xf32>
    %157 = math.exp %156 : vector<8x8xf32>
    %cst_52 = arith.constant dense<0.000000e+00> : vector<8xf32>
    %158 = vector.multi_reduction <add>, %157, %cst_52 [1] : vector<8x8xf32> to vector<8xf32>
    %159 = vector.shape_cast %158 : vector<8xf32> to vector<8x1xf32>
    %160 = tpu.reciprocal %159 {approx = true} : vector<8x1xf32> -> vector<8x1xf32>
    %161 = vector.broadcast %160 : vector<8x1xf32> to vector<8x8xf32>
    %162 = arith.mulf %157, %161 : vector<8x8xf32>
    %163 = arith.truncf %162 : vector<8x8xf32> to vector<8x8xbf16>
    %164 = vector.extract_strided_slice %106 {offsets = [0, 16], sizes = [8, 8], strides = [1, 1]} : vector<8x32xbf16> to vector<8x8xbf16>
    %cst_53 = arith.constant dense<0.000000e+00> : vector<8x8xf32>
    %165 = tpu.matmul %163, %164, %cst_53 {dimension_numbers = #tpu.dot_dimension_numbers<[1], [0], [0], [1], [0, 0, 1, 1], [], []>} : vector<8x8xbf16>, vector<8x8xbf16>, vector<8x8xf32> -> vector<8x8xf32>
    %166 = vector.extract_strided_slice %104 {offsets = [0, 24], sizes = [8, 8], strides = [1, 1]} : vector<8x32xbf16> to vector<8x8xbf16>
    %167 = vector.extract_strided_slice %105 {offsets = [0, 24], sizes = [8, 8], strides = [1, 1]} : vector<8x32xbf16> to vector<8x8xbf16>
    %cst_54 = arith.constant dense<0.000000e+00> : vector<8x8xf32>
    %168 = tpu.matmul %166, %167, %cst_54 {dimension_numbers = #tpu.dot_dimension_numbers<[1], [1], [0], [0], [0, 0, 1, 0], [], []>} : vector<8x8xbf16>, vector<8x8xbf16>, vector<8x8xf32> -> vector<8x8xf32>
    %cst_55 = arith.constant 0.353553385 : f32
    %169 = vector.broadcast %cst_55 : f32 to vector<8x8xf32>
    %170 = arith.mulf %168, %169 : vector<8x8xf32>
    %171 = arith.addf %170, %108 : vector<8x8xf32>
    %cst_56 = arith.constant dense<0xFF800000> : vector<8xf32>
    %172 = vector.multi_reduction <maximumf>, %171, %cst_56 [1] : vector<8x8xf32> to vector<8xf32>
    %173 = vector.shape_cast %172 : vector<8xf32> to vector<8x1xf32>
    %174 = vector.broadcast %173 : vector<8x1xf32> to vector<8x8xf32>
    %175 = arith.subf %171, %174 : vector<8x8xf32>
    %176 = math.exp %175 : vector<8x8xf32>
    %cst_57 = arith.constant dense<0.000000e+00> : vector<8xf32>
    %177 = vector.multi_reduction <add>, %176, %cst_57 [1] : vector<8x8xf32> to vector<8xf32>
    %178 = vector.shape_cast %177 : vector<8xf32> to vector<8x1xf32>
    %179 = tpu.reciprocal %178 {approx = true} : vector<8x1xf32> -> vector<8x1xf32>
    %180 = vector.broadcast %179 : vector<8x1xf32> to vector<8x8xf32>
    %181 = arith.mulf %176, %180 : vector<8x8xf32>
    %182 = arith.truncf %181 : vector<8x8xf32> to vector<8x8xbf16>
    %183 = vector.extract_strided_slice %106 {offsets = [0, 24], sizes = [8, 8], strides = [1, 1]} : vector<8x32xbf16> to vector<8x8xbf16>
    %cst_58 = arith.constant dense<0.000000e+00> : vector<8x8xf32>
    %184 = tpu.matmul %182, %183, %cst_58 {dimension_numbers = #tpu.dot_dimension_numbers<[1], [0], [0], [1], [0, 0, 1, 1], [], []>} : vector<8x8xbf16>, vector<8x8xbf16>, vector<8x8xf32> -> vector<8x8xf32>
    %185 = tpu.concatenate %127, %146, %165, %184 in 1 : vector<8x8xf32>, vector<8x8xf32>, vector<8x8xf32>, vector<8x8xf32> -> vector<8x32xf32>
    %186 = tpu.concatenate %103, %185 in 0 : vector<8x32xf32>, vector<8x32xf32> -> vector<16x32xf32>
    %187 = arith.truncf %186 : vector<16x32xf32> to vector<16x32xbf16>
    %cst_59 = arith.constant dense<0.000000e+00> : vector<16x32xf32>
    %188 = tpu.matmul %187, %9, %cst_59 {dimension_numbers = #tpu.dot_dimension_numbers<[1], [0], [0], [1], [0, 0, 1, 1], [], []>} : vector<16x32xbf16>, vector<32x32xbf16>, vector<16x32xf32> -> vector<16x32xf32>
    %189 = vector.broadcast %11 : vector<1x32xf32> to vector<16x32xf32>
    %190 = arith.addf %188, %189 : vector<16x32xf32>
    %191 = arith.addf %0, %190 : vector<16x32xf32>
    %192 = vector.extract_strided_slice %3 {offsets = [0, 0], sizes = [1, 32], strides = [1, 1]} : vector<4x32xf32> to vector<1x32xf32>
    %193 = vector.extract_strided_slice %3 {offsets = [1, 0], sizes = [1, 32], strides = [1, 1]} : vector<4x32xf32> to vector<1x32xf32>
    %cst_60 = arith.constant dense<0.000000e+00> : vector<16xf32>
    %194 = vector.multi_reduction <add>, %191, %cst_60 [1] : vector<16x32xf32> to vector<16xf32>
    %195 = vector.shape_cast %194 : vector<16xf32> to vector<16x1xf32>
    %cst_61 = arith.constant 3.200000e+01 : f32
    %196 = vector.broadcast %cst_61 : f32 to vector<16x1xf32>
    %197 = arith.divf %195, %196 : vector<16x1xf32>
    %198 = vector.broadcast %197 : vector<16x1xf32> to vector<16x32xf32>
    %199 = arith.subf %191, %198 : vector<16x32xf32>
    %200 = arith.mulf %199, %199 : vector<16x32xf32>
    %cst_62 = arith.constant dense<0.000000e+00> : vector<16xf32>
    %201 = vector.multi_reduction <add>, %200, %cst_62 [1] : vector<16x32xf32> to vector<16xf32>
    %202 = vector.shape_cast %201 : vector<16xf32> to vector<16x1xf32>
    %cst_63 = arith.constant 3.200000e+01 : f32
    %203 = vector.broadcast %cst_63 : f32 to vector<16x1xf32>
    %204 = arith.divf %202, %203 : vector<16x1xf32>
    %205 = vector.broadcast %197 : vector<16x1xf32> to vector<16x32xf32>
    %206 = arith.subf %191, %205 : vector<16x32xf32>
    %cst_64 = arith.constant 9.99999974E-6 : f32
    %207 = vector.broadcast %cst_64 : f32 to vector<16x1xf32>
    %208 = arith.addf %204, %207 : vector<16x1xf32>
    %209 = math.rsqrt %208 : vector<16x1xf32>
    %210 = vector.broadcast %209 : vector<16x1xf32> to vector<16x32xf32>
    %211 = arith.mulf %206, %210 : vector<16x32xf32>
    %212 = vector.broadcast %192 : vector<1x32xf32> to vector<16x32xf32>
    %213 = arith.mulf %211, %212 : vector<16x32xf32>
    %214 = vector.broadcast %193 : vector<1x32xf32> to vector<16x32xf32>
    %215 = arith.addf %213, %214 : vector<16x32xf32>
    %c0_65 = arith.constant 0 : index
    %c0_66 = arith.constant 0 : index
    %c0_67 = arith.constant 0 : index
    %216 = vector.load %arg9[%c0_65, %c0_66, %c0_67] : memref<2x32x64xbf16, #tpu.memory_space<vmem>>, vector<1x32x64xbf16>
    %217 = vector.shape_cast %216 : vector<1x32x64xbf16> to vector<32x64xbf16>
    %c0_68 = arith.constant 0 : index
    %c0_69 = arith.constant 0 : index
    %c0_70 = arith.constant 0 : index
    %218 = vector.load %arg10[%c0_68, %c0_69, %c0_70] : memref<2x1x64xf32, #tpu.memory_space<vmem>>, vector<1x1x64xf32>
    %219 = vector.shape_cast %218 : vector<1x1x64xf32> to vector<1x64xf32>
    %c0_71 = arith.constant 0 : index
    %c0_72 = arith.constant 0 : index
    %c0_73 = arith.constant 0 : index
    %220 = vector.load %arg11[%c0_71, %c0_72, %c0_73] : memref<2x64x32xbf16, #tpu.memory_space<vmem>>, vector<1x64x32xbf16>
    %221 = vector.shape_cast %220 : vector<1x64x32xbf16> to vector<64x32xbf16>
    %c0_74 = arith.constant 0 : index
    %c0_75 = arith.constant 0 : index
    %c0_76 = arith.constant 0 : index
    %222 = vector.load %arg12[%c0_74, %c0_75, %c0_76] : memref<2x1x32xf32, #tpu.memory_space<vmem>>, vector<1x1x32xf32>
    %223 = vector.shape_cast %222 : vector<1x1x32xf32> to vector<1x32xf32>
    %224 = arith.truncf %215 : vector<16x32xf32> to vector<16x32xbf16>
    %cst_77 = arith.constant dense<0.000000e+00> : vector<16x64xf32>
    %225 = tpu.matmul %224, %217, %cst_77 {dimension_numbers = #tpu.dot_dimension_numbers<[1], [0], [0], [1], [0, 0, 1, 1], [], []>} : vector<16x32xbf16>, vector<32x64xbf16>, vector<16x64xf32> -> vector<16x64xf32>
    %226 = vector.broadcast %219 : vector<1x64xf32> to vector<16x64xf32>
    %227 = arith.addf %225, %226 : vector<16x64xf32>
    %cst_78 = arith.constant 0.000000e+00 : f32
    %228 = vector.broadcast %cst_78 : f32 to vector<16x64xf32>
    %229 = arith.maximumf %227, %228 : vector<16x64xf32>
    %230 = arith.truncf %229 : vector<16x64xf32> to vector<16x64xbf16>
    %cst_79 = arith.constant dense<0.000000e+00> : vector<16x32xf32>
    %231 = tpu.matmul %230, %221, %cst_79 {dimension_numbers = #tpu.dot_dimension_numbers<[1], [0], [0], [1], [0, 0, 1, 1], [], []>} : vector<16x64xbf16>, vector<64x32xbf16>, vector<16x32xf32> -> vector<16x32xf32>
    %232 = vector.broadcast %223 : vector<1x32xf32> to vector<16x32xf32>
    %233 = arith.addf %231, %232 : vector<16x32xf32>
    %234 = arith.addf %215, %233 : vector<16x32xf32>
    %235 = vector.extract_strided_slice %3 {offsets = [2, 0], sizes = [1, 32], strides = [1, 1]} : vector<4x32xf32> to vector<1x32xf32>
    %236 = vector.extract_strided_slice %3 {offsets = [3, 0], sizes = [1, 32], strides = [1, 1]} : vector<4x32xf32> to vector<1x32xf32>
    %cst_80 = arith.constant dense<0.000000e+00> : vector<16xf32>
    %237 = vector.multi_reduction <add>, %234, %cst_80 [1] : vector<16x32xf32> to vector<16xf32>
    %238 = vector.shape_cast %237 : vector<16xf32> to vector<16x1xf32>
    %cst_81 = arith.constant 3.200000e+01 : f32
    %239 = vector.broadcast %cst_81 : f32 to vector<16x1xf32>
    %240 = arith.divf %238, %239 : vector<16x1xf32>
    %241 = vector.broadcast %240 : vector<16x1xf32> to vector<16x32xf32>
    %242 = arith.subf %234, %241 : vector<16x32xf32>
    %243 = arith.mulf %242, %242 : vector<16x32xf32>
    %cst_82 = arith.constant dense<0.000000e+00> : vector<16xf32>
    %244 = vector.multi_reduction <add>, %243, %cst_82 [1] : vector<16x32xf32> to vector<16xf32>
    %245 = vector.shape_cast %244 : vector<16xf32> to vector<16x1xf32>
    %cst_83 = arith.constant 3.200000e+01 : f32
    %246 = vector.broadcast %cst_83 : f32 to vector<16x1xf32>
    %247 = arith.divf %245, %246 : vector<16x1xf32>
    %248 = vector.broadcast %240 : vector<16x1xf32> to vector<16x32xf32>
    %249 = arith.subf %234, %248 : vector<16x32xf32>
    %cst_84 = arith.constant 9.99999974E-6 : f32
    %250 = vector.broadcast %cst_84 : f32 to vector<16x1xf32>
    %251 = arith.addf %247, %250 : vector<16x1xf32>
    %252 = math.rsqrt %251 : vector<16x1xf32>
    %253 = vector.broadcast %252 : vector<16x1xf32> to vector<16x32xf32>
    %254 = arith.mulf %249, %253 : vector<16x32xf32>
    %255 = vector.broadcast %235 : vector<1x32xf32> to vector<16x32xf32>
    %256 = arith.mulf %254, %255 : vector<16x32xf32>
    %257 = vector.broadcast %236 : vector<1x32xf32> to vector<16x32xf32>
    %258 = arith.addf %256, %257 : vector<16x32xf32>
    %c1 = arith.constant 1 : index
    %c0_85 = arith.constant 0 : index
    %c0_86 = arith.constant 0 : index
    %259 = vector.load %arg13[%c1, %c0_85, %c0_86] : memref<2x4x32xf32, #tpu.memory_space<vmem>>, vector<1x4x32xf32>
    %260 = vector.shape_cast %259 : vector<1x4x32xf32> to vector<4x32xf32>
    %c1_87 = arith.constant 1 : index
    %c0_88 = arith.constant 0 : index
    %c0_89 = arith.constant 0 : index
    %261 = vector.load %arg5[%c1_87, %c0_88, %c0_89] : memref<2x32x96xbf16, #tpu.memory_space<vmem>>, vector<1x32x96xbf16>
    %262 = vector.shape_cast %261 : vector<1x32x96xbf16> to vector<32x96xbf16>
    %c1_90 = arith.constant 1 : index
    %c0_91 = arith.constant 0 : index
    %c0_92 = arith.constant 0 : index
    %263 = vector.load %arg6[%c1_90, %c0_91, %c0_92] : memref<2x1x96xf32, #tpu.memory_space<vmem>>, vector<1x1x96xf32>
    %264 = vector.shape_cast %263 : vector<1x1x96xf32> to vector<1x96xf32>
    %c1_93 = arith.constant 1 : index
    %c0_94 = arith.constant 0 : index
    %c0_95 = arith.constant 0 : index
    %265 = vector.load %arg7[%c1_93, %c0_94, %c0_95] : memref<2x32x32xbf16, #tpu.memory_space<vmem>>, vector<1x32x32xbf16>
    %266 = vector.shape_cast %265 : vector<1x32x32xbf16> to vector<32x32xbf16>
    %c1_96 = arith.constant 1 : index
    %c0_97 = arith.constant 0 : index
    %c0_98 = arith.constant 0 : index
    %267 = vector.load %arg8[%c1_96, %c0_97, %c0_98] : memref<2x1x32xf32, #tpu.memory_space<vmem>>, vector<1x1x32xf32>
    %268 = vector.shape_cast %267 : vector<1x1x32xf32> to vector<1x32xf32>
    %269 = arith.truncf %258 : vector<16x32xf32> to vector<16x32xbf16>
    %cst_99 = arith.constant dense<0.000000e+00> : vector<16x96xf32>
    %270 = tpu.matmul %269, %262, %cst_99 {dimension_numbers = #tpu.dot_dimension_numbers<[1], [0], [0], [1], [0, 0, 1, 1], [], []>} : vector<16x32xbf16>, vector<32x96xbf16>, vector<16x96xf32> -> vector<16x96xf32>
    %271 = vector.broadcast %264 : vector<1x96xf32> to vector<16x96xf32>
    %272 = arith.addf %270, %271 : vector<16x96xf32>
    %273 = vector.extract_strided_slice %272 {offsets = [0, 0], sizes = [16, 32], strides = [1, 1]} : vector<16x96xf32> to vector<16x32xf32>
    %274 = vector.extract_strided_slice %272 {offsets = [0, 32], sizes = [16, 32], strides = [1, 1]} : vector<16x96xf32> to vector<16x32xf32>
    %275 = vector.extract_strided_slice %272 {offsets = [0, 64], sizes = [16, 32], strides = [1, 1]} : vector<16x96xf32> to vector<16x32xf32>
    %276 = arith.truncf %273 : vector<16x32xf32> to vector<16x32xbf16>
    %277 = arith.truncf %274 : vector<16x32xf32> to vector<16x32xbf16>
    %278 = arith.truncf %275 : vector<16x32xf32> to vector<16x32xbf16>
    %279 = vector.extract_strided_slice %276 {offsets = [0, 0], sizes = [8, 32], strides = [1, 1]} : vector<16x32xbf16> to vector<8x32xbf16>
    %280 = vector.extract_strided_slice %277 {offsets = [0, 0], sizes = [8, 32], strides = [1, 1]} : vector<16x32xbf16> to vector<8x32xbf16>
    %281 = vector.extract_strided_slice %278 {offsets = [0, 0], sizes = [8, 32], strides = [1, 1]} : vector<16x32xbf16> to vector<8x32xbf16>
    %282 = vector.extract_strided_slice %1 {offsets = [0, 0, 0], sizes = [1, 8, 8], strides = [1, 1, 1]} : vector<2x8x8xf32> to vector<1x8x8xf32>
    %283 = vector.shape_cast %282 : vector<1x8x8xf32> to vector<8x8xf32>
    %284 = vector.extract_strided_slice %279 {offsets = [0, 0], sizes = [8, 8], strides = [1, 1]} : vector<8x32xbf16> to vector<8x8xbf16>
    %285 = vector.extract_strided_slice %280 {offsets = [0, 0], sizes = [8, 8], strides = [1, 1]} : vector<8x32xbf16> to vector<8x8xbf16>
    %cst_100 = arith.constant dense<0.000000e+00> : vector<8x8xf32>
    %286 = tpu.matmul %284, %285, %cst_100 {dimension_numbers = #tpu.dot_dimension_numbers<[1], [1], [0], [0], [0, 0, 1, 0], [], []>} : vector<8x8xbf16>, vector<8x8xbf16>, vector<8x8xf32> -> vector<8x8xf32>
    %cst_101 = arith.constant 0.353553385 : f32
    %287 = vector.broadcast %cst_101 : f32 to vector<8x8xf32>
    %288 = arith.mulf %286, %287 : vector<8x8xf32>
    %289 = arith.addf %288, %283 : vector<8x8xf32>
    %cst_102 = arith.constant dense<0xFF800000> : vector<8xf32>
    %290 = vector.multi_reduction <maximumf>, %289, %cst_102 [1] : vector<8x8xf32> to vector<8xf32>
    %291 = vector.shape_cast %290 : vector<8xf32> to vector<8x1xf32>
    %292 = vector.broadcast %291 : vector<8x1xf32> to vector<8x8xf32>
    %293 = arith.subf %289, %292 : vector<8x8xf32>
    %294 = math.exp %293 : vector<8x8xf32>
    %cst_103 = arith.constant dense<0.000000e+00> : vector<8xf32>
    %295 = vector.multi_reduction <add>, %294, %cst_103 [1] : vector<8x8xf32> to vector<8xf32>
    %296 = vector.shape_cast %295 : vector<8xf32> to vector<8x1xf32>
    %297 = tpu.reciprocal %296 {approx = true} : vector<8x1xf32> -> vector<8x1xf32>
    %298 = vector.broadcast %297 : vector<8x1xf32> to vector<8x8xf32>
    %299 = arith.mulf %294, %298 : vector<8x8xf32>
    %300 = arith.truncf %299 : vector<8x8xf32> to vector<8x8xbf16>
    %301 = vector.extract_strided_slice %281 {offsets = [0, 0], sizes = [8, 8], strides = [1, 1]} : vector<8x32xbf16> to vector<8x8xbf16>
    %cst_104 = arith.constant dense<0.000000e+00> : vector<8x8xf32>
    %302 = tpu.matmul %300, %301, %cst_104 {dimension_numbers = #tpu.dot_dimension_numbers<[1], [0], [0], [1], [0, 0, 1, 1], [], []>} : vector<8x8xbf16>, vector<8x8xbf16>, vector<8x8xf32> -> vector<8x8xf32>
    %303 = vector.extract_strided_slice %279 {offsets = [0, 8], sizes = [8, 8], strides = [1, 1]} : vector<8x32xbf16> to vector<8x8xbf16>
    %304 = vector.extract_strided_slice %280 {offsets = [0, 8], sizes = [8, 8], strides = [1, 1]} : vector<8x32xbf16> to vector<8x8xbf16>
    %cst_105 = arith.constant dense<0.000000e+00> : vector<8x8xf32>
    %305 = tpu.matmul %303, %304, %cst_105 {dimension_numbers = #tpu.dot_dimension_numbers<[1], [1], [0], [0], [0, 0, 1, 0], [], []>} : vector<8x8xbf16>, vector<8x8xbf16>, vector<8x8xf32> -> vector<8x8xf32>
    %cst_106 = arith.constant 0.353553385 : f32
    %306 = vector.broadcast %cst_106 : f32 to vector<8x8xf32>
    %307 = arith.mulf %305, %306 : vector<8x8xf32>
    %308 = arith.addf %307, %283 : vector<8x8xf32>
    %cst_107 = arith.constant dense<0xFF800000> : vector<8xf32>
    %309 = vector.multi_reduction <maximumf>, %308, %cst_107 [1] : vector<8x8xf32> to vector<8xf32>
    %310 = vector.shape_cast %309 : vector<8xf32> to vector<8x1xf32>
    %311 = vector.broadcast %310 : vector<8x1xf32> to vector<8x8xf32>
    %312 = arith.subf %308, %311 : vector<8x8xf32>
    %313 = math.exp %312 : vector<8x8xf32>
    %cst_108 = arith.constant dense<0.000000e+00> : vector<8xf32>
    %314 = vector.multi_reduction <add>, %313, %cst_108 [1] : vector<8x8xf32> to vector<8xf32>
    %315 = vector.shape_cast %314 : vector<8xf32> to vector<8x1xf32>
    %316 = tpu.reciprocal %315 {approx = true} : vector<8x1xf32> -> vector<8x1xf32>
    %317 = vector.broadcast %316 : vector<8x1xf32> to vector<8x8xf32>
    %318 = arith.mulf %313, %317 : vector<8x8xf32>
    %319 = arith.truncf %318 : vector<8x8xf32> to vector<8x8xbf16>
    %320 = vector.extract_strided_slice %281 {offsets = [0, 8], sizes = [8, 8], strides = [1, 1]} : vector<8x32xbf16> to vector<8x8xbf16>
    %cst_109 = arith.constant dense<0.000000e+00> : vector<8x8xf32>
    %321 = tpu.matmul %319, %320, %cst_109 {dimension_numbers = #tpu.dot_dimension_numbers<[1], [0], [0], [1], [0, 0, 1, 1], [], []>} : vector<8x8xbf16>, vector<8x8xbf16>, vector<8x8xf32> -> vector<8x8xf32>
    %322 = vector.extract_strided_slice %279 {offsets = [0, 16], sizes = [8, 8], strides = [1, 1]} : vector<8x32xbf16> to vector<8x8xbf16>
    %323 = vector.extract_strided_slice %280 {offsets = [0, 16], sizes = [8, 8], strides = [1, 1]} : vector<8x32xbf16> to vector<8x8xbf16>
    %cst_110 = arith.constant dense<0.000000e+00> : vector<8x8xf32>
    %324 = tpu.matmul %322, %323, %cst_110 {dimension_numbers = #tpu.dot_dimension_numbers<[1], [1], [0], [0], [0, 0, 1, 0], [], []>} : vector<8x8xbf16>, vector<8x8xbf16>, vector<8x8xf32> -> vector<8x8xf32>
    %cst_111 = arith.constant 0.353553385 : f32
    %325 = vector.broadcast %cst_111 : f32 to vector<8x8xf32>
    %326 = arith.mulf %324, %325 : vector<8x8xf32>
    %327 = arith.addf %326, %283 : vector<8x8xf32>
    %cst_112 = arith.constant dense<0xFF800000> : vector<8xf32>
    %328 = vector.multi_reduction <maximumf>, %327, %cst_112 [1] : vector<8x8xf32> to vector<8xf32>
    %329 = vector.shape_cast %328 : vector<8xf32> to vector<8x1xf32>
    %330 = vector.broadcast %329 : vector<8x1xf32> to vector<8x8xf32>
    %331 = arith.subf %327, %330 : vector<8x8xf32>
    %332 = math.exp %331 : vector<8x8xf32>
    %cst_113 = arith.constant dense<0.000000e+00> : vector<8xf32>
    %333 = vector.multi_reduction <add>, %332, %cst_113 [1] : vector<8x8xf32> to vector<8xf32>
    %334 = vector.shape_cast %333 : vector<8xf32> to vector<8x1xf32>
    %335 = tpu.reciprocal %334 {approx = true} : vector<8x1xf32> -> vector<8x1xf32>
    %336 = vector.broadcast %335 : vector<8x1xf32> to vector<8x8xf32>
    %337 = arith.mulf %332, %336 : vector<8x8xf32>
    %338 = arith.truncf %337 : vector<8x8xf32> to vector<8x8xbf16>
    %339 = vector.extract_strided_slice %281 {offsets = [0, 16], sizes = [8, 8], strides = [1, 1]} : vector<8x32xbf16> to vector<8x8xbf16>
    %cst_114 = arith.constant dense<0.000000e+00> : vector<8x8xf32>
    %340 = tpu.matmul %338, %339, %cst_114 {dimension_numbers = #tpu.dot_dimension_numbers<[1], [0], [0], [1], [0, 0, 1, 1], [], []>} : vector<8x8xbf16>, vector<8x8xbf16>, vector<8x8xf32> -> vector<8x8xf32>
    %341 = vector.extract_strided_slice %279 {offsets = [0, 24], sizes = [8, 8], strides = [1, 1]} : vector<8x32xbf16> to vector<8x8xbf16>
    %342 = vector.extract_strided_slice %280 {offsets = [0, 24], sizes = [8, 8], strides = [1, 1]} : vector<8x32xbf16> to vector<8x8xbf16>
    %cst_115 = arith.constant dense<0.000000e+00> : vector<8x8xf32>
    %343 = tpu.matmul %341, %342, %cst_115 {dimension_numbers = #tpu.dot_dimension_numbers<[1], [1], [0], [0], [0, 0, 1, 0], [], []>} : vector<8x8xbf16>, vector<8x8xbf16>, vector<8x8xf32> -> vector<8x8xf32>
    %cst_116 = arith.constant 0.353553385 : f32
    %344 = vector.broadcast %cst_116 : f32 to vector<8x8xf32>
    %345 = arith.mulf %343, %344 : vector<8x8xf32>
    %346 = arith.addf %345, %283 : vector<8x8xf32>
    %cst_117 = arith.constant dense<0xFF800000> : vector<8xf32>
    %347 = vector.multi_reduction <maximumf>, %346, %cst_117 [1] : vector<8x8xf32> to vector<8xf32>
    %348 = vector.shape_cast %347 : vector<8xf32> to vector<8x1xf32>
    %349 = vector.broadcast %348 : vector<8x1xf32> to vector<8x8xf32>
    %350 = arith.subf %346, %349 : vector<8x8xf32>
    %351 = math.exp %350 : vector<8x8xf32>
    %cst_118 = arith.constant dense<0.000000e+00> : vector<8xf32>
    %352 = vector.multi_reduction <add>, %351, %cst_118 [1] : vector<8x8xf32> to vector<8xf32>
    %353 = vector.shape_cast %352 : vector<8xf32> to vector<8x1xf32>
    %354 = tpu.reciprocal %353 {approx = true} : vector<8x1xf32> -> vector<8x1xf32>
    %355 = vector.broadcast %354 : vector<8x1xf32> to vector<8x8xf32>
    %356 = arith.mulf %351, %355 : vector<8x8xf32>
    %357 = arith.truncf %356 : vector<8x8xf32> to vector<8x8xbf16>
    %358 = vector.extract_strided_slice %281 {offsets = [0, 24], sizes = [8, 8], strides = [1, 1]} : vector<8x32xbf16> to vector<8x8xbf16>
    %cst_119 = arith.constant dense<0.000000e+00> : vector<8x8xf32>
    %359 = tpu.matmul %357, %358, %cst_119 {dimension_numbers = #tpu.dot_dimension_numbers<[1], [0], [0], [1], [0, 0, 1, 1], [], []>} : vector<8x8xbf16>, vector<8x8xbf16>, vector<8x8xf32> -> vector<8x8xf32>
    %360 = tpu.concatenate %302, %321, %340, %359 in 1 : vector<8x8xf32>, vector<8x8xf32>, vector<8x8xf32>, vector<8x8xf32> -> vector<8x32xf32>
    %361 = vector.extract_strided_slice %276 {offsets = [8, 0], sizes = [8, 32], strides = [1, 1]} : vector<16x32xbf16> to vector<8x32xbf16>
    %362 = vector.extract_strided_slice %277 {offsets = [8, 0], sizes = [8, 32], strides = [1, 1]} : vector<16x32xbf16> to vector<8x32xbf16>
    %363 = vector.extract_strided_slice %278 {offsets = [8, 0], sizes = [8, 32], strides = [1, 1]} : vector<16x32xbf16> to vector<8x32xbf16>
    %364 = vector.extract_strided_slice %1 {offsets = [1, 0, 0], sizes = [1, 8, 8], strides = [1, 1, 1]} : vector<2x8x8xf32> to vector<1x8x8xf32>
    %365 = vector.shape_cast %364 : vector<1x8x8xf32> to vector<8x8xf32>
    %366 = vector.extract_strided_slice %361 {offsets = [0, 0], sizes = [8, 8], strides = [1, 1]} : vector<8x32xbf16> to vector<8x8xbf16>
    %367 = vector.extract_strided_slice %362 {offsets = [0, 0], sizes = [8, 8], strides = [1, 1]} : vector<8x32xbf16> to vector<8x8xbf16>
    %cst_120 = arith.constant dense<0.000000e+00> : vector<8x8xf32>
    %368 = tpu.matmul %366, %367, %cst_120 {dimension_numbers = #tpu.dot_dimension_numbers<[1], [1], [0], [0], [0, 0, 1, 0], [], []>} : vector<8x8xbf16>, vector<8x8xbf16>, vector<8x8xf32> -> vector<8x8xf32>
    %cst_121 = arith.constant 0.353553385 : f32
    %369 = vector.broadcast %cst_121 : f32 to vector<8x8xf32>
    %370 = arith.mulf %368, %369 : vector<8x8xf32>
    %371 = arith.addf %370, %365 : vector<8x8xf32>
    %cst_122 = arith.constant dense<0xFF800000> : vector<8xf32>
    %372 = vector.multi_reduction <maximumf>, %371, %cst_122 [1] : vector<8x8xf32> to vector<8xf32>
    %373 = vector.shape_cast %372 : vector<8xf32> to vector<8x1xf32>
    %374 = vector.broadcast %373 : vector<8x1xf32> to vector<8x8xf32>
    %375 = arith.subf %371, %374 : vector<8x8xf32>
    %376 = math.exp %375 : vector<8x8xf32>
    %cst_123 = arith.constant dense<0.000000e+00> : vector<8xf32>
    %377 = vector.multi_reduction <add>, %376, %cst_123 [1] : vector<8x8xf32> to vector<8xf32>
    %378 = vector.shape_cast %377 : vector<8xf32> to vector<8x1xf32>
    %379 = tpu.reciprocal %378 {approx = true} : vector<8x1xf32> -> vector<8x1xf32>
    %380 = vector.broadcast %379 : vector<8x1xf32> to vector<8x8xf32>
    %381 = arith.mulf %376, %380 : vector<8x8xf32>
    %382 = arith.truncf %381 : vector<8x8xf32> to vector<8x8xbf16>
    %383 = vector.extract_strided_slice %363 {offsets = [0, 0], sizes = [8, 8], strides = [1, 1]} : vector<8x32xbf16> to vector<8x8xbf16>
    %cst_124 = arith.constant dense<0.000000e+00> : vector<8x8xf32>
    %384 = tpu.matmul %382, %383, %cst_124 {dimension_numbers = #tpu.dot_dimension_numbers<[1], [0], [0], [1], [0, 0, 1, 1], [], []>} : vector<8x8xbf16>, vector<8x8xbf16>, vector<8x8xf32> -> vector<8x8xf32>
    %385 = vector.extract_strided_slice %361 {offsets = [0, 8], sizes = [8, 8], strides = [1, 1]} : vector<8x32xbf16> to vector<8x8xbf16>
    %386 = vector.extract_strided_slice %362 {offsets = [0, 8], sizes = [8, 8], strides = [1, 1]} : vector<8x32xbf16> to vector<8x8xbf16>
    %cst_125 = arith.constant dense<0.000000e+00> : vector<8x8xf32>
    %387 = tpu.matmul %385, %386, %cst_125 {dimension_numbers = #tpu.dot_dimension_numbers<[1], [1], [0], [0], [0, 0, 1, 0], [], []>} : vector<8x8xbf16>, vector<8x8xbf16>, vector<8x8xf32> -> vector<8x8xf32>
    %cst_126 = arith.constant 0.353553385 : f32
    %388 = vector.broadcast %cst_126 : f32 to vector<8x8xf32>
    %389 = arith.mulf %387, %388 : vector<8x8xf32>
    %390 = arith.addf %389, %365 : vector<8x8xf32>
    %cst_127 = arith.constant dense<0xFF800000> : vector<8xf32>
    %391 = vector.multi_reduction <maximumf>, %390, %cst_127 [1] : vector<8x8xf32> to vector<8xf32>
    %392 = vector.shape_cast %391 : vector<8xf32> to vector<8x1xf32>
    %393 = vector.broadcast %392 : vector<8x1xf32> to vector<8x8xf32>
    %394 = arith.subf %390, %393 : vector<8x8xf32>
    %395 = math.exp %394 : vector<8x8xf32>
    %cst_128 = arith.constant dense<0.000000e+00> : vector<8xf32>
    %396 = vector.multi_reduction <add>, %395, %cst_128 [1] : vector<8x8xf32> to vector<8xf32>
    %397 = vector.shape_cast %396 : vector<8xf32> to vector<8x1xf32>
    %398 = tpu.reciprocal %397 {approx = true} : vector<8x1xf32> -> vector<8x1xf32>
    %399 = vector.broadcast %398 : vector<8x1xf32> to vector<8x8xf32>
    %400 = arith.mulf %395, %399 : vector<8x8xf32>
    %401 = arith.truncf %400 : vector<8x8xf32> to vector<8x8xbf16>
    %402 = vector.extract_strided_slice %363 {offsets = [0, 8], sizes = [8, 8], strides = [1, 1]} : vector<8x32xbf16> to vector<8x8xbf16>
    %cst_129 = arith.constant dense<0.000000e+00> : vector<8x8xf32>
    %403 = tpu.matmul %401, %402, %cst_129 {dimension_numbers = #tpu.dot_dimension_numbers<[1], [0], [0], [1], [0, 0, 1, 1], [], []>} : vector<8x8xbf16>, vector<8x8xbf16>, vector<8x8xf32> -> vector<8x8xf32>
    %404 = vector.extract_strided_slice %361 {offsets = [0, 16], sizes = [8, 8], strides = [1, 1]} : vector<8x32xbf16> to vector<8x8xbf16>
    %405 = vector.extract_strided_slice %362 {offsets = [0, 16], sizes = [8, 8], strides = [1, 1]} : vector<8x32xbf16> to vector<8x8xbf16>
    %cst_130 = arith.constant dense<0.000000e+00> : vector<8x8xf32>
    %406 = tpu.matmul %404, %405, %cst_130 {dimension_numbers = #tpu.dot_dimension_numbers<[1], [1], [0], [0], [0, 0, 1, 0], [], []>} : vector<8x8xbf16>, vector<8x8xbf16>, vector<8x8xf32> -> vector<8x8xf32>
    %cst_131 = arith.constant 0.353553385 : f32
    %407 = vector.broadcast %cst_131 : f32 to vector<8x8xf32>
    %408 = arith.mulf %406, %407 : vector<8x8xf32>
    %409 = arith.addf %408, %365 : vector<8x8xf32>
    %cst_132 = arith.constant dense<0xFF800000> : vector<8xf32>
    %410 = vector.multi_reduction <maximumf>, %409, %cst_132 [1] : vector<8x8xf32> to vector<8xf32>
    %411 = vector.shape_cast %410 : vector<8xf32> to vector<8x1xf32>
    %412 = vector.broadcast %411 : vector<8x1xf32> to vector<8x8xf32>
    %413 = arith.subf %409, %412 : vector<8x8xf32>
    %414 = math.exp %413 : vector<8x8xf32>
    %cst_133 = arith.constant dense<0.000000e+00> : vector<8xf32>
    %415 = vector.multi_reduction <add>, %414, %cst_133 [1] : vector<8x8xf32> to vector<8xf32>
    %416 = vector.shape_cast %415 : vector<8xf32> to vector<8x1xf32>
    %417 = tpu.reciprocal %416 {approx = true} : vector<8x1xf32> -> vector<8x1xf32>
    %418 = vector.broadcast %417 : vector<8x1xf32> to vector<8x8xf32>
    %419 = arith.mulf %414, %418 : vector<8x8xf32>
    %420 = arith.truncf %419 : vector<8x8xf32> to vector<8x8xbf16>
    %421 = vector.extract_strided_slice %363 {offsets = [0, 16], sizes = [8, 8], strides = [1, 1]} : vector<8x32xbf16> to vector<8x8xbf16>
    %cst_134 = arith.constant dense<0.000000e+00> : vector<8x8xf32>
    %422 = tpu.matmul %420, %421, %cst_134 {dimension_numbers = #tpu.dot_dimension_numbers<[1], [0], [0], [1], [0, 0, 1, 1], [], []>} : vector<8x8xbf16>, vector<8x8xbf16>, vector<8x8xf32> -> vector<8x8xf32>
    %423 = vector.extract_strided_slice %361 {offsets = [0, 24], sizes = [8, 8], strides = [1, 1]} : vector<8x32xbf16> to vector<8x8xbf16>
    %424 = vector.extract_strided_slice %362 {offsets = [0, 24], sizes = [8, 8], strides = [1, 1]} : vector<8x32xbf16> to vector<8x8xbf16>
    %cst_135 = arith.constant dense<0.000000e+00> : vector<8x8xf32>
    %425 = tpu.matmul %423, %424, %cst_135 {dimension_numbers = #tpu.dot_dimension_numbers<[1], [1], [0], [0], [0, 0, 1, 0], [], []>} : vector<8x8xbf16>, vector<8x8xbf16>, vector<8x8xf32> -> vector<8x8xf32>
    %cst_136 = arith.constant 0.353553385 : f32
    %426 = vector.broadcast %cst_136 : f32 to vector<8x8xf32>
    %427 = arith.mulf %425, %426 : vector<8x8xf32>
    %428 = arith.addf %427, %365 : vector<8x8xf32>
    %cst_137 = arith.constant dense<0xFF800000> : vector<8xf32>
    %429 = vector.multi_reduction <maximumf>, %428, %cst_137 [1] : vector<8x8xf32> to vector<8xf32>
    %430 = vector.shape_cast %429 : vector<8xf32> to vector<8x1xf32>
    %431 = vector.broadcast %430 : vector<8x1xf32> to vector<8x8xf32>
    %432 = arith.subf %428, %431 : vector<8x8xf32>
    %433 = math.exp %432 : vector<8x8xf32>
    %cst_138 = arith.constant dense<0.000000e+00> : vector<8xf32>
    %434 = vector.multi_reduction <add>, %433, %cst_138 [1] : vector<8x8xf32> to vector<8xf32>
    %435 = vector.shape_cast %434 : vector<8xf32> to vector<8x1xf32>
    %436 = tpu.reciprocal %435 {approx = true} : vector<8x1xf32> -> vector<8x1xf32>
    %437 = vector.broadcast %436 : vector<8x1xf32> to vector<8x8xf32>
    %438 = arith.mulf %433, %437 : vector<8x8xf32>
    %439 = arith.truncf %438 : vector<8x8xf32> to vector<8x8xbf16>
    %440 = vector.extract_strided_slice %363 {offsets = [0, 24], sizes = [8, 8], strides = [1, 1]} : vector<8x32xbf16> to vector<8x8xbf16>
    %cst_139 = arith.constant dense<0.000000e+00> : vector<8x8xf32>
    %441 = tpu.matmul %439, %440, %cst_139 {dimension_numbers = #tpu.dot_dimension_numbers<[1], [0], [0], [1], [0, 0, 1, 1], [], []>} : vector<8x8xbf16>, vector<8x8xbf16>, vector<8x8xf32> -> vector<8x8xf32>
    %442 = tpu.concatenate %384, %403, %422, %441 in 1 : vector<8x8xf32>, vector<8x8xf32>, vector<8x8xf32>, vector<8x8xf32> -> vector<8x32xf32>
    %443 = tpu.concatenate %360, %442 in 0 : vector<8x32xf32>, vector<8x32xf32> -> vector<16x32xf32>
    %444 = arith.truncf %443 : vector<16x32xf32> to vector<16x32xbf16>
    %cst_140 = arith.constant dense<0.000000e+00> : vector<16x32xf32>
    %445 = tpu.matmul %444, %266, %cst_140 {dimension_numbers = #tpu.dot_dimension_numbers<[1], [0], [0], [1], [0, 0, 1, 1], [], []>} : vector<16x32xbf16>, vector<32x32xbf16>, vector<16x32xf32> -> vector<16x32xf32>
    %446 = vector.broadcast %268 : vector<1x32xf32> to vector<16x32xf32>
    %447 = arith.addf %445, %446 : vector<16x32xf32>
    %448 = arith.addf %258, %447 : vector<16x32xf32>
    %449 = vector.extract_strided_slice %260 {offsets = [0, 0], sizes = [1, 32], strides = [1, 1]} : vector<4x32xf32> to vector<1x32xf32>
    %450 = vector.extract_strided_slice %260 {offsets = [1, 0], sizes = [1, 32], strides = [1, 1]} : vector<4x32xf32> to vector<1x32xf32>
    %cst_141 = arith.constant dense<0.000000e+00> : vector<16xf32>
    %451 = vector.multi_reduction <add>, %448, %cst_141 [1] : vector<16x32xf32> to vector<16xf32>
    %452 = vector.shape_cast %451 : vector<16xf32> to vector<16x1xf32>
    %cst_142 = arith.constant 3.200000e+01 : f32
    %453 = vector.broadcast %cst_142 : f32 to vector<16x1xf32>
    %454 = arith.divf %452, %453 : vector<16x1xf32>
    %455 = vector.broadcast %454 : vector<16x1xf32> to vector<16x32xf32>
    %456 = arith.subf %448, %455 : vector<16x32xf32>
    %457 = arith.mulf %456, %456 : vector<16x32xf32>
    %cst_143 = arith.constant dense<0.000000e+00> : vector<16xf32>
    %458 = vector.multi_reduction <add>, %457, %cst_143 [1] : vector<16x32xf32> to vector<16xf32>
    %459 = vector.shape_cast %458 : vector<16xf32> to vector<16x1xf32>
    %cst_144 = arith.constant 3.200000e+01 : f32
    %460 = vector.broadcast %cst_144 : f32 to vector<16x1xf32>
    %461 = arith.divf %459, %460 : vector<16x1xf32>
    %462 = vector.broadcast %454 : vector<16x1xf32> to vector<16x32xf32>
    %463 = arith.subf %448, %462 : vector<16x32xf32>
    %cst_145 = arith.constant 9.99999974E-6 : f32
    %464 = vector.broadcast %cst_145 : f32 to vector<16x1xf32>
    %465 = arith.addf %461, %464 : vector<16x1xf32>
    %466 = math.rsqrt %465 : vector<16x1xf32>
    %467 = vector.broadcast %466 : vector<16x1xf32> to vector<16x32xf32>
    %468 = arith.mulf %463, %467 : vector<16x32xf32>
    %469 = vector.broadcast %449 : vector<1x32xf32> to vector<16x32xf32>
    %470 = arith.mulf %468, %469 : vector<16x32xf32>
    %471 = vector.broadcast %450 : vector<1x32xf32> to vector<16x32xf32>
    %472 = arith.addf %470, %471 : vector<16x32xf32>
    %c1_146 = arith.constant 1 : index
    %c0_147 = arith.constant 0 : index
    %c0_148 = arith.constant 0 : index
    %473 = vector.load %arg9[%c1_146, %c0_147, %c0_148] : memref<2x32x64xbf16, #tpu.memory_space<vmem>>, vector<1x32x64xbf16>
    %474 = vector.shape_cast %473 : vector<1x32x64xbf16> to vector<32x64xbf16>
    %c1_149 = arith.constant 1 : index
    %c0_150 = arith.constant 0 : index
    %c0_151 = arith.constant 0 : index
    %475 = vector.load %arg10[%c1_149, %c0_150, %c0_151] : memref<2x1x64xf32, #tpu.memory_space<vmem>>, vector<1x1x64xf32>
    %476 = vector.shape_cast %475 : vector<1x1x64xf32> to vector<1x64xf32>
    %c1_152 = arith.constant 1 : index
    %c0_153 = arith.constant 0 : index
    %c0_154 = arith.constant 0 : index
    %477 = vector.load %arg11[%c1_152, %c0_153, %c0_154] : memref<2x64x32xbf16, #tpu.memory_space<vmem>>, vector<1x64x32xbf16>
    %478 = vector.shape_cast %477 : vector<1x64x32xbf16> to vector<64x32xbf16>
    %c1_155 = arith.constant 1 : index
    %c0_156 = arith.constant 0 : index
    %c0_157 = arith.constant 0 : index
    %479 = vector.load %arg12[%c1_155, %c0_156, %c0_157] : memref<2x1x32xf32, #tpu.memory_space<vmem>>, vector<1x1x32xf32>
    %480 = vector.shape_cast %479 : vector<1x1x32xf32> to vector<1x32xf32>
    %481 = arith.truncf %472 : vector<16x32xf32> to vector<16x32xbf16>
    %cst_158 = arith.constant dense<0.000000e+00> : vector<16x64xf32>
    %482 = tpu.matmul %481, %474, %cst_158 {dimension_numbers = #tpu.dot_dimension_numbers<[1], [0], [0], [1], [0, 0, 1, 1], [], []>} : vector<16x32xbf16>, vector<32x64xbf16>, vector<16x64xf32> -> vector<16x64xf32>
    %483 = vector.broadcast %476 : vector<1x64xf32> to vector<16x64xf32>
    %484 = arith.addf %482, %483 : vector<16x64xf32>
    %cst_159 = arith.constant 0.000000e+00 : f32
    %485 = vector.broadcast %cst_159 : f32 to vector<16x64xf32>
    %486 = arith.maximumf %484, %485 : vector<16x64xf32>
    %487 = arith.truncf %486 : vector<16x64xf32> to vector<16x64xbf16>
    %cst_160 = arith.constant dense<0.000000e+00> : vector<16x32xf32>
    %488 = tpu.matmul %487, %478, %cst_160 {dimension_numbers = #tpu.dot_dimension_numbers<[1], [0], [0], [1], [0, 0, 1, 1], [], []>} : vector<16x64xbf16>, vector<64x32xbf16>, vector<16x32xf32> -> vector<16x32xf32>
    %489 = vector.broadcast %480 : vector<1x32xf32> to vector<16x32xf32>
    %490 = arith.addf %488, %489 : vector<16x32xf32>
    %491 = arith.addf %472, %490 : vector<16x32xf32>
    %492 = vector.extract_strided_slice %260 {offsets = [2, 0], sizes = [1, 32], strides = [1, 1]} : vector<4x32xf32> to vector<1x32xf32>
    %493 = vector.extract_strided_slice %260 {offsets = [3, 0], sizes = [1, 32], strides = [1, 1]} : vector<4x32xf32> to vector<1x32xf32>
    %cst_161 = arith.constant dense<0.000000e+00> : vector<16xf32>
    %494 = vector.multi_reduction <add>, %491, %cst_161 [1] : vector<16x32xf32> to vector<16xf32>
    %495 = vector.shape_cast %494 : vector<16xf32> to vector<16x1xf32>
    %cst_162 = arith.constant 3.200000e+01 : f32
    %496 = vector.broadcast %cst_162 : f32 to vector<16x1xf32>
    %497 = arith.divf %495, %496 : vector<16x1xf32>
    %498 = vector.broadcast %497 : vector<16x1xf32> to vector<16x32xf32>
    %499 = arith.subf %491, %498 : vector<16x32xf32>
    %500 = arith.mulf %499, %499 : vector<16x32xf32>
    %cst_163 = arith.constant dense<0.000000e+00> : vector<16xf32>
    %501 = vector.multi_reduction <add>, %500, %cst_163 [1] : vector<16x32xf32> to vector<16xf32>
    %502 = vector.shape_cast %501 : vector<16xf32> to vector<16x1xf32>
    %cst_164 = arith.constant 3.200000e+01 : f32
    %503 = vector.broadcast %cst_164 : f32 to vector<16x1xf32>
    %504 = arith.divf %502, %503 : vector<16x1xf32>
    %505 = vector.broadcast %497 : vector<16x1xf32> to vector<16x32xf32>
    %506 = arith.subf %491, %505 : vector<16x32xf32>
    %cst_165 = arith.constant 9.99999974E-6 : f32
    %507 = vector.broadcast %cst_165 : f32 to vector<16x1xf32>
    %508 = arith.addf %504, %507 : vector<16x1xf32>
    %509 = math.rsqrt %508 : vector<16x1xf32>
    %510 = vector.broadcast %509 : vector<16x1xf32> to vector<16x32xf32>
    %511 = arith.mulf %506, %510 : vector<16x32xf32>
    %512 = vector.broadcast %492 : vector<1x32xf32> to vector<16x32xf32>
    %513 = arith.mulf %511, %512 : vector<16x32xf32>
    %514 = vector.broadcast %493 : vector<1x32xf32> to vector<16x32xf32>
    %515 = arith.addf %513, %514 : vector<16x32xf32>
    %c0_166 = arith.constant 0 : index
    %c0_167 = arith.constant 0 : index
    %516 = vector.load %arg1[%c0_166, %c0_167] : memref<12x32xf32, #tpu.memory_space<vmem>>, vector<12x32xf32>
    %c0_168 = arith.constant 0 : index
    %c0_169 = arith.constant 0 : index
    %c0_170 = arith.constant 0 : index
    %517 = vector.load %arg3[%c0_168, %c0_169, %c0_170] : memref<2x6x6xf32, #tpu.memory_space<vmem>>, vector<2x6x6xf32>
    %c0_171 = arith.constant 0 : index
    %c0_172 = arith.constant 0 : index
    %c0_173 = arith.constant 0 : index
    %518 = vector.load %arg4[%c0_171, %c0_172, %c0_173] : memref<2x6x8xf32, #tpu.memory_space<vmem>>, vector<2x6x8xf32>
    %c0_174 = arith.constant 0 : index
    %c0_175 = arith.constant 0 : index
    %c0_176 = arith.constant 0 : index
    %519 = vector.load %arg28[%c0_174, %c0_175, %c0_176] : memref<2x6x32xf32, #tpu.memory_space<vmem>>, vector<1x6x32xf32>
    %520 = vector.shape_cast %519 : vector<1x6x32xf32> to vector<6x32xf32>
    %c0_177 = arith.constant 0 : index
    %c0_178 = arith.constant 0 : index
    %c0_179 = arith.constant 0 : index
    %521 = vector.load %arg14[%c0_177, %c0_178, %c0_179] : memref<2x32x96xbf16, #tpu.memory_space<vmem>>, vector<1x32x96xbf16>
    %522 = vector.shape_cast %521 : vector<1x32x96xbf16> to vector<32x96xbf16>
    %c0_180 = arith.constant 0 : index
    %c0_181 = arith.constant 0 : index
    %c0_182 = arith.constant 0 : index
    %523 = vector.load %arg15[%c0_180, %c0_181, %c0_182] : memref<2x1x96xf32, #tpu.memory_space<vmem>>, vector<1x1x96xf32>
    %524 = vector.shape_cast %523 : vector<1x1x96xf32> to vector<1x96xf32>
    %c0_183 = arith.constant 0 : index
    %c0_184 = arith.constant 0 : index
    %c0_185 = arith.constant 0 : index
    %525 = vector.load %arg16[%c0_183, %c0_184, %c0_185] : memref<2x32x32xbf16, #tpu.memory_space<vmem>>, vector<1x32x32xbf16>
    %526 = vector.shape_cast %525 : vector<1x32x32xbf16> to vector<32x32xbf16>
    %c0_186 = arith.constant 0 : index
    %c0_187 = arith.constant 0 : index
    %c0_188 = arith.constant 0 : index
    %527 = vector.load %arg17[%c0_186, %c0_187, %c0_188] : memref<2x1x32xf32, #tpu.memory_space<vmem>>, vector<1x1x32xf32>
    %528 = vector.shape_cast %527 : vector<1x1x32xf32> to vector<1x32xf32>
    %529 = arith.truncf %516 : vector<12x32xf32> to vector<12x32xbf16>
    %cst_189 = arith.constant dense<0.000000e+00> : vector<12x96xf32>
    %530 = tpu.matmul %529, %522, %cst_189 {dimension_numbers = #tpu.dot_dimension_numbers<[1], [0], [0], [1], [0, 0, 1, 1], [], []>} : vector<12x32xbf16>, vector<32x96xbf16>, vector<12x96xf32> -> vector<12x96xf32>
    %531 = vector.broadcast %524 : vector<1x96xf32> to vector<12x96xf32>
    %532 = arith.addf %530, %531 : vector<12x96xf32>
    %533 = vector.extract_strided_slice %532 {offsets = [0, 0], sizes = [12, 32], strides = [1, 1]} : vector<12x96xf32> to vector<12x32xf32>
    %534 = vector.extract_strided_slice %532 {offsets = [0, 32], sizes = [12, 32], strides = [1, 1]} : vector<12x96xf32> to vector<12x32xf32>
    %535 = vector.extract_strided_slice %532 {offsets = [0, 64], sizes = [12, 32], strides = [1, 1]} : vector<12x96xf32> to vector<12x32xf32>
    %536 = arith.truncf %533 : vector<12x32xf32> to vector<12x32xbf16>
    %537 = arith.truncf %534 : vector<12x32xf32> to vector<12x32xbf16>
    %538 = arith.truncf %535 : vector<12x32xf32> to vector<12x32xbf16>
    %539 = vector.extract_strided_slice %536 {offsets = [0, 0], sizes = [6, 32], strides = [1, 1]} : vector<12x32xbf16> to vector<6x32xbf16>
    %540 = vector.extract_strided_slice %537 {offsets = [0, 0], sizes = [6, 32], strides = [1, 1]} : vector<12x32xbf16> to vector<6x32xbf16>
    %541 = vector.extract_strided_slice %538 {offsets = [0, 0], sizes = [6, 32], strides = [1, 1]} : vector<12x32xbf16> to vector<6x32xbf16>
    %542 = vector.extract_strided_slice %517 {offsets = [0, 0, 0], sizes = [1, 6, 6], strides = [1, 1, 1]} : vector<2x6x6xf32> to vector<1x6x6xf32>
    %543 = vector.shape_cast %542 : vector<1x6x6xf32> to vector<6x6xf32>
    %544 = vector.extract_strided_slice %539 {offsets = [0, 0], sizes = [6, 8], strides = [1, 1]} : vector<6x32xbf16> to vector<6x8xbf16>
    %545 = vector.extract_strided_slice %540 {offsets = [0, 0], sizes = [6, 8], strides = [1, 1]} : vector<6x32xbf16> to vector<6x8xbf16>
    %cst_190 = arith.constant dense<0.000000e+00> : vector<6x6xf32>
    %546 = tpu.matmul %544, %545, %cst_190 {dimension_numbers = #tpu.dot_dimension_numbers<[1], [1], [0], [0], [0, 0, 1, 0], [], []>} : vector<6x8xbf16>, vector<6x8xbf16>, vector<6x6xf32> -> vector<6x6xf32>
    %cst_191 = arith.constant 0.353553385 : f32
    %547 = vector.broadcast %cst_191 : f32 to vector<6x6xf32>
    %548 = arith.mulf %546, %547 : vector<6x6xf32>
    %549 = arith.addf %548, %543 : vector<6x6xf32>
    %cst_192 = arith.constant dense<0xFF800000> : vector<6xf32>
    %550 = vector.multi_reduction <maximumf>, %549, %cst_192 [1] : vector<6x6xf32> to vector<6xf32>
    %551 = vector.shape_cast %550 : vector<6xf32> to vector<6x1xf32>
    %552 = vector.broadcast %551 : vector<6x1xf32> to vector<6x6xf32>
    %553 = arith.subf %549, %552 : vector<6x6xf32>
    %554 = math.exp %553 : vector<6x6xf32>
    %cst_193 = arith.constant dense<0.000000e+00> : vector<6xf32>
    %555 = vector.multi_reduction <add>, %554, %cst_193 [1] : vector<6x6xf32> to vector<6xf32>
    %556 = vector.shape_cast %555 : vector<6xf32> to vector<6x1xf32>
    %557 = tpu.reciprocal %556 {approx = true} : vector<6x1xf32> -> vector<6x1xf32>
    %558 = vector.broadcast %557 : vector<6x1xf32> to vector<6x6xf32>
    %559 = arith.mulf %554, %558 : vector<6x6xf32>
    %560 = arith.truncf %559 : vector<6x6xf32> to vector<6x6xbf16>
    %561 = vector.extract_strided_slice %541 {offsets = [0, 0], sizes = [6, 8], strides = [1, 1]} : vector<6x32xbf16> to vector<6x8xbf16>
    %cst_194 = arith.constant dense<0.000000e+00> : vector<6x8xf32>
    %562 = tpu.matmul %560, %561, %cst_194 {dimension_numbers = #tpu.dot_dimension_numbers<[1], [0], [0], [1], [0, 0, 1, 1], [], []>} : vector<6x6xbf16>, vector<6x8xbf16>, vector<6x8xf32> -> vector<6x8xf32>
    %563 = vector.extract_strided_slice %539 {offsets = [0, 8], sizes = [6, 8], strides = [1, 1]} : vector<6x32xbf16> to vector<6x8xbf16>
    %564 = vector.extract_strided_slice %540 {offsets = [0, 8], sizes = [6, 8], strides = [1, 1]} : vector<6x32xbf16> to vector<6x8xbf16>
    %cst_195 = arith.constant dense<0.000000e+00> : vector<6x6xf32>
    %565 = tpu.matmul %563, %564, %cst_195 {dimension_numbers = #tpu.dot_dimension_numbers<[1], [1], [0], [0], [0, 0, 1, 0], [], []>} : vector<6x8xbf16>, vector<6x8xbf16>, vector<6x6xf32> -> vector<6x6xf32>
    %cst_196 = arith.constant 0.353553385 : f32
    %566 = vector.broadcast %cst_196 : f32 to vector<6x6xf32>
    %567 = arith.mulf %565, %566 : vector<6x6xf32>
    %568 = arith.addf %567, %543 : vector<6x6xf32>
    %cst_197 = arith.constant dense<0xFF800000> : vector<6xf32>
    %569 = vector.multi_reduction <maximumf>, %568, %cst_197 [1] : vector<6x6xf32> to vector<6xf32>
    %570 = vector.shape_cast %569 : vector<6xf32> to vector<6x1xf32>
    %571 = vector.broadcast %570 : vector<6x1xf32> to vector<6x6xf32>
    %572 = arith.subf %568, %571 : vector<6x6xf32>
    %573 = math.exp %572 : vector<6x6xf32>
    %cst_198 = arith.constant dense<0.000000e+00> : vector<6xf32>
    %574 = vector.multi_reduction <add>, %573, %cst_198 [1] : vector<6x6xf32> to vector<6xf32>
    %575 = vector.shape_cast %574 : vector<6xf32> to vector<6x1xf32>
    %576 = tpu.reciprocal %575 {approx = true} : vector<6x1xf32> -> vector<6x1xf32>
    %577 = vector.broadcast %576 : vector<6x1xf32> to vector<6x6xf32>
    %578 = arith.mulf %573, %577 : vector<6x6xf32>
    %579 = arith.truncf %578 : vector<6x6xf32> to vector<6x6xbf16>
    %580 = vector.extract_strided_slice %541 {offsets = [0, 8], sizes = [6, 8], strides = [1, 1]} : vector<6x32xbf16> to vector<6x8xbf16>
    %cst_199 = arith.constant dense<0.000000e+00> : vector<6x8xf32>
    %581 = tpu.matmul %579, %580, %cst_199 {dimension_numbers = #tpu.dot_dimension_numbers<[1], [0], [0], [1], [0, 0, 1, 1], [], []>} : vector<6x6xbf16>, vector<6x8xbf16>, vector<6x8xf32> -> vector<6x8xf32>
    %582 = vector.extract_strided_slice %539 {offsets = [0, 16], sizes = [6, 8], strides = [1, 1]} : vector<6x32xbf16> to vector<6x8xbf16>
    %583 = vector.extract_strided_slice %540 {offsets = [0, 16], sizes = [6, 8], strides = [1, 1]} : vector<6x32xbf16> to vector<6x8xbf16>
    %cst_200 = arith.constant dense<0.000000e+00> : vector<6x6xf32>
    %584 = tpu.matmul %582, %583, %cst_200 {dimension_numbers = #tpu.dot_dimension_numbers<[1], [1], [0], [0], [0, 0, 1, 0], [], []>} : vector<6x8xbf16>, vector<6x8xbf16>, vector<6x6xf32> -> vector<6x6xf32>
    %cst_201 = arith.constant 0.353553385 : f32
    %585 = vector.broadcast %cst_201 : f32 to vector<6x6xf32>
    %586 = arith.mulf %584, %585 : vector<6x6xf32>
    %587 = arith.addf %586, %543 : vector<6x6xf32>
    %cst_202 = arith.constant dense<0xFF800000> : vector<6xf32>
    %588 = vector.multi_reduction <maximumf>, %587, %cst_202 [1] : vector<6x6xf32> to vector<6xf32>
    %589 = vector.shape_cast %588 : vector<6xf32> to vector<6x1xf32>
    %590 = vector.broadcast %589 : vector<6x1xf32> to vector<6x6xf32>
    %591 = arith.subf %587, %590 : vector<6x6xf32>
    %592 = math.exp %591 : vector<6x6xf32>
    %cst_203 = arith.constant dense<0.000000e+00> : vector<6xf32>
    %593 = vector.multi_reduction <add>, %592, %cst_203 [1] : vector<6x6xf32> to vector<6xf32>
    %594 = vector.shape_cast %593 : vector<6xf32> to vector<6x1xf32>
    %595 = tpu.reciprocal %594 {approx = true} : vector<6x1xf32> -> vector<6x1xf32>
    %596 = vector.broadcast %595 : vector<6x1xf32> to vector<6x6xf32>
    %597 = arith.mulf %592, %596 : vector<6x6xf32>
    %598 = arith.truncf %597 : vector<6x6xf32> to vector<6x6xbf16>
    %599 = vector.extract_strided_slice %541 {offsets = [0, 16], sizes = [6, 8], strides = [1, 1]} : vector<6x32xbf16> to vector<6x8xbf16>
    %cst_204 = arith.constant dense<0.000000e+00> : vector<6x8xf32>
    %600 = tpu.matmul %598, %599, %cst_204 {dimension_numbers = #tpu.dot_dimension_numbers<[1], [0], [0], [1], [0, 0, 1, 1], [], []>} : vector<6x6xbf16>, vector<6x8xbf16>, vector<6x8xf32> -> vector<6x8xf32>
    %601 = vector.extract_strided_slice %539 {offsets = [0, 24], sizes = [6, 8], strides = [1, 1]} : vector<6x32xbf16> to vector<6x8xbf16>
    %602 = vector.extract_strided_slice %540 {offsets = [0, 24], sizes = [6, 8], strides = [1, 1]} : vector<6x32xbf16> to vector<6x8xbf16>
    %cst_205 = arith.constant dense<0.000000e+00> : vector<6x6xf32>
    %603 = tpu.matmul %601, %602, %cst_205 {dimension_numbers = #tpu.dot_dimension_numbers<[1], [1], [0], [0], [0, 0, 1, 0], [], []>} : vector<6x8xbf16>, vector<6x8xbf16>, vector<6x6xf32> -> vector<6x6xf32>
    %cst_206 = arith.constant 0.353553385 : f32
    %604 = vector.broadcast %cst_206 : f32 to vector<6x6xf32>
    %605 = arith.mulf %603, %604 : vector<6x6xf32>
    %606 = arith.addf %605, %543 : vector<6x6xf32>
    %cst_207 = arith.constant dense<0xFF800000> : vector<6xf32>
    %607 = vector.multi_reduction <maximumf>, %606, %cst_207 [1] : vector<6x6xf32> to vector<6xf32>
    %608 = vector.shape_cast %607 : vector<6xf32> to vector<6x1xf32>
    %609 = vector.broadcast %608 : vector<6x1xf32> to vector<6x6xf32>
    %610 = arith.subf %606, %609 : vector<6x6xf32>
    %611 = math.exp %610 : vector<6x6xf32>
    %cst_208 = arith.constant dense<0.000000e+00> : vector<6xf32>
    %612 = vector.multi_reduction <add>, %611, %cst_208 [1] : vector<6x6xf32> to vector<6xf32>
    %613 = vector.shape_cast %612 : vector<6xf32> to vector<6x1xf32>
    %614 = tpu.reciprocal %613 {approx = true} : vector<6x1xf32> -> vector<6x1xf32>
    %615 = vector.broadcast %614 : vector<6x1xf32> to vector<6x6xf32>
    %616 = arith.mulf %611, %615 : vector<6x6xf32>
    %617 = arith.truncf %616 : vector<6x6xf32> to vector<6x6xbf16>
    %618 = vector.extract_strided_slice %541 {offsets = [0, 24], sizes = [6, 8], strides = [1, 1]} : vector<6x32xbf16> to vector<6x8xbf16>
    %cst_209 = arith.constant dense<0.000000e+00> : vector<6x8xf32>
    %619 = tpu.matmul %617, %618, %cst_209 {dimension_numbers = #tpu.dot_dimension_numbers<[1], [0], [0], [1], [0, 0, 1, 1], [], []>} : vector<6x6xbf16>, vector<6x8xbf16>, vector<6x8xf32> -> vector<6x8xf32>
    %620 = tpu.concatenate %562, %581, %600, %619 in 1 : vector<6x8xf32>, vector<6x8xf32>, vector<6x8xf32>, vector<6x8xf32> -> vector<6x32xf32>
    %621 = vector.extract_strided_slice %536 {offsets = [6, 0], sizes = [6, 32], strides = [1, 1]} : vector<12x32xbf16> to vector<6x32xbf16>
    %622 = vector.extract_strided_slice %537 {offsets = [6, 0], sizes = [6, 32], strides = [1, 1]} : vector<12x32xbf16> to vector<6x32xbf16>
    %623 = vector.extract_strided_slice %538 {offsets = [6, 0], sizes = [6, 32], strides = [1, 1]} : vector<12x32xbf16> to vector<6x32xbf16>
    %624 = vector.extract_strided_slice %517 {offsets = [1, 0, 0], sizes = [1, 6, 6], strides = [1, 1, 1]} : vector<2x6x6xf32> to vector<1x6x6xf32>
    %625 = vector.shape_cast %624 : vector<1x6x6xf32> to vector<6x6xf32>
    %626 = vector.extract_strided_slice %621 {offsets = [0, 0], sizes = [6, 8], strides = [1, 1]} : vector<6x32xbf16> to vector<6x8xbf16>
    %627 = vector.extract_strided_slice %622 {offsets = [0, 0], sizes = [6, 8], strides = [1, 1]} : vector<6x32xbf16> to vector<6x8xbf16>
    %cst_210 = arith.constant dense<0.000000e+00> : vector<6x6xf32>
    %628 = tpu.matmul %626, %627, %cst_210 {dimension_numbers = #tpu.dot_dimension_numbers<[1], [1], [0], [0], [0, 0, 1, 0], [], []>} : vector<6x8xbf16>, vector<6x8xbf16>, vector<6x6xf32> -> vector<6x6xf32>
    %cst_211 = arith.constant 0.353553385 : f32
    %629 = vector.broadcast %cst_211 : f32 to vector<6x6xf32>
    %630 = arith.mulf %628, %629 : vector<6x6xf32>
    %631 = arith.addf %630, %625 : vector<6x6xf32>
    %cst_212 = arith.constant dense<0xFF800000> : vector<6xf32>
    %632 = vector.multi_reduction <maximumf>, %631, %cst_212 [1] : vector<6x6xf32> to vector<6xf32>
    %633 = vector.shape_cast %632 : vector<6xf32> to vector<6x1xf32>
    %634 = vector.broadcast %633 : vector<6x1xf32> to vector<6x6xf32>
    %635 = arith.subf %631, %634 : vector<6x6xf32>
    %636 = math.exp %635 : vector<6x6xf32>
    %cst_213 = arith.constant dense<0.000000e+00> : vector<6xf32>
    %637 = vector.multi_reduction <add>, %636, %cst_213 [1] : vector<6x6xf32> to vector<6xf32>
    %638 = vector.shape_cast %637 : vector<6xf32> to vector<6x1xf32>
    %639 = tpu.reciprocal %638 {approx = true} : vector<6x1xf32> -> vector<6x1xf32>
    %640 = vector.broadcast %639 : vector<6x1xf32> to vector<6x6xf32>
    %641 = arith.mulf %636, %640 : vector<6x6xf32>
    %642 = arith.truncf %641 : vector<6x6xf32> to vector<6x6xbf16>
    %643 = vector.extract_strided_slice %623 {offsets = [0, 0], sizes = [6, 8], strides = [1, 1]} : vector<6x32xbf16> to vector<6x8xbf16>
    %cst_214 = arith.constant dense<0.000000e+00> : vector<6x8xf32>
    %644 = tpu.matmul %642, %643, %cst_214 {dimension_numbers = #tpu.dot_dimension_numbers<[1], [0], [0], [1], [0, 0, 1, 1], [], []>} : vector<6x6xbf16>, vector<6x8xbf16>, vector<6x8xf32> -> vector<6x8xf32>
    %645 = vector.extract_strided_slice %621 {offsets = [0, 8], sizes = [6, 8], strides = [1, 1]} : vector<6x32xbf16> to vector<6x8xbf16>
    %646 = vector.extract_strided_slice %622 {offsets = [0, 8], sizes = [6, 8], strides = [1, 1]} : vector<6x32xbf16> to vector<6x8xbf16>
    %cst_215 = arith.constant dense<0.000000e+00> : vector<6x6xf32>
    %647 = tpu.matmul %645, %646, %cst_215 {dimension_numbers = #tpu.dot_dimension_numbers<[1], [1], [0], [0], [0, 0, 1, 0], [], []>} : vector<6x8xbf16>, vector<6x8xbf16>, vector<6x6xf32> -> vector<6x6xf32>
    %cst_216 = arith.constant 0.353553385 : f32
    %648 = vector.broadcast %cst_216 : f32 to vector<6x6xf32>
    %649 = arith.mulf %647, %648 : vector<6x6xf32>
    %650 = arith.addf %649, %625 : vector<6x6xf32>
    %cst_217 = arith.constant dense<0xFF800000> : vector<6xf32>
    %651 = vector.multi_reduction <maximumf>, %650, %cst_217 [1] : vector<6x6xf32> to vector<6xf32>
    %652 = vector.shape_cast %651 : vector<6xf32> to vector<6x1xf32>
    %653 = vector.broadcast %652 : vector<6x1xf32> to vector<6x6xf32>
    %654 = arith.subf %650, %653 : vector<6x6xf32>
    %655 = math.exp %654 : vector<6x6xf32>
    %cst_218 = arith.constant dense<0.000000e+00> : vector<6xf32>
    %656 = vector.multi_reduction <add>, %655, %cst_218 [1] : vector<6x6xf32> to vector<6xf32>
    %657 = vector.shape_cast %656 : vector<6xf32> to vector<6x1xf32>
    %658 = tpu.reciprocal %657 {approx = true} : vector<6x1xf32> -> vector<6x1xf32>
    %659 = vector.broadcast %658 : vector<6x1xf32> to vector<6x6xf32>
    %660 = arith.mulf %655, %659 : vector<6x6xf32>
    %661 = arith.truncf %660 : vector<6x6xf32> to vector<6x6xbf16>
    %662 = vector.extract_strided_slice %623 {offsets = [0, 8], sizes = [6, 8], strides = [1, 1]} : vector<6x32xbf16> to vector<6x8xbf16>
    %cst_219 = arith.constant dense<0.000000e+00> : vector<6x8xf32>
    %663 = tpu.matmul %661, %662, %cst_219 {dimension_numbers = #tpu.dot_dimension_numbers<[1], [0], [0], [1], [0, 0, 1, 1], [], []>} : vector<6x6xbf16>, vector<6x8xbf16>, vector<6x8xf32> -> vector<6x8xf32>
    %664 = vector.extract_strided_slice %621 {offsets = [0, 16], sizes = [6, 8], strides = [1, 1]} : vector<6x32xbf16> to vector<6x8xbf16>
    %665 = vector.extract_strided_slice %622 {offsets = [0, 16], sizes = [6, 8], strides = [1, 1]} : vector<6x32xbf16> to vector<6x8xbf16>
    %cst_220 = arith.constant dense<0.000000e+00> : vector<6x6xf32>
    %666 = tpu.matmul %664, %665, %cst_220 {dimension_numbers = #tpu.dot_dimension_numbers<[1], [1], [0], [0], [0, 0, 1, 0], [], []>} : vector<6x8xbf16>, vector<6x8xbf16>, vector<6x6xf32> -> vector<6x6xf32>
    %cst_221 = arith.constant 0.353553385 : f32
    %667 = vector.broadcast %cst_221 : f32 to vector<6x6xf32>
    %668 = arith.mulf %666, %667 : vector<6x6xf32>
    %669 = arith.addf %668, %625 : vector<6x6xf32>
    %cst_222 = arith.constant dense<0xFF800000> : vector<6xf32>
    %670 = vector.multi_reduction <maximumf>, %669, %cst_222 [1] : vector<6x6xf32> to vector<6xf32>
    %671 = vector.shape_cast %670 : vector<6xf32> to vector<6x1xf32>
    %672 = vector.broadcast %671 : vector<6x1xf32> to vector<6x6xf32>
    %673 = arith.subf %669, %672 : vector<6x6xf32>
    %674 = math.exp %673 : vector<6x6xf32>
    %cst_223 = arith.constant dense<0.000000e+00> : vector<6xf32>
    %675 = vector.multi_reduction <add>, %674, %cst_223 [1] : vector<6x6xf32> to vector<6xf32>
    %676 = vector.shape_cast %675 : vector<6xf32> to vector<6x1xf32>
    %677 = tpu.reciprocal %676 {approx = true} : vector<6x1xf32> -> vector<6x1xf32>
    %678 = vector.broadcast %677 : vector<6x1xf32> to vector<6x6xf32>
    %679 = arith.mulf %674, %678 : vector<6x6xf32>
    %680 = arith.truncf %679 : vector<6x6xf32> to vector<6x6xbf16>
    %681 = vector.extract_strided_slice %623 {offsets = [0, 16], sizes = [6, 8], strides = [1, 1]} : vector<6x32xbf16> to vector<6x8xbf16>
    %cst_224 = arith.constant dense<0.000000e+00> : vector<6x8xf32>
    %682 = tpu.matmul %680, %681, %cst_224 {dimension_numbers = #tpu.dot_dimension_numbers<[1], [0], [0], [1], [0, 0, 1, 1], [], []>} : vector<6x6xbf16>, vector<6x8xbf16>, vector<6x8xf32> -> vector<6x8xf32>
    %683 = vector.extract_strided_slice %621 {offsets = [0, 24], sizes = [6, 8], strides = [1, 1]} : vector<6x32xbf16> to vector<6x8xbf16>
    %684 = vector.extract_strided_slice %622 {offsets = [0, 24], sizes = [6, 8], strides = [1, 1]} : vector<6x32xbf16> to vector<6x8xbf16>
    %cst_225 = arith.constant dense<0.000000e+00> : vector<6x6xf32>
    %685 = tpu.matmul %683, %684, %cst_225 {dimension_numbers = #tpu.dot_dimension_numbers<[1], [1], [0], [0], [0, 0, 1, 0], [], []>} : vector<6x8xbf16>, vector<6x8xbf16>, vector<6x6xf32> -> vector<6x6xf32>
    %cst_226 = arith.constant 0.353553385 : f32
    %686 = vector.broadcast %cst_226 : f32 to vector<6x6xf32>
    %687 = arith.mulf %685, %686 : vector<6x6xf32>
    %688 = arith.addf %687, %625 : vector<6x6xf32>
    %cst_227 = arith.constant dense<0xFF800000> : vector<6xf32>
    %689 = vector.multi_reduction <maximumf>, %688, %cst_227 [1] : vector<6x6xf32> to vector<6xf32>
    %690 = vector.shape_cast %689 : vector<6xf32> to vector<6x1xf32>
    %691 = vector.broadcast %690 : vector<6x1xf32> to vector<6x6xf32>
    %692 = arith.subf %688, %691 : vector<6x6xf32>
    %693 = math.exp %692 : vector<6x6xf32>
    %cst_228 = arith.constant dense<0.000000e+00> : vector<6xf32>
    %694 = vector.multi_reduction <add>, %693, %cst_228 [1] : vector<6x6xf32> to vector<6xf32>
    %695 = vector.shape_cast %694 : vector<6xf32> to vector<6x1xf32>
    %696 = tpu.reciprocal %695 {approx = true} : vector<6x1xf32> -> vector<6x1xf32>
    %697 = vector.broadcast %696 : vector<6x1xf32> to vector<6x6xf32>
    %698 = arith.mulf %693, %697 : vector<6x6xf32>
    %699 = arith.truncf %698 : vector<6x6xf32> to vector<6x6xbf16>
    %700 = vector.extract_strided_slice %623 {offsets = [0, 24], sizes = [6, 8], strides = [1, 1]} : vector<6x32xbf16> to vector<6x8xbf16>
    %cst_229 = arith.constant dense<0.000000e+00> : vector<6x8xf32>
    %701 = tpu.matmul %699, %700, %cst_229 {dimension_numbers = #tpu.dot_dimension_numbers<[1], [0], [0], [1], [0, 0, 1, 1], [], []>} : vector<6x6xbf16>, vector<6x8xbf16>, vector<6x8xf32> -> vector<6x8xf32>
    %702 = tpu.concatenate %644, %663, %682, %701 in 1 : vector<6x8xf32>, vector<6x8xf32>, vector<6x8xf32>, vector<6x8xf32> -> vector<6x32xf32>
    %703 = tpu.concatenate %620, %702 in 0 : vector<6x32xf32>, vector<6x32xf32> -> vector<12x32xf32>
    %704 = arith.truncf %703 : vector<12x32xf32> to vector<12x32xbf16>
    %cst_230 = arith.constant dense<0.000000e+00> : vector<12x32xf32>
    %705 = tpu.matmul %704, %526, %cst_230 {dimension_numbers = #tpu.dot_dimension_numbers<[1], [0], [0], [1], [0, 0, 1, 1], [], []>} : vector<12x32xbf16>, vector<32x32xbf16>, vector<12x32xf32> -> vector<12x32xf32>
    %706 = vector.broadcast %528 : vector<1x32xf32> to vector<12x32xf32>
    %707 = arith.addf %705, %706 : vector<12x32xf32>
    %708 = arith.addf %516, %707 : vector<12x32xf32>
    %709 = vector.extract_strided_slice %520 {offsets = [0, 0], sizes = [1, 32], strides = [1, 1]} : vector<6x32xf32> to vector<1x32xf32>
    %710 = vector.extract_strided_slice %520 {offsets = [1, 0], sizes = [1, 32], strides = [1, 1]} : vector<6x32xf32> to vector<1x32xf32>
    %cst_231 = arith.constant dense<0.000000e+00> : vector<12xf32>
    %711 = vector.multi_reduction <add>, %708, %cst_231 [1] : vector<12x32xf32> to vector<12xf32>
    %712 = vector.shape_cast %711 : vector<12xf32> to vector<12x1xf32>
    %cst_232 = arith.constant 3.200000e+01 : f32
    %713 = vector.broadcast %cst_232 : f32 to vector<12x1xf32>
    %714 = arith.divf %712, %713 : vector<12x1xf32>
    %715 = vector.broadcast %714 : vector<12x1xf32> to vector<12x32xf32>
    %716 = arith.subf %708, %715 : vector<12x32xf32>
    %717 = arith.mulf %716, %716 : vector<12x32xf32>
    %cst_233 = arith.constant dense<0.000000e+00> : vector<12xf32>
    %718 = vector.multi_reduction <add>, %717, %cst_233 [1] : vector<12x32xf32> to vector<12xf32>
    %719 = vector.shape_cast %718 : vector<12xf32> to vector<12x1xf32>
    %cst_234 = arith.constant 3.200000e+01 : f32
    %720 = vector.broadcast %cst_234 : f32 to vector<12x1xf32>
    %721 = arith.divf %719, %720 : vector<12x1xf32>
    %722 = vector.broadcast %714 : vector<12x1xf32> to vector<12x32xf32>
    %723 = arith.subf %708, %722 : vector<12x32xf32>
    %cst_235 = arith.constant 9.99999974E-6 : f32
    %724 = vector.broadcast %cst_235 : f32 to vector<12x1xf32>
    %725 = arith.addf %721, %724 : vector<12x1xf32>
    %726 = math.rsqrt %725 : vector<12x1xf32>
    %727 = vector.broadcast %726 : vector<12x1xf32> to vector<12x32xf32>
    %728 = arith.mulf %723, %727 : vector<12x32xf32>
    %729 = vector.broadcast %709 : vector<1x32xf32> to vector<12x32xf32>
    %730 = arith.mulf %728, %729 : vector<12x32xf32>
    %731 = vector.broadcast %710 : vector<1x32xf32> to vector<12x32xf32>
    %732 = arith.addf %730, %731 : vector<12x32xf32>
    %c0_236 = arith.constant 0 : index
    %c0_237 = arith.constant 0 : index
    %c0_238 = arith.constant 0 : index
    %733 = vector.load %arg18[%c0_236, %c0_237, %c0_238] : memref<2x32x32xbf16, #tpu.memory_space<vmem>>, vector<1x32x32xbf16>
    %734 = vector.shape_cast %733 : vector<1x32x32xbf16> to vector<32x32xbf16>
    %c0_239 = arith.constant 0 : index
    %c0_240 = arith.constant 0 : index
    %c0_241 = arith.constant 0 : index
    %735 = vector.load %arg19[%c0_239, %c0_240, %c0_241] : memref<2x1x32xf32, #tpu.memory_space<vmem>>, vector<1x1x32xf32>
    %736 = vector.shape_cast %735 : vector<1x1x32xf32> to vector<1x32xf32>
    %c0_242 = arith.constant 0 : index
    %c0_243 = arith.constant 0 : index
    %c0_244 = arith.constant 0 : index
    %737 = vector.load %arg20[%c0_242, %c0_243, %c0_244] : memref<2x32x64xbf16, #tpu.memory_space<vmem>>, vector<1x32x64xbf16>
    %738 = vector.shape_cast %737 : vector<1x32x64xbf16> to vector<32x64xbf16>
    %c0_245 = arith.constant 0 : index
    %c0_246 = arith.constant 0 : index
    %c0_247 = arith.constant 0 : index
    %739 = vector.load %arg21[%c0_245, %c0_246, %c0_247] : memref<2x1x64xf32, #tpu.memory_space<vmem>>, vector<1x1x64xf32>
    %740 = vector.shape_cast %739 : vector<1x1x64xf32> to vector<1x64xf32>
    %c0_248 = arith.constant 0 : index
    %c0_249 = arith.constant 0 : index
    %c0_250 = arith.constant 0 : index
    %741 = vector.load %arg22[%c0_248, %c0_249, %c0_250] : memref<2x32x32xbf16, #tpu.memory_space<vmem>>, vector<1x32x32xbf16>
    %742 = vector.shape_cast %741 : vector<1x32x32xbf16> to vector<32x32xbf16>
    %c0_251 = arith.constant 0 : index
    %c0_252 = arith.constant 0 : index
    %c0_253 = arith.constant 0 : index
    %743 = vector.load %arg23[%c0_251, %c0_252, %c0_253] : memref<2x1x32xf32, #tpu.memory_space<vmem>>, vector<1x1x32xf32>
    %744 = vector.shape_cast %743 : vector<1x1x32xf32> to vector<1x32xf32>
    %745 = arith.truncf %732 : vector<12x32xf32> to vector<12x32xbf16>
    %cst_254 = arith.constant dense<0.000000e+00> : vector<12x32xf32>
    %746 = tpu.matmul %745, %734, %cst_254 {dimension_numbers = #tpu.dot_dimension_numbers<[1], [0], [0], [1], [0, 0, 1, 1], [], []>} : vector<12x32xbf16>, vector<32x32xbf16>, vector<12x32xf32> -> vector<12x32xf32>
    %747 = vector.broadcast %736 : vector<1x32xf32> to vector<12x32xf32>
    %748 = arith.addf %746, %747 : vector<12x32xf32>
    %749 = arith.truncf %515 : vector<16x32xf32> to vector<16x32xbf16>
    %cst_255 = arith.constant dense<0.000000e+00> : vector<16x64xf32>
    %750 = tpu.matmul %749, %738, %cst_255 {dimension_numbers = #tpu.dot_dimension_numbers<[1], [0], [0], [1], [0, 0, 1, 1], [], []>} : vector<16x32xbf16>, vector<32x64xbf16>, vector<16x64xf32> -> vector<16x64xf32>
    %751 = vector.broadcast %740 : vector<1x64xf32> to vector<16x64xf32>
    %752 = arith.addf %750, %751 : vector<16x64xf32>
    %753 = vector.extract_strided_slice %752 {offsets = [0, 0], sizes = [16, 32], strides = [1, 1]} : vector<16x64xf32> to vector<16x32xf32>
    %754 = vector.extract_strided_slice %752 {offsets = [0, 32], sizes = [16, 32], strides = [1, 1]} : vector<16x64xf32> to vector<16x32xf32>
    %755 = arith.truncf %748 : vector<12x32xf32> to vector<12x32xbf16>
    %756 = arith.truncf %753 : vector<16x32xf32> to vector<16x32xbf16>
    %757 = arith.truncf %754 : vector<16x32xf32> to vector<16x32xbf16>
    %758 = vector.extract_strided_slice %755 {offsets = [0, 0], sizes = [6, 32], strides = [1, 1]} : vector<12x32xbf16> to vector<6x32xbf16>
    %759 = vector.extract_strided_slice %756 {offsets = [0, 0], sizes = [8, 32], strides = [1, 1]} : vector<16x32xbf16> to vector<8x32xbf16>
    %760 = vector.extract_strided_slice %757 {offsets = [0, 0], sizes = [8, 32], strides = [1, 1]} : vector<16x32xbf16> to vector<8x32xbf16>
    %761 = vector.extract_strided_slice %518 {offsets = [0, 0, 0], sizes = [1, 6, 8], strides = [1, 1, 1]} : vector<2x6x8xf32> to vector<1x6x8xf32>
    %762 = vector.shape_cast %761 : vector<1x6x8xf32> to vector<6x8xf32>
    %763 = vector.extract_strided_slice %758 {offsets = [0, 0], sizes = [6, 8], strides = [1, 1]} : vector<6x32xbf16> to vector<6x8xbf16>
    %764 = vector.extract_strided_slice %759 {offsets = [0, 0], sizes = [8, 8], strides = [1, 1]} : vector<8x32xbf16> to vector<8x8xbf16>
    %cst_256 = arith.constant dense<0.000000e+00> : vector<6x8xf32>
    %765 = tpu.matmul %763, %764, %cst_256 {dimension_numbers = #tpu.dot_dimension_numbers<[1], [1], [0], [0], [0, 0, 1, 0], [], []>} : vector<6x8xbf16>, vector<8x8xbf16>, vector<6x8xf32> -> vector<6x8xf32>
    %cst_257 = arith.constant 0.353553385 : f32
    %766 = vector.broadcast %cst_257 : f32 to vector<6x8xf32>
    %767 = arith.mulf %765, %766 : vector<6x8xf32>
    %768 = arith.addf %767, %762 : vector<6x8xf32>
    %cst_258 = arith.constant dense<0xFF800000> : vector<6xf32>
    %769 = vector.multi_reduction <maximumf>, %768, %cst_258 [1] : vector<6x8xf32> to vector<6xf32>
    %770 = vector.shape_cast %769 : vector<6xf32> to vector<6x1xf32>
    %771 = vector.broadcast %770 : vector<6x1xf32> to vector<6x8xf32>
    %772 = arith.subf %768, %771 : vector<6x8xf32>
    %773 = math.exp %772 : vector<6x8xf32>
    %cst_259 = arith.constant dense<0.000000e+00> : vector<6xf32>
    %774 = vector.multi_reduction <add>, %773, %cst_259 [1] : vector<6x8xf32> to vector<6xf32>
    %775 = vector.shape_cast %774 : vector<6xf32> to vector<6x1xf32>
    %776 = tpu.reciprocal %775 {approx = true} : vector<6x1xf32> -> vector<6x1xf32>
    %777 = vector.broadcast %776 : vector<6x1xf32> to vector<6x8xf32>
    %778 = arith.mulf %773, %777 : vector<6x8xf32>
    %779 = arith.truncf %778 : vector<6x8xf32> to vector<6x8xbf16>
    %780 = vector.extract_strided_slice %760 {offsets = [0, 0], sizes = [8, 8], strides = [1, 1]} : vector<8x32xbf16> to vector<8x8xbf16>
    %cst_260 = arith.constant dense<0.000000e+00> : vector<6x8xf32>
    %781 = tpu.matmul %779, %780, %cst_260 {dimension_numbers = #tpu.dot_dimension_numbers<[1], [0], [0], [1], [0, 0, 1, 1], [], []>} : vector<6x8xbf16>, vector<8x8xbf16>, vector<6x8xf32> -> vector<6x8xf32>
    %782 = vector.extract_strided_slice %758 {offsets = [0, 8], sizes = [6, 8], strides = [1, 1]} : vector<6x32xbf16> to vector<6x8xbf16>
    %783 = vector.extract_strided_slice %759 {offsets = [0, 8], sizes = [8, 8], strides = [1, 1]} : vector<8x32xbf16> to vector<8x8xbf16>
    %cst_261 = arith.constant dense<0.000000e+00> : vector<6x8xf32>
    %784 = tpu.matmul %782, %783, %cst_261 {dimension_numbers = #tpu.dot_dimension_numbers<[1], [1], [0], [0], [0, 0, 1, 0], [], []>} : vector<6x8xbf16>, vector<8x8xbf16>, vector<6x8xf32> -> vector<6x8xf32>
    %cst_262 = arith.constant 0.353553385 : f32
    %785 = vector.broadcast %cst_262 : f32 to vector<6x8xf32>
    %786 = arith.mulf %784, %785 : vector<6x8xf32>
    %787 = arith.addf %786, %762 : vector<6x8xf32>
    %cst_263 = arith.constant dense<0xFF800000> : vector<6xf32>
    %788 = vector.multi_reduction <maximumf>, %787, %cst_263 [1] : vector<6x8xf32> to vector<6xf32>
    %789 = vector.shape_cast %788 : vector<6xf32> to vector<6x1xf32>
    %790 = vector.broadcast %789 : vector<6x1xf32> to vector<6x8xf32>
    %791 = arith.subf %787, %790 : vector<6x8xf32>
    %792 = math.exp %791 : vector<6x8xf32>
    %cst_264 = arith.constant dense<0.000000e+00> : vector<6xf32>
    %793 = vector.multi_reduction <add>, %792, %cst_264 [1] : vector<6x8xf32> to vector<6xf32>
    %794 = vector.shape_cast %793 : vector<6xf32> to vector<6x1xf32>
    %795 = tpu.reciprocal %794 {approx = true} : vector<6x1xf32> -> vector<6x1xf32>
    %796 = vector.broadcast %795 : vector<6x1xf32> to vector<6x8xf32>
    %797 = arith.mulf %792, %796 : vector<6x8xf32>
    %798 = arith.truncf %797 : vector<6x8xf32> to vector<6x8xbf16>
    %799 = vector.extract_strided_slice %760 {offsets = [0, 8], sizes = [8, 8], strides = [1, 1]} : vector<8x32xbf16> to vector<8x8xbf16>
    %cst_265 = arith.constant dense<0.000000e+00> : vector<6x8xf32>
    %800 = tpu.matmul %798, %799, %cst_265 {dimension_numbers = #tpu.dot_dimension_numbers<[1], [0], [0], [1], [0, 0, 1, 1], [], []>} : vector<6x8xbf16>, vector<8x8xbf16>, vector<6x8xf32> -> vector<6x8xf32>
    %801 = vector.extract_strided_slice %758 {offsets = [0, 16], sizes = [6, 8], strides = [1, 1]} : vector<6x32xbf16> to vector<6x8xbf16>
    %802 = vector.extract_strided_slice %759 {offsets = [0, 16], sizes = [8, 8], strides = [1, 1]} : vector<8x32xbf16> to vector<8x8xbf16>
    %cst_266 = arith.constant dense<0.000000e+00> : vector<6x8xf32>
    %803 = tpu.matmul %801, %802, %cst_266 {dimension_numbers = #tpu.dot_dimension_numbers<[1], [1], [0], [0], [0, 0, 1, 0], [], []>} : vector<6x8xbf16>, vector<8x8xbf16>, vector<6x8xf32> -> vector<6x8xf32>
    %cst_267 = arith.constant 0.353553385 : f32
    %804 = vector.broadcast %cst_267 : f32 to vector<6x8xf32>
    %805 = arith.mulf %803, %804 : vector<6x8xf32>
    %806 = arith.addf %805, %762 : vector<6x8xf32>
    %cst_268 = arith.constant dense<0xFF800000> : vector<6xf32>
    %807 = vector.multi_reduction <maximumf>, %806, %cst_268 [1] : vector<6x8xf32> to vector<6xf32>
    %808 = vector.shape_cast %807 : vector<6xf32> to vector<6x1xf32>
    %809 = vector.broadcast %808 : vector<6x1xf32> to vector<6x8xf32>
    %810 = arith.subf %806, %809 : vector<6x8xf32>
    %811 = math.exp %810 : vector<6x8xf32>
    %cst_269 = arith.constant dense<0.000000e+00> : vector<6xf32>
    %812 = vector.multi_reduction <add>, %811, %cst_269 [1] : vector<6x8xf32> to vector<6xf32>
    %813 = vector.shape_cast %812 : vector<6xf32> to vector<6x1xf32>
    %814 = tpu.reciprocal %813 {approx = true} : vector<6x1xf32> -> vector<6x1xf32>
    %815 = vector.broadcast %814 : vector<6x1xf32> to vector<6x8xf32>
    %816 = arith.mulf %811, %815 : vector<6x8xf32>
    %817 = arith.truncf %816 : vector<6x8xf32> to vector<6x8xbf16>
    %818 = vector.extract_strided_slice %760 {offsets = [0, 16], sizes = [8, 8], strides = [1, 1]} : vector<8x32xbf16> to vector<8x8xbf16>
    %cst_270 = arith.constant dense<0.000000e+00> : vector<6x8xf32>
    %819 = tpu.matmul %817, %818, %cst_270 {dimension_numbers = #tpu.dot_dimension_numbers<[1], [0], [0], [1], [0, 0, 1, 1], [], []>} : vector<6x8xbf16>, vector<8x8xbf16>, vector<6x8xf32> -> vector<6x8xf32>
    %820 = vector.extract_strided_slice %758 {offsets = [0, 24], sizes = [6, 8], strides = [1, 1]} : vector<6x32xbf16> to vector<6x8xbf16>
    %821 = vector.extract_strided_slice %759 {offsets = [0, 24], sizes = [8, 8], strides = [1, 1]} : vector<8x32xbf16> to vector<8x8xbf16>
    %cst_271 = arith.constant dense<0.000000e+00> : vector<6x8xf32>
    %822 = tpu.matmul %820, %821, %cst_271 {dimension_numbers = #tpu.dot_dimension_numbers<[1], [1], [0], [0], [0, 0, 1, 0], [], []>} : vector<6x8xbf16>, vector<8x8xbf16>, vector<6x8xf32> -> vector<6x8xf32>
    %cst_272 = arith.constant 0.353553385 : f32
    %823 = vector.broadcast %cst_272 : f32 to vector<6x8xf32>
    %824 = arith.mulf %822, %823 : vector<6x8xf32>
    %825 = arith.addf %824, %762 : vector<6x8xf32>
    %cst_273 = arith.constant dense<0xFF800000> : vector<6xf32>
    %826 = vector.multi_reduction <maximumf>, %825, %cst_273 [1] : vector<6x8xf32> to vector<6xf32>
    %827 = vector.shape_cast %826 : vector<6xf32> to vector<6x1xf32>
    %828 = vector.broadcast %827 : vector<6x1xf32> to vector<6x8xf32>
    %829 = arith.subf %825, %828 : vector<6x8xf32>
    %830 = math.exp %829 : vector<6x8xf32>
    %cst_274 = arith.constant dense<0.000000e+00> : vector<6xf32>
    %831 = vector.multi_reduction <add>, %830, %cst_274 [1] : vector<6x8xf32> to vector<6xf32>
    %832 = vector.shape_cast %831 : vector<6xf32> to vector<6x1xf32>
    %833 = tpu.reciprocal %832 {approx = true} : vector<6x1xf32> -> vector<6x1xf32>
    %834 = vector.broadcast %833 : vector<6x1xf32> to vector<6x8xf32>
    %835 = arith.mulf %830, %834 : vector<6x8xf32>
    %836 = arith.truncf %835 : vector<6x8xf32> to vector<6x8xbf16>
    %837 = vector.extract_strided_slice %760 {offsets = [0, 24], sizes = [8, 8], strides = [1, 1]} : vector<8x32xbf16> to vector<8x8xbf16>
    %cst_275 = arith.constant dense<0.000000e+00> : vector<6x8xf32>
    %838 = tpu.matmul %836, %837, %cst_275 {dimension_numbers = #tpu.dot_dimension_numbers<[1], [0], [0], [1], [0, 0, 1, 1], [], []>} : vector<6x8xbf16>, vector<8x8xbf16>, vector<6x8xf32> -> vector<6x8xf32>
    %839 = tpu.concatenate %781, %800, %819, %838 in 1 : vector<6x8xf32>, vector<6x8xf32>, vector<6x8xf32>, vector<6x8xf32> -> vector<6x32xf32>
    %840 = vector.extract_strided_slice %755 {offsets = [6, 0], sizes = [6, 32], strides = [1, 1]} : vector<12x32xbf16> to vector<6x32xbf16>
    %841 = vector.extract_strided_slice %756 {offsets = [8, 0], sizes = [8, 32], strides = [1, 1]} : vector<16x32xbf16> to vector<8x32xbf16>
    %842 = vector.extract_strided_slice %757 {offsets = [8, 0], sizes = [8, 32], strides = [1, 1]} : vector<16x32xbf16> to vector<8x32xbf16>
    %843 = vector.extract_strided_slice %518 {offsets = [1, 0, 0], sizes = [1, 6, 8], strides = [1, 1, 1]} : vector<2x6x8xf32> to vector<1x6x8xf32>
    %844 = vector.shape_cast %843 : vector<1x6x8xf32> to vector<6x8xf32>
    %845 = vector.extract_strided_slice %840 {offsets = [0, 0], sizes = [6, 8], strides = [1, 1]} : vector<6x32xbf16> to vector<6x8xbf16>
    %846 = vector.extract_strided_slice %841 {offsets = [0, 0], sizes = [8, 8], strides = [1, 1]} : vector<8x32xbf16> to vector<8x8xbf16>
    %cst_276 = arith.constant dense<0.000000e+00> : vector<6x8xf32>
    %847 = tpu.matmul %845, %846, %cst_276 {dimension_numbers = #tpu.dot_dimension_numbers<[1], [1], [0], [0], [0, 0, 1, 0], [], []>} : vector<6x8xbf16>, vector<8x8xbf16>, vector<6x8xf32> -> vector<6x8xf32>
    %cst_277 = arith.constant 0.353553385 : f32
    %848 = vector.broadcast %cst_277 : f32 to vector<6x8xf32>
    %849 = arith.mulf %847, %848 : vector<6x8xf32>
    %850 = arith.addf %849, %844 : vector<6x8xf32>
    %cst_278 = arith.constant dense<0xFF800000> : vector<6xf32>
    %851 = vector.multi_reduction <maximumf>, %850, %cst_278 [1] : vector<6x8xf32> to vector<6xf32>
    %852 = vector.shape_cast %851 : vector<6xf32> to vector<6x1xf32>
    %853 = vector.broadcast %852 : vector<6x1xf32> to vector<6x8xf32>
    %854 = arith.subf %850, %853 : vector<6x8xf32>
    %855 = math.exp %854 : vector<6x8xf32>
    %cst_279 = arith.constant dense<0.000000e+00> : vector<6xf32>
    %856 = vector.multi_reduction <add>, %855, %cst_279 [1] : vector<6x8xf32> to vector<6xf32>
    %857 = vector.shape_cast %856 : vector<6xf32> to vector<6x1xf32>
    %858 = tpu.reciprocal %857 {approx = true} : vector<6x1xf32> -> vector<6x1xf32>
    %859 = vector.broadcast %858 : vector<6x1xf32> to vector<6x8xf32>
    %860 = arith.mulf %855, %859 : vector<6x8xf32>
    %861 = arith.truncf %860 : vector<6x8xf32> to vector<6x8xbf16>
    %862 = vector.extract_strided_slice %842 {offsets = [0, 0], sizes = [8, 8], strides = [1, 1]} : vector<8x32xbf16> to vector<8x8xbf16>
    %cst_280 = arith.constant dense<0.000000e+00> : vector<6x8xf32>
    %863 = tpu.matmul %861, %862, %cst_280 {dimension_numbers = #tpu.dot_dimension_numbers<[1], [0], [0], [1], [0, 0, 1, 1], [], []>} : vector<6x8xbf16>, vector<8x8xbf16>, vector<6x8xf32> -> vector<6x8xf32>
    %864 = vector.extract_strided_slice %840 {offsets = [0, 8], sizes = [6, 8], strides = [1, 1]} : vector<6x32xbf16> to vector<6x8xbf16>
    %865 = vector.extract_strided_slice %841 {offsets = [0, 8], sizes = [8, 8], strides = [1, 1]} : vector<8x32xbf16> to vector<8x8xbf16>
    %cst_281 = arith.constant dense<0.000000e+00> : vector<6x8xf32>
    %866 = tpu.matmul %864, %865, %cst_281 {dimension_numbers = #tpu.dot_dimension_numbers<[1], [1], [0], [0], [0, 0, 1, 0], [], []>} : vector<6x8xbf16>, vector<8x8xbf16>, vector<6x8xf32> -> vector<6x8xf32>
    %cst_282 = arith.constant 0.353553385 : f32
    %867 = vector.broadcast %cst_282 : f32 to vector<6x8xf32>
    %868 = arith.mulf %866, %867 : vector<6x8xf32>
    %869 = arith.addf %868, %844 : vector<6x8xf32>
    %cst_283 = arith.constant dense<0xFF800000> : vector<6xf32>
    %870 = vector.multi_reduction <maximumf>, %869, %cst_283 [1] : vector<6x8xf32> to vector<6xf32>
    %871 = vector.shape_cast %870 : vector<6xf32> to vector<6x1xf32>
    %872 = vector.broadcast %871 : vector<6x1xf32> to vector<6x8xf32>
    %873 = arith.subf %869, %872 : vector<6x8xf32>
    %874 = math.exp %873 : vector<6x8xf32>
    %cst_284 = arith.constant dense<0.000000e+00> : vector<6xf32>
    %875 = vector.multi_reduction <add>, %874, %cst_284 [1] : vector<6x8xf32> to vector<6xf32>
    %876 = vector.shape_cast %875 : vector<6xf32> to vector<6x1xf32>
    %877 = tpu.reciprocal %876 {approx = true} : vector<6x1xf32> -> vector<6x1xf32>
    %878 = vector.broadcast %877 : vector<6x1xf32> to vector<6x8xf32>
    %879 = arith.mulf %874, %878 : vector<6x8xf32>
    %880 = arith.truncf %879 : vector<6x8xf32> to vector<6x8xbf16>
    %881 = vector.extract_strided_slice %842 {offsets = [0, 8], sizes = [8, 8], strides = [1, 1]} : vector<8x32xbf16> to vector<8x8xbf16>
    %cst_285 = arith.constant dense<0.000000e+00> : vector<6x8xf32>
    %882 = tpu.matmul %880, %881, %cst_285 {dimension_numbers = #tpu.dot_dimension_numbers<[1], [0], [0], [1], [0, 0, 1, 1], [], []>} : vector<6x8xbf16>, vector<8x8xbf16>, vector<6x8xf32> -> vector<6x8xf32>
    %883 = vector.extract_strided_slice %840 {offsets = [0, 16], sizes = [6, 8], strides = [1, 1]} : vector<6x32xbf16> to vector<6x8xbf16>
    %884 = vector.extract_strided_slice %841 {offsets = [0, 16], sizes = [8, 8], strides = [1, 1]} : vector<8x32xbf16> to vector<8x8xbf16>
    %cst_286 = arith.constant dense<0.000000e+00> : vector<6x8xf32>
    %885 = tpu.matmul %883, %884, %cst_286 {dimension_numbers = #tpu.dot_dimension_numbers<[1], [1], [0], [0], [0, 0, 1, 0], [], []>} : vector<6x8xbf16>, vector<8x8xbf16>, vector<6x8xf32> -> vector<6x8xf32>
    %cst_287 = arith.constant 0.353553385 : f32
    %886 = vector.broadcast %cst_287 : f32 to vector<6x8xf32>
    %887 = arith.mulf %885, %886 : vector<6x8xf32>
    %888 = arith.addf %887, %844 : vector<6x8xf32>
    %cst_288 = arith.constant dense<0xFF800000> : vector<6xf32>
    %889 = vector.multi_reduction <maximumf>, %888, %cst_288 [1] : vector<6x8xf32> to vector<6xf32>
    %890 = vector.shape_cast %889 : vector<6xf32> to vector<6x1xf32>
    %891 = vector.broadcast %890 : vector<6x1xf32> to vector<6x8xf32>
    %892 = arith.subf %888, %891 : vector<6x8xf32>
    %893 = math.exp %892 : vector<6x8xf32>
    %cst_289 = arith.constant dense<0.000000e+00> : vector<6xf32>
    %894 = vector.multi_reduction <add>, %893, %cst_289 [1] : vector<6x8xf32> to vector<6xf32>
    %895 = vector.shape_cast %894 : vector<6xf32> to vector<6x1xf32>
    %896 = tpu.reciprocal %895 {approx = true} : vector<6x1xf32> -> vector<6x1xf32>
    %897 = vector.broadcast %896 : vector<6x1xf32> to vector<6x8xf32>
    %898 = arith.mulf %893, %897 : vector<6x8xf32>
    %899 = arith.truncf %898 : vector<6x8xf32> to vector<6x8xbf16>
    %900 = vector.extract_strided_slice %842 {offsets = [0, 16], sizes = [8, 8], strides = [1, 1]} : vector<8x32xbf16> to vector<8x8xbf16>
    %cst_290 = arith.constant dense<0.000000e+00> : vector<6x8xf32>
    %901 = tpu.matmul %899, %900, %cst_290 {dimension_numbers = #tpu.dot_dimension_numbers<[1], [0], [0], [1], [0, 0, 1, 1], [], []>} : vector<6x8xbf16>, vector<8x8xbf16>, vector<6x8xf32> -> vector<6x8xf32>
    %902 = vector.extract_strided_slice %840 {offsets = [0, 24], sizes = [6, 8], strides = [1, 1]} : vector<6x32xbf16> to vector<6x8xbf16>
    %903 = vector.extract_strided_slice %841 {offsets = [0, 24], sizes = [8, 8], strides = [1, 1]} : vector<8x32xbf16> to vector<8x8xbf16>
    %cst_291 = arith.constant dense<0.000000e+00> : vector<6x8xf32>
    %904 = tpu.matmul %902, %903, %cst_291 {dimension_numbers = #tpu.dot_dimension_numbers<[1], [1], [0], [0], [0, 0, 1, 0], [], []>} : vector<6x8xbf16>, vector<8x8xbf16>, vector<6x8xf32> -> vector<6x8xf32>
    %cst_292 = arith.constant 0.353553385 : f32
    %905 = vector.broadcast %cst_292 : f32 to vector<6x8xf32>
    %906 = arith.mulf %904, %905 : vector<6x8xf32>
    %907 = arith.addf %906, %844 : vector<6x8xf32>
    %cst_293 = arith.constant dense<0xFF800000> : vector<6xf32>
    %908 = vector.multi_reduction <maximumf>, %907, %cst_293 [1] : vector<6x8xf32> to vector<6xf32>
    %909 = vector.shape_cast %908 : vector<6xf32> to vector<6x1xf32>
    %910 = vector.broadcast %909 : vector<6x1xf32> to vector<6x8xf32>
    %911 = arith.subf %907, %910 : vector<6x8xf32>
    %912 = math.exp %911 : vector<6x8xf32>
    %cst_294 = arith.constant dense<0.000000e+00> : vector<6xf32>
    %913 = vector.multi_reduction <add>, %912, %cst_294 [1] : vector<6x8xf32> to vector<6xf32>
    %914 = vector.shape_cast %913 : vector<6xf32> to vector<6x1xf32>
    %915 = tpu.reciprocal %914 {approx = true} : vector<6x1xf32> -> vector<6x1xf32>
    %916 = vector.broadcast %915 : vector<6x1xf32> to vector<6x8xf32>
    %917 = arith.mulf %912, %916 : vector<6x8xf32>
    %918 = arith.truncf %917 : vector<6x8xf32> to vector<6x8xbf16>
    %919 = vector.extract_strided_slice %842 {offsets = [0, 24], sizes = [8, 8], strides = [1, 1]} : vector<8x32xbf16> to vector<8x8xbf16>
    %cst_295 = arith.constant dense<0.000000e+00> : vector<6x8xf32>
    %920 = tpu.matmul %918, %919, %cst_295 {dimension_numbers = #tpu.dot_dimension_numbers<[1], [0], [0], [1], [0, 0, 1, 1], [], []>} : vector<6x8xbf16>, vector<8x8xbf16>, vector<6x8xf32> -> vector<6x8xf32>
    %921 = tpu.concatenate %863, %882, %901, %920 in 1 : vector<6x8xf32>, vector<6x8xf32>, vector<6x8xf32>, vector<6x8xf32> -> vector<6x32xf32>
    %922 = tpu.concatenate %839, %921 in 0 : vector<6x32xf32>, vector<6x32xf32> -> vector<12x32xf32>
    %923 = arith.truncf %922 : vector<12x32xf32> to vector<12x32xbf16>
    %cst_296 = arith.constant dense<0.000000e+00> : vector<12x32xf32>
    %924 = tpu.matmul %923, %742, %cst_296 {dimension_numbers = #tpu.dot_dimension_numbers<[1], [0], [0], [1], [0, 0, 1, 1], [], []>} : vector<12x32xbf16>, vector<32x32xbf16>, vector<12x32xf32> -> vector<12x32xf32>
    %925 = vector.broadcast %744 : vector<1x32xf32> to vector<12x32xf32>
    %926 = arith.addf %924, %925 : vector<12x32xf32>
    %927 = arith.addf %732, %926 : vector<12x32xf32>
    %928 = vector.extract_strided_slice %520 {offsets = [2, 0], sizes = [1, 32], strides = [1, 1]} : vector<6x32xf32> to vector<1x32xf32>
    %929 = vector.extract_strided_slice %520 {offsets = [3, 0], sizes = [1, 32], strides = [1, 1]} : vector<6x32xf32> to vector<1x32xf32>
    %cst_297 = arith.constant dense<0.000000e+00> : vector<12xf32>
    %930 = vector.multi_reduction <add>, %927, %cst_297 [1] : vector<12x32xf32> to vector<12xf32>
    %931 = vector.shape_cast %930 : vector<12xf32> to vector<12x1xf32>
    %cst_298 = arith.constant 3.200000e+01 : f32
    %932 = vector.broadcast %cst_298 : f32 to vector<12x1xf32>
    %933 = arith.divf %931, %932 : vector<12x1xf32>
    %934 = vector.broadcast %933 : vector<12x1xf32> to vector<12x32xf32>
    %935 = arith.subf %927, %934 : vector<12x32xf32>
    %936 = arith.mulf %935, %935 : vector<12x32xf32>
    %cst_299 = arith.constant dense<0.000000e+00> : vector<12xf32>
    %937 = vector.multi_reduction <add>, %936, %cst_299 [1] : vector<12x32xf32> to vector<12xf32>
    %938 = vector.shape_cast %937 : vector<12xf32> to vector<12x1xf32>
    %cst_300 = arith.constant 3.200000e+01 : f32
    %939 = vector.broadcast %cst_300 : f32 to vector<12x1xf32>
    %940 = arith.divf %938, %939 : vector<12x1xf32>
    %941 = vector.broadcast %933 : vector<12x1xf32> to vector<12x32xf32>
    %942 = arith.subf %927, %941 : vector<12x32xf32>
    %cst_301 = arith.constant 9.99999974E-6 : f32
    %943 = vector.broadcast %cst_301 : f32 to vector<12x1xf32>
    %944 = arith.addf %940, %943 : vector<12x1xf32>
    %945 = math.rsqrt %944 : vector<12x1xf32>
    %946 = vector.broadcast %945 : vector<12x1xf32> to vector<12x32xf32>
    %947 = arith.mulf %942, %946 : vector<12x32xf32>
    %948 = vector.broadcast %928 : vector<1x32xf32> to vector<12x32xf32>
    %949 = arith.mulf %947, %948 : vector<12x32xf32>
    %950 = vector.broadcast %929 : vector<1x32xf32> to vector<12x32xf32>
    %951 = arith.addf %949, %950 : vector<12x32xf32>
    %c0_302 = arith.constant 0 : index
    %c0_303 = arith.constant 0 : index
    %c0_304 = arith.constant 0 : index
    %952 = vector.load %arg24[%c0_302, %c0_303, %c0_304] : memref<2x32x64xbf16, #tpu.memory_space<vmem>>, vector<1x32x64xbf16>
    %953 = vector.shape_cast %952 : vector<1x32x64xbf16> to vector<32x64xbf16>
    %c0_305 = arith.constant 0 : index
    %c0_306 = arith.constant 0 : index
    %c0_307 = arith.constant 0 : index
    %954 = vector.load %arg25[%c0_305, %c0_306, %c0_307] : memref<2x1x64xf32, #tpu.memory_space<vmem>>, vector<1x1x64xf32>
    %955 = vector.shape_cast %954 : vector<1x1x64xf32> to vector<1x64xf32>
    %c0_308 = arith.constant 0 : index
    %c0_309 = arith.constant 0 : index
    %c0_310 = arith.constant 0 : index
    %956 = vector.load %arg26[%c0_308, %c0_309, %c0_310] : memref<2x64x32xbf16, #tpu.memory_space<vmem>>, vector<1x64x32xbf16>
    %957 = vector.shape_cast %956 : vector<1x64x32xbf16> to vector<64x32xbf16>
    %c0_311 = arith.constant 0 : index
    %c0_312 = arith.constant 0 : index
    %c0_313 = arith.constant 0 : index
    %958 = vector.load %arg27[%c0_311, %c0_312, %c0_313] : memref<2x1x32xf32, #tpu.memory_space<vmem>>, vector<1x1x32xf32>
    %959 = vector.shape_cast %958 : vector<1x1x32xf32> to vector<1x32xf32>
    %960 = arith.truncf %951 : vector<12x32xf32> to vector<12x32xbf16>
    %cst_314 = arith.constant dense<0.000000e+00> : vector<12x64xf32>
    %961 = tpu.matmul %960, %953, %cst_314 {dimension_numbers = #tpu.dot_dimension_numbers<[1], [0], [0], [1], [0, 0, 1, 1], [], []>} : vector<12x32xbf16>, vector<32x64xbf16>, vector<12x64xf32> -> vector<12x64xf32>
    %962 = vector.broadcast %955 : vector<1x64xf32> to vector<12x64xf32>
    %963 = arith.addf %961, %962 : vector<12x64xf32>
    %cst_315 = arith.constant 0.000000e+00 : f32
    %964 = vector.broadcast %cst_315 : f32 to vector<12x64xf32>
    %965 = arith.maximumf %963, %964 : vector<12x64xf32>
    %966 = arith.truncf %965 : vector<12x64xf32> to vector<12x64xbf16>
    %cst_316 = arith.constant dense<0.000000e+00> : vector<12x32xf32>
    %967 = tpu.matmul %966, %957, %cst_316 {dimension_numbers = #tpu.dot_dimension_numbers<[1], [0], [0], [1], [0, 0, 1, 1], [], []>} : vector<12x64xbf16>, vector<64x32xbf16>, vector<12x32xf32> -> vector<12x32xf32>
    %968 = vector.broadcast %959 : vector<1x32xf32> to vector<12x32xf32>
    %969 = arith.addf %967, %968 : vector<12x32xf32>
    %970 = arith.addf %951, %969 : vector<12x32xf32>
    %971 = vector.extract_strided_slice %520 {offsets = [4, 0], sizes = [1, 32], strides = [1, 1]} : vector<6x32xf32> to vector<1x32xf32>
    %972 = vector.extract_strided_slice %520 {offsets = [5, 0], sizes = [1, 32], strides = [1, 1]} : vector<6x32xf32> to vector<1x32xf32>
    %cst_317 = arith.constant dense<0.000000e+00> : vector<12xf32>
    %973 = vector.multi_reduction <add>, %970, %cst_317 [1] : vector<12x32xf32> to vector<12xf32>
    %974 = vector.shape_cast %973 : vector<12xf32> to vector<12x1xf32>
    %cst_318 = arith.constant 3.200000e+01 : f32
    %975 = vector.broadcast %cst_318 : f32 to vector<12x1xf32>
    %976 = arith.divf %974, %975 : vector<12x1xf32>
    %977 = vector.broadcast %976 : vector<12x1xf32> to vector<12x32xf32>
    %978 = arith.subf %970, %977 : vector<12x32xf32>
    %979 = arith.mulf %978, %978 : vector<12x32xf32>
    %cst_319 = arith.constant dense<0.000000e+00> : vector<12xf32>
    %980 = vector.multi_reduction <add>, %979, %cst_319 [1] : vector<12x32xf32> to vector<12xf32>
    %981 = vector.shape_cast %980 : vector<12xf32> to vector<12x1xf32>
    %cst_320 = arith.constant 3.200000e+01 : f32
    %982 = vector.broadcast %cst_320 : f32 to vector<12x1xf32>
    %983 = arith.divf %981, %982 : vector<12x1xf32>
    %984 = vector.broadcast %976 : vector<12x1xf32> to vector<12x32xf32>
    %985 = arith.subf %970, %984 : vector<12x32xf32>
    %cst_321 = arith.constant 9.99999974E-6 : f32
    %986 = vector.broadcast %cst_321 : f32 to vector<12x1xf32>
    %987 = arith.addf %983, %986 : vector<12x1xf32>
    %988 = math.rsqrt %987 : vector<12x1xf32>
    %989 = vector.broadcast %988 : vector<12x1xf32> to vector<12x32xf32>
    %990 = arith.mulf %985, %989 : vector<12x32xf32>
    %991 = vector.broadcast %971 : vector<1x32xf32> to vector<12x32xf32>
    %992 = arith.mulf %990, %991 : vector<12x32xf32>
    %993 = vector.broadcast %972 : vector<1x32xf32> to vector<12x32xf32>
    %994 = arith.addf %992, %993 : vector<12x32xf32>
    %c1_322 = arith.constant 1 : index
    %c0_323 = arith.constant 0 : index
    %c0_324 = arith.constant 0 : index
    %995 = vector.load %arg28[%c1_322, %c0_323, %c0_324] : memref<2x6x32xf32, #tpu.memory_space<vmem>>, vector<1x6x32xf32>
    %996 = vector.shape_cast %995 : vector<1x6x32xf32> to vector<6x32xf32>
    %c1_325 = arith.constant 1 : index
    %c0_326 = arith.constant 0 : index
    %c0_327 = arith.constant 0 : index
    %997 = vector.load %arg14[%c1_325, %c0_326, %c0_327] : memref<2x32x96xbf16, #tpu.memory_space<vmem>>, vector<1x32x96xbf16>
    %998 = vector.shape_cast %997 : vector<1x32x96xbf16> to vector<32x96xbf16>
    %c1_328 = arith.constant 1 : index
    %c0_329 = arith.constant 0 : index
    %c0_330 = arith.constant 0 : index
    %999 = vector.load %arg15[%c1_328, %c0_329, %c0_330] : memref<2x1x96xf32, #tpu.memory_space<vmem>>, vector<1x1x96xf32>
    %1000 = vector.shape_cast %999 : vector<1x1x96xf32> to vector<1x96xf32>
    %c1_331 = arith.constant 1 : index
    %c0_332 = arith.constant 0 : index
    %c0_333 = arith.constant 0 : index
    %1001 = vector.load %arg16[%c1_331, %c0_332, %c0_333] : memref<2x32x32xbf16, #tpu.memory_space<vmem>>, vector<1x32x32xbf16>
    %1002 = vector.shape_cast %1001 : vector<1x32x32xbf16> to vector<32x32xbf16>
    %c1_334 = arith.constant 1 : index
    %c0_335 = arith.constant 0 : index
    %c0_336 = arith.constant 0 : index
    %1003 = vector.load %arg17[%c1_334, %c0_335, %c0_336] : memref<2x1x32xf32, #tpu.memory_space<vmem>>, vector<1x1x32xf32>
    %1004 = vector.shape_cast %1003 : vector<1x1x32xf32> to vector<1x32xf32>
    %1005 = arith.truncf %994 : vector<12x32xf32> to vector<12x32xbf16>
    %cst_337 = arith.constant dense<0.000000e+00> : vector<12x96xf32>
    %1006 = tpu.matmul %1005, %998, %cst_337 {dimension_numbers = #tpu.dot_dimension_numbers<[1], [0], [0], [1], [0, 0, 1, 1], [], []>} : vector<12x32xbf16>, vector<32x96xbf16>, vector<12x96xf32> -> vector<12x96xf32>
    %1007 = vector.broadcast %1000 : vector<1x96xf32> to vector<12x96xf32>
    %1008 = arith.addf %1006, %1007 : vector<12x96xf32>
    %1009 = vector.extract_strided_slice %1008 {offsets = [0, 0], sizes = [12, 32], strides = [1, 1]} : vector<12x96xf32> to vector<12x32xf32>
    %1010 = vector.extract_strided_slice %1008 {offsets = [0, 32], sizes = [12, 32], strides = [1, 1]} : vector<12x96xf32> to vector<12x32xf32>
    %1011 = vector.extract_strided_slice %1008 {offsets = [0, 64], sizes = [12, 32], strides = [1, 1]} : vector<12x96xf32> to vector<12x32xf32>
    %1012 = arith.truncf %1009 : vector<12x32xf32> to vector<12x32xbf16>
    %1013 = arith.truncf %1010 : vector<12x32xf32> to vector<12x32xbf16>
    %1014 = arith.truncf %1011 : vector<12x32xf32> to vector<12x32xbf16>
    %1015 = vector.extract_strided_slice %1012 {offsets = [0, 0], sizes = [6, 32], strides = [1, 1]} : vector<12x32xbf16> to vector<6x32xbf16>
    %1016 = vector.extract_strided_slice %1013 {offsets = [0, 0], sizes = [6, 32], strides = [1, 1]} : vector<12x32xbf16> to vector<6x32xbf16>
    %1017 = vector.extract_strided_slice %1014 {offsets = [0, 0], sizes = [6, 32], strides = [1, 1]} : vector<12x32xbf16> to vector<6x32xbf16>
    %1018 = vector.extract_strided_slice %517 {offsets = [0, 0, 0], sizes = [1, 6, 6], strides = [1, 1, 1]} : vector<2x6x6xf32> to vector<1x6x6xf32>
    %1019 = vector.shape_cast %1018 : vector<1x6x6xf32> to vector<6x6xf32>
    %1020 = vector.extract_strided_slice %1015 {offsets = [0, 0], sizes = [6, 8], strides = [1, 1]} : vector<6x32xbf16> to vector<6x8xbf16>
    %1021 = vector.extract_strided_slice %1016 {offsets = [0, 0], sizes = [6, 8], strides = [1, 1]} : vector<6x32xbf16> to vector<6x8xbf16>
    %cst_338 = arith.constant dense<0.000000e+00> : vector<6x6xf32>
    %1022 = tpu.matmul %1020, %1021, %cst_338 {dimension_numbers = #tpu.dot_dimension_numbers<[1], [1], [0], [0], [0, 0, 1, 0], [], []>} : vector<6x8xbf16>, vector<6x8xbf16>, vector<6x6xf32> -> vector<6x6xf32>
    %cst_339 = arith.constant 0.353553385 : f32
    %1023 = vector.broadcast %cst_339 : f32 to vector<6x6xf32>
    %1024 = arith.mulf %1022, %1023 : vector<6x6xf32>
    %1025 = arith.addf %1024, %1019 : vector<6x6xf32>
    %cst_340 = arith.constant dense<0xFF800000> : vector<6xf32>
    %1026 = vector.multi_reduction <maximumf>, %1025, %cst_340 [1] : vector<6x6xf32> to vector<6xf32>
    %1027 = vector.shape_cast %1026 : vector<6xf32> to vector<6x1xf32>
    %1028 = vector.broadcast %1027 : vector<6x1xf32> to vector<6x6xf32>
    %1029 = arith.subf %1025, %1028 : vector<6x6xf32>
    %1030 = math.exp %1029 : vector<6x6xf32>
    %cst_341 = arith.constant dense<0.000000e+00> : vector<6xf32>
    %1031 = vector.multi_reduction <add>, %1030, %cst_341 [1] : vector<6x6xf32> to vector<6xf32>
    %1032 = vector.shape_cast %1031 : vector<6xf32> to vector<6x1xf32>
    %1033 = tpu.reciprocal %1032 {approx = true} : vector<6x1xf32> -> vector<6x1xf32>
    %1034 = vector.broadcast %1033 : vector<6x1xf32> to vector<6x6xf32>
    %1035 = arith.mulf %1030, %1034 : vector<6x6xf32>
    %1036 = arith.truncf %1035 : vector<6x6xf32> to vector<6x6xbf16>
    %1037 = vector.extract_strided_slice %1017 {offsets = [0, 0], sizes = [6, 8], strides = [1, 1]} : vector<6x32xbf16> to vector<6x8xbf16>
    %cst_342 = arith.constant dense<0.000000e+00> : vector<6x8xf32>
    %1038 = tpu.matmul %1036, %1037, %cst_342 {dimension_numbers = #tpu.dot_dimension_numbers<[1], [0], [0], [1], [0, 0, 1, 1], [], []>} : vector<6x6xbf16>, vector<6x8xbf16>, vector<6x8xf32> -> vector<6x8xf32>
    %1039 = vector.extract_strided_slice %1015 {offsets = [0, 8], sizes = [6, 8], strides = [1, 1]} : vector<6x32xbf16> to vector<6x8xbf16>
    %1040 = vector.extract_strided_slice %1016 {offsets = [0, 8], sizes = [6, 8], strides = [1, 1]} : vector<6x32xbf16> to vector<6x8xbf16>
    %cst_343 = arith.constant dense<0.000000e+00> : vector<6x6xf32>
    %1041 = tpu.matmul %1039, %1040, %cst_343 {dimension_numbers = #tpu.dot_dimension_numbers<[1], [1], [0], [0], [0, 0, 1, 0], [], []>} : vector<6x8xbf16>, vector<6x8xbf16>, vector<6x6xf32> -> vector<6x6xf32>
    %cst_344 = arith.constant 0.353553385 : f32
    %1042 = vector.broadcast %cst_344 : f32 to vector<6x6xf32>
    %1043 = arith.mulf %1041, %1042 : vector<6x6xf32>
    %1044 = arith.addf %1043, %1019 : vector<6x6xf32>
    %cst_345 = arith.constant dense<0xFF800000> : vector<6xf32>
    %1045 = vector.multi_reduction <maximumf>, %1044, %cst_345 [1] : vector<6x6xf32> to vector<6xf32>
    %1046 = vector.shape_cast %1045 : vector<6xf32> to vector<6x1xf32>
    %1047 = vector.broadcast %1046 : vector<6x1xf32> to vector<6x6xf32>
    %1048 = arith.subf %1044, %1047 : vector<6x6xf32>
    %1049 = math.exp %1048 : vector<6x6xf32>
    %cst_346 = arith.constant dense<0.000000e+00> : vector<6xf32>
    %1050 = vector.multi_reduction <add>, %1049, %cst_346 [1] : vector<6x6xf32> to vector<6xf32>
    %1051 = vector.shape_cast %1050 : vector<6xf32> to vector<6x1xf32>
    %1052 = tpu.reciprocal %1051 {approx = true} : vector<6x1xf32> -> vector<6x1xf32>
    %1053 = vector.broadcast %1052 : vector<6x1xf32> to vector<6x6xf32>
    %1054 = arith.mulf %1049, %1053 : vector<6x6xf32>
    %1055 = arith.truncf %1054 : vector<6x6xf32> to vector<6x6xbf16>
    %1056 = vector.extract_strided_slice %1017 {offsets = [0, 8], sizes = [6, 8], strides = [1, 1]} : vector<6x32xbf16> to vector<6x8xbf16>
    %cst_347 = arith.constant dense<0.000000e+00> : vector<6x8xf32>
    %1057 = tpu.matmul %1055, %1056, %cst_347 {dimension_numbers = #tpu.dot_dimension_numbers<[1], [0], [0], [1], [0, 0, 1, 1], [], []>} : vector<6x6xbf16>, vector<6x8xbf16>, vector<6x8xf32> -> vector<6x8xf32>
    %1058 = vector.extract_strided_slice %1015 {offsets = [0, 16], sizes = [6, 8], strides = [1, 1]} : vector<6x32xbf16> to vector<6x8xbf16>
    %1059 = vector.extract_strided_slice %1016 {offsets = [0, 16], sizes = [6, 8], strides = [1, 1]} : vector<6x32xbf16> to vector<6x8xbf16>
    %cst_348 = arith.constant dense<0.000000e+00> : vector<6x6xf32>
    %1060 = tpu.matmul %1058, %1059, %cst_348 {dimension_numbers = #tpu.dot_dimension_numbers<[1], [1], [0], [0], [0, 0, 1, 0], [], []>} : vector<6x8xbf16>, vector<6x8xbf16>, vector<6x6xf32> -> vector<6x6xf32>
    %cst_349 = arith.constant 0.353553385 : f32
    %1061 = vector.broadcast %cst_349 : f32 to vector<6x6xf32>
    %1062 = arith.mulf %1060, %1061 : vector<6x6xf32>
    %1063 = arith.addf %1062, %1019 : vector<6x6xf32>
    %cst_350 = arith.constant dense<0xFF800000> : vector<6xf32>
    %1064 = vector.multi_reduction <maximumf>, %1063, %cst_350 [1] : vector<6x6xf32> to vector<6xf32>
    %1065 = vector.shape_cast %1064 : vector<6xf32> to vector<6x1xf32>
    %1066 = vector.broadcast %1065 : vector<6x1xf32> to vector<6x6xf32>
    %1067 = arith.subf %1063, %1066 : vector<6x6xf32>
    %1068 = math.exp %1067 : vector<6x6xf32>
    %cst_351 = arith.constant dense<0.000000e+00> : vector<6xf32>
    %1069 = vector.multi_reduction <add>, %1068, %cst_351 [1] : vector<6x6xf32> to vector<6xf32>
    %1070 = vector.shape_cast %1069 : vector<6xf32> to vector<6x1xf32>
    %1071 = tpu.reciprocal %1070 {approx = true} : vector<6x1xf32> -> vector<6x1xf32>
    %1072 = vector.broadcast %1071 : vector<6x1xf32> to vector<6x6xf32>
    %1073 = arith.mulf %1068, %1072 : vector<6x6xf32>
    %1074 = arith.truncf %1073 : vector<6x6xf32> to vector<6x6xbf16>
    %1075 = vector.extract_strided_slice %1017 {offsets = [0, 16], sizes = [6, 8], strides = [1, 1]} : vector<6x32xbf16> to vector<6x8xbf16>
    %cst_352 = arith.constant dense<0.000000e+00> : vector<6x8xf32>
    %1076 = tpu.matmul %1074, %1075, %cst_352 {dimension_numbers = #tpu.dot_dimension_numbers<[1], [0], [0], [1], [0, 0, 1, 1], [], []>} : vector<6x6xbf16>, vector<6x8xbf16>, vector<6x8xf32> -> vector<6x8xf32>
    %1077 = vector.extract_strided_slice %1015 {offsets = [0, 24], sizes = [6, 8], strides = [1, 1]} : vector<6x32xbf16> to vector<6x8xbf16>
    %1078 = vector.extract_strided_slice %1016 {offsets = [0, 24], sizes = [6, 8], strides = [1, 1]} : vector<6x32xbf16> to vector<6x8xbf16>
    %cst_353 = arith.constant dense<0.000000e+00> : vector<6x6xf32>
    %1079 = tpu.matmul %1077, %1078, %cst_353 {dimension_numbers = #tpu.dot_dimension_numbers<[1], [1], [0], [0], [0, 0, 1, 0], [], []>} : vector<6x8xbf16>, vector<6x8xbf16>, vector<6x6xf32> -> vector<6x6xf32>
    %cst_354 = arith.constant 0.353553385 : f32
    %1080 = vector.broadcast %cst_354 : f32 to vector<6x6xf32>
    %1081 = arith.mulf %1079, %1080 : vector<6x6xf32>
    %1082 = arith.addf %1081, %1019 : vector<6x6xf32>
    %cst_355 = arith.constant dense<0xFF800000> : vector<6xf32>
    %1083 = vector.multi_reduction <maximumf>, %1082, %cst_355 [1] : vector<6x6xf32> to vector<6xf32>
    %1084 = vector.shape_cast %1083 : vector<6xf32> to vector<6x1xf32>
    %1085 = vector.broadcast %1084 : vector<6x1xf32> to vector<6x6xf32>
    %1086 = arith.subf %1082, %1085 : vector<6x6xf32>
    %1087 = math.exp %1086 : vector<6x6xf32>
    %cst_356 = arith.constant dense<0.000000e+00> : vector<6xf32>
    %1088 = vector.multi_reduction <add>, %1087, %cst_356 [1] : vector<6x6xf32> to vector<6xf32>
    %1089 = vector.shape_cast %1088 : vector<6xf32> to vector<6x1xf32>
    %1090 = tpu.reciprocal %1089 {approx = true} : vector<6x1xf32> -> vector<6x1xf32>
    %1091 = vector.broadcast %1090 : vector<6x1xf32> to vector<6x6xf32>
    %1092 = arith.mulf %1087, %1091 : vector<6x6xf32>
    %1093 = arith.truncf %1092 : vector<6x6xf32> to vector<6x6xbf16>
    %1094 = vector.extract_strided_slice %1017 {offsets = [0, 24], sizes = [6, 8], strides = [1, 1]} : vector<6x32xbf16> to vector<6x8xbf16>
    %cst_357 = arith.constant dense<0.000000e+00> : vector<6x8xf32>
    %1095 = tpu.matmul %1093, %1094, %cst_357 {dimension_numbers = #tpu.dot_dimension_numbers<[1], [0], [0], [1], [0, 0, 1, 1], [], []>} : vector<6x6xbf16>, vector<6x8xbf16>, vector<6x8xf32> -> vector<6x8xf32>
    %1096 = tpu.concatenate %1038, %1057, %1076, %1095 in 1 : vector<6x8xf32>, vector<6x8xf32>, vector<6x8xf32>, vector<6x8xf32> -> vector<6x32xf32>
    %1097 = vector.extract_strided_slice %1012 {offsets = [6, 0], sizes = [6, 32], strides = [1, 1]} : vector<12x32xbf16> to vector<6x32xbf16>
    %1098 = vector.extract_strided_slice %1013 {offsets = [6, 0], sizes = [6, 32], strides = [1, 1]} : vector<12x32xbf16> to vector<6x32xbf16>
    %1099 = vector.extract_strided_slice %1014 {offsets = [6, 0], sizes = [6, 32], strides = [1, 1]} : vector<12x32xbf16> to vector<6x32xbf16>
    %1100 = vector.extract_strided_slice %517 {offsets = [1, 0, 0], sizes = [1, 6, 6], strides = [1, 1, 1]} : vector<2x6x6xf32> to vector<1x6x6xf32>
    %1101 = vector.shape_cast %1100 : vector<1x6x6xf32> to vector<6x6xf32>
    %1102 = vector.extract_strided_slice %1097 {offsets = [0, 0], sizes = [6, 8], strides = [1, 1]} : vector<6x32xbf16> to vector<6x8xbf16>
    %1103 = vector.extract_strided_slice %1098 {offsets = [0, 0], sizes = [6, 8], strides = [1, 1]} : vector<6x32xbf16> to vector<6x8xbf16>
    %cst_358 = arith.constant dense<0.000000e+00> : vector<6x6xf32>
    %1104 = tpu.matmul %1102, %1103, %cst_358 {dimension_numbers = #tpu.dot_dimension_numbers<[1], [1], [0], [0], [0, 0, 1, 0], [], []>} : vector<6x8xbf16>, vector<6x8xbf16>, vector<6x6xf32> -> vector<6x6xf32>
    %cst_359 = arith.constant 0.353553385 : f32
    %1105 = vector.broadcast %cst_359 : f32 to vector<6x6xf32>
    %1106 = arith.mulf %1104, %1105 : vector<6x6xf32>
    %1107 = arith.addf %1106, %1101 : vector<6x6xf32>
    %cst_360 = arith.constant dense<0xFF800000> : vector<6xf32>
    %1108 = vector.multi_reduction <maximumf>, %1107, %cst_360 [1] : vector<6x6xf32> to vector<6xf32>
    %1109 = vector.shape_cast %1108 : vector<6xf32> to vector<6x1xf32>
    %1110 = vector.broadcast %1109 : vector<6x1xf32> to vector<6x6xf32>
    %1111 = arith.subf %1107, %1110 : vector<6x6xf32>
    %1112 = math.exp %1111 : vector<6x6xf32>
    %cst_361 = arith.constant dense<0.000000e+00> : vector<6xf32>
    %1113 = vector.multi_reduction <add>, %1112, %cst_361 [1] : vector<6x6xf32> to vector<6xf32>
    %1114 = vector.shape_cast %1113 : vector<6xf32> to vector<6x1xf32>
    %1115 = tpu.reciprocal %1114 {approx = true} : vector<6x1xf32> -> vector<6x1xf32>
    %1116 = vector.broadcast %1115 : vector<6x1xf32> to vector<6x6xf32>
    %1117 = arith.mulf %1112, %1116 : vector<6x6xf32>
    %1118 = arith.truncf %1117 : vector<6x6xf32> to vector<6x6xbf16>
    %1119 = vector.extract_strided_slice %1099 {offsets = [0, 0], sizes = [6, 8], strides = [1, 1]} : vector<6x32xbf16> to vector<6x8xbf16>
    %cst_362 = arith.constant dense<0.000000e+00> : vector<6x8xf32>
    %1120 = tpu.matmul %1118, %1119, %cst_362 {dimension_numbers = #tpu.dot_dimension_numbers<[1], [0], [0], [1], [0, 0, 1, 1], [], []>} : vector<6x6xbf16>, vector<6x8xbf16>, vector<6x8xf32> -> vector<6x8xf32>
    %1121 = vector.extract_strided_slice %1097 {offsets = [0, 8], sizes = [6, 8], strides = [1, 1]} : vector<6x32xbf16> to vector<6x8xbf16>
    %1122 = vector.extract_strided_slice %1098 {offsets = [0, 8], sizes = [6, 8], strides = [1, 1]} : vector<6x32xbf16> to vector<6x8xbf16>
    %cst_363 = arith.constant dense<0.000000e+00> : vector<6x6xf32>
    %1123 = tpu.matmul %1121, %1122, %cst_363 {dimension_numbers = #tpu.dot_dimension_numbers<[1], [1], [0], [0], [0, 0, 1, 0], [], []>} : vector<6x8xbf16>, vector<6x8xbf16>, vector<6x6xf32> -> vector<6x6xf32>
    %cst_364 = arith.constant 0.353553385 : f32
    %1124 = vector.broadcast %cst_364 : f32 to vector<6x6xf32>
    %1125 = arith.mulf %1123, %1124 : vector<6x6xf32>
    %1126 = arith.addf %1125, %1101 : vector<6x6xf32>
    %cst_365 = arith.constant dense<0xFF800000> : vector<6xf32>
    %1127 = vector.multi_reduction <maximumf>, %1126, %cst_365 [1] : vector<6x6xf32> to vector<6xf32>
    %1128 = vector.shape_cast %1127 : vector<6xf32> to vector<6x1xf32>
    %1129 = vector.broadcast %1128 : vector<6x1xf32> to vector<6x6xf32>
    %1130 = arith.subf %1126, %1129 : vector<6x6xf32>
    %1131 = math.exp %1130 : vector<6x6xf32>
    %cst_366 = arith.constant dense<0.000000e+00> : vector<6xf32>
    %1132 = vector.multi_reduction <add>, %1131, %cst_366 [1] : vector<6x6xf32> to vector<6xf32>
    %1133 = vector.shape_cast %1132 : vector<6xf32> to vector<6x1xf32>
    %1134 = tpu.reciprocal %1133 {approx = true} : vector<6x1xf32> -> vector<6x1xf32>
    %1135 = vector.broadcast %1134 : vector<6x1xf32> to vector<6x6xf32>
    %1136 = arith.mulf %1131, %1135 : vector<6x6xf32>
    %1137 = arith.truncf %1136 : vector<6x6xf32> to vector<6x6xbf16>
    %1138 = vector.extract_strided_slice %1099 {offsets = [0, 8], sizes = [6, 8], strides = [1, 1]} : vector<6x32xbf16> to vector<6x8xbf16>
    %cst_367 = arith.constant dense<0.000000e+00> : vector<6x8xf32>
    %1139 = tpu.matmul %1137, %1138, %cst_367 {dimension_numbers = #tpu.dot_dimension_numbers<[1], [0], [0], [1], [0, 0, 1, 1], [], []>} : vector<6x6xbf16>, vector<6x8xbf16>, vector<6x8xf32> -> vector<6x8xf32>
    %1140 = vector.extract_strided_slice %1097 {offsets = [0, 16], sizes = [6, 8], strides = [1, 1]} : vector<6x32xbf16> to vector<6x8xbf16>
    %1141 = vector.extract_strided_slice %1098 {offsets = [0, 16], sizes = [6, 8], strides = [1, 1]} : vector<6x32xbf16> to vector<6x8xbf16>
    %cst_368 = arith.constant dense<0.000000e+00> : vector<6x6xf32>
    %1142 = tpu.matmul %1140, %1141, %cst_368 {dimension_numbers = #tpu.dot_dimension_numbers<[1], [1], [0], [0], [0, 0, 1, 0], [], []>} : vector<6x8xbf16>, vector<6x8xbf16>, vector<6x6xf32> -> vector<6x6xf32>
    %cst_369 = arith.constant 0.353553385 : f32
    %1143 = vector.broadcast %cst_369 : f32 to vector<6x6xf32>
    %1144 = arith.mulf %1142, %1143 : vector<6x6xf32>
    %1145 = arith.addf %1144, %1101 : vector<6x6xf32>
    %cst_370 = arith.constant dense<0xFF800000> : vector<6xf32>
    %1146 = vector.multi_reduction <maximumf>, %1145, %cst_370 [1] : vector<6x6xf32> to vector<6xf32>
    %1147 = vector.shape_cast %1146 : vector<6xf32> to vector<6x1xf32>
    %1148 = vector.broadcast %1147 : vector<6x1xf32> to vector<6x6xf32>
    %1149 = arith.subf %1145, %1148 : vector<6x6xf32>
    %1150 = math.exp %1149 : vector<6x6xf32>
    %cst_371 = arith.constant dense<0.000000e+00> : vector<6xf32>
    %1151 = vector.multi_reduction <add>, %1150, %cst_371 [1] : vector<6x6xf32> to vector<6xf32>
    %1152 = vector.shape_cast %1151 : vector<6xf32> to vector<6x1xf32>
    %1153 = tpu.reciprocal %1152 {approx = true} : vector<6x1xf32> -> vector<6x1xf32>
    %1154 = vector.broadcast %1153 : vector<6x1xf32> to vector<6x6xf32>
    %1155 = arith.mulf %1150, %1154 : vector<6x6xf32>
    %1156 = arith.truncf %1155 : vector<6x6xf32> to vector<6x6xbf16>
    %1157 = vector.extract_strided_slice %1099 {offsets = [0, 16], sizes = [6, 8], strides = [1, 1]} : vector<6x32xbf16> to vector<6x8xbf16>
    %cst_372 = arith.constant dense<0.000000e+00> : vector<6x8xf32>
    %1158 = tpu.matmul %1156, %1157, %cst_372 {dimension_numbers = #tpu.dot_dimension_numbers<[1], [0], [0], [1], [0, 0, 1, 1], [], []>} : vector<6x6xbf16>, vector<6x8xbf16>, vector<6x8xf32> -> vector<6x8xf32>
    %1159 = vector.extract_strided_slice %1097 {offsets = [0, 24], sizes = [6, 8], strides = [1, 1]} : vector<6x32xbf16> to vector<6x8xbf16>
    %1160 = vector.extract_strided_slice %1098 {offsets = [0, 24], sizes = [6, 8], strides = [1, 1]} : vector<6x32xbf16> to vector<6x8xbf16>
    %cst_373 = arith.constant dense<0.000000e+00> : vector<6x6xf32>
    %1161 = tpu.matmul %1159, %1160, %cst_373 {dimension_numbers = #tpu.dot_dimension_numbers<[1], [1], [0], [0], [0, 0, 1, 0], [], []>} : vector<6x8xbf16>, vector<6x8xbf16>, vector<6x6xf32> -> vector<6x6xf32>
    %cst_374 = arith.constant 0.353553385 : f32
    %1162 = vector.broadcast %cst_374 : f32 to vector<6x6xf32>
    %1163 = arith.mulf %1161, %1162 : vector<6x6xf32>
    %1164 = arith.addf %1163, %1101 : vector<6x6xf32>
    %cst_375 = arith.constant dense<0xFF800000> : vector<6xf32>
    %1165 = vector.multi_reduction <maximumf>, %1164, %cst_375 [1] : vector<6x6xf32> to vector<6xf32>
    %1166 = vector.shape_cast %1165 : vector<6xf32> to vector<6x1xf32>
    %1167 = vector.broadcast %1166 : vector<6x1xf32> to vector<6x6xf32>
    %1168 = arith.subf %1164, %1167 : vector<6x6xf32>
    %1169 = math.exp %1168 : vector<6x6xf32>
    %cst_376 = arith.constant dense<0.000000e+00> : vector<6xf32>
    %1170 = vector.multi_reduction <add>, %1169, %cst_376 [1] : vector<6x6xf32> to vector<6xf32>
    %1171 = vector.shape_cast %1170 : vector<6xf32> to vector<6x1xf32>
    %1172 = tpu.reciprocal %1171 {approx = true} : vector<6x1xf32> -> vector<6x1xf32>
    %1173 = vector.broadcast %1172 : vector<6x1xf32> to vector<6x6xf32>
    %1174 = arith.mulf %1169, %1173 : vector<6x6xf32>
    %1175 = arith.truncf %1174 : vector<6x6xf32> to vector<6x6xbf16>
    %1176 = vector.extract_strided_slice %1099 {offsets = [0, 24], sizes = [6, 8], strides = [1, 1]} : vector<6x32xbf16> to vector<6x8xbf16>
    %cst_377 = arith.constant dense<0.000000e+00> : vector<6x8xf32>
    %1177 = tpu.matmul %1175, %1176, %cst_377 {dimension_numbers = #tpu.dot_dimension_numbers<[1], [0], [0], [1], [0, 0, 1, 1], [], []>} : vector<6x6xbf16>, vector<6x8xbf16>, vector<6x8xf32> -> vector<6x8xf32>
    %1178 = tpu.concatenate %1120, %1139, %1158, %1177 in 1 : vector<6x8xf32>, vector<6x8xf32>, vector<6x8xf32>, vector<6x8xf32> -> vector<6x32xf32>
    %1179 = tpu.concatenate %1096, %1178 in 0 : vector<6x32xf32>, vector<6x32xf32> -> vector<12x32xf32>
    %1180 = arith.truncf %1179 : vector<12x32xf32> to vector<12x32xbf16>
    %cst_378 = arith.constant dense<0.000000e+00> : vector<12x32xf32>
    %1181 = tpu.matmul %1180, %1002, %cst_378 {dimension_numbers = #tpu.dot_dimension_numbers<[1], [0], [0], [1], [0, 0, 1, 1], [], []>} : vector<12x32xbf16>, vector<32x32xbf16>, vector<12x32xf32> -> vector<12x32xf32>
    %1182 = vector.broadcast %1004 : vector<1x32xf32> to vector<12x32xf32>
    %1183 = arith.addf %1181, %1182 : vector<12x32xf32>
    %1184 = arith.addf %994, %1183 : vector<12x32xf32>
    %1185 = vector.extract_strided_slice %996 {offsets = [0, 0], sizes = [1, 32], strides = [1, 1]} : vector<6x32xf32> to vector<1x32xf32>
    %1186 = vector.extract_strided_slice %996 {offsets = [1, 0], sizes = [1, 32], strides = [1, 1]} : vector<6x32xf32> to vector<1x32xf32>
    %cst_379 = arith.constant dense<0.000000e+00> : vector<12xf32>
    %1187 = vector.multi_reduction <add>, %1184, %cst_379 [1] : vector<12x32xf32> to vector<12xf32>
    %1188 = vector.shape_cast %1187 : vector<12xf32> to vector<12x1xf32>
    %cst_380 = arith.constant 3.200000e+01 : f32
    %1189 = vector.broadcast %cst_380 : f32 to vector<12x1xf32>
    %1190 = arith.divf %1188, %1189 : vector<12x1xf32>
    %1191 = vector.broadcast %1190 : vector<12x1xf32> to vector<12x32xf32>
    %1192 = arith.subf %1184, %1191 : vector<12x32xf32>
    %1193 = arith.mulf %1192, %1192 : vector<12x32xf32>
    %cst_381 = arith.constant dense<0.000000e+00> : vector<12xf32>
    %1194 = vector.multi_reduction <add>, %1193, %cst_381 [1] : vector<12x32xf32> to vector<12xf32>
    %1195 = vector.shape_cast %1194 : vector<12xf32> to vector<12x1xf32>
    %cst_382 = arith.constant 3.200000e+01 : f32
    %1196 = vector.broadcast %cst_382 : f32 to vector<12x1xf32>
    %1197 = arith.divf %1195, %1196 : vector<12x1xf32>
    %1198 = vector.broadcast %1190 : vector<12x1xf32> to vector<12x32xf32>
    %1199 = arith.subf %1184, %1198 : vector<12x32xf32>
    %cst_383 = arith.constant 9.99999974E-6 : f32
    %1200 = vector.broadcast %cst_383 : f32 to vector<12x1xf32>
    %1201 = arith.addf %1197, %1200 : vector<12x1xf32>
    %1202 = math.rsqrt %1201 : vector<12x1xf32>
    %1203 = vector.broadcast %1202 : vector<12x1xf32> to vector<12x32xf32>
    %1204 = arith.mulf %1199, %1203 : vector<12x32xf32>
    %1205 = vector.broadcast %1185 : vector<1x32xf32> to vector<12x32xf32>
    %1206 = arith.mulf %1204, %1205 : vector<12x32xf32>
    %1207 = vector.broadcast %1186 : vector<1x32xf32> to vector<12x32xf32>
    %1208 = arith.addf %1206, %1207 : vector<12x32xf32>
    %c1_384 = arith.constant 1 : index
    %c0_385 = arith.constant 0 : index
    %c0_386 = arith.constant 0 : index
    %1209 = vector.load %arg18[%c1_384, %c0_385, %c0_386] : memref<2x32x32xbf16, #tpu.memory_space<vmem>>, vector<1x32x32xbf16>
    %1210 = vector.shape_cast %1209 : vector<1x32x32xbf16> to vector<32x32xbf16>
    %c1_387 = arith.constant 1 : index
    %c0_388 = arith.constant 0 : index
    %c0_389 = arith.constant 0 : index
    %1211 = vector.load %arg19[%c1_387, %c0_388, %c0_389] : memref<2x1x32xf32, #tpu.memory_space<vmem>>, vector<1x1x32xf32>
    %1212 = vector.shape_cast %1211 : vector<1x1x32xf32> to vector<1x32xf32>
    %c1_390 = arith.constant 1 : index
    %c0_391 = arith.constant 0 : index
    %c0_392 = arith.constant 0 : index
    %1213 = vector.load %arg20[%c1_390, %c0_391, %c0_392] : memref<2x32x64xbf16, #tpu.memory_space<vmem>>, vector<1x32x64xbf16>
    %1214 = vector.shape_cast %1213 : vector<1x32x64xbf16> to vector<32x64xbf16>
    %c1_393 = arith.constant 1 : index
    %c0_394 = arith.constant 0 : index
    %c0_395 = arith.constant 0 : index
    %1215 = vector.load %arg21[%c1_393, %c0_394, %c0_395] : memref<2x1x64xf32, #tpu.memory_space<vmem>>, vector<1x1x64xf32>
    %1216 = vector.shape_cast %1215 : vector<1x1x64xf32> to vector<1x64xf32>
    %c1_396 = arith.constant 1 : index
    %c0_397 = arith.constant 0 : index
    %c0_398 = arith.constant 0 : index
    %1217 = vector.load %arg22[%c1_396, %c0_397, %c0_398] : memref<2x32x32xbf16, #tpu.memory_space<vmem>>, vector<1x32x32xbf16>
    %1218 = vector.shape_cast %1217 : vector<1x32x32xbf16> to vector<32x32xbf16>
    %c1_399 = arith.constant 1 : index
    %c0_400 = arith.constant 0 : index
    %c0_401 = arith.constant 0 : index
    %1219 = vector.load %arg23[%c1_399, %c0_400, %c0_401] : memref<2x1x32xf32, #tpu.memory_space<vmem>>, vector<1x1x32xf32>
    %1220 = vector.shape_cast %1219 : vector<1x1x32xf32> to vector<1x32xf32>
    %1221 = arith.truncf %1208 : vector<12x32xf32> to vector<12x32xbf16>
    %cst_402 = arith.constant dense<0.000000e+00> : vector<12x32xf32>
    %1222 = tpu.matmul %1221, %1210, %cst_402 {dimension_numbers = #tpu.dot_dimension_numbers<[1], [0], [0], [1], [0, 0, 1, 1], [], []>} : vector<12x32xbf16>, vector<32x32xbf16>, vector<12x32xf32> -> vector<12x32xf32>
    %1223 = vector.broadcast %1212 : vector<1x32xf32> to vector<12x32xf32>
    %1224 = arith.addf %1222, %1223 : vector<12x32xf32>
    %1225 = arith.truncf %515 : vector<16x32xf32> to vector<16x32xbf16>
    %cst_403 = arith.constant dense<0.000000e+00> : vector<16x64xf32>
    %1226 = tpu.matmul %1225, %1214, %cst_403 {dimension_numbers = #tpu.dot_dimension_numbers<[1], [0], [0], [1], [0, 0, 1, 1], [], []>} : vector<16x32xbf16>, vector<32x64xbf16>, vector<16x64xf32> -> vector<16x64xf32>
    %1227 = vector.broadcast %1216 : vector<1x64xf32> to vector<16x64xf32>
    %1228 = arith.addf %1226, %1227 : vector<16x64xf32>
    %1229 = vector.extract_strided_slice %1228 {offsets = [0, 0], sizes = [16, 32], strides = [1, 1]} : vector<16x64xf32> to vector<16x32xf32>
    %1230 = vector.extract_strided_slice %1228 {offsets = [0, 32], sizes = [16, 32], strides = [1, 1]} : vector<16x64xf32> to vector<16x32xf32>
    %1231 = arith.truncf %1224 : vector<12x32xf32> to vector<12x32xbf16>
    %1232 = arith.truncf %1229 : vector<16x32xf32> to vector<16x32xbf16>
    %1233 = arith.truncf %1230 : vector<16x32xf32> to vector<16x32xbf16>
    %1234 = vector.extract_strided_slice %1231 {offsets = [0, 0], sizes = [6, 32], strides = [1, 1]} : vector<12x32xbf16> to vector<6x32xbf16>
    %1235 = vector.extract_strided_slice %1232 {offsets = [0, 0], sizes = [8, 32], strides = [1, 1]} : vector<16x32xbf16> to vector<8x32xbf16>
    %1236 = vector.extract_strided_slice %1233 {offsets = [0, 0], sizes = [8, 32], strides = [1, 1]} : vector<16x32xbf16> to vector<8x32xbf16>
    %1237 = vector.extract_strided_slice %518 {offsets = [0, 0, 0], sizes = [1, 6, 8], strides = [1, 1, 1]} : vector<2x6x8xf32> to vector<1x6x8xf32>
    %1238 = vector.shape_cast %1237 : vector<1x6x8xf32> to vector<6x8xf32>
    %1239 = vector.extract_strided_slice %1234 {offsets = [0, 0], sizes = [6, 8], strides = [1, 1]} : vector<6x32xbf16> to vector<6x8xbf16>
    %1240 = vector.extract_strided_slice %1235 {offsets = [0, 0], sizes = [8, 8], strides = [1, 1]} : vector<8x32xbf16> to vector<8x8xbf16>
    %cst_404 = arith.constant dense<0.000000e+00> : vector<6x8xf32>
    %1241 = tpu.matmul %1239, %1240, %cst_404 {dimension_numbers = #tpu.dot_dimension_numbers<[1], [1], [0], [0], [0, 0, 1, 0], [], []>} : vector<6x8xbf16>, vector<8x8xbf16>, vector<6x8xf32> -> vector<6x8xf32>
    %cst_405 = arith.constant 0.353553385 : f32
    %1242 = vector.broadcast %cst_405 : f32 to vector<6x8xf32>
    %1243 = arith.mulf %1241, %1242 : vector<6x8xf32>
    %1244 = arith.addf %1243, %1238 : vector<6x8xf32>
    %cst_406 = arith.constant dense<0xFF800000> : vector<6xf32>
    %1245 = vector.multi_reduction <maximumf>, %1244, %cst_406 [1] : vector<6x8xf32> to vector<6xf32>
    %1246 = vector.shape_cast %1245 : vector<6xf32> to vector<6x1xf32>
    %1247 = vector.broadcast %1246 : vector<6x1xf32> to vector<6x8xf32>
    %1248 = arith.subf %1244, %1247 : vector<6x8xf32>
    %1249 = math.exp %1248 : vector<6x8xf32>
    %cst_407 = arith.constant dense<0.000000e+00> : vector<6xf32>
    %1250 = vector.multi_reduction <add>, %1249, %cst_407 [1] : vector<6x8xf32> to vector<6xf32>
    %1251 = vector.shape_cast %1250 : vector<6xf32> to vector<6x1xf32>
    %1252 = tpu.reciprocal %1251 {approx = true} : vector<6x1xf32> -> vector<6x1xf32>
    %1253 = vector.broadcast %1252 : vector<6x1xf32> to vector<6x8xf32>
    %1254 = arith.mulf %1249, %1253 : vector<6x8xf32>
    %1255 = arith.truncf %1254 : vector<6x8xf32> to vector<6x8xbf16>
    %1256 = vector.extract_strided_slice %1236 {offsets = [0, 0], sizes = [8, 8], strides = [1, 1]} : vector<8x32xbf16> to vector<8x8xbf16>
    %cst_408 = arith.constant dense<0.000000e+00> : vector<6x8xf32>
    %1257 = tpu.matmul %1255, %1256, %cst_408 {dimension_numbers = #tpu.dot_dimension_numbers<[1], [0], [0], [1], [0, 0, 1, 1], [], []>} : vector<6x8xbf16>, vector<8x8xbf16>, vector<6x8xf32> -> vector<6x8xf32>
    %1258 = vector.extract_strided_slice %1234 {offsets = [0, 8], sizes = [6, 8], strides = [1, 1]} : vector<6x32xbf16> to vector<6x8xbf16>
    %1259 = vector.extract_strided_slice %1235 {offsets = [0, 8], sizes = [8, 8], strides = [1, 1]} : vector<8x32xbf16> to vector<8x8xbf16>
    %cst_409 = arith.constant dense<0.000000e+00> : vector<6x8xf32>
    %1260 = tpu.matmul %1258, %1259, %cst_409 {dimension_numbers = #tpu.dot_dimension_numbers<[1], [1], [0], [0], [0, 0, 1, 0], [], []>} : vector<6x8xbf16>, vector<8x8xbf16>, vector<6x8xf32> -> vector<6x8xf32>
    %cst_410 = arith.constant 0.353553385 : f32
    %1261 = vector.broadcast %cst_410 : f32 to vector<6x8xf32>
    %1262 = arith.mulf %1260, %1261 : vector<6x8xf32>
    %1263 = arith.addf %1262, %1238 : vector<6x8xf32>
    %cst_411 = arith.constant dense<0xFF800000> : vector<6xf32>
    %1264 = vector.multi_reduction <maximumf>, %1263, %cst_411 [1] : vector<6x8xf32> to vector<6xf32>
    %1265 = vector.shape_cast %1264 : vector<6xf32> to vector<6x1xf32>
    %1266 = vector.broadcast %1265 : vector<6x1xf32> to vector<6x8xf32>
    %1267 = arith.subf %1263, %1266 : vector<6x8xf32>
    %1268 = math.exp %1267 : vector<6x8xf32>
    %cst_412 = arith.constant dense<0.000000e+00> : vector<6xf32>
    %1269 = vector.multi_reduction <add>, %1268, %cst_412 [1] : vector<6x8xf32> to vector<6xf32>
    %1270 = vector.shape_cast %1269 : vector<6xf32> to vector<6x1xf32>
    %1271 = tpu.reciprocal %1270 {approx = true} : vector<6x1xf32> -> vector<6x1xf32>
    %1272 = vector.broadcast %1271 : vector<6x1xf32> to vector<6x8xf32>
    %1273 = arith.mulf %1268, %1272 : vector<6x8xf32>
    %1274 = arith.truncf %1273 : vector<6x8xf32> to vector<6x8xbf16>
    %1275 = vector.extract_strided_slice %1236 {offsets = [0, 8], sizes = [8, 8], strides = [1, 1]} : vector<8x32xbf16> to vector<8x8xbf16>
    %cst_413 = arith.constant dense<0.000000e+00> : vector<6x8xf32>
    %1276 = tpu.matmul %1274, %1275, %cst_413 {dimension_numbers = #tpu.dot_dimension_numbers<[1], [0], [0], [1], [0, 0, 1, 1], [], []>} : vector<6x8xbf16>, vector<8x8xbf16>, vector<6x8xf32> -> vector<6x8xf32>
    %1277 = vector.extract_strided_slice %1234 {offsets = [0, 16], sizes = [6, 8], strides = [1, 1]} : vector<6x32xbf16> to vector<6x8xbf16>
    %1278 = vector.extract_strided_slice %1235 {offsets = [0, 16], sizes = [8, 8], strides = [1, 1]} : vector<8x32xbf16> to vector<8x8xbf16>
    %cst_414 = arith.constant dense<0.000000e+00> : vector<6x8xf32>
    %1279 = tpu.matmul %1277, %1278, %cst_414 {dimension_numbers = #tpu.dot_dimension_numbers<[1], [1], [0], [0], [0, 0, 1, 0], [], []>} : vector<6x8xbf16>, vector<8x8xbf16>, vector<6x8xf32> -> vector<6x8xf32>
    %cst_415 = arith.constant 0.353553385 : f32
    %1280 = vector.broadcast %cst_415 : f32 to vector<6x8xf32>
    %1281 = arith.mulf %1279, %1280 : vector<6x8xf32>
    %1282 = arith.addf %1281, %1238 : vector<6x8xf32>
    %cst_416 = arith.constant dense<0xFF800000> : vector<6xf32>
    %1283 = vector.multi_reduction <maximumf>, %1282, %cst_416 [1] : vector<6x8xf32> to vector<6xf32>
    %1284 = vector.shape_cast %1283 : vector<6xf32> to vector<6x1xf32>
    %1285 = vector.broadcast %1284 : vector<6x1xf32> to vector<6x8xf32>
    %1286 = arith.subf %1282, %1285 : vector<6x8xf32>
    %1287 = math.exp %1286 : vector<6x8xf32>
    %cst_417 = arith.constant dense<0.000000e+00> : vector<6xf32>
    %1288 = vector.multi_reduction <add>, %1287, %cst_417 [1] : vector<6x8xf32> to vector<6xf32>
    %1289 = vector.shape_cast %1288 : vector<6xf32> to vector<6x1xf32>
    %1290 = tpu.reciprocal %1289 {approx = true} : vector<6x1xf32> -> vector<6x1xf32>
    %1291 = vector.broadcast %1290 : vector<6x1xf32> to vector<6x8xf32>
    %1292 = arith.mulf %1287, %1291 : vector<6x8xf32>
    %1293 = arith.truncf %1292 : vector<6x8xf32> to vector<6x8xbf16>
    %1294 = vector.extract_strided_slice %1236 {offsets = [0, 16], sizes = [8, 8], strides = [1, 1]} : vector<8x32xbf16> to vector<8x8xbf16>
    %cst_418 = arith.constant dense<0.000000e+00> : vector<6x8xf32>
    %1295 = tpu.matmul %1293, %1294, %cst_418 {dimension_numbers = #tpu.dot_dimension_numbers<[1], [0], [0], [1], [0, 0, 1, 1], [], []>} : vector<6x8xbf16>, vector<8x8xbf16>, vector<6x8xf32> -> vector<6x8xf32>
    %1296 = vector.extract_strided_slice %1234 {offsets = [0, 24], sizes = [6, 8], strides = [1, 1]} : vector<6x32xbf16> to vector<6x8xbf16>
    %1297 = vector.extract_strided_slice %1235 {offsets = [0, 24], sizes = [8, 8], strides = [1, 1]} : vector<8x32xbf16> to vector<8x8xbf16>
    %cst_419 = arith.constant dense<0.000000e+00> : vector<6x8xf32>
    %1298 = tpu.matmul %1296, %1297, %cst_419 {dimension_numbers = #tpu.dot_dimension_numbers<[1], [1], [0], [0], [0, 0, 1, 0], [], []>} : vector<6x8xbf16>, vector<8x8xbf16>, vector<6x8xf32> -> vector<6x8xf32>
    %cst_420 = arith.constant 0.353553385 : f32
    %1299 = vector.broadcast %cst_420 : f32 to vector<6x8xf32>
    %1300 = arith.mulf %1298, %1299 : vector<6x8xf32>
    %1301 = arith.addf %1300, %1238 : vector<6x8xf32>
    %cst_421 = arith.constant dense<0xFF800000> : vector<6xf32>
    %1302 = vector.multi_reduction <maximumf>, %1301, %cst_421 [1] : vector<6x8xf32> to vector<6xf32>
    %1303 = vector.shape_cast %1302 : vector<6xf32> to vector<6x1xf32>
    %1304 = vector.broadcast %1303 : vector<6x1xf32> to vector<6x8xf32>
    %1305 = arith.subf %1301, %1304 : vector<6x8xf32>
    %1306 = math.exp %1305 : vector<6x8xf32>
    %cst_422 = arith.constant dense<0.000000e+00> : vector<6xf32>
    %1307 = vector.multi_reduction <add>, %1306, %cst_422 [1] : vector<6x8xf32> to vector<6xf32>
    %1308 = vector.shape_cast %1307 : vector<6xf32> to vector<6x1xf32>
    %1309 = tpu.reciprocal %1308 {approx = true} : vector<6x1xf32> -> vector<6x1xf32>
    %1310 = vector.broadcast %1309 : vector<6x1xf32> to vector<6x8xf32>
    %1311 = arith.mulf %1306, %1310 : vector<6x8xf32>
    %1312 = arith.truncf %1311 : vector<6x8xf32> to vector<6x8xbf16>
    %1313 = vector.extract_strided_slice %1236 {offsets = [0, 24], sizes = [8, 8], strides = [1, 1]} : vector<8x32xbf16> to vector<8x8xbf16>
    %cst_423 = arith.constant dense<0.000000e+00> : vector<6x8xf32>
    %1314 = tpu.matmul %1312, %1313, %cst_423 {dimension_numbers = #tpu.dot_dimension_numbers<[1], [0], [0], [1], [0, 0, 1, 1], [], []>} : vector<6x8xbf16>, vector<8x8xbf16>, vector<6x8xf32> -> vector<6x8xf32>
    %1315 = tpu.concatenate %1257, %1276, %1295, %1314 in 1 : vector<6x8xf32>, vector<6x8xf32>, vector<6x8xf32>, vector<6x8xf32> -> vector<6x32xf32>
    %1316 = vector.extract_strided_slice %1231 {offsets = [6, 0], sizes = [6, 32], strides = [1, 1]} : vector<12x32xbf16> to vector<6x32xbf16>
    %1317 = vector.extract_strided_slice %1232 {offsets = [8, 0], sizes = [8, 32], strides = [1, 1]} : vector<16x32xbf16> to vector<8x32xbf16>
    %1318 = vector.extract_strided_slice %1233 {offsets = [8, 0], sizes = [8, 32], strides = [1, 1]} : vector<16x32xbf16> to vector<8x32xbf16>
    %1319 = vector.extract_strided_slice %518 {offsets = [1, 0, 0], sizes = [1, 6, 8], strides = [1, 1, 1]} : vector<2x6x8xf32> to vector<1x6x8xf32>
    %1320 = vector.shape_cast %1319 : vector<1x6x8xf32> to vector<6x8xf32>
    %1321 = vector.extract_strided_slice %1316 {offsets = [0, 0], sizes = [6, 8], strides = [1, 1]} : vector<6x32xbf16> to vector<6x8xbf16>
    %1322 = vector.extract_strided_slice %1317 {offsets = [0, 0], sizes = [8, 8], strides = [1, 1]} : vector<8x32xbf16> to vector<8x8xbf16>
    %cst_424 = arith.constant dense<0.000000e+00> : vector<6x8xf32>
    %1323 = tpu.matmul %1321, %1322, %cst_424 {dimension_numbers = #tpu.dot_dimension_numbers<[1], [1], [0], [0], [0, 0, 1, 0], [], []>} : vector<6x8xbf16>, vector<8x8xbf16>, vector<6x8xf32> -> vector<6x8xf32>
    %cst_425 = arith.constant 0.353553385 : f32
    %1324 = vector.broadcast %cst_425 : f32 to vector<6x8xf32>
    %1325 = arith.mulf %1323, %1324 : vector<6x8xf32>
    %1326 = arith.addf %1325, %1320 : vector<6x8xf32>
    %cst_426 = arith.constant dense<0xFF800000> : vector<6xf32>
    %1327 = vector.multi_reduction <maximumf>, %1326, %cst_426 [1] : vector<6x8xf32> to vector<6xf32>
    %1328 = vector.shape_cast %1327 : vector<6xf32> to vector<6x1xf32>
    %1329 = vector.broadcast %1328 : vector<6x1xf32> to vector<6x8xf32>
    %1330 = arith.subf %1326, %1329 : vector<6x8xf32>
    %1331 = math.exp %1330 : vector<6x8xf32>
    %cst_427 = arith.constant dense<0.000000e+00> : vector<6xf32>
    %1332 = vector.multi_reduction <add>, %1331, %cst_427 [1] : vector<6x8xf32> to vector<6xf32>
    %1333 = vector.shape_cast %1332 : vector<6xf32> to vector<6x1xf32>
    %1334 = tpu.reciprocal %1333 {approx = true} : vector<6x1xf32> -> vector<6x1xf32>
    %1335 = vector.broadcast %1334 : vector<6x1xf32> to vector<6x8xf32>
    %1336 = arith.mulf %1331, %1335 : vector<6x8xf32>
    %1337 = arith.truncf %1336 : vector<6x8xf32> to vector<6x8xbf16>
    %1338 = vector.extract_strided_slice %1318 {offsets = [0, 0], sizes = [8, 8], strides = [1, 1]} : vector<8x32xbf16> to vector<8x8xbf16>
    %cst_428 = arith.constant dense<0.000000e+00> : vector<6x8xf32>
    %1339 = tpu.matmul %1337, %1338, %cst_428 {dimension_numbers = #tpu.dot_dimension_numbers<[1], [0], [0], [1], [0, 0, 1, 1], [], []>} : vector<6x8xbf16>, vector<8x8xbf16>, vector<6x8xf32> -> vector<6x8xf32>
    %1340 = vector.extract_strided_slice %1316 {offsets = [0, 8], sizes = [6, 8], strides = [1, 1]} : vector<6x32xbf16> to vector<6x8xbf16>
    %1341 = vector.extract_strided_slice %1317 {offsets = [0, 8], sizes = [8, 8], strides = [1, 1]} : vector<8x32xbf16> to vector<8x8xbf16>
    %cst_429 = arith.constant dense<0.000000e+00> : vector<6x8xf32>
    %1342 = tpu.matmul %1340, %1341, %cst_429 {dimension_numbers = #tpu.dot_dimension_numbers<[1], [1], [0], [0], [0, 0, 1, 0], [], []>} : vector<6x8xbf16>, vector<8x8xbf16>, vector<6x8xf32> -> vector<6x8xf32>
    %cst_430 = arith.constant 0.353553385 : f32
    %1343 = vector.broadcast %cst_430 : f32 to vector<6x8xf32>
    %1344 = arith.mulf %1342, %1343 : vector<6x8xf32>
    %1345 = arith.addf %1344, %1320 : vector<6x8xf32>
    %cst_431 = arith.constant dense<0xFF800000> : vector<6xf32>
    %1346 = vector.multi_reduction <maximumf>, %1345, %cst_431 [1] : vector<6x8xf32> to vector<6xf32>
    %1347 = vector.shape_cast %1346 : vector<6xf32> to vector<6x1xf32>
    %1348 = vector.broadcast %1347 : vector<6x1xf32> to vector<6x8xf32>
    %1349 = arith.subf %1345, %1348 : vector<6x8xf32>
    %1350 = math.exp %1349 : vector<6x8xf32>
    %cst_432 = arith.constant dense<0.000000e+00> : vector<6xf32>
    %1351 = vector.multi_reduction <add>, %1350, %cst_432 [1] : vector<6x8xf32> to vector<6xf32>
    %1352 = vector.shape_cast %1351 : vector<6xf32> to vector<6x1xf32>
    %1353 = tpu.reciprocal %1352 {approx = true} : vector<6x1xf32> -> vector<6x1xf32>
    %1354 = vector.broadcast %1353 : vector<6x1xf32> to vector<6x8xf32>
    %1355 = arith.mulf %1350, %1354 : vector<6x8xf32>
    %1356 = arith.truncf %1355 : vector<6x8xf32> to vector<6x8xbf16>
    %1357 = vector.extract_strided_slice %1318 {offsets = [0, 8], sizes = [8, 8], strides = [1, 1]} : vector<8x32xbf16> to vector<8x8xbf16>
    %cst_433 = arith.constant dense<0.000000e+00> : vector<6x8xf32>
    %1358 = tpu.matmul %1356, %1357, %cst_433 {dimension_numbers = #tpu.dot_dimension_numbers<[1], [0], [0], [1], [0, 0, 1, 1], [], []>} : vector<6x8xbf16>, vector<8x8xbf16>, vector<6x8xf32> -> vector<6x8xf32>
    %1359 = vector.extract_strided_slice %1316 {offsets = [0, 16], sizes = [6, 8], strides = [1, 1]} : vector<6x32xbf16> to vector<6x8xbf16>
    %1360 = vector.extract_strided_slice %1317 {offsets = [0, 16], sizes = [8, 8], strides = [1, 1]} : vector<8x32xbf16> to vector<8x8xbf16>
    %cst_434 = arith.constant dense<0.000000e+00> : vector<6x8xf32>
    %1361 = tpu.matmul %1359, %1360, %cst_434 {dimension_numbers = #tpu.dot_dimension_numbers<[1], [1], [0], [0], [0, 0, 1, 0], [], []>} : vector<6x8xbf16>, vector<8x8xbf16>, vector<6x8xf32> -> vector<6x8xf32>
    %cst_435 = arith.constant 0.353553385 : f32
    %1362 = vector.broadcast %cst_435 : f32 to vector<6x8xf32>
    %1363 = arith.mulf %1361, %1362 : vector<6x8xf32>
    %1364 = arith.addf %1363, %1320 : vector<6x8xf32>
    %cst_436 = arith.constant dense<0xFF800000> : vector<6xf32>
    %1365 = vector.multi_reduction <maximumf>, %1364, %cst_436 [1] : vector<6x8xf32> to vector<6xf32>
    %1366 = vector.shape_cast %1365 : vector<6xf32> to vector<6x1xf32>
    %1367 = vector.broadcast %1366 : vector<6x1xf32> to vector<6x8xf32>
    %1368 = arith.subf %1364, %1367 : vector<6x8xf32>
    %1369 = math.exp %1368 : vector<6x8xf32>
    %cst_437 = arith.constant dense<0.000000e+00> : vector<6xf32>
    %1370 = vector.multi_reduction <add>, %1369, %cst_437 [1] : vector<6x8xf32> to vector<6xf32>
    %1371 = vector.shape_cast %1370 : vector<6xf32> to vector<6x1xf32>
    %1372 = tpu.reciprocal %1371 {approx = true} : vector<6x1xf32> -> vector<6x1xf32>
    %1373 = vector.broadcast %1372 : vector<6x1xf32> to vector<6x8xf32>
    %1374 = arith.mulf %1369, %1373 : vector<6x8xf32>
    %1375 = arith.truncf %1374 : vector<6x8xf32> to vector<6x8xbf16>
    %1376 = vector.extract_strided_slice %1318 {offsets = [0, 16], sizes = [8, 8], strides = [1, 1]} : vector<8x32xbf16> to vector<8x8xbf16>
    %cst_438 = arith.constant dense<0.000000e+00> : vector<6x8xf32>
    %1377 = tpu.matmul %1375, %1376, %cst_438 {dimension_numbers = #tpu.dot_dimension_numbers<[1], [0], [0], [1], [0, 0, 1, 1], [], []>} : vector<6x8xbf16>, vector<8x8xbf16>, vector<6x8xf32> -> vector<6x8xf32>
    %1378 = vector.extract_strided_slice %1316 {offsets = [0, 24], sizes = [6, 8], strides = [1, 1]} : vector<6x32xbf16> to vector<6x8xbf16>
    %1379 = vector.extract_strided_slice %1317 {offsets = [0, 24], sizes = [8, 8], strides = [1, 1]} : vector<8x32xbf16> to vector<8x8xbf16>
    %cst_439 = arith.constant dense<0.000000e+00> : vector<6x8xf32>
    %1380 = tpu.matmul %1378, %1379, %cst_439 {dimension_numbers = #tpu.dot_dimension_numbers<[1], [1], [0], [0], [0, 0, 1, 0], [], []>} : vector<6x8xbf16>, vector<8x8xbf16>, vector<6x8xf32> -> vector<6x8xf32>
    %cst_440 = arith.constant 0.353553385 : f32
    %1381 = vector.broadcast %cst_440 : f32 to vector<6x8xf32>
    %1382 = arith.mulf %1380, %1381 : vector<6x8xf32>
    %1383 = arith.addf %1382, %1320 : vector<6x8xf32>
    %cst_441 = arith.constant dense<0xFF800000> : vector<6xf32>
    %1384 = vector.multi_reduction <maximumf>, %1383, %cst_441 [1] : vector<6x8xf32> to vector<6xf32>
    %1385 = vector.shape_cast %1384 : vector<6xf32> to vector<6x1xf32>
    %1386 = vector.broadcast %1385 : vector<6x1xf32> to vector<6x8xf32>
    %1387 = arith.subf %1383, %1386 : vector<6x8xf32>
    %1388 = math.exp %1387 : vector<6x8xf32>
    %cst_442 = arith.constant dense<0.000000e+00> : vector<6xf32>
    %1389 = vector.multi_reduction <add>, %1388, %cst_442 [1] : vector<6x8xf32> to vector<6xf32>
    %1390 = vector.shape_cast %1389 : vector<6xf32> to vector<6x1xf32>
    %1391 = tpu.reciprocal %1390 {approx = true} : vector<6x1xf32> -> vector<6x1xf32>
    %1392 = vector.broadcast %1391 : vector<6x1xf32> to vector<6x8xf32>
    %1393 = arith.mulf %1388, %1392 : vector<6x8xf32>
    %1394 = arith.truncf %1393 : vector<6x8xf32> to vector<6x8xbf16>
    %1395 = vector.extract_strided_slice %1318 {offsets = [0, 24], sizes = [8, 8], strides = [1, 1]} : vector<8x32xbf16> to vector<8x8xbf16>
    %cst_443 = arith.constant dense<0.000000e+00> : vector<6x8xf32>
    %1396 = tpu.matmul %1394, %1395, %cst_443 {dimension_numbers = #tpu.dot_dimension_numbers<[1], [0], [0], [1], [0, 0, 1, 1], [], []>} : vector<6x8xbf16>, vector<8x8xbf16>, vector<6x8xf32> -> vector<6x8xf32>
    %1397 = tpu.concatenate %1339, %1358, %1377, %1396 in 1 : vector<6x8xf32>, vector<6x8xf32>, vector<6x8xf32>, vector<6x8xf32> -> vector<6x32xf32>
    %1398 = tpu.concatenate %1315, %1397 in 0 : vector<6x32xf32>, vector<6x32xf32> -> vector<12x32xf32>
    %1399 = arith.truncf %1398 : vector<12x32xf32> to vector<12x32xbf16>
    %cst_444 = arith.constant dense<0.000000e+00> : vector<12x32xf32>
    %1400 = tpu.matmul %1399, %1218, %cst_444 {dimension_numbers = #tpu.dot_dimension_numbers<[1], [0], [0], [1], [0, 0, 1, 1], [], []>} : vector<12x32xbf16>, vector<32x32xbf16>, vector<12x32xf32> -> vector<12x32xf32>
    %1401 = vector.broadcast %1220 : vector<1x32xf32> to vector<12x32xf32>
    %1402 = arith.addf %1400, %1401 : vector<12x32xf32>
    %1403 = arith.addf %1208, %1402 : vector<12x32xf32>
    %1404 = vector.extract_strided_slice %996 {offsets = [2, 0], sizes = [1, 32], strides = [1, 1]} : vector<6x32xf32> to vector<1x32xf32>
    %1405 = vector.extract_strided_slice %996 {offsets = [3, 0], sizes = [1, 32], strides = [1, 1]} : vector<6x32xf32> to vector<1x32xf32>
    %cst_445 = arith.constant dense<0.000000e+00> : vector<12xf32>
    %1406 = vector.multi_reduction <add>, %1403, %cst_445 [1] : vector<12x32xf32> to vector<12xf32>
    %1407 = vector.shape_cast %1406 : vector<12xf32> to vector<12x1xf32>
    %cst_446 = arith.constant 3.200000e+01 : f32
    %1408 = vector.broadcast %cst_446 : f32 to vector<12x1xf32>
    %1409 = arith.divf %1407, %1408 : vector<12x1xf32>
    %1410 = vector.broadcast %1409 : vector<12x1xf32> to vector<12x32xf32>
    %1411 = arith.subf %1403, %1410 : vector<12x32xf32>
    %1412 = arith.mulf %1411, %1411 : vector<12x32xf32>
    %cst_447 = arith.constant dense<0.000000e+00> : vector<12xf32>
    %1413 = vector.multi_reduction <add>, %1412, %cst_447 [1] : vector<12x32xf32> to vector<12xf32>
    %1414 = vector.shape_cast %1413 : vector<12xf32> to vector<12x1xf32>
    %cst_448 = arith.constant 3.200000e+01 : f32
    %1415 = vector.broadcast %cst_448 : f32 to vector<12x1xf32>
    %1416 = arith.divf %1414, %1415 : vector<12x1xf32>
    %1417 = vector.broadcast %1409 : vector<12x1xf32> to vector<12x32xf32>
    %1418 = arith.subf %1403, %1417 : vector<12x32xf32>
    %cst_449 = arith.constant 9.99999974E-6 : f32
    %1419 = vector.broadcast %cst_449 : f32 to vector<12x1xf32>
    %1420 = arith.addf %1416, %1419 : vector<12x1xf32>
    %1421 = math.rsqrt %1420 : vector<12x1xf32>
    %1422 = vector.broadcast %1421 : vector<12x1xf32> to vector<12x32xf32>
    %1423 = arith.mulf %1418, %1422 : vector<12x32xf32>
    %1424 = vector.broadcast %1404 : vector<1x32xf32> to vector<12x32xf32>
    %1425 = arith.mulf %1423, %1424 : vector<12x32xf32>
    %1426 = vector.broadcast %1405 : vector<1x32xf32> to vector<12x32xf32>
    %1427 = arith.addf %1425, %1426 : vector<12x32xf32>
    %c1_450 = arith.constant 1 : index
    %c0_451 = arith.constant 0 : index
    %c0_452 = arith.constant 0 : index
    %1428 = vector.load %arg24[%c1_450, %c0_451, %c0_452] : memref<2x32x64xbf16, #tpu.memory_space<vmem>>, vector<1x32x64xbf16>
    %1429 = vector.shape_cast %1428 : vector<1x32x64xbf16> to vector<32x64xbf16>
    %c1_453 = arith.constant 1 : index
    %c0_454 = arith.constant 0 : index
    %c0_455 = arith.constant 0 : index
    %1430 = vector.load %arg25[%c1_453, %c0_454, %c0_455] : memref<2x1x64xf32, #tpu.memory_space<vmem>>, vector<1x1x64xf32>
    %1431 = vector.shape_cast %1430 : vector<1x1x64xf32> to vector<1x64xf32>
    %c1_456 = arith.constant 1 : index
    %c0_457 = arith.constant 0 : index
    %c0_458 = arith.constant 0 : index
    %1432 = vector.load %arg26[%c1_456, %c0_457, %c0_458] : memref<2x64x32xbf16, #tpu.memory_space<vmem>>, vector<1x64x32xbf16>
    %1433 = vector.shape_cast %1432 : vector<1x64x32xbf16> to vector<64x32xbf16>
    %c1_459 = arith.constant 1 : index
    %c0_460 = arith.constant 0 : index
    %c0_461 = arith.constant 0 : index
    %1434 = vector.load %arg27[%c1_459, %c0_460, %c0_461] : memref<2x1x32xf32, #tpu.memory_space<vmem>>, vector<1x1x32xf32>
    %1435 = vector.shape_cast %1434 : vector<1x1x32xf32> to vector<1x32xf32>
    %1436 = arith.truncf %1427 : vector<12x32xf32> to vector<12x32xbf16>
    %cst_462 = arith.constant dense<0.000000e+00> : vector<12x64xf32>
    %1437 = tpu.matmul %1436, %1429, %cst_462 {dimension_numbers = #tpu.dot_dimension_numbers<[1], [0], [0], [1], [0, 0, 1, 1], [], []>} : vector<12x32xbf16>, vector<32x64xbf16>, vector<12x64xf32> -> vector<12x64xf32>
    %1438 = vector.broadcast %1431 : vector<1x64xf32> to vector<12x64xf32>
    %1439 = arith.addf %1437, %1438 : vector<12x64xf32>
    %cst_463 = arith.constant 0.000000e+00 : f32
    %1440 = vector.broadcast %cst_463 : f32 to vector<12x64xf32>
    %1441 = arith.maximumf %1439, %1440 : vector<12x64xf32>
    %1442 = arith.truncf %1441 : vector<12x64xf32> to vector<12x64xbf16>
    %cst_464 = arith.constant dense<0.000000e+00> : vector<12x32xf32>
    %1443 = tpu.matmul %1442, %1433, %cst_464 {dimension_numbers = #tpu.dot_dimension_numbers<[1], [0], [0], [1], [0, 0, 1, 1], [], []>} : vector<12x64xbf16>, vector<64x32xbf16>, vector<12x32xf32> -> vector<12x32xf32>
    %1444 = vector.broadcast %1435 : vector<1x32xf32> to vector<12x32xf32>
    %1445 = arith.addf %1443, %1444 : vector<12x32xf32>
    %1446 = arith.addf %1427, %1445 : vector<12x32xf32>
    %1447 = vector.extract_strided_slice %996 {offsets = [4, 0], sizes = [1, 32], strides = [1, 1]} : vector<6x32xf32> to vector<1x32xf32>
    %1448 = vector.extract_strided_slice %996 {offsets = [5, 0], sizes = [1, 32], strides = [1, 1]} : vector<6x32xf32> to vector<1x32xf32>
    %cst_465 = arith.constant dense<0.000000e+00> : vector<12xf32>
    %1449 = vector.multi_reduction <add>, %1446, %cst_465 [1] : vector<12x32xf32> to vector<12xf32>
    %1450 = vector.shape_cast %1449 : vector<12xf32> to vector<12x1xf32>
    %cst_466 = arith.constant 3.200000e+01 : f32
    %1451 = vector.broadcast %cst_466 : f32 to vector<12x1xf32>
    %1452 = arith.divf %1450, %1451 : vector<12x1xf32>
    %1453 = vector.broadcast %1452 : vector<12x1xf32> to vector<12x32xf32>
    %1454 = arith.subf %1446, %1453 : vector<12x32xf32>
    %1455 = arith.mulf %1454, %1454 : vector<12x32xf32>
    %cst_467 = arith.constant dense<0.000000e+00> : vector<12xf32>
    %1456 = vector.multi_reduction <add>, %1455, %cst_467 [1] : vector<12x32xf32> to vector<12xf32>
    %1457 = vector.shape_cast %1456 : vector<12xf32> to vector<12x1xf32>
    %cst_468 = arith.constant 3.200000e+01 : f32
    %1458 = vector.broadcast %cst_468 : f32 to vector<12x1xf32>
    %1459 = arith.divf %1457, %1458 : vector<12x1xf32>
    %1460 = vector.broadcast %1452 : vector<12x1xf32> to vector<12x32xf32>
    %1461 = arith.subf %1446, %1460 : vector<12x32xf32>
    %cst_469 = arith.constant 9.99999974E-6 : f32
    %1462 = vector.broadcast %cst_469 : f32 to vector<12x1xf32>
    %1463 = arith.addf %1459, %1462 : vector<12x1xf32>
    %1464 = math.rsqrt %1463 : vector<12x1xf32>
    %1465 = vector.broadcast %1464 : vector<12x1xf32> to vector<12x32xf32>
    %1466 = arith.mulf %1461, %1465 : vector<12x32xf32>
    %1467 = vector.broadcast %1447 : vector<1x32xf32> to vector<12x32xf32>
    %1468 = arith.mulf %1466, %1467 : vector<12x32xf32>
    %1469 = vector.broadcast %1448 : vector<1x32xf32> to vector<12x32xf32>
    %1470 = arith.addf %1468, %1469 : vector<12x32xf32>
    %1471 = arith.truncf %1470 : vector<12x32xf32> to vector<12x32xbf16>
    %c0_470 = arith.constant 0 : index
    %c0_471 = arith.constant 0 : index
    %1472 = vector.load %arg29[%c0_470, %c0_471] : memref<32x56xbf16, #tpu.memory_space<vmem>>, vector<32x56xbf16>
    %cst_472 = arith.constant dense<0.000000e+00> : vector<12x56xf32>
    %1473 = tpu.matmul %1471, %1472, %cst_472 {dimension_numbers = #tpu.dot_dimension_numbers<[1], [0], [0], [1], [0, 0, 1, 1], [], []>} : vector<12x32xbf16>, vector<32x56xbf16>, vector<12x56xf32> -> vector<12x56xf32>
    %c0_473 = arith.constant 0 : index
    %c0_474 = arith.constant 0 : index
    %1474 = vector.load %arg30[%c0_473, %c0_474] : memref<1x56xf32, #tpu.memory_space<vmem>>, vector<1x56xf32>
    %1475 = vector.broadcast %1474 : vector<1x56xf32> to vector<12x56xf32>
    %1476 = arith.addf %1473, %1475 : vector<12x56xf32>
    %1477 = vector.extract_strided_slice %1476 {offsets = [0, 0], sizes = [6, 56], strides = [1, 1]} : vector<12x56xf32> to vector<6x56xf32>
    %1478 = vector.shape_cast %1477 : vector<6x56xf32> to vector<6x1x56xf32>
    %1479 = vector.extract_strided_slice %1476 {offsets = [6, 0], sizes = [6, 56], strides = [1, 1]} : vector<12x56xf32> to vector<6x56xf32>
    %1480 = vector.shape_cast %1479 : vector<6x56xf32> to vector<6x1x56xf32>
    %1481 = tpu.concatenate %1478, %1480 in 1 : vector<6x1x56xf32>, vector<6x1x56xf32> -> vector<6x2x56xf32>
    %c0_475 = arith.constant 0 : index
    %c0_476 = arith.constant 0 : index
    %c0_477 = arith.constant 0 : index
    %1482 = vector.load %arg31[%c0_475, %c0_476, %c0_477] : memref<6x2x56xf32, #tpu.memory_space<vmem>>, vector<6x2x56xf32>
    tpu.vector_store %arg31[%c0_475, %c0_476, %c0_477], %1481 {strides = array<i32>} : memref<6x2x56xf32, #tpu.memory_space<vmem>>, vector<6x2x56xf32>,
    return
  }
}

</mosaic_0001>

<bundles_post_ra>
// kernel: seq2seq_forward.1
= control target key start
LH: loop header
LB: loop body
LE: loop exit
PB: predicated region body
PF: predicated region fallthrough
CT: control target
= control target key end

     0   :  { %s9694_s6 = smov 1   ;;  %s9695_s10 = smov 2   ;;  %s11513_s0 = inlined_call_operand.smem [shape: u32[32], index: -1, kind: input, shape index: {}] }
   0x1   :  { %s9753_s5 = sld [smem:[%s11513_s0]]   ;;  %s9696_s14 = smov 3  }
   0x2   :  { %s9758_s9 = sld [smem:[%s11513_s0 + %s9694_s6]]   ;;  %s9697_s18 = smov 4  }
   0x3   :  { %s9763_s13 = sld [smem:[%s11513_s0 + %s9695_s10]]   ;;  %s9698_s22 = smov 5  }
   0x4   :  { %s9768_s17 = sld [smem:[%s11513_s0 + %s9696_s14]]   ;;  %s9699_s26 = smov 6  }
   0x5   :  { %s9773_s21 = sld [smem:[%s11513_s0 + %s9697_s18]]   ;;  %s9700_s30 = smov 7  }
   0x6   :  { %s9778_s25 = sld [smem:[%s11513_s0 + %s9698_s22]]   ;;  %s9701_s4 = smov 8  }
   0x7   :  { %s9783_s29 = sld [smem:[%s11513_s0 + %s9699_s26]]   ;;  %s9702_s10 = smov 9  }
   0x8   :  { %s9788_s3 = sld [smem:[%s11513_s0 + %s9700_s30]]   ;;  %s9703_s15 = smov 10  }
   0x9   :  { %s9793_s8 = sld [smem:[%s11513_s0 + %s9701_s4]]   ;;  %s9704_s20 = smov 11  }
   0xa   :  { %11534 = sst [smem:[#allocation5_spill]] %s9768_s17  ;;  %s9705_s26 = smov 12  }
   0xb   :  { %11535 = sst [smem:[#allocation6_spill]] %s9773_s21  ;;  %s9706_s1 = smov 13  }
   0xc   :  { %s9798_s14 = sld [smem:[%s11513_s0 + %s9702_s10]]   ;;  %s9707_s7 = smov 14  }
   0xd   :  { %s9803_s19 = sld [smem:[%s11513_s0 + %s9703_s15]]   ;;  %s9708_s15 = smov 15  }
   0xe   :  { %s9808_s24 = sld [smem:[%s11513_s0 + %s9704_s20]]   ;;  %s9709_s22 = smov 16  }
   0xf   :  { %s9813_s30 = sld [smem:[%s11513_s0 + %s9705_s26]]   ;;  %s9710_s28 = smov 17  }
  0x10   :  { %s9818_s6 = sld [smem:[%s11513_s0 + %s9706_s1]]  }
  0x11   :  { %s9823_s12 = sld [smem:[%s11513_s0 + %s9707_s7]]   ;;  %s9711_s7 = smov 18  }
  0x12   :  { %s9828_s20 = sld [smem:[%s11513_s0 + %s9708_s15]]   ;;  %s9712_s15 = smov 19  }
  0x13   :  { %s9833_s27 = sld [smem:[%s11513_s0 + %s9709_s22]]   ;;  %s9713_s22 = smov 20  }
  0x14   :  { %s9838_s4 = sld [smem:[%s11513_s0 + %s9710_s28]]   ;;  %s9714_s28 = smov 21  }
  0x15   :  { %s9843_s21 = sld [smem:[%s11513_s0 + %s9711_s7]]   ;;  %s9715_s7 = smov 22  }
  0x16   :  { %s9848_s17 = sld [smem:[%s11513_s0 + %s9712_s15]]   ;;  %s9716_s15 = smov 23  }
  0x19   :  { %11536 = sst [smem:[#allocation7_spill]] %s9833_s27 }
  0x1a   :  { %11537 = sst [smem:[#allocation8_spill]] %s9838_s4 }
  0x1b   :  { %11538 = sst [smem:[#allocation9_spill]] %s9843_s21 }
  0x1c   :  { %11539 = sst [smem:[#allocation10_spill]] %s9848_s17 }
  0x1d   :  { %s9853_s27 = sld [smem:[%s11513_s0 + %s9713_s22]]   ;;  %s9717_s22 = smov 24  }
  0x1e   :  { %s9858_s4 = sld [smem:[%s11513_s0 + %s9714_s28]]   ;;  %s9718_s28 = smov 25  }
  0x1f   :  { %s9863_s21 = sld [smem:[%s11513_s0 + %s9715_s7]]   ;;  %s9719_s7 = smov 26  }
  0x20   :  { %s9868_s17 = sld [smem:[%s11513_s0 + %s9716_s15]]   ;;  %s9720_s15 = smov 27  }
  0x23   :  { %11540 = sst [smem:[#allocation11_spill]] %s9853_s27 }
  0x24   :  { %11541 = sst [smem:[#allocation12_spill]] %s9858_s4 }
  0x25   :  { %11542 = sst [smem:[#allocation13_spill]] %s9863_s21 }
  0x26   :  { %11543 = sst [smem:[#allocation14_spill]] %s9868_s17 }
  0x27   :  { %s9873_s27 = sld [smem:[%s11513_s0 + %s9717_s22]]   ;;  %s9721_s22 = smov 28  }
  0x28   :  { %s9878_s4 = sld [smem:[%s11513_s0 + %s9718_s28]]   ;;  %s9722_s28 = smov 29  }
  0x29   :  { %s9883_s21 = sld [smem:[%s11513_s0 + %s9719_s7]]   ;;  %s9723_s7 = smov 30  }
  0x2a   :  { %s9888_s17 = sld [smem:[%s11513_s0 + %s9720_s15]]   ;;  %s9724_s15 = smov 31  }
  0x2d   :  { %11544 = sst [smem:[#allocation15_spill]] %s9873_s27 }
  0x2e   :  { %11545 = sst [smem:[#allocation16_spill]] %s9878_s4 }
  0x2f   :  { %11546 = sst [smem:[#allocation17_spill]] %s9883_s21 }
  0x30   :  { %11547 = sst [smem:[#allocation18_spill]] %s9888_s17 }
  0x31   :  { %s9893_s27 = sld [smem:[%s11513_s0 + %s9721_s22]]  }
  0x32   :  { %s9898_s4 = sld [smem:[%s11513_s0 + %s9722_s28]]  }
  0x33   :  { %s9903_s21 = sld [smem:[%s11513_s0 + %s9723_s7]]  }
  0x34   :  { %s9908_s17 = sld [smem:[%s11513_s0 + %s9724_s15]]  }
  0x35   :  { %v9378_v0 = vld [vmem:[%s9778_s25] sm:$0xff]   ;;  %v9725_v1 = vmov 0.0   ;;  %v9379_v2 = vld [vmem:[%s9778_s25 + $0x8] sm:$0xff]   ;;  %vm9726_vm0 = vmmov 0   ;;  %vm166_vm1 = vcmask 261120  }
  0x36   :  { %8481 = vmatprep.subr.bf16.mxu0 %v9725_v1  ;;  %8489 = vmatprep.subr.bf16.mxu1 %v9725_v1  ;;  %v9917_v3 = vld [vmem:[%s9753_s5] sm:$0xff]  ;;  %v9920_v4 = vld [vmem:[%s9753_s5 + $0x8] sm:$0xff] }
  0x37   :  { %8482 = vmatpush3.bf16.msra.mxu0 %v9378_v0  ;;  %8485 = vmatprep.mubr.msk.bf16.mxu0 %vm9726_vm0, %v9725_v1  ;;  %v147_v5 = vpack.c.bf16 %v9920_v4, %v9917_v3 }
  0x38   :  { %8483 = vmatprep.subr.bf16.mxu0 %v9725_v1  ;;  %8491 = vmatprep.mubr.msk.bf16.mxu1 %vm9726_vm0, %v9725_v1 }
  0x3b   :  { %8484 = vmatpush3.bf16.msra.mxu0 %v9379_v2 }
  0x3c   :  { %8495 = vmatprep.subr.bf16.mxu0 %v9725_v1 }
  0x3e   :  { %8486 = vmatmul.mubr.msk.bf16.vlgmr.msra.gmra.mrb[0].mxu0 %vm166_vm1, %v147_v5 }
  0x3f   :  { %8497 = vmatprep.mubr.msk.bf16.mxu0 %vm9726_vm0, %v9725_v1 }
  0x40   :  { %68 = vsyncpa [#allocation3], 0  ;;  %v7951_v6 = vld [vmem:[%s9783_s29] ss:$0 sm:$0xff]  ;;  %s9727_s0 = smov 120   ;;  %s9728_s5 = smov 96  }
  0x41   :  { %s9729_s22 = smov 80   ;;  %s9730_s23 = smov 88   ;;  %vm215_vm2 = vcmask 64512   ;;  %v10008_v38 = vld [vmem:[%s9763_s13] sm:$0xff]  ;;  %vm281_vm3 = vcmask 1043456   ;;  %vm674_vm4 = vcmask 130048  }
  0x42   :  { %s9731_s26 = smov 72   ;;  %s9732_s28 = smov 112   ;;  %vm676_vm5 = vcmask 195584   ;;  %vm1354_vm6 = vcmask 523264   ;;  %vm2876_vm7 = vcmask 46080   ;;  %vm2895_vm8 = vcmask 1042432  }
  0x43   :  { %s9733_s1 = smov 104   ;;  %s9734_s2 = smov 56   ;;  %vm2891_vm9 = vcmask 48128   ;;  %vm3755_vm10 = vcmask 1045504   ;;  %vm3825_vm11 = vcmask 257024   ;;  %vm4052_vm12 = vcmask 62464  }
  0x44   :  { %s9735_s7 = smov 64   ;;  %s9736_s10 = smov 48   ;;  %vm7890_vm13 = vcmask 1040384   ;;  %vm7897_vm14 = vcmask 451584  }
  0x45   :  { %s9737_s11 = smov 40   ;;  %s11532_s15 = smov 8  }
  0x46   :  { %s11530_s16 = smov 16   ;;  %s11528_s18 = smov 24  }
 0x111   :  { %v204_v7 = vpop.f32.mrb[0].mxu0 }
 0x112   :  { %v8487_v8 = vpop.f32.mrb[1].mxu0  ;;  %v205_v10 = vadd.f32 %v7951_v6, %v204_v7 }
 0x113   :  { %v207_v9 = vpop.f32.mrb[2].mxu0 }
 0x114   :  { %v208_v11 = vadd.f32 %v7951_v6, %v207_v9  ;;  %v8488_v12 = vpop.f32.mrb[3].mxu0  ;;  %v10025_v6 = vld [vmem:[%s9763_s13 + $0x8] sm:$0xff] }
 0x116   :  { %v9932_v13 = vpack.c.bf16 %v208_v11, %v205_v10 }
 0x118   :  { %325 = vrot.lane.b32.xlu1 %v9932_v13, %s9727_s0  ;;  %213 = vrot.lane.b32.xlu0 %v9932_v13, %s9728_s5  ;;  %v9947_v14 = vrot.slane %v9932_v13, 4 }
 0x11c   :  { %439 = vrot.lane.b32.xlu1 %v9932_v13, %s9729_s22  ;;  %327 = vrot.lane.b32.xlu0 %v9932_v13, %s9730_s23 }
 0x120   :  { %551 = vrot.lane.b32.xlu1 %v9932_v13, %s9731_s26  ;;  %437 = vrot.lane.b32.xlu0 %v9932_v13, %s9732_s28 }
 0x124   :  { %549 = vrot.lane.b32.xlu0 %v9932_v13, %s9733_s1  ;;  %679 = vrot.lane.b32.xlu1 %v9947_v14, %s9728_s5 }
 0x128   :  { %791 = vrot.lane.b32.xlu0 %v9947_v14, %s9730_s23  ;;  %789 = vrot.lane.b32.xlu1 %v9947_v14, %s9727_s0 }
 0x12c   :  { %903 = vrot.lane.b32.xlu0 %v9947_v14, %s9729_s22  ;;  %901 = vrot.lane.b32.xlu1 %v9947_v14, %s9732_s28 }
 0x130   :  { %1015 = vrot.lane.b32.xlu0 %v9947_v14, %s9731_s26  ;;  %1013 = vrot.lane.b32.xlu1 %v9947_v14, %s9733_s1 }
 0x18a   :  { %v214_v15 = vpop.permute.xlu0 %213  ;;  %v326_v18 = vpop.permute.xlu1 %325 }
 0x18b   :  { %v220_v16 = vsel %vm215_vm2, %v214_v15, 0 }
 0x18c   :  { %8490 = vmatpush3.bf16.xpose.msra.mxu1 %v220_v16 }
 0x18d   :  { %8501 = vmatprep.subr.bf16.mxu1 %v9725_v1 }
 0x18e   :  { %v328_v17 = vpop.permute.xlu0 %327  ;;  %v440_v20 = vpop.permute.xlu1 %439 }
 0x18f   :  { %v333_v19 = vsel %vm215_vm2, %v328_v17, 0  ;;  %v445_v21 = vsel %vm215_vm2, %v440_v20, 0 }
 0x192   :  { %v552_v22 = vpop.permute.xlu1 %551  ;;  %v438_v23 = vpop.permute.xlu0 %437 }
 0x193   :  { %8492 = vmatmul.mubr.msk.bf16.vlgmr.msra.gmra.mrb[0].mxu1 %vm215_vm2, %v9932_v13  ;;  %v557_v24 = vsel %vm215_vm2, %v552_v22, 0 }
 0x194   :  { %8502 = vmatpush3.bf16.xpose.msra.mxu1 %v333_v19  ;;  %8503 = vmatprep.mubr.msk.bf16.mxu1 %vm9726_vm0, %v9725_v1 }
 0x195   :  { %8513 = vmatprep.subr.bf16.mxu1 %v9725_v1 }
 0x196   :  { %v680_v25 = vpop.permute.xlu1 %679  ;;  %v550_v26 = vpop.permute.xlu0 %549 }
 0x197   :  { %v685_v27 = vsel %vm215_vm2, %v680_v25, 0 }
 0x19a   :  { %v792_v28 = vpop.permute.xlu0 %791  ;;  %v790_v31 = vpop.permute.xlu1 %789 }
 0x19b   :  { %8504 = vmatmul.mubr.msk.bf16.vlgmr.msra.gmra.mrb[4].mxu1 %vm215_vm2, %v326_v18  ;;  %v797_v29 = vsel %vm215_vm2, %v792_v28, 0 }
 0x19c   :  { %8514 = vmatpush3.bf16.xpose.msra.mxu1 %v445_v21  ;;  %8515 = vmatprep.mubr.msk.bf16.mxu1 %vm9726_vm0, %v9725_v1 }
 0x19d   :  { %8525 = vmatprep.subr.bf16.mxu1 %v9725_v1 }
 0x19e   :  { %v904_v30 = vpop.permute.xlu0 %903  ;;  %v902_v34 = vpop.permute.xlu1 %901 }
 0x19f   :  { %v909_v32 = vsel %vm215_vm2, %v904_v30, 0 }
 0x1a2   :  { %v1016_v33 = vpop.permute.xlu0 %1015  ;;  %v1014_v36 = vpop.permute.xlu1 %1013 }
 0x1a3   :  { %8516 = vmatmul.mubr.msk.bf16.vlgmr.msra.gmra.mrb[8].mxu1 %vm215_vm2, %v438_v23  ;;  %v1021_v35 = vsel %vm215_vm2, %v1016_v33, 0 }
 0x1a4   :  { %8526 = vmatpush3.bf16.xpose.msra.mxu1 %v557_v24  ;;  %8527 = vmatprep.mubr.msk.bf16.mxu1 %vm9726_vm0, %v9725_v1 }
 0x1a5   :  { %8537 = vmatprep.subr.bf16.mxu1 %v9725_v1 }
 0x1ab   :  { %8528 = vmatmul.mubr.msk.bf16.vlgmr.msra.gmra.mrb[12].mxu1 %vm215_vm2, %v550_v26 }
 0x1ac   :  { %8538 = vmatpush3.bf16.xpose.msra.mxu1 %v685_v27  ;;  %8539 = vmatprep.mubr.msk.bf16.mxu1 %vm9726_vm0, %v9725_v1 }
 0x1ad   :  { %8549 = vmatprep.subr.bf16.mxu1 %v9725_v1 }
 0x1b3   :  { %8540 = vmatmul.mubr.msk.bf16.vlgmr.msra.gmra.mrb[16].mxu1 %vm215_vm2, %v9947_v14 }
 0x1b4   :  { %8550 = vmatpush3.bf16.xpose.msra.mxu1 %v797_v29  ;;  %8551 = vmatprep.mubr.msk.bf16.mxu1 %vm9726_vm0, %v9725_v1 }
 0x1b5   :  { %8561 = vmatprep.subr.bf16.mxu1 %v9725_v1 }
 0x1bb   :  { %8552 = vmatmul.mubr.msk.bf16.vlgmr.msra.gmra.mrb[20].mxu1 %vm215_vm2, %v790_v31 }
 0x1bc   :  { %8562 = vmatpush3.bf16.xpose.msra.mxu1 %v909_v32  ;;  %8563 = vmatprep.mubr.msk.bf16.mxu1 %vm9726_vm0, %v9725_v1 }
 0x1bd   :  { %8573 = vmatprep.subr.bf16.mxu1 %v9725_v1 }
 0x1c3   :  { %8564 = vmatmul.mubr.msk.bf16.vlgmr.msra.gmra.mrb[24].mxu1 %vm215_vm2, %v902_v34 }
 0x1c4   :  { %8574 = vmatpush3.bf16.xpose.msra.mxu1 %v1021_v35  ;;  %8575 = vmatprep.mubr.msk.bf16.mxu1 %vm9726_vm0, %v9725_v1 }
 0x1c5   :  { %8585 = vmatprep.subr.bf16.mxu1 %v9725_v1 }
 0x1cb   :  { %8576 = vmatmul.mubr.msk.bf16.vlgmr.msra.gmra.mrb[28].mxu1 %vm215_vm2, %v1014_v36 }
 0x1cc   :  { %8589 = vmatprep.mubr.msk.bf16.mxu1 %vm9726_vm0, %v9725_v1 }
 0x266   :  { %v256_v37 = vpop.f32.mrb[0].mxu1 }
 0x267   :  { %v262_v39 = vmul.f32 0.35355338, %v256_v37  ;;  %v8493_v40 = vpop.f32.mrb[1].mxu1 }
 0x268   :  { %v259_v41 = vpop.f32.mrb[2].mxu1 }
 0x269   :  { %v8494_v42 = vpop.f32.mrb[3].mxu1  ;;  %v10011_v43 = vadd.f32 %v262_v39, %v10008_v38 }
 0x26b   :  { %v264_v44 = vsel %vm215_vm2, %v10011_v43, -inf }
 0x26c   :  { %265 = vmax.xlane.f32.xlu0 %v264_v44 }
 0x26e   :  { %v369_v45 = vpop.f32.mrb[4].mxu1 }
 0x26f   :  { %v375_v46 = vmul.f32 0.35355338, %v369_v45  ;;  %v8505_v47 = vpop.f32.mrb[5].mxu1 }
 0x270   :  { %v372_v48 = vpop.f32.mrb[6].mxu1 }
 0x271   :  { %v8506_v49 = vpop.f32.mrb[7].mxu1  ;;  %v376_v50 = vadd.f32 %v375_v46, %v10008_v38 }
 0x273   :  { %v377_v51 = vsel %vm215_vm2, %v376_v50, -inf }
 0x274   :  { %378 = vmax.xlane.f32.xlu1 %v377_v51 }
 0x276   :  { %v481_v52 = vpop.f32.mrb[8].mxu1 }
 0x277   :  { %v487_v53 = vmul.f32 0.35355338, %v481_v52  ;;  %v8517_v54 = vpop.f32.mrb[9].mxu1 }
 0x278   :  { %v484_v55 = vpop.f32.mrb[10].mxu1 }
 0x279   :  { %v8518_v56 = vpop.f32.mrb[11].mxu1  ;;  %v488_v57 = vadd.f32 %v487_v53, %v10008_v38 }
 0x27b   :  { %v489_v58 = vsel %vm215_vm2, %v488_v57, -inf }
 0x27c   :  { %490 = vmax.xlane.f32.xlu0 %v489_v58 }
 0x27e   :  { %v593_v59 = vpop.f32.mrb[12].mxu1 }
 0x27f   :  { %v599_v60 = vmul.f32 0.35355338, %v593_v59  ;;  %v8529_v61 = vpop.f32.mrb[13].mxu1 }
 0x280   :  { %v596_v62 = vpop.f32.mrb[14].mxu1 }
 0x281   :  { %v8530_v63 = vpop.f32.mrb[15].mxu1  ;;  %v10020_v0 = vadd.f32 %v599_v60, %v10008_v38 }
 0x283   :  { %v601_v2 = vsel %vm215_vm2, %v10020_v0, -inf }
 0x284   :  { %602 = vmax.xlane.f32.xlu0 %v601_v2 }
 0x286   :  { %v721_v5 = vpop.f32.mrb[16].mxu1 }
 0x287   :  { %v727_v7 = vmul.f32 0.35355338, %v721_v5  ;;  %v8541_v8 = vpop.f32.mrb[17].mxu1 }
 0x288   :  { %v724_v9 = vpop.f32.mrb[18].mxu1 }
 0x289   :  { %v8542_v10 = vpop.f32.mrb[19].mxu1  ;;  %v10028_v11 = vadd.f32 %v727_v7, %v10025_v6 }
 0x28b   :  { %v729_v12 = vsel %vm215_vm2, %v10028_v11, -inf }
 0x28c   :  { %730 = vmax.xlane.f32.xlu1 %v729_v12 }
 0x28e   :  { %v833_v15 = vpop.f32.mrb[20].mxu1 }
 0x28f   :  { %v839_v16 = vmul.f32 0.35355338, %v833_v15  ;;  %v8553_v17 = vpop.f32.mrb[21].mxu1 }
 0x290   :  { %v836_v18 = vpop.f32.mrb[22].mxu1 }
 0x291   :  { %v8554_v19 = vpop.f32.mrb[23].mxu1  ;;  %v10033_v20 = vadd.f32 %v839_v16, %v10025_v6 }
 0x293   :  { %v841_v21 = vsel %vm215_vm2, %v10033_v20, -inf }
 0x294   :  { %842 = vmax.xlane.f32.xlu0 %v841_v21 }
 0x296   :  { %v945_v22 = vpop.f32.mrb[24].mxu1 }
 0x297   :  { %v951_v23 = vmul.f32 0.35355338, %v945_v22  ;;  %v8565_v24 = vpop.f32.mrb[25].mxu1 }
 0x298   :  { %v948_v25 = vpop.f32.mrb[26].mxu1 }
 0x299   :  { %v8566_v26 = vpop.f32.mrb[27].mxu1  ;;  %v952_v27 = vadd.f32 %v951_v23, %v10025_v6 }
 0x29b   :  { %v953_v28 = vsel %vm215_vm2, %v952_v27, -inf }
 0x29c   :  { %954 = vmax.xlane.f32.xlu1 %v953_v28 }
 0x29e   :  { %v1057_v29 = vpop.f32.mrb[28].mxu1 }
 0x29f   :  { %v8577_v30 = vpop.f32.mrb[29].mxu1  ;;  %v1063_v33 = vmul.f32 0.35355338, %v1057_v29 }
 0x2a0   :  { %v1060_v31 = vpop.f32.mrb[30].mxu1 }
 0x2a1   :  { %v8578_v32 = vpop.f32.mrb[31].mxu1  ;;  %v10044_v34 = vadd.f32 %v1063_v33, %v10025_v6 }
 0x2a3   :  { %v1065_v35 = vsel %vm215_vm2, %v10044_v34, -inf }
 0x2aa   :  { %389 = vrot.lane.b32.xlu0 %v9932_v13, %s9734_s2 }
 0x2ad   :  { %276 = vrot.lane.b32.xlu1 %v9932_v13, %s9735_s7 }
 0x2c9   :  { %1066 = vmax.xlane.f32.xlu0 %v1065_v35 }
 0x2f9   :  { %v266_v36 = vpop.xlane.xlu0 %265 }
 0x2fa   :  { %v267_v37 = vsub.f32 %v10011_v43, %v266_v36 }
 0x2fc   :  { %v268_v39 = vmul.f32 1.442695, %v267_v37 }
 0x2fe   :  { %9432 = vpow2.f32 %v268_v39 }
 0x301   :  { %v379_v40 = vpop.xlane.xlu1 %378 }
 0x302   :  { %v380_v41 = vsub.f32 %v376_v50, %v379_v40 }
 0x304   :  { %v381_v42 = vmul.f32 1.442695, %v380_v41 }
 0x306   :  { %9434 = vpow2.f32 %v381_v42 }
 0x308   :  { %v10049_v44 = vpop.eup %9432 }
 0x309   :  { %v491_v45 = vpop.xlane.xlu0 %490  ;;  %v270_v46 = vsel %vm215_vm2, %v10049_v44, 0.0 }
 0x30a   :  { %v492_v47 = vsub.f32 %v488_v57, %v491_v45  ;;  %271 = vadd.xlane.f32.xlu1 %v270_v46 }
 0x30c   :  { %v493_v48 = vmul.f32 1.442695, %v492_v47 }
 0x30e   :  { %9436 = vpow2.f32 %v493_v48 }
 0x310   :  { %v10053_v49 = vpop.eup %9434 }
 0x311   :  { %v383_v43 = vsel %vm215_vm2, %v10053_v49, 0.0  ;;  %v603_v55 = vpop.xlane.xlu0 %602 }
 0x312   :  { %384 = vadd.xlane.f32.xlu0 %v383_v43  ;;  %v604_v57 = vsub.f32 %v10020_v0, %v603_v55 }
 0x314   :  { %v605_v58 = vmul.f32 1.442695, %v604_v57 }
 0x316   :  { %9438 = vpow2.f32 %v605_v58 }
 0x318   :  { %v10057_v51 = vpop.eup %9436 }
 0x319   :  { %v495_v50 = vsel %vm215_vm2, %v10057_v51, 0.0  ;;  %v731_v52 = vpop.xlane.xlu1 %730 }
 0x31a   :  { %496 = vadd.xlane.f32.xlu1 %v495_v50  ;;  %v732_v59 = vsub.f32 %v10028_v11, %v731_v52 }
 0x31c   :  { %v733_v62 = vmul.f32 1.442695, %v732_v59 }
 0x31e   :  { %9440 = vpow2.f32 %v733_v62 }
 0x320   :  { %v9439_v5 = vpop.eup %9438 }
 0x321   :  { %v843_v60 = vpop.xlane.xlu0 %842  ;;  %v607_v7 = vsel %vm215_vm2, %v9439_v5, 0.0 }
 0x322   :  { %v844_v61 = vsub.f32 %v10033_v20, %v843_v60 }
 0x325   :  { %v390_v15 = vpop.permute.xlu0 %389 }
 0x326   :  { %v395_v26 = vsel %vm281_vm3, %v390_v15, 0 }
 0x328   :  { %501 = vrot.lane.b32.xlu0 %v9932_v13, %s9736_s10  ;;  %v10071_v8 = vpop.eup %9440 }
 0x329   :  { %v955_v53 = vpop.xlane.xlu1 %954  ;;  %v735_v9 = vsel %vm215_vm2, %v10071_v8, 0.0 }
 0x32a   :  { %v956_v63 = vsub.f32 %v952_v27, %v955_v53 }
 0x32b   :  { %613 = vrot.lane.b32.xlu1 %v9932_v13, %s9737_s11  ;;  %v845_v13 = vmul.f32 1.442695, %v844_v61 }
 0x32c   :  { %v957_v2 = vmul.f32 1.442695, %v956_v63 }
 0x32d   :  { %v277_v54 = vpop.permute.xlu1 %276  ;;  %9442 = vpow2.f32 %v845_v13 }
 0x32e   :  { %v283_v56 = vsel %vm281_vm3, %v277_v54, 0  ;;  %9444 = vpow2.f32 %v957_v2 }
 0x32f   :  { %8496 = vmatpush3.bf16.msra.mxu0 %v283_v56 }
 0x330   :  { %8507 = vmatprep.subr.bf16.mxu0 %v9725_v1 }
 0x337   :  { %v10073_v0 = vpop.eup %9442 }
 0x338   :  { %v10077_v10 = vpop.eup %9444  ;;  %v847_v11 = vsel %vm215_vm2, %v10073_v0, 0.0 }
 0x339   :  { %v959_v12 = vsel %vm215_vm2, %v10077_v10, 0.0 }
 0x347   :  { %608 = vadd.xlane.f32.xlu0 %v607_v7 }
 0x34b   :  { %736 = vadd.xlane.f32.xlu0 %v735_v9 }
 0x34f   :  { %848 = vadd.xlane.f32.xlu1 %v847_v11  ;;  %960 = vadd.xlane.f32.xlu0 %v959_v12 }
 0x356   :  { %v1067_v16 = vpop.xlane.xlu0 %1066 }
 0x357   :  { %v1068_v17 = vsub.f32 %v10044_v34, %v1067_v16 }
 0x359   :  { %v1069_v18 = vmul.f32 1.442695, %v1068_v17 }
 0x35b   :  { %9446 = vpow2.f32 %v1069_v18 }
 0x360   :  { %853 = vrot.lane.b32.xlu1 %v9947_v14, %s9734_s2 }
 0x364   :  { %965 = vrot.lane.b32.xlu1 %v9947_v14, %s9736_s10 }
 0x365   :  { %v10088_v19 = vpop.eup %9446 }
 0x366   :  { %v1071_v20 = vsel %vm215_vm2, %v10088_v19, 0.0 }
 0x367   :  { %1072 = vadd.xlane.f32.xlu0 %v1071_v20 }
 0x368   :  { %1077 = vrot.lane.b32.xlu1 %v9947_v14, %s9737_s11 }
 0x37d   :  { %741 = vrot.lane.b32.xlu0 %v9947_v14, %s9735_s7 }
 0x397   :  { %v272_v21 = vpop.xlane.xlu1 %271 }
 0x398   :  { %9448 = vrcp.f32 %v272_v21 }
 0x39f   :  { %v385_v22 = vpop.xlane.xlu0 %384 }
 0x3a0   :  { %9450 = vrcp.f32 %v385_v22 }
 0x3a2   :  { %v9449_v23 = vpop.eup %9448 }
 0x3a3   :  { %v274_v24 = vmul.f32 %v9449_v23, %v10049_v44  ;;  %v502_v29 = vpop.permute.xlu0 %501 }
 0x3a4   :  { %v507_v31 = vsel %vm281_vm3, %v502_v29, 0 }
 0x3a5   :  { %v275_v25 = vpack.c.bf16 %v274_v24, %v274_v24 }
 0x3a7   :  { %8498 = vmatmul.mubr.msk.bf16.vlgmr.msra.gmra.mrb[4].mxu0 %vm215_vm2, %v275_v25  ;;  %v497_v27 = vpop.xlane.xlu1 %496 }
 0x3a8   :  { %8508 = vmatpush3.bf16.msra.mxu0 %v395_v26  ;;  %9452 = vrcp.f32 %v497_v27  ;;  %8509 = vmatprep.mubr.msk.bf16.mxu0 %vm9726_vm0, %v9725_v1 }
 0x3a9   :  { %8519 = vmatprep.subr.bf16.mxu0 %v9725_v1 }
 0x3aa   :  { %v9451_v14 = vpop.eup %9450 }
 0x3ab   :  { %v387_v28 = vmul.f32 %v9451_v14, %v10053_v49  ;;  %v614_v34 = vpop.permute.xlu1 %613  ;;  %v9380_v14 = vld [vmem:[%s9788_s3] sm:$0xff]  }
 0x3ac   :  { %v619_v36 = vsel %vm281_vm3, %v614_v34, 0  ;;  %8586 = vmatpush3.bf16.msra.mxu1 %v9380_v14 }
 0x3ad   :  { %v388_v30 = vpack.c.bf16 %v387_v28, %v387_v28  ;;  %8587 = vmatprep.subr.bf16.mxu1 %v9725_v1 }
 0x3af   :  { %8510 = vmatmul.mubr.msk.bf16.vlgmr.msra.gmra.mrb[8].mxu0 %vm215_vm2, %v388_v30 }
 0x3b0   :  { %8520 = vmatpush3.bf16.msra.mxu0 %v507_v31  ;;  %8521 = vmatprep.mubr.msk.bf16.mxu0 %vm9726_vm0, %v9725_v1 }
 0x3b1   :  { %8531 = vmatprep.subr.bf16.mxu0 %v9725_v1 }
 0x3b2   :  { %v9453_v32 = vpop.eup %9452 }
 0x3b3   :  { %v499_v33 = vmul.f32 %v9453_v32, %v10057_v51  ;;  %v9381_v32 = vld [vmem:[%s9788_s3 + $0x8] sm:$0xff]  }
 0x3b4   :  { %8588 = vmatpush3.bf16.msra.mxu1 %v9381_v32  ;;  %v10178_v32 = vld [vmem:[%s9818_s6] sm:$0xf] }
 0x3b5   :  { %v500_v35 = vpack.c.bf16 %v499_v33, %v499_v33  ;;  %8601 = vmatprep.subr.bf16.mxu1 %v9725_v1 }
 0x3b7   :  { %8522 = vmatmul.mubr.msk.bf16.vlgmr.msra.gmra.mrb[12].mxu0 %vm215_vm2, %v500_v35 }
 0x3b8   :  { %8532 = vmatpush3.bf16.msra.mxu0 %v619_v36  ;;  %8533 = vmatprep.mubr.msk.bf16.mxu0 %vm9726_vm0, %v9725_v1 }
 0x3b9   :  { %8543 = vmatprep.subr.bf16.mxu0 %v9725_v1 }
 0x3d4   :  { %v609_v37 = vpop.xlane.xlu0 %608 }
 0x3d5   :  { %9454 = vrcp.f32 %v609_v37 }
 0x3d8   :  { %v737_v42 = vpop.xlane.xlu0 %736 }
 0x3d9   :  { %9456 = vrcp.f32 %v737_v42 }
 0x3dc   :  { %v849_v44 = vpop.xlane.xlu1 %848  ;;  %v961_v45 = vpop.xlane.xlu0 %960 }
 0x3dd   :  { %9458 = vrcp.f32 %v849_v44 }
 0x3de   :  { %9460 = vrcp.f32 %v961_v45 }
 0x3df   :  { %v9455_v39 = vpop.eup %9454 }
 0x3e0   :  { %v611_v40 = vmul.f32 %v9455_v39, %v9439_v5  ;;  %v854_v51 = vpop.permute.xlu1 %853 }
 0x3e1   :  { %v859_v53 = vsel %vm281_vm3, %v854_v51, 0 }
 0x3e2   :  { %v612_v41 = vpack.c.bf16 %v611_v40, %v611_v40 }
 0x3e3   :  { %v9457_v46 = vpop.eup %9456 }
 0x3e4   :  { %8534 = vmatmul.mubr.msk.bf16.vlgmr.msra.gmra.mrb[16].mxu0 %vm215_vm2, %v612_v41  ;;  %v739_v48 = vmul.f32 %v9457_v46, %v10071_v8  ;;  %v966_v55 = vpop.permute.xlu1 %965 }
 0x3e5   :  { %8545 = vmatprep.mubr.msk.bf16.mxu0 %vm9726_vm0, %v9725_v1  ;;  %v971_v58 = vsel %vm281_vm3, %v966_v55, 0 }
 0x3e6   :  { %v740_v50 = vpack.c.bf16 %v739_v48, %v739_v48 }
 0x3e7   :  { %v9459_v52 = vpop.eup %9458 }
 0x3e8   :  { %v851_v54 = vmul.f32 %v9459_v52, %v10073_v0  ;;  %v9461_v57 = vpop.eup %9460  ;;  %v1078_v60 = vpop.permute.xlu1 %1077 }
 0x3e9   :  { %v963_v59 = vmul.f32 %v9461_v57, %v10077_v10  ;;  %v1083_v63 = vsel %vm281_vm3, %v1078_v60, 0  ;;  %v7971_v60 = vld [vmem:[%s9793_s8] ss:$0 sm:$0xff] }
 0x3ea   :  { %v852_v56 = vpack.c.bf16 %v851_v54, %v851_v54 }
 0x3eb   :  { %v964_v61 = vpack.c.bf16 %v963_v59, %v963_v59 }
 0x3f4   :  { %v1073_v47 = vpop.xlane.xlu0 %1072 }
 0x3f5   :  { %9462 = vrcp.f32 %v1073_v47 }
 0x3f8   :  { %v742_v49 = vpop.permute.xlu0 %741 }
 0x3f9   :  { %v747_v43 = vsel %vm281_vm3, %v742_v49, 0 }
 0x3fa   :  { %8544 = vmatpush3.bf16.msra.mxu0 %v747_v43 }
 0x3fb   :  { %8555 = vmatprep.subr.bf16.mxu0 %v9725_v1 }
 0x3fd   :  { %8546 = vmatmul.mubr.msk.bf16.vlgmr.msra.gmra.mrb[20].mxu0 %vm215_vm2, %v740_v50 }
 0x3fe   :  { %8556 = vmatpush3.bf16.msra.mxu0 %v859_v53  ;;  %8557 = vmatprep.mubr.msk.bf16.mxu0 %vm9726_vm0, %v9725_v1 }
 0x3ff   :  { %8567 = vmatprep.subr.bf16.mxu0 %v9725_v1  ;;  %v9463_v62 = vpop.eup %9462 }
 0x400   :  { %v1075_v13 = vmul.f32 %v9463_v62, %v10088_v19 }
 0x402   :  { %v1076_v2 = vpack.c.bf16 %v1075_v13, %v1075_v13 }
 0x405   :  { %8558 = vmatmul.mubr.msk.bf16.vlgmr.msra.gmra.mrb[24].mxu0 %vm215_vm2, %v852_v56 }
 0x406   :  { %8568 = vmatpush3.bf16.msra.mxu0 %v971_v58  ;;  %8569 = vmatprep.mubr.msk.bf16.mxu0 %vm9726_vm0, %v9725_v1 }
 0x407   :  { %8579 = vmatprep.subr.bf16.mxu0 %v9725_v1 }
 0x40d   :  { %8570 = vmatmul.mubr.msk.bf16.vlgmr.msra.gmra.mrb[28].mxu0 %vm215_vm2, %v964_v61 }
 0x40e   :  { %8580 = vmatpush3.bf16.msra.mxu0 %v1083_v63  ;;  %8581 = vmatprep.mubr.msk.bf16.mxu0 %vm9726_vm0, %v9725_v1 }
 0x40f   :  { %8593 = vmatprep.subr.bf16.mxu0 %v9725_v1 }
 0x415   :  { %8582 = vmatmul.mubr.msk.bf16.vlgmr.msra.gmra.mrb[32].mxu0 %vm215_vm2, %v1076_v2 }
 0x416   :  { %8597 = vmatprep.mubr.msk.bf16.mxu0 %vm9726_vm0, %v9725_v1 }
 0x47a   :  { %v319_v5 = vpop.f32.mrb[4].mxu0 }
 0x47b   :  { %v8499_v7 = vpop.f32.mrb[5].mxu0 }
 0x47c   :  { %v322_v8 = vpop.f32.mrb[6].mxu0 }
 0x47d   :  { %v8500_v0 = vpop.f32.mrb[7].mxu0 }
 0x482   :  { %v431_v9 = vpop.f32.mrb[8].mxu0 }
 0x483   :  { %v8511_v10 = vpop.f32.mrb[9].mxu0 }
 0x484   :  { %v434_v11 = vpop.f32.mrb[10].mxu0 }
 0x485   :  { %v8512_v12 = vpop.f32.mrb[11].mxu0 }
 0x48a   :  { %v543_v15 = vpop.f32.mrb[12].mxu0 }
 0x48b   :  { %v8523_v16 = vpop.f32.mrb[13].mxu0 }
 0x48c   :  { %v546_v17 = vpop.f32.mrb[14].mxu0 }
 0x48d   :  { %v8524_v18 = vpop.f32.mrb[15].mxu0 }
 0x4b7   :  { %v655_v19 = vpop.f32.mrb[16].mxu0 }
 0x4b8   :  { %v8535_v20 = vpop.f32.mrb[17].mxu0 }
 0x4b9   :  { %v658_v21 = vpop.f32.mrb[18].mxu0  ;;  %v9382_v20 = vld [vmem:[%s9798_s14] sm:$0xff]  }
 0x4ba   :  { %v8536_v22 = vpop.f32.mrb[19].mxu0  ;;  %8594 = vmatpush3.bf16.msra.mxu0 %v9382_v20  ;;  %v9383_v21 = vld [vmem:[%s9798_s14 + $0x8] sm:$0xff]  }
 0x4bb   :  { %8595 = vmatprep.subr.bf16.mxu0 %v9725_v1  ;;  %v9384_v22 = vld [vmem:[%s9808_s24] sm:$0xff]  }
 0x4be   :  { %8596 = vmatpush3.bf16.msra.mxu0 %v9383_v21 }
 0x4bf   :  { %8613 = vmatprep.subr.bf16.mxu0 %v9725_v1 }
 0x4d0   :  { %v783_v23 = vpop.f32.mrb[20].mxu0 }
 0x4d1   :  { %v8547_v24 = vpop.f32.mrb[21].mxu0 }
 0x4d2   :  { %v786_v25 = vpop.f32.mrb[22].mxu0 }
 0x4d3   :  { %v8548_v26 = vpop.f32.mrb[23].mxu0 }
 0x4d4   :  { %v1232_v26 = vlaneseq }
 0x4d8   :  { %v895_v27 = vpop.f32.mrb[24].mxu0 }
 0x4d9   :  { %v9308_v28 = vpack.i.bf16 %v895_v27, %v431_v9  ;;  %v8559_v29 = vpop.f32.mrb[25].mxu0 }
 0x4da   :  { %v898_v30 = vpop.f32.mrb[26].mxu0 }
 0x4db   :  { %9309 = vrot.lane.b32.xlu1 %v9308_v28, %s11532_s15  ;;  %v8560_v31 = vpop.f32.mrb[27].mxu0  ;;  %v10172_v30 = vshrl.u32 %v1232_v26, 7 }
 0x4dd   :  { %v10175_v31 = vsub.s32 0, %v10172_v30  ;;  %v10208_v26 = vsub.s32 2, %v10172_v30 }
 0x4e0   :  { %v1007_v33 = vpop.f32.mrb[28].mxu0 }
 0x4e1   :  { %v9313_v34 = vpack.i.bf16 %v1007_v33, %v543_v15  ;;  %v8571_v35 = vpop.f32.mrb[29].mxu0  ;;  %v1235_v33 = vrot.slane %v10178_v32, %v10175_v31 }
 0x4e2   :  { %v1010_v36 = vpop.f32.mrb[30].mxu0 }
 0x4e3   :  { %9314 = vrot.lane.b32.xlu1 %v9313_v34, %s11530_s16  ;;  %v8572_v37 = vpop.f32.mrb[31].mxu0  ;;  %v10183_v34 = vsub.s32 1, %v10172_v30 }
 0x4e8   :  { %v1119_v39 = vpop.f32.mrb[32].mxu0 }
 0x4e9   :  { %v9318_v40 = vpack.i.bf16 %v1119_v39, %v655_v19  ;;  %v8583_v41 = vpop.f32.mrb[33].mxu0 }
 0x4ea   :  { %v1122_v42 = vpop.f32.mrb[34].mxu0  ;;  %v1241_v41 = vrot.slane %v10178_v32, %v10183_v34 }
 0x4eb   :  { %9319 = vrot.lane.b32.xlu0 %v9318_v40, %s11528_s18  ;;  %v8584_v44 = vpop.f32.mrb[35].mxu0 }
 0x54d   :  { %v9310_v45 = vpop.permute.xlu1 %9309 }
 0x54e   :  { %v9312_v47 = vunpack.i.h.bf16 %v9310_v45  ;;  %v9311_v48 = vunpack.i.l.bf16 %v9310_v45 }
 0x550   :  { %v1137_v50 = vsel %vm215_vm2, %v783_v23, %v9312_v47  ;;  %v673_v52 = vsel %vm215_vm2, %v319_v5, %v9311_v48  ;;  %v9385_v23 = vld [vmem:[%s9808_s24 + $0x8] sm:$0xff]   ;;  %v9386_v47 = vld [vmem:[%s9808_s24 + $0x10] sm:$0xff]   ;;  %v9387_v48 = vld [vmem:[%s9808_s24 + $0x18] sm:$0xff]  }
 0x555   :  { %v9315_v46 = vpop.permute.xlu1 %9314 }
 0x556   :  { %v9317_v49 = vunpack.i.h.bf16 %v9315_v46  ;;  %v9316_v43 = vunpack.i.l.bf16 %v9315_v46 }
 0x558   :  { %v1138_v55 = vsel %vm674_vm4, %v1137_v50, %v9317_v49  ;;  %v675_v56 = vsel %vm674_vm4, %v673_v52, %v9316_v43  ;;  %v7975_v49 = vld [vmem:[%s9803_s19] ss:$0 sm:$0xff] }
 0x55d   :  { %v9320_v51 = vpop.permute.xlu0 %9319 }
 0x55e   :  { %v9322_v53 = vunpack.i.h.bf16 %v9320_v51  ;;  %v9321_v54 = vunpack.i.l.bf16 %v9320_v51 }
 0x560   :  { %v1139_v57 = vsel %vm676_vm5, %v1138_v55, %v9322_v53  ;;  %v677_v58 = vsel %vm676_vm5, %v675_v56, %v9321_v54 }
 0x561   :  { %v1140_v59 = vpack.c.bf16 %v1139_v57, %v677_v58  ;;  %v7979_v58 = vld [vmem:[%s9813_s30] ss:$0 sm:$0xff] }
 0x563   :  { %8590 = vmatmul.mubr.msk.bf16.vlgmr.msra.gmra.mrb[32].mxu1 %vm166_vm1, %v1140_v59 }
 0x564   :  { %8609 = vmatprep.mubr.msk.bf16.mxu1 %vm9726_vm0, %v9725_v1  ;;  %8602 = vmatpush3.bf16.msra.mxu1 %v9384_v22 }
 0x565   :  { %8603 = vmatprep.subr.bf16.mxu1 %v9725_v1 }
 0x568   :  { %8604 = vmatpush3.bf16.msra.mxu1 %v9385_v23 }
 0x569   :  { %8605 = vmatprep.subr.bf16.mxu1 %v9725_v1 }
 0x56c   :  { %8606 = vmatpush3.bf16.msra.mxu1 %v9386_v47 }
 0x56d   :  { %8607 = vmatprep.subr.bf16.mxu1 %v9725_v1 }
 0x570   :  { %8608 = vmatpush3.bf16.msra.mxu1 %v9387_v48 }
 0x571   :  { %8627 = vmatprep.subr.bf16.mxu1 %v9725_v1 }
 0x636   :  { %v1196_v61 = vpop.f32.mrb[32].mxu1 }
 0x637   :  { %v1197_v62 = vadd.f32 %v7971_v60, %v1196_v61  ;;  %v8591_v63 = vpop.f32.mrb[33].mxu1 }
 0x638   :  { %v1199_v13 = vpop.f32.mrb[34].mxu1 }
 0x639   :  { %v1200_v2 = vadd.f32 %v7971_v60, %v1199_v13  ;;  %v8592_v5 = vpop.f32.mrb[35].mxu1  ;;  %v1203_v7 = vadd.f32 %v1197_v62, %v9917_v3 }
 0x63b   :  { %v1205_v8 = vsel %vm166_vm1, %v1203_v7, 0.0  ;;  %v1204_v0 = vadd.f32 %v1200_v2, %v9920_v4 }
 0x63c   :  { %1206 = vadd.xlane.f32.xlu1 %v1205_v8 }
 0x63d   :  { %v1208_v9 = vsel %vm166_vm1, %v1204_v0, 0.0 }
 0x63e   :  { %1209 = vadd.xlane.f32.xlu0 %v1208_v9 }
 0x6c9   :  { %v1207_v10 = vpop.xlane.xlu1 %1206 }
 0x6ca   :  { %v1212_v11 = vmul.f32 0.03125, %v1207_v10 }
 0x6cb   :  { %v1210_v12 = vpop.xlane.xlu0 %1209 }
 0x6cc   :  { %v1214_v15 = vsub.f32 %v1203_v7, %v1212_v11  ;;  %v1213_v16 = vmul.f32 0.03125, %v1210_v12 }
 0x6ce   :  { %v1215_v17 = vsub.f32 %v1204_v0, %v1213_v16  ;;  %v1216_v18 = vmul.f32 %v1214_v15, %v1214_v15 }
 0x6d0   :  { %v1218_v3 = vsel %vm166_vm1, %v1216_v18, 0.0  ;;  %v1217_v19 = vmul.f32 %v1215_v17, %v1215_v17 }
 0x6d1   :  { %1219 = vadd.xlane.f32.xlu0 %v1218_v3 }
 0x6d2   :  { %v1221_v4 = vsel %vm166_vm1, %v1217_v19, 0.0  ;;  %v9388_v19 = vld [vmem:[%s9778_s25 + $0x10] sm:$0xff]  }
 0x6d3   :  { %1222 = vadd.xlane.f32.xlu1 %v1221_v4  ;;  %v9389_v4 = vld [vmem:[%s9778_s25 + $0x18] sm:$0xff]   ;;  %s11550_s25 = sld [smem:[#allocation8_spill]] }
 0x75e   :  { %v1220_v24 = vpop.xlane.xlu0 %1219 }
 0x75f   :  { %v1224_v25 = vmul.f32 0.03125, %v1220_v24 }
 0x760   :  { %v1223_v27 = vpop.xlane.xlu1 %1222 }
 0x761   :  { %v1226_v14 = vadd.f32 1e-05, %v1224_v25  ;;  %v1225_v28 = vmul.f32 0.03125, %v1223_v27  ;;  %v1430_v27 = vrot.slane %v10178_v32, %v10208_v26 }
 0x763   :  { %9464 = vrsqrt.f32 %v1226_v14  ;;  %v1227_v29 = vadd.f32 1e-05, %v1225_v28  ;;  %v10213_v14 = vsub.s32 3, %v10172_v30 }
 0x765   :  { %9466 = vrsqrt.f32 %v1227_v29 }
 0x76d   :  { %v9465_v35 = vpop.eup %9464 }
 0x76e   :  { %v1230_v36 = vmul.f32 %v9465_v35, %v1214_v15 }
 0x76f   :  { %v9467_v37 = vpop.eup %9466 }
 0x770   :  { %v1236_v39 = vmul.f32 %v1235_v33, %v1230_v36  ;;  %v1231_v40 = vmul.f32 %v9467_v37, %v1215_v17  ;;  %v1436_v37 = vrot.slane %v10178_v32, %v10213_v14 }
 0x772   :  { %v1237_v42 = vmul.f32 %v1235_v33, %v1231_v40  ;;  %v1242_v44 = vadd.f32 %v1241_v41, %v1236_v39 }
 0x774   :  { %v1243_v45 = vadd.f32 %v1241_v41, %v1237_v42 }
 0x776   :  { %v1258_v46 = vpack.c.bf16 %v1243_v45, %v1242_v44 }
 0x778   :  { %8598 = vmatmul.mubr.msk.bf16.vlgmr.msra.gmra.mrb[36].mxu0 %vm166_vm1, %v1258_v46 }
 0x779   :  { %8617 = vmatprep.mubr.msk.bf16.mxu0 %vm9726_vm0, %v9725_v1  ;;  %8614 = vmatpush3.bf16.msra.mxu0 %v9388_v19 }
 0x77a   :  { %8615 = vmatprep.subr.bf16.mxu0 %v9725_v1 }
 0x77d   :  { %8616 = vmatpush3.bf16.msra.mxu0 %v9389_v4 }
 0x77e   :  { %8621 = vmatprep.subr.bf16.mxu0 %v9725_v1 }
 0x84b   :  { %v1314_v43 = vpop.f32.mrb[36].mxu0 }
 0x84c   :  { %v1315_v51 = vadd.f32 %v7975_v49, %v1314_v43  ;;  %v8599_v50 = vpop.f32.mrb[37].mxu0 }
 0x84d   :  { %v1317_v52 = vpop.f32.mrb[38].mxu0 }
 0x84e   :  { %v1318_v53 = vadd.f32 %v7975_v49, %v1317_v52  ;;  %v8600_v54 = vpop.f32.mrb[39].mxu0  ;;  %v1321_v55 = vmax.f32 %v1315_v51, 0.0 }
 0x850   :  { %v1322_v56 = vmax.f32 %v1318_v53, 0.0 }
 0x852   :  { %v1323_v57 = vpack.c.bf16 %v1322_v56, %v1321_v55 }
 0x854   :  { %8610 = vmatmul.mubr.msk.bf16.vlgmr.msra.gmra.mrb[36].mxu1 %vm1354_vm6, %v1323_v57 }
 0x855   :  { %8629 = vmatprep.mubr.msk.bf16.mxu1 %vm9726_vm0, %v9725_v1 }
 0x927   :  { %v1392_v59 = vpop.f32.mrb[36].mxu1 }
 0x928   :  { %v1393_v60 = vadd.f32 %v7979_v58, %v1392_v59  ;;  %v8611_v61 = vpop.f32.mrb[37].mxu1 }
 0x929   :  { %v1395_v62 = vpop.f32.mrb[38].mxu1 }
 0x92a   :  { %v1396_v63 = vadd.f32 %v7979_v58, %v1395_v62  ;;  %v8612_v13 = vpop.f32.mrb[39].mxu1  ;;  %v1399_v2 = vadd.f32 %v1393_v60, %v1242_v44  ;;  %v7996_v44 = vld [vmem:[%s9783_s29 + $0x1] ss:$0 sm:$0xff]  ;;  %s11551_s29 = sld [smem:[#allocation11_spill]] }
 0x92c   :  { %v1401_v5 = vsel %vm166_vm1, %v1399_v2, 0.0  ;;  %v1400_v7 = vadd.f32 %v1396_v63, %v1243_v45 }
 0x92d   :  { %1402 = vadd.xlane.f32.xlu0 %v1401_v5 }
 0x92e   :  { %v1404_v8 = vsel %vm166_vm1, %v1400_v7, 0.0 }
 0x92f   :  { %1405 = vadd.xlane.f32.xlu1 %v1404_v8 }
 0x9ba   :  { %v1403_v0 = vpop.xlane.xlu0 %1402 }
 0x9bb   :  { %v1407_v9 = vmul.f32 0.03125, %v1403_v0 }
 0x9bc   :  { %v1406_v10 = vpop.xlane.xlu1 %1405 }
 0x9bd   :  { %v1409_v11 = vsub.f32 %v1399_v2, %v1407_v9  ;;  %v1408_v12 = vmul.f32 0.03125, %v1406_v10 }
 0x9bf   :  { %v1410_v15 = vsub.f32 %v1400_v7, %v1408_v12  ;;  %v1411_v16 = vmul.f32 %v1409_v11, %v1409_v11 }
 0x9c1   :  { %v1413_v17 = vsel %vm166_vm1, %v1411_v16, 0.0  ;;  %v1412_v18 = vmul.f32 %v1410_v15, %v1410_v15 }
 0x9c2   :  { %1414 = vadd.xlane.f32.xlu0 %v1413_v17 }
 0x9c3   :  { %v1416_v3 = vsel %vm166_vm1, %v1412_v18, 0.0 }
 0x9c4   :  { %1417 = vadd.xlane.f32.xlu1 %v1416_v3 }
 0xa4f   :  { %v1415_v20 = vpop.xlane.xlu0 %1414 }
 0xa50   :  { %v1419_v21 = vmul.f32 0.03125, %v1415_v20 }
 0xa51   :  { %v1418_v22 = vpop.xlane.xlu1 %1417 }
 0xa52   :  { %v1421_v23 = vadd.f32 1e-05, %v1419_v21  ;;  %v1420_v24 = vmul.f32 0.03125, %v1418_v22 }
 0xa54   :  { %9468 = vrsqrt.f32 %v1421_v23  ;;  %v1422_v25 = vadd.f32 1e-05, %v1420_v24  ;;  %v9664_v24 = vld [vmem:[%s9763_s13] sm:$0xff] }
 0xa56   :  { %9470 = vrsqrt.f32 %v1422_v25 }
 0xa5e   :  { %v9469_v28 = vpop.eup %9468 }
 0xa5f   :  { %v1425_v29 = vmul.f32 %v9469_v28, %v1409_v11 }
 0xa60   :  { %v9471_v33 = vpop.eup %9470 }
 0xa61   :  { %v1431_v35 = vmul.f32 %v1430_v27, %v1425_v29  ;;  %v1426_v36 = vmul.f32 %v9471_v33, %v1410_v15 }
 0xa63   :  { %v1432_v39 = vmul.f32 %v1430_v27, %v1426_v36  ;;  %v10217_v40 = vadd.f32 %v1436_v37, %v1431_v35 }
 0xa65   :  { %v10219_v41 = vadd.f32 %v1436_v37, %v1432_v39 }
 0xa67   :  { %v1455_v42 = vpack.c.bf16 %v10219_v41, %v10217_v40 }
 0xa69   :  { %8618 = vmatmul.mubr.msk.bf16.vlgmr.msra.gmra.mrb[40].mxu0 %vm166_vm1, %v1455_v42 }
 0xa6a   :  { %8623 = vmatprep.mubr.msk.bf16.mxu0 %vm9726_vm0, %v9725_v1 }
 0xb3c   :  { %v1511_v45 = vpop.f32.mrb[40].mxu0 }
 0xb3d   :  { %v8619_v46 = vpop.f32.mrb[41].mxu0  ;;  %v1512_v48 = vadd.f32 %v7996_v44, %v1511_v45 }
 0xb3e   :  { %v1514_v47 = vpop.f32.mrb[42].mxu0 }
 0xb3f   :  { %v1515_v49 = vadd.f32 %v7996_v44, %v1514_v47  ;;  %v8620_v32 = vpop.f32.mrb[43].mxu0 }
 0xb41   :  { %v10227_v43 = vpack.c.bf16 %v1515_v49, %v1512_v48 }
 0xb43   :  { %1632 = vrot.lane.b32.xlu1 %v10227_v43, %s9730_s23  ;;  %1520 = vrot.lane.b32.xlu0 %v10227_v43, %s9728_s5  ;;  %v10242_v51 = vrot.slane %v10227_v43, 4 }
 0xb47   :  { %1630 = vrot.lane.b32.xlu1 %v10227_v43, %s9727_s0  ;;  %1744 = vrot.lane.b32.xlu0 %v10227_v43, %s9729_s22 }
 0xb4b   :  { %1742 = vrot.lane.b32.xlu1 %v10227_v43, %s9732_s28  ;;  %1856 = vrot.lane.b32.xlu0 %v10227_v43, %s9731_s26 }
 0xb4f   :  { %1854 = vrot.lane.b32.xlu1 %v10227_v43, %s9733_s1  ;;  %1982 = vrot.lane.b32.xlu0 %v10242_v51, %s9728_s5 }
 0xb53   :  { %2094 = vrot.lane.b32.xlu1 %v10242_v51, %s9730_s23  ;;  %2092 = vrot.lane.b32.xlu0 %v10242_v51, %s9727_s0 }
 0xb57   :  { %2206 = vrot.lane.b32.xlu1 %v10242_v51, %s9729_s22  ;;  %2204 = vrot.lane.b32.xlu0 %v10242_v51, %s9732_s28 }
 0xb5b   :  { %2318 = vrot.lane.b32.xlu1 %v10242_v51, %s9731_s26  ;;  %2316 = vrot.lane.b32.xlu0 %v10242_v51, %s9733_s1 }
 0xbb5   :  { %v1521_v50 = vpop.permute.xlu0 %1520  ;;  %v1633_v53 = vpop.permute.xlu1 %1632 }
 0xbb6   :  { %v1526_v52 = vsel %vm215_vm2, %v1521_v50, 0  ;;  %v1638_v54 = vsel %vm215_vm2, %v1633_v53, 0 }
 0xbb7   :  { %8622 = vmatpush3.bf16.xpose.msra.mxu0 %v1526_v52 }
 0xbb8   :  { %8633 = vmatprep.subr.bf16.mxu0 %v9725_v1 }
 0xbb9   :  { %v1745_v55 = vpop.permute.xlu0 %1744  ;;  %v1631_v56 = vpop.permute.xlu1 %1630 }
 0xbba   :  { %v1750_v57 = vsel %vm215_vm2, %v1745_v55, 0 }
 0xbbd   :  { %v1857_v58 = vpop.permute.xlu0 %1856  ;;  %v1743_v59 = vpop.permute.xlu1 %1742 }
 0xbbe   :  { %8624 = vmatmul.mubr.msk.bf16.vlgmr.msra.gmra.mrb[44].mxu0 %vm215_vm2, %v10227_v43  ;;  %v1862_v60 = vsel %vm215_vm2, %v1857_v58, 0 }
 0xbbf   :  { %8634 = vmatpush3.bf16.xpose.msra.mxu0 %v1638_v54  ;;  %8635 = vmatprep.mubr.msk.bf16.mxu0 %vm9726_vm0, %v9725_v1 }
 0xbc0   :  { %8645 = vmatprep.subr.bf16.mxu0 %v9725_v1 }
 0xbc1   :  { %v1983_v61 = vpop.permute.xlu0 %1982  ;;  %v1855_v62 = vpop.permute.xlu1 %1854 }
 0xbc2   :  { %v1988_v63 = vsel %vm215_vm2, %v1983_v61, 0  ;;  %v9665_v61 = vld [vmem:[%s9763_s13 + $0x8] sm:$0xff]  ;;  %s11549_s13 = sld [smem:[#allocation7_spill]] }
 0xbc5   :  { %v2095_v13 = vpop.permute.xlu1 %2094  ;;  %v2093_v7 = vpop.permute.xlu0 %2092 }
 0xbc6   :  { %8636 = vmatmul.mubr.msk.bf16.vlgmr.msra.gmra.mrb[48].mxu0 %vm215_vm2, %v1631_v56  ;;  %v2100_v2 = vsel %vm215_vm2, %v2095_v13, 0 }
 0xbc7   :  { %8646 = vmatpush3.bf16.xpose.msra.mxu0 %v1750_v57  ;;  %8647 = vmatprep.mubr.msk.bf16.mxu0 %vm9726_vm0, %v9725_v1 }
 0xbc8   :  { %8657 = vmatprep.subr.bf16.mxu0 %v9725_v1 }
 0xbc9   :  { %v2207_v5 = vpop.permute.xlu1 %2206  ;;  %v2205_v9 = vpop.permute.xlu0 %2204 }
 0xbca   :  { %v2212_v8 = vsel %vm215_vm2, %v2207_v5, 0 }
 0xbcd   :  { %v2319_v0 = vpop.permute.xlu1 %2318  ;;  %v2317_v11 = vpop.permute.xlu0 %2316 }
 0xbce   :  { %8648 = vmatmul.mubr.msk.bf16.vlgmr.msra.gmra.mrb[52].mxu0 %vm215_vm2, %v1743_v59  ;;  %v2324_v10 = vsel %vm215_vm2, %v2319_v0, 0 }
 0xbcf   :  { %8658 = vmatpush3.bf16.xpose.msra.mxu0 %v1862_v60  ;;  %8659 = vmatprep.mubr.msk.bf16.mxu0 %vm9726_vm0, %v9725_v1 }
 0xbd0   :  { %8669 = vmatprep.subr.bf16.mxu0 %v9725_v1 }
 0xbd6   :  { %8660 = vmatmul.mubr.msk.bf16.vlgmr.msra.gmra.mrb[56].mxu0 %vm215_vm2, %v1855_v62 }
 0xbd7   :  { %8670 = vmatpush3.bf16.xpose.msra.mxu0 %v1988_v63  ;;  %8671 = vmatprep.mubr.msk.bf16.mxu0 %vm9726_vm0, %v9725_v1 }
 0xbd8   :  { %8681 = vmatprep.subr.bf16.mxu0 %v9725_v1 }
 0xbde   :  { %8672 = vmatmul.mubr.msk.bf16.vlgmr.msra.gmra.mrb[60].mxu0 %vm215_vm2, %v10242_v51 }
 0xbdf   :  { %8682 = vmatpush3.bf16.xpose.msra.mxu0 %v2100_v2  ;;  %8683 = vmatprep.mubr.msk.bf16.mxu0 %vm9726_vm0, %v9725_v1 }
 0xbe0   :  { %8693 = vmatprep.subr.bf16.mxu0 %v9725_v1 }
 0xbe6   :  { %8684 = vmatmul.mubr.msk.bf16.vlgmr.msra.gmra.mrb[64].mxu0 %vm215_vm2, %v2093_v7 }
 0xbe7   :  { %8694 = vmatpush3.bf16.xpose.msra.mxu0 %v2212_v8  ;;  %8695 = vmatprep.mubr.msk.bf16.mxu0 %vm9726_vm0, %v9725_v1 }
 0xbe8   :  { %8705 = vmatprep.subr.bf16.mxu0 %v9725_v1 }
 0xbee   :  { %8696 = vmatmul.mubr.msk.bf16.vlgmr.msra.gmra.mrb[68].mxu0 %vm215_vm2, %v2205_v9 }
 0xbef   :  { %8706 = vmatpush3.bf16.xpose.msra.mxu0 %v2324_v10  ;;  %8707 = vmatprep.mubr.msk.bf16.mxu0 %vm9726_vm0, %v9725_v1 }
 0xbf0   :  { %8717 = vmatprep.subr.bf16.mxu0 %v9725_v1 }
 0xbf6   :  { %8708 = vmatmul.mubr.msk.bf16.vlgmr.msra.gmra.mrb[72].mxu0 %vm215_vm2, %v2317_v11 }
 0xbf7   :  { %8721 = vmatprep.mubr.msk.bf16.mxu0 %vm9726_vm0, %v9725_v1 }
 0xc91   :  { %v1562_v12 = vpop.f32.mrb[44].mxu0 }
 0xc92   :  { %v1568_v15 = vmul.f32 0.35355338, %v1562_v12  ;;  %v8625_v16 = vpop.f32.mrb[45].mxu0 }
 0xc93   :  { %v1565_v17 = vpop.f32.mrb[46].mxu0 }
 0xc94   :  { %v8626_v18 = vpop.f32.mrb[47].mxu0  ;;  %v10303_v3 = vadd.f32 %v1568_v15, %v10008_v38 }
 0xc96   :  { %v1570_v19 = vsel %vm215_vm2, %v10303_v3, -inf }
 0xc97   :  { %1571 = vmax.xlane.f32.xlu1 %v1570_v19 }
 0xc99   :  { %v1674_v4 = vpop.f32.mrb[48].mxu0 }
 0xc9a   :  { %v1680_v20 = vmul.f32 0.35355338, %v1674_v4  ;;  %v8637_v21 = vpop.f32.mrb[49].mxu0 }
 0xc9b   :  { %v1677_v22 = vpop.f32.mrb[50].mxu0 }
 0xc9c   :  { %v8638_v23 = vpop.f32.mrb[51].mxu0  ;;  %v1681_v25 = vadd.f32 %v9664_v24, %v1680_v20 }
 0xc9e   :  { %v1682_v27 = vsel %vm215_vm2, %v1681_v25, -inf }
 0xc9f   :  { %1683 = vmax.xlane.f32.xlu0 %v1682_v27 }
 0xca1   :  { %v1786_v28 = vpop.f32.mrb[52].mxu0 }
 0xca2   :  { %v1792_v29 = vmul.f32 0.35355338, %v1786_v28  ;;  %v8649_v33 = vpop.f32.mrb[53].mxu0 }
 0xca3   :  { %v1789_v35 = vpop.f32.mrb[54].mxu0 }
 0xca4   :  { %v8650_v38 = vpop.f32.mrb[55].mxu0  ;;  %v1793_v36 = vadd.f32 %v9664_v24, %v1792_v29 }
 0xca6   :  { %v1794_v37 = vsel %vm215_vm2, %v1793_v36, -inf }
 0xca7   :  { %1795 = vmax.xlane.f32.xlu0 %v1794_v37 }
 0xca9   :  { %v1898_v39 = vpop.f32.mrb[56].mxu0 }
 0xcaa   :  { %v1904_v42 = vmul.f32 0.35355338, %v1898_v39  ;;  %v8661_v44 = vpop.f32.mrb[57].mxu0 }
 0xcab   :  { %v1901_v45 = vpop.f32.mrb[58].mxu0 }
 0xcac   :  { %v8662_v46 = vpop.f32.mrb[59].mxu0  ;;  %v1905_v47 = vadd.f32 %v9664_v24, %v1904_v42 }
 0xcae   :  { %v1906_v48 = vsel %vm215_vm2, %v1905_v47, -inf }
 0xcaf   :  { %1907 = vmax.xlane.f32.xlu1 %v1906_v48 }
 0xcb1   :  { %v2024_v49 = vpop.f32.mrb[60].mxu0 }
 0xcb2   :  { %v2030_v32 = vmul.f32 0.35355338, %v2024_v49  ;;  %v8673_v50 = vpop.f32.mrb[61].mxu0 }
 0xcb3   :  { %v2027_v52 = vpop.f32.mrb[62].mxu0 }
 0xcb4   :  { %v8674_v53 = vpop.f32.mrb[63].mxu0  ;;  %v2031_v54 = vadd.f32 %v2030_v32, %v10025_v6 }
 0xcb6   :  { %v2032_v55 = vsel %vm215_vm2, %v2031_v54, -inf }
 0xcb7   :  { %2033 = vmax.xlane.f32.xlu0 %v2032_v55 }
 0xcb9   :  { %v2136_v56 = vpop.f32.mrb[64].mxu0 }
 0xcba   :  { %v2142_v57 = vmul.f32 0.35355338, %v2136_v56  ;;  %v8685_v58 = vpop.f32.mrb[65].mxu0 }
 0xcbb   :  { %v2139_v59 = vpop.f32.mrb[66].mxu0 }
 0xcbc   :  { %v8686_v60 = vpop.f32.mrb[67].mxu0  ;;  %v10314_v62 = vadd.f32 %v9665_v61, %v2142_v57 }
 0xcbe   :  { %v2144_v63 = vsel %vm215_vm2, %v10314_v62, -inf }
 0xcbf   :  { %2145 = vmax.xlane.f32.xlu1 %v2144_v63 }
 0xcc1   :  { %v2248_v13 = vpop.f32.mrb[68].mxu0 }
 0xcc2   :  { %v2254_v2 = vmul.f32 0.35355338, %v2248_v13  ;;  %v8697_v5 = vpop.f32.mrb[69].mxu0 }
 0xcc3   :  { %v2251_v7 = vpop.f32.mrb[70].mxu0 }
 0xcc4   :  { %v8698_v6 = vpop.f32.mrb[71].mxu0  ;;  %v2255_v8 = vadd.f32 %v9665_v61, %v2254_v2 }
 0xcc6   :  { %v2256_v0 = vsel %vm215_vm2, %v2255_v8, -inf }
 0xcc7   :  { %2257 = vmax.xlane.f32.xlu0 %v2256_v0 }
 0xcc9   :  { %v2360_v9 = vpop.f32.mrb[72].mxu0 }
 0xcca   :  { %v8709_v10 = vpop.f32.mrb[73].mxu0  ;;  %v2366_v15 = vmul.f32 0.35355338, %v2360_v9 }
 0xccb   :  { %v2363_v11 = vpop.f32.mrb[74].mxu0 }
 0xccc   :  { %v8710_v12 = vpop.f32.mrb[75].mxu0  ;;  %v2367_v16 = vadd.f32 %v9665_v61, %v2366_v15 }
 0xcce   :  { %v2368_v17 = vsel %vm215_vm2, %v2367_v16, -inf }
 0xcd0   :  { %1694 = vrot.lane.b32.xlu1 %v10227_v43, %s9734_s2 }
 0xcdd   :  { %1582 = vrot.lane.b32.xlu0 %v10227_v43, %s9735_s7 }
 0xcf4   :  { %2369 = vmax.xlane.f32.xlu1 %v2368_v17 }
 0xd05   :  { %1806 = vrot.lane.b32.xlu1 %v10227_v43, %s9736_s10 }
 0xd24   :  { %v1572_v18 = vpop.xlane.xlu1 %1571 }
 0xd25   :  { %v1573_v19 = vsub.f32 %v10303_v3, %v1572_v18 }
 0xd27   :  { %v1574_v4 = vmul.f32 1.442695, %v1573_v19 }
 0xd29   :  { %9472 = vpow2.f32 %v1574_v4 }
 0xd2c   :  { %v1684_v20 = vpop.xlane.xlu0 %1683 }
 0xd2d   :  { %v1685_v21 = vsub.f32 %v1681_v25, %v1684_v20 }
 0xd2f   :  { %v1686_v22 = vmul.f32 1.442695, %v1685_v21 }
 0xd31   :  { %9474 = vpow2.f32 %v1686_v22 }
 0xd33   :  { %v10327_v23 = vpop.eup %9472 }
 0xd34   :  { %v1796_v24 = vpop.xlane.xlu0 %1795  ;;  %v1576_v27 = vsel %vm215_vm2, %v10327_v23, 0.0 }
 0xd35   :  { %v1797_v28 = vsub.f32 %v1793_v36, %v1796_v24  ;;  %1577 = vadd.xlane.f32.xlu0 %v1576_v27 }
 0xd37   :  { %v1798_v29 = vmul.f32 1.442695, %v1797_v28 }
 0xd39   :  { %9476 = vpow2.f32 %v1798_v29 }
 0xd3b   :  { %v10331_v33 = vpop.eup %9474 }
 0xd3c   :  { %v1908_v35 = vpop.xlane.xlu1 %1907  ;;  %v1688_v3 = vsel %vm215_vm2, %v10331_v33, 0.0 }
 0xd3d   :  { %v1909_v38 = vsub.f32 %v1905_v47, %v1908_v35  ;;  %1689 = vadd.xlane.f32.xlu1 %v1688_v3 }
 0xd3f   :  { %v1910_v25 = vmul.f32 1.442695, %v1909_v38 }
 0xd41   :  { %9478 = vpow2.f32 %v1910_v25 }
 0xd43   :  { %v10335_v37 = vpop.eup %9476 }
 0xd44   :  { %v2034_v39 = vpop.xlane.xlu0 %2033  ;;  %v1800_v42 = vsel %vm215_vm2, %v10335_v37, 0.0 }
 0xd45   :  { %v2035_v36 = vsub.f32 %v2031_v54, %v2034_v39  ;;  %1801 = vadd.xlane.f32.xlu0 %v1800_v42 }
 0xd47   :  { %v2036_v44 = vmul.f32 1.442695, %v2035_v36 }
 0xd49   :  { %9480 = vpow2.f32 %v2036_v44 }
 0xd4b   :  { %v10339_v45 = vpop.eup %9478 }
 0xd4c   :  { %v1912_v46 = vsel %vm215_vm2, %v10339_v45, 0.0  ;;  %v2146_v54 = vpop.xlane.xlu1 %2145 }
 0xd4d   :  { %1913 = vadd.xlane.f32.xlu1 %v1912_v46  ;;  %v2147_v56 = vsub.f32 %v10314_v62, %v2146_v54 }
 0xd4f   :  { %v2148_v58 = vmul.f32 1.442695, %v2147_v56 }
 0xd53   :  { %v10343_v47 = vpop.eup %9480 }
 0xd54   :  { %v2258_v48 = vpop.xlane.xlu0 %2257  ;;  %v2038_v49 = vsel %vm215_vm2, %v10343_v47, 0.0 }
 0xd55   :  { %v2259_v32 = vsub.f32 %v2255_v8, %v2258_v48  ;;  %2039 = vadd.xlane.f32.xlu1 %v2038_v49 }
 0xd57   :  { %v2260_v50 = vmul.f32 1.442695, %v2259_v32 }
 0xd58   :  { %v1583_v52 = vpop.permute.xlu0 %1582 }
 0xd59   :  { %9482 = vpow2.f32 %v2260_v50  ;;  %v1588_v53 = vsel %vm281_vm3, %v1583_v52, 0 }
 0xd5a   :  { %8628 = vmatpush3.bf16.msra.mxu1 %v1588_v53  ;;  %9484 = vpow2.f32 %v2148_v58 }
 0xd5b   :  { %1918 = vrot.lane.b32.xlu0 %v10227_v43, %s9737_s11  ;;  %8639 = vmatprep.subr.bf16.mxu1 %v9725_v1  ;;  %v1695_v43 = vpop.permute.xlu1 %1694 }
 0xd5c   :  { %v1700_v10 = vsel %vm281_vm3, %v1695_v43, 0 }
 0xd63   :  { %v10351_v55 = vpop.eup %9482 }
 0xd64   :  { %v2262_v57 = vsel %vm215_vm2, %v10351_v55, 0.0  ;;  %v10356_v59 = vpop.eup %9484 }
 0xd65   :  { %2263 = vadd.xlane.f32.xlu1 %v2262_v57  ;;  %v2150_v60 = vsel %vm215_vm2, %v10356_v59, 0.0 }
 0xd7a   :  { %2151 = vadd.xlane.f32.xlu0 %v2150_v60 }
 0xd81   :  { %v2370_v61 = vpop.xlane.xlu1 %2369 }
 0xd82   :  { %v2371_v63 = vsub.f32 %v2367_v16, %v2370_v61 }
 0xd84   :  { %v2372_v13 = vmul.f32 1.442695, %v2371_v63 }
 0xd85   :  { %v1807_v7 = vpop.permute.xlu1 %1806 }
 0xd86   :  { %9486 = vpow2.f32 %v2372_v13  ;;  %v1812_v16 = vsel %vm281_vm3, %v1807_v7, 0 }
 0xd90   :  { %v10360_v2 = vpop.eup %9486  ;;  %2156 = vrot.lane.b32.xlu0 %v10242_v51, %s9734_s2 }
 0xd91   :  { %v2374_v62 = vsel %vm215_vm2, %v10360_v2, 0.0 }
 0xd92   :  { %2375 = vadd.xlane.f32.xlu1 %v2374_v62 }
 0xd94   :  { %2268 = vrot.lane.b32.xlu0 %v10242_v51, %s9736_s10 }
 0xd98   :  { %2380 = vrot.lane.b32.xlu0 %v10242_v51, %s9737_s11 }
 0xda3   :  { %2044 = vrot.lane.b32.xlu1 %v10242_v51, %s9735_s7 }
 0xdc2   :  { %v1578_v5 = vpop.xlane.xlu0 %1577 }
 0xdc3   :  { %9488 = vrcp.f32 %v1578_v5 }
 0xdca   :  { %v1690_v6 = vpop.xlane.xlu1 %1689 }
 0xdcb   :  { %9490 = vrcp.f32 %v1690_v6 }
 0xdcd   :  { %v9489_v8 = vpop.eup %9488 }
 0xdce   :  { %v1580_v0 = vmul.f32 %v9489_v8, %v10327_v23 }
 0xdd0   :  { %v1581_v9 = vpack.c.bf16 %v1580_v0, %v1580_v0 }
 0xdd2   :  { %8630 = vmatmul.mubr.msk.bf16.vlgmr.msra.gmra.mrb[40].mxu1 %vm215_vm2, %v1581_v9  ;;  %v1802_v11 = vpop.xlane.xlu0 %1801 }
 0xdd3   :  { %8640 = vmatpush3.bf16.msra.mxu1 %v1700_v10  ;;  %9492 = vrcp.f32 %v1802_v11  ;;  %8641 = vmatprep.mubr.msk.bf16.mxu1 %vm9726_vm0, %v9725_v1 }
 0xdd4   :  { %8651 = vmatprep.subr.bf16.mxu1 %v9725_v1 }
 0xdd5   :  { %v9491_v51 = vpop.eup %9490 }
 0xdd6   :  { %v1692_v12 = vmul.f32 %v9491_v51, %v10331_v33  ;;  %v1919_v4 = vpop.permute.xlu0 %1918 }
 0xdd7   :  { %v1924_v21 = vsel %vm281_vm3, %v1919_v4, 0  ;;  %v9391_v4 = vld [vmem:[%s9788_s3 + $0x18] sm:$0xff]  }
 0xdd8   :  { %v1693_v15 = vpack.c.bf16 %v1692_v12, %v1692_v12 }
 0xdda   :  { %8642 = vmatmul.mubr.msk.bf16.vlgmr.msra.gmra.mrb[44].mxu1 %vm215_vm2, %v1693_v15  ;;  %v1914_v17 = vpop.xlane.xlu1 %1913  ;;  %v9390_v15 = vld [vmem:[%s9788_s3 + $0x10] sm:$0xff]   ;;  %s11552_s3 = sld [smem:[#allocation9_spill]] }
 0xddb   :  { %8652 = vmatpush3.bf16.msra.mxu1 %v1812_v16  ;;  %9494 = vrcp.f32 %v1914_v17  ;;  %8653 = vmatprep.mubr.msk.bf16.mxu1 %vm9726_vm0, %v9725_v1 }
 0xddc   :  { %8663 = vmatprep.subr.bf16.mxu1 %v9725_v1  ;;  %8718 = vmatpush3.bf16.msra.mxu0 %v9390_v15 }
 0xddd   :  { %v9493_v18 = vpop.eup %9492  ;;  %8719 = vmatprep.subr.bf16.mxu0 %v9725_v1 }
 0xdde   :  { %v1804_v19 = vmul.f32 %v9493_v18, %v10335_v37 }
 0xde0   :  { %v1805_v20 = vpack.c.bf16 %v1804_v19, %v1804_v19  ;;  %8720 = vmatpush3.bf16.msra.mxu0 %v9391_v4  ;;  %v10450_v4 = vld [vmem:[%s9818_s6 + $0x4] sm:$0xf]  ;;  %s11558_s6 = sld [smem:[#allocation15_spill]] }
 0xde1   :  { %8733 = vmatprep.subr.bf16.mxu0 %v9725_v1 }
 0xde2   :  { %8654 = vmatmul.mubr.msk.bf16.vlgmr.msra.gmra.mrb[48].mxu1 %vm215_vm2, %v1805_v20  ;;  %v2040_v27 = vpop.xlane.xlu1 %2039 }
 0xde3   :  { %8664 = vmatpush3.bf16.msra.mxu1 %v1924_v21  ;;  %8665 = vmatprep.mubr.msk.bf16.mxu1 %vm9726_vm0, %v9725_v1  ;;  %9496 = vrcp.f32 %v2040_v27 }
 0xde4   :  { %8675 = vmatprep.subr.bf16.mxu1 %v9725_v1 }
 0xde5   :  { %v9495_v22 = vpop.eup %9494 }
 0xde6   :  { %v1916_v23 = vmul.f32 %v9495_v22, %v10339_v45 }
 0xde8   :  { %v1917_v24 = vpack.c.bf16 %v1916_v23, %v1916_v23 }
 0xdea   :  { %8666 = vmatmul.mubr.msk.bf16.vlgmr.msra.gmra.mrb[52].mxu1 %vm215_vm2, %v1917_v24 }
 0xdeb   :  { %8677 = vmatprep.mubr.msk.bf16.mxu1 %vm9726_vm0, %v9725_v1 }
 0xded   :  { %v9497_v33 = vpop.eup %9496 }
 0xdee   :  { %v2042_v3 = vmul.f32 %v9497_v33, %v10343_v47 }
 0xdf0   :  { %v2043_v39 = vpack.c.bf16 %v2042_v3, %v2042_v3 }
 0xdf2   :  { %v2264_v29 = vpop.xlane.xlu1 %2263 }
 0xe07   :  { %v2152_v28 = vpop.xlane.xlu0 %2151 }
 0xe08   :  { %9498 = vrcp.f32 %v2152_v28 }
 0xe09   :  { %9500 = vrcp.f32 %v2264_v29 }
 0xe0b   :  { %v2157_v37 = vpop.permute.xlu0 %2156 }
 0xe0c   :  { %v2162_v36 = vsel %vm281_vm3, %v2157_v37, 0 }
 0xe0f   :  { %v2269_v45 = vpop.permute.xlu0 %2268 }
 0xe10   :  { %v2274_v48 = vsel %vm281_vm3, %v2269_v45, 0 }
 0xe12   :  { %v9499_v42 = vpop.eup %9498 }
 0xe13   :  { %v2154_v44 = vmul.f32 %v9499_v42, %v10356_v59  ;;  %v9501_v47 = vpop.eup %9500  ;;  %v2381_v32 = vpop.permute.xlu0 %2380 }
 0xe14   :  { %v2266_v49 = vmul.f32 %v9501_v47, %v10351_v55  ;;  %v2386_v53 = vsel %vm281_vm3, %v2381_v32, 0 }
 0xe15   :  { %v2155_v46 = vpack.c.bf16 %v2154_v44, %v2154_v44 }
 0xe16   :  { %v2267_v50 = vpack.c.bf16 %v2266_v49, %v2266_v49 }
 0xe1f   :  { %v2376_v35 = vpop.xlane.xlu1 %2375 }
 0xe20   :  { %9502 = vrcp.f32 %v2376_v35 }
 0xe23   :  { %v2045_v38 = vpop.permute.xlu1 %2044 }
 0xe24   :  { %v2050_v25 = vsel %vm281_vm3, %v2045_v38, 0 }
 0xe25   :  { %8676 = vmatpush3.bf16.msra.mxu1 %v2050_v25 }
 0xe26   :  { %8687 = vmatprep.subr.bf16.mxu1 %v9725_v1 }
 0xe28   :  { %8678 = vmatmul.mubr.msk.bf16.vlgmr.msra.gmra.mrb[56].mxu1 %vm215_vm2, %v2043_v39 }
 0xe29   :  { %8688 = vmatpush3.bf16.msra.mxu1 %v2162_v36  ;;  %8689 = vmatprep.mubr.msk.bf16.mxu1 %vm9726_vm0, %v9725_v1 }
 0xe2a   :  { %8699 = vmatprep.subr.bf16.mxu1 %v9725_v1  ;;  %v9503_v52 = vpop.eup %9502 }
 0xe2b   :  { %v2378_v54 = vmul.f32 %v9503_v52, %v10360_v2 }
 0xe2d   :  { %v2379_v56 = vpack.c.bf16 %v2378_v54, %v2378_v54 }
 0xe30   :  { %8690 = vmatmul.mubr.msk.bf16.vlgmr.msra.gmra.mrb[60].mxu1 %vm215_vm2, %v2155_v46 }
 0xe31   :  { %8700 = vmatpush3.bf16.msra.mxu1 %v2274_v48  ;;  %8701 = vmatprep.mubr.msk.bf16.mxu1 %vm9726_vm0, %v9725_v1 }
 0xe32   :  { %8711 = vmatprep.subr.bf16.mxu1 %v9725_v1 }
 0xe38   :  { %8702 = vmatmul.mubr.msk.bf16.vlgmr.msra.gmra.mrb[64].mxu1 %vm215_vm2, %v2267_v50 }
 0xe39   :  { %8712 = vmatpush3.bf16.msra.mxu1 %v2386_v53  ;;  %8713 = vmatprep.mubr.msk.bf16.mxu1 %vm9726_vm0, %v9725_v1  ;;  %v8016_v53 = vld [vmem:[%s9793_s8 + $0x1] ss:$0 sm:$0xff]  ;;  %s11553_s8 = sld [smem:[#allocation12_spill]] }
 0xe3a   :  { %8725 = vmatprep.subr.bf16.mxu1 %v9725_v1 }
 0xe40   :  { %8714 = vmatmul.mubr.msk.bf16.vlgmr.msra.gmra.mrb[68].mxu1 %vm215_vm2, %v2379_v56 }
 0xe41   :  { %8729 = vmatprep.mubr.msk.bf16.mxu1 %vm9726_vm0, %v9725_v1 }
 0xea5   :  { %v1624_v55 = vpop.f32.mrb[40].mxu1 }
 0xea6   :  { %v8631_v57 = vpop.f32.mrb[41].mxu1 }
 0xea7   :  { %v1627_v58 = vpop.f32.mrb[42].mxu1 }
 0xea8   :  { %v8632_v59 = vpop.f32.mrb[43].mxu1 }
 0xead   :  { %v1736_v60 = vpop.f32.mrb[44].mxu1 }
 0xeae   :  { %v8643_v43 = vpop.f32.mrb[45].mxu1 }
 0xeaf   :  { %v1739_v61 = vpop.f32.mrb[46].mxu1 }
 0xeb0   :  { %v8644_v63 = vpop.f32.mrb[47].mxu1 }
 0xeb5   :  { %v1848_v13 = vpop.f32.mrb[48].mxu1 }
 0xeb6   :  { %v8655_v62 = vpop.f32.mrb[49].mxu1 }
 0xeb7   :  { %v1851_v2 = vpop.f32.mrb[50].mxu1 }
 0xeb8   :  { %v8656_v5 = vpop.f32.mrb[51].mxu1 }
 0xebd   :  { %v1960_v7 = vpop.f32.mrb[52].mxu1 }
 0xebe   :  { %v8667_v6 = vpop.f32.mrb[53].mxu1 }
 0xebf   :  { %v1963_v8 = vpop.f32.mrb[54].mxu1 }
 0xec0   :  { %v8668_v0 = vpop.f32.mrb[55].mxu1 }
 0xefb   :  { %v2086_v9 = vpop.f32.mrb[56].mxu1 }
 0xefc   :  { %v8679_v10 = vpop.f32.mrb[57].mxu1 }
 0xefd   :  { %v2089_v11 = vpop.f32.mrb[58].mxu1  ;;  %v9393_v10 = vld [vmem:[%s9798_s14 + $0x18] sm:$0xff]  }
 0xefe   :  { %v8680_v51 = vpop.f32.mrb[59].mxu1  ;;  %v9396_v11 = vld [vmem:[%s9808_s24 + $0x20] sm:$0xff]  }
 0xeff   :  { %v9397_v51 = vld [vmem:[%s9808_s24 + $0x28] sm:$0xff]  }
 0xf03   :  { %v2198_v12 = vpop.f32.mrb[60].mxu1 }
 0xf04   :  { %v9323_v16 = vpack.i.bf16 %v2198_v12, %v1736_v60  ;;  %v8691_v17 = vpop.f32.mrb[61].mxu1 }
 0xf05   :  { %v2201_v18 = vpop.f32.mrb[62].mxu1 }
 0xf06   :  { %9324 = vrot.lane.b32.xlu1 %v9323_v16, %s11532_s15  ;;  %v8692_v19 = vpop.f32.mrb[63].mxu1 }
 0xf0b   :  { %v2310_v20 = vpop.f32.mrb[64].mxu1 }
 0xf0c   :  { %v9328_v21 = vpack.i.bf16 %v2310_v20, %v1848_v13  ;;  %v8703_v22 = vpop.f32.mrb[65].mxu1 }
 0xf0d   :  { %v2313_v23 = vpop.f32.mrb[66].mxu1 }
 0xf0e   :  { %9329 = vrot.lane.b32.xlu0 %v9328_v21, %s11530_s16  ;;  %v8704_v24 = vpop.f32.mrb[67].mxu1  ;;  %v2537_v21 = vrot.slane %v10450_v4, %v10175_v31 }
 0xf13   :  { %v2422_v27 = vpop.f32.mrb[68].mxu1 }
 0xf14   :  { %v9333_v28 = vpack.i.bf16 %v2422_v27, %v1960_v7  ;;  %v8715_v29 = vpop.f32.mrb[69].mxu1 }
 0xf15   :  { %v2425_v33 = vpop.f32.mrb[70].mxu1 }
 0xf16   :  { %9334 = vrot.lane.b32.xlu1 %v9333_v28, %s11528_s18  ;;  %v8716_v35 = vpop.f32.mrb[71].mxu1  ;;  %v2543_v28 = vrot.slane %v10450_v4, %v10183_v34 }
 0xf78   :  { %v9325_v3 = vpop.permute.xlu1 %9324 }
 0xf79   :  { %v9327_v25 = vunpack.i.h.bf16 %v9325_v3  ;;  %v9326_v37 = vunpack.i.l.bf16 %v9325_v3  ;;  %v9394_v3 = vld [vmem:[%s9823_s12] sm:$0xff]  }
 0xf7b   :  { %v2440_v44 = vsel %vm215_vm2, %v2086_v9, %v9327_v25  ;;  %v1978_v45 = vsel %vm215_vm2, %v1624_v55, %v9326_v37  ;;  %v9392_v9 = vld [vmem:[%s9798_s14 + $0x10] sm:$0xff]   ;;  %v9395_v25 = vld [vmem:[%s9823_s12 + $0x8] sm:$0xff]   ;;  %v10468_v37 = vld [vmem:[%s9758_s9] sm:$0xff]  ;;  %s11554_s14 = sld [smem:[#allocation10_spill]] }
 0xf7c   :  { %8726 = vmatpush3.bf16.msra.mxu1 %v9392_v9 }
 0xf7d   :  { %8727 = vmatprep.subr.bf16.mxu1 %v9725_v1 }
 0xf80   :  { %v9330_v38 = vpop.permute.xlu0 %9329  ;;  %8728 = vmatpush3.bf16.msra.mxu1 %v9393_v10 }
 0xf81   :  { %v9332_v39 = vunpack.i.h.bf16 %v9330_v38  ;;  %v9331_v42 = vunpack.i.l.bf16 %v9330_v38  ;;  %8745 = vmatprep.subr.bf16.mxu1 %v9725_v1 }
 0xf83   :  { %v2441_v48 = vsel %vm674_vm4, %v2440_v44, %v9332_v39  ;;  %v1979_v49 = vsel %vm674_vm4, %v1978_v45, %v9331_v42  ;;  %v10471_v39 = vld [vmem:[%s9758_s9 + $0x8] sm:$0xf]  ;;  %v9399_v44 = vld [vmem:[%s9808_s24 + $0x38] sm:$0xff]   ;;  %v8034_v45 = vld [vmem:[%s9803_s19 + $0x1] ss:$0 sm:$0xff]  ;;  %s11548_s9 = sld [smem:[#allocation5_spill]] }
 0xf84   :  { %v2761_v42 = vpack.c.bf16 %v10471_v39, %v10468_v37  ;;  %s11555_s19 = sld [smem:[#allocation6_spill]] }
 0xf88   :  { %v9335_v36 = vpop.permute.xlu1 %9334 }
 0xf89   :  { %v9337_v46 = vunpack.i.h.bf16 %v9335_v36  ;;  %v9336_v47 = vunpack.i.l.bf16 %v9335_v36  ;;  %v9398_v36 = vld [vmem:[%s9808_s24 + $0x30] sm:$0xff]   ;;  %s11556_s24 = sld [smem:[#allocation13_spill]] }
 0xf8b   :  { %v2442_v32 = vsel %vm676_vm5, %v2441_v48, %v9337_v46  ;;  %v1980_v50 = vsel %vm676_vm5, %v1979_v49, %v9336_v47 }
 0xf8c   :  { %v2443_v52 = vpack.c.bf16 %v2442_v32, %v1980_v50 }
 0xf8e   :  { %8722 = vmatmul.mubr.msk.bf16.vlgmr.msra.gmra.mrb[76].mxu0 %vm166_vm1, %v2443_v52 }
 0xf8f   :  { %8741 = vmatprep.mubr.msk.bf16.mxu0 %vm9726_vm0, %v9725_v1  ;;  %8734 = vmatpush3.bf16.msra.mxu0 %v9396_v11 }
 0xf90   :  { %8735 = vmatprep.subr.bf16.mxu0 %v9725_v1 }
 0xf93   :  { %8736 = vmatpush3.bf16.msra.mxu0 %v9397_v51 }
 0xf94   :  { %8737 = vmatprep.subr.bf16.mxu0 %v9725_v1 }
 0xf97   :  { %8738 = vmatpush3.bf16.msra.mxu0 %v9398_v36 }
 0xf98   :  { %8739 = vmatprep.subr.bf16.mxu0 %v9725_v1 }
 0xf9b   :  { %8740 = vmatpush3.bf16.msra.mxu0 %v9399_v44 }
 0xf9c   :  { %8759 = vmatprep.subr.bf16.mxu0 %v9725_v1 }
0x1061   :  { %v2499_v54 = vpop.f32.mrb[76].mxu0 }
0x1062   :  { %v2500_v56 = vadd.f32 %v8016_v53, %v2499_v54  ;;  %v8723_v55 = vpop.f32.mrb[77].mxu0 }
0x1063   :  { %v2502_v57 = vpop.f32.mrb[78].mxu0 }
0x1064   :  { %v2503_v58 = vadd.f32 %v8016_v53, %v2502_v57  ;;  %v8724_v59 = vpop.f32.mrb[79].mxu0  ;;  %v2506_v60 = vadd.f32 %v2500_v56, %v10217_v40  ;;  %v8044_v56 = vld [vmem:[%s9828_s20] ss:$0 sm:$0xff] }
0x1066   :  { %v2508_v43 = vsel %vm166_vm1, %v2506_v60, 0.0  ;;  %v2507_v61 = vadd.f32 %v2503_v58, %v10219_v41 }
0x1067   :  { %2509 = vadd.xlane.f32.xlu0 %v2508_v43 }
0x1068   :  { %v2511_v63 = vsel %vm166_vm1, %v2507_v61, 0.0 }
0x1069   :  { %2512 = vadd.xlane.f32.xlu1 %v2511_v63 }
0x10f4   :  { %v2510_v13 = vpop.xlane.xlu0 %2509 }
0x10f5   :  { %v2514_v62 = vmul.f32 0.03125, %v2510_v13 }
0x10f6   :  { %v2513_v2 = vpop.xlane.xlu1 %2512 }
0x10f7   :  { %v2516_v5 = vsub.f32 %v2506_v60, %v2514_v62  ;;  %v2515_v7 = vmul.f32 0.03125, %v2513_v2 }
0x10f9   :  { %v2517_v6 = vsub.f32 %v2507_v61, %v2515_v7  ;;  %v2518_v8 = vmul.f32 %v2516_v5, %v2516_v5 }
0x10fb   :  { %v2520_v40 = vsel %vm166_vm1, %v2518_v8, 0.0  ;;  %v2519_v0 = vmul.f32 %v2517_v6, %v2517_v6 }
0x10fc   :  { %2521 = vadd.xlane.f32.xlu0 %v2520_v40 }
0x10fd   :  { %v2523_v41 = vsel %vm166_vm1, %v2519_v0, 0.0 }
0x1100   :  { %2524 = vadd.xlane.f32.xlu0 %v2523_v41 }
0x1189   :  { %v2522_v12 = vpop.xlane.xlu0 %2521 }
0x118a   :  { %v2526_v15 = vmul.f32 0.03125, %v2522_v12 }
0x118c   :  { %v2528_v16 = vadd.f32 1e-05, %v2526_v15 }
0x118d   :  { %v2525_v17 = vpop.xlane.xlu0 %2524 }
0x118e   :  { %9504 = vrsqrt.f32 %v2528_v16  ;;  %v2527_v18 = vmul.f32 0.03125, %v2525_v17 }
0x1190   :  { %v2529_v19 = vadd.f32 1e-05, %v2527_v18 }
0x1192   :  { %9506 = vrsqrt.f32 %v2529_v19 }
0x1198   :  { %v9505_v20 = vpop.eup %9504 }
0x1199   :  { %v2532_v22 = vmul.f32 %v9505_v20, %v2516_v5 }
0x119b   :  { %v2538_v24 = vmul.f32 %v2537_v21, %v2532_v22 }
0x119c   :  { %v9507_v23 = vpop.eup %9506 }
0x119d   :  { %v2533_v27 = vmul.f32 %v9507_v23, %v2517_v6  ;;  %v10456_v33 = vadd.f32 %v2543_v28, %v2538_v24 }
0x119f   :  { %v2539_v29 = vmul.f32 %v2537_v21, %v2533_v27 }
0x11a1   :  { %v10458_v35 = vadd.f32 %v2543_v28, %v2539_v29  ;;  %v2746_v28 = vld [vmem:[%s11548_s9] sm:$0x3f] }
0x11a3   :  { %v2564_v38 = vpack.c.bf16 %v10458_v35, %v10456_v33 }
0x11a5   :  { %8730 = vmatmul.mubr.msk.bf16.vlgmr.msra.gmra.mrb[72].mxu1 %vm166_vm1, %v2564_v38 }
0x11a6   :  { %8746 = vmatpush3.bf16.msra.mxu1 %v9394_v3  ;;  %8749 = vmatprep.mubr.msk.bf16.mxu1 %vm9726_vm0, %v9725_v1 }
0x11a7   :  { %8747 = vmatprep.subr.bf16.mxu1 %v9725_v1 }
0x11aa   :  { %8748 = vmatpush3.bf16.msra.mxu1 %v9395_v25 }
0x11ab   :  { %8753 = vmatprep.subr.bf16.mxu1 %v9725_v1 }
0x11ad   :  { %8750 = vmatmul.mubr.msk.bf16.vlgmr.msra.gmra.mrb[76].mxu1 %vm166_vm1, %v2761_v42 }
0x11ae   :  { %8755 = vmatprep.mubr.msk.bf16.mxu1 %vm9726_vm0, %v9725_v1 }
0x1278   :  { %v2620_v46 = vpop.f32.mrb[72].mxu1 }
0x1279   :  { %v2621_v47 = vadd.f32 %v8034_v45, %v2620_v46  ;;  %v8731_v48 = vpop.f32.mrb[73].mxu1 }
0x127a   :  { %v2623_v49 = vpop.f32.mrb[74].mxu1 }
0x127b   :  { %v2624_v32 = vadd.f32 %v8034_v45, %v2623_v49  ;;  %v8732_v50 = vpop.f32.mrb[75].mxu1  ;;  %v2627_v52 = vmax.f32 %v2621_v47, 0.0 }
0x127d   :  { %v2628_v53 = vmax.f32 %v2624_v32, 0.0 }
0x127f   :  { %v2629_v54 = vpack.c.bf16 %v2628_v53, %v2627_v52 }
0x1280   :  { %v2817_v55 = vpop.f32.mrb[76].mxu1 }
0x1281   :  { %8742 = vmatmul.mubr.msk.bf16.vlgmr.msra.gmra.mrb[80].mxu0 %vm1354_vm6, %v2629_v54  ;;  %v8751_v57 = vpop.f32.mrb[77].mxu1  ;;  %v2818_v59 = vadd.f32 %v8044_v56, %v2817_v55 }
0x1282   :  { %v2820_v58 = vpop.f32.mrb[78].mxu1  ;;  %8761 = vmatprep.mubr.msk.bf16.mxu0 %vm9726_vm0, %v9725_v1 }
0x1283   :  { %v2821_v60 = vadd.f32 %v8044_v56, %v2820_v58  ;;  %v8752_v43 = vpop.f32.mrb[79].mxu1 }
0x1285   :  { %v10489_v61 = vpack.c.bf16 %v2821_v60, %v2818_v59 }
0x1287   :  { %2941 = vrot.lane.b32.xlu0 %v10489_v61, %s9730_s23  ;;  %2826 = vrot.lane.b32.xlu1 %v10489_v61, %s9728_s5  ;;  %v10504_v63 = vrot.slane %v10489_v61, 3 }
0x128b   :  { %3051 = vrot.lane.b32.xlu0 %v10489_v61, %s9732_s28  ;;  %2939 = vrot.lane.b32.xlu1 %v10489_v61, %s9727_s0 }
0x128f   :  { %3163 = vrot.lane.b32.xlu0 %v10489_v61, %s9733_s1  ;;  %3053 = vrot.lane.b32.xlu1 %v10489_v61, %s9729_s22 }
0x1293   :  { %3165 = vrot.lane.b32.xlu1 %v10489_v61, %s9731_s26  ;;  %3403 = vrot.lane.b32.xlu0 %v10504_v63, %s9730_s23 }
0x1297   :  { %3515 = vrot.lane.b32.xlu0 %v10504_v63, %s9729_s22  ;;  %3291 = vrot.lane.b32.xlu1 %v10504_v63, %s9728_s5 }
0x129b   :  { %3627 = vrot.lane.b32.xlu0 %v10504_v63, %s9731_s26  ;;  %3401 = vrot.lane.b32.xlu1 %v10504_v63, %s9727_s0 }
0x129f   :  { %3513 = vrot.lane.b32.xlu1 %v10504_v63, %s9732_s28 }
0x12a3   :  { %3625 = vrot.lane.b32.xlu1 %v10504_v63, %s9733_s1 }
0x12f9   :  { %v2827_v13 = vpop.permute.xlu1 %2826  ;;  %v2942_v2 = vpop.permute.xlu0 %2941 }
0x12fa   :  { %v2832_v62 = vsel %vm215_vm2, %v2827_v13, 0  ;;  %v2947_v7 = vsel %vm215_vm2, %v2942_v2, 0 }
0x12fb   :  { %8754 = vmatpush3.bf16.xpose.msra.mxu1 %v2832_v62 }
0x12fc   :  { %8765 = vmatprep.subr.bf16.mxu1 %v9725_v1 }
0x12fd   :  { %v2940_v5 = vpop.permute.xlu1 %2939  ;;  %v3052_v0 = vpop.permute.xlu0 %3051 }
0x1301   :  { %v3054_v6 = vpop.permute.xlu1 %3053  ;;  %v3164_v10 = vpop.permute.xlu0 %3163 }
0x1302   :  { %8756 = vmatmul.mubr.msk.bf16.vlgmr.msra.gmra.mrb[80].mxu1 %vm215_vm2, %v10489_v61  ;;  %v3059_v8 = vsel %vm215_vm2, %v3054_v6, 0 }
0x1303   :  { %8766 = vmatpush3.bf16.xpose.msra.mxu1 %v2947_v7  ;;  %8767 = vmatprep.mubr.msk.bf16.mxu1 %vm9726_vm0, %v9725_v1  ;;  %v2747_v7 = vld [vmem:[%s11548_s9 + $0x8] sm:$0x3f] }
0x1304   :  { %8777 = vmatprep.subr.bf16.mxu1 %v9725_v1 }
0x1305   :  { %v3166_v40 = vpop.permute.xlu1 %3165  ;;  %v3404_v51 = vpop.permute.xlu0 %3403 }
0x1306   :  { %v3171_v41 = vsel %vm215_vm2, %v3166_v40, 0  ;;  %v3409_v12 = vsel %vm215_vm2, %v3404_v51, 0 }
0x1309   :  { %v3292_v9 = vpop.permute.xlu1 %3291  ;;  %v3516_v15 = vpop.permute.xlu0 %3515 }
0x130a   :  { %8768 = vmatmul.mubr.msk.bf16.vlgmr.msra.gmra.mrb[84].mxu1 %vm215_vm2, %v2940_v5  ;;  %v3297_v11 = vsel %vm215_vm2, %v3292_v9, 0  ;;  %v3521_v17 = vsel %vm215_vm2, %v3516_v15, 0 }
0x130b   :  { %8778 = vmatpush3.bf16.xpose.msra.mxu1 %v3059_v8  ;;  %8779 = vmatprep.mubr.msk.bf16.mxu1 %vm9726_vm0, %v9725_v1 }
0x130c   :  { %8789 = vmatprep.subr.bf16.mxu1 %v9725_v1 }
0x130d   :  { %v3402_v16 = vpop.permute.xlu1 %3401  ;;  %v3628_v18 = vpop.permute.xlu0 %3627 }
0x130e   :  { %v3633_v20 = vsel %vm215_vm2, %v3628_v18, 0 }
0x1311   :  { %v3514_v19 = vpop.permute.xlu1 %3513 }
0x1312   :  { %8780 = vmatmul.mubr.msk.bf16.vlgmr.msra.gmra.mrb[88].mxu1 %vm215_vm2, %v3052_v0 }
0x1313   :  { %8790 = vmatpush3.bf16.xpose.msra.mxu1 %v3171_v41  ;;  %8791 = vmatprep.mubr.msk.bf16.mxu1 %vm9726_vm0, %v9725_v1 }
0x1314   :  { %8801 = vmatprep.subr.bf16.mxu1 %v9725_v1 }
0x1315   :  { %v3626_v21 = vpop.permute.xlu1 %3625 }
0x131a   :  { %8792 = vmatmul.mubr.msk.bf16.vlgmr.msra.gmra.mrb[92].mxu1 %vm215_vm2, %v3164_v10 }
0x131b   :  { %8802 = vmatpush3.bf16.xpose.msra.mxu1 %v3297_v11  ;;  %8803 = vmatprep.mubr.msk.bf16.mxu1 %vm9726_vm0, %v9725_v1 }
0x131c   :  { %8813 = vmatprep.subr.bf16.mxu1 %v9725_v1 }
0x1322   :  { %8804 = vmatmul.mubr.msk.bf16.vlgmr.msra.gmra.mrb[96].mxu1 %vm215_vm2, %v10504_v63 }
0x1323   :  { %8814 = vmatpush3.bf16.xpose.msra.mxu1 %v3409_v12  ;;  %8815 = vmatprep.mubr.msk.bf16.mxu1 %vm9726_vm0, %v9725_v1 }
0x1324   :  { %8825 = vmatprep.subr.bf16.mxu1 %v9725_v1 }
0x132a   :  { %8816 = vmatmul.mubr.msk.bf16.vlgmr.msra.gmra.mrb[100].mxu1 %vm215_vm2, %v3402_v16 }
0x132b   :  { %8826 = vmatpush3.bf16.xpose.msra.mxu1 %v3521_v17  ;;  %8827 = vmatprep.mubr.msk.bf16.mxu1 %vm9726_vm0, %v9725_v1 }
0x132c   :  { %8837 = vmatprep.subr.bf16.mxu1 %v9725_v1 }
0x1332   :  { %8828 = vmatmul.mubr.msk.bf16.vlgmr.msra.gmra.mrb[104].mxu1 %vm215_vm2, %v3514_v19 }
0x1333   :  { %8838 = vmatpush3.bf16.xpose.msra.mxu1 %v3633_v20  ;;  %8839 = vmatprep.mubr.msk.bf16.mxu1 %vm9726_vm0, %v9725_v1 }
0x1334   :  { %8849 = vmatprep.subr.bf16.mxu1 %v9725_v1 }
0x133a   :  { %8840 = vmatmul.mubr.msk.bf16.vlgmr.msra.gmra.mrb[108].mxu1 %vm215_vm2, %v3626_v21 }
0x133b   :  { %8853 = vmatprep.mubr.msk.bf16.mxu1 %vm9726_vm0, %v9725_v1 }
0x1354   :  { %v10564_v22 = vpop.f32.mrb[80].mxu0 }
0x1355   :  { %v8743_v23 = vpop.f32.mrb[81].mxu0 }
0x1356   :  { %v10566_v24 = vpop.f32.mrb[82].mxu0 }
0x1357   :  { %v8744_v27 = vpop.f32.mrb[83].mxu0 }
0x13d5   :  { %v2868_v29 = vpop.f32.mrb[80].mxu1 }
0x13d6   :  { %v2874_v3 = vmul.f32 0.35355338, %v2868_v29  ;;  %v8757_v38 = vpop.f32.mrb[81].mxu1 }
0x13d7   :  { %v2871_v25 = vpop.f32.mrb[82].mxu1 }
0x13d8   :  { %v10569_v42 = vadd.f32 %v2874_v3, %v2746_v28  ;;  %v8758_v36 = vpop.f32.mrb[83].mxu1 }
0x13da   :  { %v2877_v44 = vsel %vm2876_vm7, %v10569_v42, -inf }
0x13db   :  { %2878 = vmax.xlane.f32.xlu0 %v2877_v44 }
0x13dd   :  { %v2983_v45 = vpop.f32.mrb[84].mxu1 }
0x13de   :  { %v2989_v46 = vmul.f32 0.35355338, %v2983_v45  ;;  %v8769_v47 = vpop.f32.mrb[85].mxu1 }
0x13df   :  { %v2986_v48 = vpop.f32.mrb[86].mxu1 }
0x13e0   :  { %v2990_v49 = vadd.f32 %v2989_v46, %v2746_v28  ;;  %v8770_v32 = vpop.f32.mrb[87].mxu1 }
0x13e2   :  { %v2991_v50 = vsel %vm2876_vm7, %v2990_v49, -inf }
0x13e3   :  { %2992 = vmax.xlane.f32.xlu1 %v2991_v50 }
0x13e5   :  { %v3095_v52 = vpop.f32.mrb[88].mxu1 }
0x13e6   :  { %v3101_v53 = vmul.f32 0.35355338, %v3095_v52  ;;  %v8781_v54 = vpop.f32.mrb[89].mxu1 }
0x13e7   :  { %v3098_v56 = vpop.f32.mrb[90].mxu1 }
0x13e8   :  { %v3102_v55 = vadd.f32 %v3101_v53, %v2746_v28  ;;  %v8782_v57 = vpop.f32.mrb[91].mxu1 }
0x13ea   :  { %v3103_v58 = vsel %vm2876_vm7, %v3102_v55, -inf }
0x13eb   :  { %3104 = vmax.xlane.f32.xlu0 %v3103_v58 }
0x13ed   :  { %v3207_v59 = vpop.f32.mrb[92].mxu1 }
0x13ee   :  { %v3213_v60 = vmul.f32 0.35355338, %v3207_v59  ;;  %v8793_v43 = vpop.f32.mrb[93].mxu1 }
0x13ef   :  { %v3210_v13 = vpop.f32.mrb[94].mxu1 }
0x13f0   :  { %v10575_v62 = vadd.f32 %v3213_v60, %v2746_v28  ;;  %v8794_v2 = vpop.f32.mrb[95].mxu1 }
0x13f2   :  { %v3215_v5 = vsel %vm2876_vm7, %v10575_v62, -inf }
0x13f3   :  { %3216 = vmax.xlane.f32.xlu0 %v3215_v5 }
0x13f5   :  { %v3333_v6 = vpop.f32.mrb[96].mxu1 }
0x13f6   :  { %v3339_v8 = vmul.f32 0.35355338, %v3333_v6  ;;  %v8805_v40 = vpop.f32.mrb[97].mxu1 }
0x13f7   :  { %v3336_v0 = vpop.f32.mrb[98].mxu1 }
0x13f8   :  { %v10580_v41 = vadd.f32 %v3339_v8, %v2747_v7  ;;  %v8806_v9 = vpop.f32.mrb[99].mxu1 }
0x13fa   :  { %v3341_v10 = vsel %vm2876_vm7, %v10580_v41, -inf }
0x13fb   :  { %3342 = vmax.xlane.f32.xlu1 %v3341_v10 }
0x13fd   :  { %v3445_v11 = vpop.f32.mrb[100].mxu1 }
0x13fe   :  { %v3451_v51 = vmul.f32 0.35355338, %v3445_v11  ;;  %v8817_v12 = vpop.f32.mrb[101].mxu1 }
0x13ff   :  { %v3448_v15 = vpop.f32.mrb[102].mxu1 }
0x1400   :  { %v3452_v16 = vadd.f32 %v3451_v51, %v2747_v7  ;;  %v8818_v17 = vpop.f32.mrb[103].mxu1 }
0x1402   :  { %v3453_v18 = vsel %vm2876_vm7, %v3452_v16, -inf }
0x1403   :  { %3454 = vmax.xlane.f32.xlu0 %v3453_v18 }
0x1405   :  { %v3557_v19 = vpop.f32.mrb[104].mxu1 }
0x1406   :  { %v3563_v20 = vmul.f32 0.35355338, %v3557_v19  ;;  %v8829_v21 = vpop.f32.mrb[105].mxu1 }
0x1407   :  { %v3560_v23 = vpop.f32.mrb[106].mxu1 }
0x1408   :  { %v3564_v27 = vadd.f32 %v3563_v20, %v2747_v7  ;;  %v8830_v28 = vpop.f32.mrb[107].mxu1 }
0x140a   :  { %v3565_v29 = vsel %vm2876_vm7, %v3564_v27, -inf }
0x140b   :  { %3566 = vmax.xlane.f32.xlu1 %v3565_v29 }
0x140d   :  { %v3669_v3 = vpop.f32.mrb[108].mxu1 }
0x140e   :  { %v8841_v38 = vpop.f32.mrb[109].mxu1  ;;  %v3675_v44 = vmul.f32 0.35355338, %v3669_v3 }
0x140f   :  { %v3672_v25 = vpop.f32.mrb[110].mxu1 }
0x1410   :  { %v8842_v36 = vpop.f32.mrb[111].mxu1  ;;  %v3676_v45 = vadd.f32 %v3675_v44, %v2747_v7 }
0x1412   :  { %v3677_v46 = vsel %vm2876_vm7, %v3676_v45, -inf }
0x1419   :  { %3003 = vrot.lane.b32.xlu0 %v10489_v61, %s9734_s2 }
0x141c   :  { %2889 = vrot.lane.b32.xlu1 %v10489_v61, %s9735_s7 }
0x1438   :  { %3678 = vmax.xlane.f32.xlu0 %v3677_v46 }
0x1468   :  { %v2879_v47 = vpop.xlane.xlu0 %2878 }
0x1469   :  { %v2880_v48 = vsub.f32 %v10569_v42, %v2879_v47 }
0x146b   :  { %v2881_v32 = vmul.f32 1.442695, %v2880_v48 }
0x146d   :  { %9508 = vpow2.f32 %v2881_v32 }
0x1470   :  { %v2993_v50 = vpop.xlane.xlu1 %2992 }
0x1471   :  { %v2994_v52 = vsub.f32 %v2990_v49, %v2993_v50 }
0x1473   :  { %v2995_v53 = vmul.f32 1.442695, %v2994_v52 }
0x1475   :  { %9510 = vpow2.f32 %v2995_v53 }
0x1477   :  { %v10592_v54 = vpop.eup %9508 }
0x1478   :  { %v3105_v56 = vpop.xlane.xlu0 %3104  ;;  %v2883_v57 = vsel %vm2876_vm7, %v10592_v54, 0.0 }
0x1479   :  { %v3106_v58 = vsub.f32 %v3102_v55, %v3105_v56  ;;  %2884 = vadd.xlane.f32.xlu1 %v2883_v57 }
0x147b   :  { %v3107_v59 = vmul.f32 1.442695, %v3106_v58 }
0x147d   :  { %9512 = vpow2.f32 %v3107_v59 }
0x147f   :  { %v10596_v60 = vpop.eup %9510 }
0x1480   :  { %v2997_v42 = vsel %vm2876_vm7, %v10596_v60, 0.0  ;;  %v3217_v5 = vpop.xlane.xlu0 %3216 }
0x1481   :  { %2998 = vadd.xlane.f32.xlu0 %v2997_v42  ;;  %v3218_v6 = vsub.f32 %v10575_v62, %v3217_v5 }
0x1483   :  { %v3219_v8 = vmul.f32 1.442695, %v3218_v6 }
0x1485   :  { %9514 = vpow2.f32 %v3219_v8 }
0x1487   :  { %v10600_v43 = vpop.eup %9512 }
0x1488   :  { %v3109_v49 = vsel %vm2876_vm7, %v10600_v43, 0.0  ;;  %v3343_v13 = vpop.xlane.xlu1 %3342 }
0x1489   :  { %3110 = vadd.xlane.f32.xlu1 %v3109_v49  ;;  %v3344_v40 = vsub.f32 %v10580_v41, %v3343_v13 }
0x148b   :  { %v3345_v10 = vmul.f32 1.442695, %v3344_v40 }
0x148d   :  { %9516 = vpow2.f32 %v3345_v10 }
0x148f   :  { %v9515_v12 = vpop.eup %9514 }
0x1490   :  { %v3455_v0 = vpop.xlane.xlu0 %3454  ;;  %v3221_v15 = vsel %vm2876_vm7, %v9515_v12, 0.0 }
0x1491   :  { %v3456_v9 = vsub.f32 %v3452_v16, %v3455_v0 }
0x1493   :  { %v3457_v51 = vmul.f32 1.442695, %v3456_v9 }
0x1494   :  { %v3004_v20 = vpop.permute.xlu0 %3003 }
0x1495   :  { %9518 = vpow2.f32 %v3457_v51 }
0x1497   :  { %3115 = vrot.lane.b32.xlu0 %v10489_v61, %s9736_s10  ;;  %v10613_v17 = vpop.eup %9516 }
0x1498   :  { %v3567_v55 = vpop.xlane.xlu1 %3566  ;;  %v3347_v41 = vsel %vm2876_vm7, %v10613_v17, 0.0 }
0x1499   :  { %v3568_v11 = vsub.f32 %v3564_v27, %v3567_v55 }
0x149a   :  { %3227 = vrot.lane.b32.xlu1 %v10489_v61, %s9737_s11 }
0x149b   :  { %v3569_v61 = vmul.f32 1.442695, %v3568_v11 }
0x149c   :  { %v2890_v2 = vpop.permute.xlu1 %2889 }
0x149d   :  { %v2897_v7 = vsel %vm2895_vm8, %v2890_v2, 0  ;;  %9520 = vpow2.f32 %v3569_v61 }
0x149e   :  { %8760 = vmatpush3.bf16.msra.mxu0 %v2897_v7 }
0x149f   :  { %8771 = vmatprep.subr.bf16.mxu0 %v9725_v1  ;;  %v10615_v62 = vpop.eup %9518 }
0x14a0   :  { %v3459_v18 = vsel %vm2876_vm7, %v10615_v62, 0.0 }
0x14a7   :  { %v10619_v16 = vpop.eup %9520 }
0x14a8   :  { %v3571_v19 = vsel %vm2876_vm7, %v10619_v16, 0.0 }
0x14b6   :  { %3222 = vadd.xlane.f32.xlu0 %v3221_v15 }
0x14ba   :  { %3348 = vadd.xlane.f32.xlu0 %v3347_v41 }
0x14be   :  { %3460 = vadd.xlane.f32.xlu1 %v3459_v18  ;;  %3572 = vadd.xlane.f32.xlu0 %v3571_v19 }
0x14c5   :  { %v3679_v21 = vpop.xlane.xlu0 %3678 }
0x14c6   :  { %v3680_v23 = vsub.f32 %v3676_v45, %v3679_v21  ;;  %v3009_v45 = vsel %vm2895_vm8, %v3004_v20, 0 }
0x14c8   :  { %v3681_v27 = vmul.f32 1.442695, %v3680_v23 }
0x14ca   :  { %9522 = vpow2.f32 %v3681_v27 }
0x14cf   :  { %3465 = vrot.lane.b32.xlu1 %v10504_v63, %s9734_s2 }
0x14d3   :  { %3577 = vrot.lane.b32.xlu1 %v10504_v63, %s9736_s10 }
0x14d4   :  { %v10629_v28 = vpop.eup %9522 }
0x14d5   :  { %v3683_v29 = vsel %vm2876_vm7, %v10629_v28, 0.0 }
0x14d6   :  { %3684 = vadd.xlane.f32.xlu0 %v3683_v29 }
0x14d7   :  { %3689 = vrot.lane.b32.xlu1 %v10504_v63, %s9737_s11 }
0x14ec   :  { %3353 = vrot.lane.b32.xlu0 %v10504_v63, %s9735_s7 }
0x1506   :  { %v2885_v3 = vpop.xlane.xlu1 %2884 }
0x1507   :  { %9524 = vrcp.f32 %v2885_v3 }
0x150e   :  { %v2999_v38 = vpop.xlane.xlu0 %2998 }
0x150f   :  { %9526 = vrcp.f32 %v2999_v38 }
0x1511   :  { %v9525_v25 = vpop.eup %9524 }
0x1512   :  { %v2887_v36 = vmul.f32 %v9525_v25, %v10592_v54  ;;  %v3116_v48 = vpop.permute.xlu0 %3115 }
0x1513   :  { %v3121_v50 = vsel %vm2895_vm8, %v3116_v48, 0 }
0x1514   :  { %v2888_v44 = vpack.c.bf16 %v2887_v36, %v2887_v36 }
0x1516   :  { %8762 = vmatmul.mubr.msk.bf16.vlgmr.msra.gmra.mrb[84].mxu0 %vm2891_vm9, %v2888_v44  ;;  %v3111_v46 = vpop.xlane.xlu1 %3110 }
0x1517   :  { %8772 = vmatpush3.bf16.msra.mxu0 %v3009_v45  ;;  %9528 = vrcp.f32 %v3111_v46  ;;  %8773 = vmatprep.mubr.msk.bf16.mxu0 %vm9726_vm0, %v9725_v1 }
0x1518   :  { %8783 = vmatprep.subr.bf16.mxu0 %v9725_v1 }
0x1519   :  { %v9527_v63 = vpop.eup %9526 }
0x151a   :  { %v3001_v47 = vmul.f32 %v9527_v63, %v10596_v60  ;;  %v3228_v54 = vpop.permute.xlu1 %3227 }
0x151b   :  { %v3233_v57 = vsel %vm2895_vm8, %v3228_v54, 0 }
0x151c   :  { %v3002_v32 = vpack.c.bf16 %v3001_v47, %v3001_v47 }
0x151e   :  { %8774 = vmatmul.mubr.msk.bf16.vlgmr.msra.gmra.mrb[88].mxu0 %vm2891_vm9, %v3002_v32 }
0x151f   :  { %8784 = vmatpush3.bf16.msra.mxu0 %v3121_v50  ;;  %8785 = vmatprep.mubr.msk.bf16.mxu0 %vm9726_vm0, %v9725_v1 }
0x1520   :  { %8795 = vmatprep.subr.bf16.mxu0 %v9725_v1 }
0x1521   :  { %v9529_v52 = vpop.eup %9528 }
0x1522   :  { %v3113_v53 = vmul.f32 %v9529_v52, %v10600_v43 }
0x1524   :  { %v3114_v56 = vpack.c.bf16 %v3113_v53, %v3113_v53 }
0x1526   :  { %8786 = vmatmul.mubr.msk.bf16.vlgmr.msra.gmra.mrb[92].mxu0 %vm2891_vm9, %v3114_v56 }
0x1527   :  { %8796 = vmatpush3.bf16.msra.mxu0 %v3233_v57  ;;  %8797 = vmatprep.mubr.msk.bf16.mxu0 %vm9726_vm0, %v9725_v1 }
0x1528   :  { %8807 = vmatprep.subr.bf16.mxu0 %v9725_v1 }
0x1543   :  { %v3223_v58 = vpop.xlane.xlu0 %3222 }
0x1544   :  { %9530 = vrcp.f32 %v3223_v58 }
0x1547   :  { %v3349_v43 = vpop.xlane.xlu0 %3348 }
0x1548   :  { %9532 = vrcp.f32 %v3349_v43 }
0x154b   :  { %v3461_v49 = vpop.xlane.xlu1 %3460  ;;  %v3573_v13 = vpop.xlane.xlu0 %3572 }
0x154c   :  { %9534 = vrcp.f32 %v3461_v49 }
0x154d   :  { %9536 = vrcp.f32 %v3573_v13 }
0x154e   :  { %v9531_v59 = vpop.eup %9530 }
0x154f   :  { %v3225_v60 = vmul.f32 %v9531_v59, %v9515_v12  ;;  %v3466_v8 = vpop.permute.xlu1 %3465  ;;  %v9400_v59 = vld [vmem:[%s11549_s13] sm:$0xff]  }
0x1550   :  { %v3471_v9 = vsel %vm2895_vm8, %v3466_v8, 0  ;;  %8850 = vmatpush3.bf16.msra.mxu1 %v9400_v59 }
0x1551   :  { %v3226_v42 = vpack.c.bf16 %v3225_v60, %v3225_v60  ;;  %8851 = vmatprep.subr.bf16.mxu1 %v9725_v1 }
0x1552   :  { %v9533_v55 = vpop.eup %9532 }
0x1553   :  { %8798 = vmatmul.mubr.msk.bf16.vlgmr.msra.gmra.mrb[96].mxu0 %vm2891_vm9, %v3226_v42  ;;  %v3351_v5 = vmul.f32 %v9533_v55, %v10613_v17  ;;  %v3578_v11 = vpop.permute.xlu1 %3577  ;;  %v9401_v42 = vld [vmem:[%s11549_s13 + $0x8] sm:$0xff]  }
0x1554   :  { %8809 = vmatprep.mubr.msk.bf16.mxu0 %vm9726_vm0, %v9725_v1  ;;  %v3583_v12 = vsel %vm2895_vm8, %v3578_v11, 0  ;;  %8852 = vmatpush3.bf16.msra.mxu1 %v9401_v42  ;;  %v9402_v42 = vld [vmem:[%s11551_s29] sm:$0xff]  }
0x1555   :  { %v3352_v40 = vpack.c.bf16 %v3351_v5, %v3351_v5  ;;  %8865 = vmatprep.subr.bf16.mxu1 %v9725_v1 }
0x1556   :  { %v9535_v0 = vpop.eup %9534 }
0x1557   :  { %v3463_v10 = vmul.f32 %v9535_v0, %v10615_v62  ;;  %v9537_v61 = vpop.eup %9536  ;;  %v3690_v17 = vpop.permute.xlu1 %3689 }
0x1558   :  { %v3575_v15 = vmul.f32 %v9537_v61, %v10619_v16  ;;  %v3695_v62 = vsel %vm2895_vm8, %v3690_v17, 0 }
0x1559   :  { %v3464_v51 = vpack.c.bf16 %v3463_v10, %v3463_v10 }
0x155a   :  { %v3576_v41 = vpack.c.bf16 %v3575_v15, %v3575_v15 }
0x1563   :  { %v3685_v2 = vpop.xlane.xlu0 %3684 }
0x1564   :  { %9538 = vrcp.f32 %v3685_v2 }
0x1567   :  { %v3354_v7 = vpop.permute.xlu0 %3353 }
0x1568   :  { %v3359_v6 = vsel %vm2895_vm8, %v3354_v7, 0 }
0x1569   :  { %8808 = vmatpush3.bf16.msra.mxu0 %v3359_v6 }
0x156a   :  { %8819 = vmatprep.subr.bf16.mxu0 %v9725_v1 }
0x156c   :  { %8810 = vmatmul.mubr.msk.bf16.vlgmr.msra.gmra.mrb[100].mxu0 %vm2891_vm9, %v3352_v40  ;;  %v8038_v40 = vld [vmem:[%s9813_s30 + $0x1] ss:$0 sm:$0xff]  ;;  %s11557_s30 = sld [smem:[#allocation14_spill]] }
0x156d   :  { %8820 = vmatpush3.bf16.msra.mxu0 %v3471_v9  ;;  %8821 = vmatprep.mubr.msk.bf16.mxu0 %vm9726_vm0, %v9725_v1  ;;  %v2698_v0 = vadd.f32 %v8038_v40, %v10564_v22  ;;  %v2701_v9 = vadd.f32 %v8038_v40, %v10566_v24 }
0x156e   :  { %8831 = vmatprep.subr.bf16.mxu0 %v9725_v1  ;;  %v9539_v18 = vpop.eup %9538 }
0x156f   :  { %v3687_v19 = vmul.f32 %v9539_v18, %v10629_v28  ;;  %v2704_v10 = vadd.f32 %v2698_v0, %v10456_v33  ;;  %v2705_v11 = vadd.f32 %v2701_v9, %v10458_v35 }
0x1571   :  { %v3688_v20 = vpack.c.bf16 %v3687_v19, %v3687_v19  ;;  %v2709_v61 = vsel %vm166_vm1, %v2705_v11, 0.0 }
0x1574   :  { %8822 = vmatmul.mubr.msk.bf16.vlgmr.msra.gmra.mrb[104].mxu0 %vm2891_vm9, %v3464_v51  ;;  %v2706_v51 = vsel %vm166_vm1, %v2704_v10, 0.0 }
0x1575   :  { %8832 = vmatpush3.bf16.msra.mxu0 %v3583_v12  ;;  %8833 = vmatprep.mubr.msk.bf16.mxu0 %vm9726_vm0, %v9725_v1 }
0x1576   :  { %8843 = vmatprep.subr.bf16.mxu0 %v9725_v1 }
0x157c   :  { %8834 = vmatmul.mubr.msk.bf16.vlgmr.msra.gmra.mrb[108].mxu0 %vm2891_vm9, %v3576_v41 }
0x157d   :  { %8844 = vmatpush3.bf16.msra.mxu0 %v3695_v62  ;;  %8845 = vmatprep.mubr.msk.bf16.mxu0 %vm9726_vm0, %v9725_v1 }
0x157e   :  { %8857 = vmatprep.subr.bf16.mxu0 %v9725_v1 }
0x1584   :  { %8846 = vmatmul.mubr.msk.bf16.vlgmr.msra.gmra.mrb[112].mxu0 %vm2891_vm9, %v3688_v20 }
0x1585   :  { %8861 = vmatprep.mubr.msk.bf16.mxu0 %vm9726_vm0, %v9725_v1 }
0x15e9   :  { %v2933_v16 = vpop.f32.mrb[84].mxu0 }
0x15ea   :  { %v8763_v21 = vpop.f32.mrb[85].mxu0 }
0x15eb   :  { %v2936_v23 = vpop.f32.mrb[86].mxu0 }
0x15ec   :  { %v8764_v27 = vpop.f32.mrb[87].mxu0 }
0x15f1   :  { %v3045_v29 = vpop.f32.mrb[88].mxu0 }
0x15f2   :  { %v8775_v3 = vpop.f32.mrb[89].mxu0 }
0x15f3   :  { %v3048_v38 = vpop.f32.mrb[90].mxu0 }
0x15f4   :  { %v8776_v25 = vpop.f32.mrb[91].mxu0 }
0x15f9   :  { %v3157_v36 = vpop.f32.mrb[92].mxu0 }
0x15fa   :  { %v8787_v44 = vpop.f32.mrb[93].mxu0 }
0x15fb   :  { %v3160_v28 = vpop.f32.mrb[94].mxu0 }
0x15fc   :  { %v8788_v45 = vpop.f32.mrb[95].mxu0 }
0x15fd   :  { %v8064_v45 = vld [vmem:[%s11550_s25] ss:$0 sm:$0xff] }
0x1626   :  { %v3269_v46 = vpop.f32.mrb[96].mxu0 }
0x1627   :  { %v8799_v63 = vpop.f32.mrb[97].mxu0 }
0x1628   :  { %v3272_v47 = vpop.f32.mrb[98].mxu0 }
0x1629   :  { %v8800_v48 = vpop.f32.mrb[99].mxu0 }
0x163f   :  { %v3395_v32 = vpop.f32.mrb[100].mxu0 }
0x1640   :  { %v8811_v50 = vpop.f32.mrb[101].mxu0 }
0x1641   :  { %v3398_v52 = vpop.f32.mrb[102].mxu0 }
0x1642   :  { %v8812_v53 = vpop.f32.mrb[103].mxu0 }
0x1647   :  { %v3507_v54 = vpop.f32.mrb[104].mxu0 }
0x1648   :  { %v9338_v56 = vpack.i.bf16 %v3045_v29, %v3507_v54  ;;  %v8823_v57 = vpop.f32.mrb[105].mxu0 }
0x1649   :  { %v3510_v58 = vpop.f32.mrb[106].mxu0 }
0x164a   :  { %9339 = vrot.lane.b32.xlu1 %v9338_v56, %s11532_s15  ;;  %v8824_v60 = vpop.f32.mrb[107].mxu0 }
0x164f   :  { %v3619_v43 = vpop.f32.mrb[108].mxu0 }
0x1650   :  { %v9343_v49 = vpack.i.bf16 %v3157_v36, %v3619_v43  ;;  %v8835_v13 = vpop.f32.mrb[109].mxu0  ;;  %v9403_v43 = vld [vmem:[%s11551_s29 + $0x8] sm:$0xff]  }
0x1651   :  { %v3622_v55 = vpop.f32.mrb[110].mxu0 }
0x1652   :  { %9344 = vrot.lane.b32.xlu1 %v9343_v49, %s11530_s16  ;;  %v8836_v2 = vpop.f32.mrb[111].mxu0 }
0x1656   :  { %3284 = vrot.lane.b32.xlu1 %v3269_v46, %s11528_s18 }
0x1657   :  { %v3731_v5 = vpop.f32.mrb[112].mxu0 }
0x1658   :  { %3746 = vrot.lane.b32.xlu0 %v3731_v5, %s11528_s18  ;;  %v8847_v7 = vpop.f32.mrb[113].mxu0 }
0x1659   :  { %v3734_v6 = vpop.f32.mrb[114].mxu0 }
0x165a   :  { %v8848_v8 = vpop.f32.mrb[115].mxu0 }
0x1677   :  { %2707 = vadd.xlane.f32.xlu0 %v2706_v51 }
0x167a   :  { %2710 = vadd.xlane.f32.xlu1 %v2709_v61 }
0x16bc   :  { %v9340_v12 = vpop.permute.xlu1 %9339 }
0x16bd   :  { %v9342_v17 = vunpack.i.h.bf16 %v9340_v12  ;;  %v9341_v41 = vunpack.i.l.bf16 %v9340_v12  ;;  %v2735_v12 = vrot.slane %v10450_v4, %v10208_v26 }
0x16bf   :  { %v3287_v22 = vsel %vm215_vm2, %v2933_v16, %v9342_v17  ;;  %v3749_v24 = vsel %vm215_vm2, %v3395_v32, %v9341_v41 }
0x16c4   :  { %v9345_v15 = vpop.permute.xlu1 %9344 }
0x16c5   :  { %v9347_v18 = vunpack.i.h.bf16 %v9345_v15  ;;  %v9346_v62 = vunpack.i.l.bf16 %v9345_v15 }
0x16c7   :  { %v3288_v33 = vsel %vm674_vm4, %v3287_v22, %v9347_v18  ;;  %v3750_v35 = vsel %vm674_vm4, %v3749_v24, %v9346_v62  ;;  %v2741_v62 = vrot.slane %v10450_v4, %v10213_v14 }
0x16c8   :  { %v3285_v19 = vpop.permute.xlu1 %3284 }
0x16c9   :  { %v3289_v27 = vsel %vm676_vm5, %v3288_v33, %v3285_v19 }
0x16ca   :  { %v3747_v20 = vpop.permute.xlu0 %3746 }
0x16cb   :  { %v3751_v21 = vsel %vm676_vm5, %v3750_v35, %v3747_v20  ;;  %v9404_v35 = vld [vmem:[%s11552_s3] sm:$0xff]   ;;  %v9405_v20 = vld [vmem:[%s11552_s3 + $0x8] sm:$0xff]  }
0x16cc   :  { %v3753_v23 = vrot.slane %v3751_v21, 2  ;;  %8858 = vmatpush3.bf16.msra.mxu0 %v9404_v35 }
0x16cd   :  { %8859 = vmatprep.subr.bf16.mxu0 %v9725_v1 }
0x16ce   :  { %v3756_v29 = vsel %vm3755_vm10, %v3289_v27, %v3753_v23 }
0x16cf   :  { %v3757_v3 = vpack.c.bf16 %v3753_v23, %v3756_v29 }
0x16d0   :  { %8860 = vmatpush3.bf16.msra.mxu0 %v9405_v20  ;;  %v2748_v20 = vld [vmem:[%s11555_s19] sm:$0x3f] }
0x16d1   :  { %8854 = vmatmul.mubr.msk.bf16.vlgmr.msra.gmra.mrb[112].mxu1 %vm166_vm1, %v3757_v3  ;;  %8873 = vmatprep.subr.bf16.mxu0 %v9725_v1 }
0x16d2   :  { %8869 = vmatprep.mubr.msk.bf16.mxu1 %vm9726_vm0, %v9725_v1  ;;  %8866 = vmatpush3.bf16.msra.mxu1 %v9402_v42  ;;  %v8068_v42 = vld [vmem:[%s11554_s14] ss:$0 sm:$0xff] }
0x16d3   :  { %8867 = vmatprep.subr.bf16.mxu1 %v9725_v1 }
0x16d6   :  { %8868 = vmatpush3.bf16.msra.mxu1 %v9403_v43 }
0x16d7   :  { %8879 = vmatprep.subr.bf16.mxu1 %v9725_v1 }
0x1704   :  { %v2708_v16 = vpop.xlane.xlu0 %2707 }
0x1705   :  { %v2712_v38 = vmul.f32 0.03125, %v2708_v16  ;;  %v10735_v16 = vld [vmem:[%s9893_s27] sm:$0x3f] }
0x1707   :  { %v2714_v25 = vsub.f32 %v2704_v10, %v2712_v38  ;;  %v2711_v28 = vpop.xlane.xlu1 %2710 }
0x1708   :  { %v2713_v63 = vmul.f32 0.03125, %v2711_v28 }
0x1709   :  { %v2716_v36 = vmul.f32 %v2714_v25, %v2714_v25 }
0x170a   :  { %v2715_v54 = vsub.f32 %v2705_v11, %v2713_v63 }
0x170b   :  { %v2718_v44 = vsel %vm166_vm1, %v2716_v36, 0.0 }
0x170c   :  { %2719 = vadd.xlane.f32.xlu1 %v2718_v44  ;;  %v2717_v59 = vmul.f32 %v2715_v54, %v2715_v54 }
0x170e   :  { %v2721_v60 = vsel %vm166_vm1, %v2717_v59, 0.0 }
0x17a4   :  { %v3813_v46 = vpop.f32.mrb[112].mxu1 }
0x17a5   :  { %v3814_v47 = vadd.f32 %v8064_v45, %v3813_v46  ;;  %v8855_v48 = vpop.f32.mrb[113].mxu1  ;;  %v3858_v46 = vrot.slane %v10735_v16, %v10183_v34 }
0x17a6   :  { %v3816_v32 = vpop.f32.mrb[114].mxu1 }
0x17a7   :  { %v3820_v50 = vadd.f32 %v3814_v47, %v10468_v37  ;;  %v3817_v52 = vadd.f32 %v8064_v45, %v3816_v32  ;;  %v8856_v53 = vpop.f32.mrb[115].mxu1  ;;  %v2720_v37 = vpop.xlane.xlu1 %2719 }
0x17a9   :  { %v3821_v56 = vadd.f32 %v3817_v52, %v10471_v39  ;;  %v3822_v57 = vsel %vm166_vm1, %v3820_v50, 0.0  ;;  %v2724_v39 = vmul.f32 0.03125, %v2720_v37 }
0x17aa   :  { %3823 = vadd.xlane.f32.xlu0 %v3822_v57 }
0x17ab   :  { %v3826_v58 = vsel %vm3825_vm11, %v3821_v56, 0.0  ;;  %v2726_v55 = vadd.f32 1e-05, %v2724_v39 }
0x17ad   :  { %9540 = vrsqrt.f32 %v2726_v55 }
0x17ae   :  { %3827 = vadd.xlane.f32.xlu0 %v3826_v58 }
0x17b2   :  { %2722 = vadd.xlane.f32.xlu0 %v2721_v60 }
0x17b7   :  { %v9541_v61 = vpop.eup %9540 }
0x17b8   :  { %v2730_v15 = vmul.f32 %v9541_v61, %v2714_v25  ;;  %v3852_v25 = vrot.slane %v10735_v16, %v10175_v31 }
0x17ba   :  { %v2736_v41 = vmul.f32 %v2735_v12, %v2730_v15 }
0x17bc   :  { %v2742_v24 = vadd.f32 %v2741_v62, %v2736_v41 }
0x1837   :  { %v3824_v49 = vpop.xlane.xlu0 %3823 }
0x1838   :  { %v3829_v13 = vmul.f32 0.03125, %v3824_v49 }
0x183a   :  { %v3831_v2 = vsub.f32 %v3820_v50, %v3829_v13  ;;  %v8072_v50 = vld [vmem:[%s11553_s8] ss:$0 sm:$0xff] }
0x183b   :  { %v3828_v5 = vpop.xlane.xlu0 %3827 }
0x183c   :  { %v3830_v7 = vmul.f32 0.03125, %v3828_v5  ;;  %v3833_v6 = vmul.f32 %v3831_v2, %v3831_v2 }
0x183e   :  { %v3832_v8 = vsub.f32 %v3821_v56, %v3830_v7  ;;  %v3835_v40 = vsel %vm166_vm1, %v3833_v6, 0.0 }
0x183f   :  { %3836 = vadd.xlane.f32.xlu1 %v3835_v40  ;;  %v2723_v0 = vpop.xlane.xlu0 %2722 }
0x1840   :  { %v2725_v9 = vmul.f32 0.03125, %v2723_v0  ;;  %v3834_v10 = vmul.f32 %v3832_v8, %v3832_v8 }
0x1842   :  { %v2727_v11 = vadd.f32 1e-05, %v2725_v9  ;;  %v3838_v51 = vsel %vm3825_vm11, %v3834_v10, 0.0 }
0x1843   :  { %3839 = vadd.xlane.f32.xlu0 %v3838_v51 }
0x1844   :  { %9542 = vrsqrt.f32 %v2727_v11 }
0x184e   :  { %v9543_v17 = vpop.eup %9542 }
0x184f   :  { %v2731_v18 = vmul.f32 %v9543_v17, %v2715_v54 }
0x1851   :  { %v2737_v22 = vmul.f32 %v2735_v12, %v2731_v18 }
0x1853   :  { %v2743_v19 = vadd.f32 %v2741_v62, %v2737_v22 }
0x1855   :  { %v10724_v33 = vpack.c.bf16 %v2743_v19, %v2742_v24 }
0x1857   :  { %8870 = vmatmul.mubr.msk.bf16.vlgmr.msra.gmra.mrb[116].mxu1 %vm166_vm1, %v10724_v33 }
0x1858   :  { %8881 = vmatprep.mubr.msk.bf16.mxu1 %vm9726_vm0, %v9725_v1 }
0x18cc   :  { %v3837_v4 = vpop.xlane.xlu1 %3836 }
0x18cd   :  { %v3841_v21 = vmul.f32 0.03125, %v3837_v4 }
0x18cf   :  { %v3843_v23 = vadd.f32 1e-05, %v3841_v21 }
0x18d0   :  { %v3840_v27 = vpop.xlane.xlu0 %3839 }
0x18d1   :  { %9544 = vrsqrt.f32 %v3843_v23  ;;  %v3842_v29 = vmul.f32 0.03125, %v3840_v27 }
0x18d3   :  { %v3844_v3 = vadd.f32 1e-05, %v3842_v29 }
0x18d5   :  { %9546 = vrsqrt.f32 %v3844_v3 }
0x18db   :  { %v9545_v38 = vpop.eup %9544 }
0x18dc   :  { %v3847_v36 = vmul.f32 %v9545_v38, %v3831_v2 }
0x18de   :  { %v3853_v28 = vmul.f32 %v3852_v25, %v3847_v36 }
0x18df   :  { %v9547_v44 = vpop.eup %9546 }
0x18e0   :  { %v3848_v45 = vmul.f32 %v9547_v44, %v3832_v8  ;;  %v10741_v47 = vadd.f32 %v3858_v46, %v3853_v28 }
0x18e2   :  { %v3854_v63 = vmul.f32 %v3852_v25, %v3848_v45 }
0x18e4   :  { %v10743_v48 = vadd.f32 %v3858_v46, %v3854_v63 }
0x18e6   :  { %v3876_v32 = vpack.c.bf16 %v10743_v48, %v10741_v47 }
0x18e8   :  { %8862 = vmatmul.mubr.msk.bf16.vlgmr.msra.gmra.mrb[116].mxu0 %vm166_vm1, %v3876_v32 }
0x18e9   :  { %8875 = vmatprep.mubr.msk.bf16.mxu0 %vm9726_vm0, %v9725_v1 }
0x192a   :  { %v3995_v52 = vpop.f32.mrb[116].mxu1 }
0x192b   :  { %v8871_v53 = vpop.f32.mrb[117].mxu1  ;;  %v3996_v56 = vadd.f32 %v8072_v50, %v3995_v52 }
0x192c   :  { %v3998_v54 = vpop.f32.mrb[118].mxu1 }
0x192d   :  { %v3999_v57 = vadd.f32 %v8072_v50, %v3998_v54  ;;  %v8872_v58 = vpop.f32.mrb[119].mxu1 }
0x192f   :  { %v10751_v59 = vpack.c.bf16 %v3999_v57, %v3996_v56 }
0x1931   :  { %4117 = vrot.lane.b32.xlu1 %v10751_v59, %s9727_s0  ;;  %v4008_v60 = vsel %vm215_vm2, %v10751_v59, 0  ;;  %v10772_v6 = vrot.slane %v10751_v59, 4 }
0x1932   :  { %8874 = vmatpush3.bf16.xpose.msra.mxu0 %v4008_v60 }
0x1933   :  { %8885 = vmatprep.subr.bf16.mxu0 %v9725_v1  ;;  %v4472_v12 = vsel %vm215_vm2, %v10772_v6, 0 }
0x1935   :  { %4229 = vrot.lane.b32.xlu1 %v10751_v59, %s9732_s28 }
0x19a3   :  { %v4118_v2 = vpop.permute.xlu1 %4117 }
0x19a4   :  { %v4123_v7 = vsel %vm215_vm2, %v4118_v2, 0 }
0x19a7   :  { %v4230_v40 = vpop.permute.xlu1 %4229 }
0x19a8   :  { %v4235_v9 = vsel %vm215_vm2, %v4230_v40, 0 }
0x19bb   :  { %v3932_v43 = vpop.f32.mrb[116].mxu0 }
0x19bc   :  { %v8863_v37 = vpop.f32.mrb[117].mxu0  ;;  %v3933_v49 = vadd.f32 %v8068_v42, %v3932_v43 }
0x19bd   :  { %v3935_v39 = vpop.f32.mrb[118].mxu0 }
0x19be   :  { %v3936_v13 = vadd.f32 %v8068_v42, %v3935_v39  ;;  %v8864_v55 = vpop.f32.mrb[119].mxu0 }
0x19c0   :  { %v4002_v5 = vpack.c.bf16 %v3936_v13, %v3933_v49  ;;  %v2749_v13 = vld [vmem:[%s11555_s19 + $0x8] sm:$0x3f] }
0x19c2   :  { %4227 = vrot.lane.b32.xlu1 %v4002_v5, %s9732_s28  ;;  %4115 = vrot.lane.b32.xlu0 %v4002_v5, %s9727_s0  ;;  %v4466_v8 = vrot.slane %v4002_v5, 3 }
0x19c3   :  { %8876 = vmatmul.mubr.msk.bf16.vlgmr.msra.gmra.mrb[120].mxu0 %vm215_vm2, %v4002_v5 }
0x19c4   :  { %8886 = vmatpush3.bf16.xpose.msra.mxu0 %v4123_v7  ;;  %8887 = vmatprep.mubr.msk.bf16.mxu0 %vm9726_vm0, %v9725_v1 }
0x19c5   :  { %8897 = vmatprep.subr.bf16.mxu0 %v9725_v1 }
0x19c6   :  { %4339 = vrot.lane.b32.xlu1 %v4002_v5, %s9733_s1  ;;  %4341 = vrot.lane.b32.xlu0 %v10751_v59, %s9733_s1 }
0x19ca   :  { %4578 = vrot.lane.b32.xlu0 %v10772_v6, %s9727_s0  ;;  %4576 = vrot.lane.b32.xlu1 %v4466_v8, %s9727_s0 }
0x19ce   :  { %4690 = vrot.lane.b32.xlu0 %v10772_v6, %s9732_s28  ;;  %4688 = vrot.lane.b32.xlu1 %v4466_v8, %s9732_s28 }
0x19d2   :  { %4802 = vrot.lane.b32.xlu0 %v10772_v6, %s9733_s1  ;;  %4800 = vrot.lane.b32.xlu1 %v4466_v8, %s9733_s1 }
0x1a34   :  { %v4116_v0 = vpop.permute.xlu0 %4115  ;;  %v4228_v11 = vpop.permute.xlu1 %4227 }
0x1a35   :  { %8888 = vmatmul.mubr.msk.bf16.vlgmr.msra.gmra.mrb[124].mxu0 %vm215_vm2, %v4116_v0 }
0x1a36   :  { %8898 = vmatpush3.bf16.xpose.msra.mxu0 %v4235_v9  ;;  %8899 = vmatprep.mubr.msk.bf16.mxu0 %vm9726_vm0, %v9725_v1 }
0x1a37   :  { %8909 = vmatprep.subr.bf16.mxu0 %v9725_v1 }
0x1a38   :  { %v4342_v10 = vpop.permute.xlu0 %4341  ;;  %v4340_v61 = vpop.permute.xlu1 %4339 }
0x1a39   :  { %v4347_v51 = vsel %vm215_vm2, %v4342_v10, 0 }
0x1a3c   :  { %v4579_v15 = vpop.permute.xlu0 %4578  ;;  %v4577_v18 = vpop.permute.xlu1 %4576 }
0x1a3d   :  { %8900 = vmatmul.mubr.msk.bf16.vlgmr.msra.gmra.mrb[128].mxu0 %vm215_vm2, %v4228_v11  ;;  %v4584_v17 = vsel %vm215_vm2, %v4579_v15, 0 }
0x1a3e   :  { %8910 = vmatpush3.bf16.xpose.msra.mxu0 %v4347_v51  ;;  %8911 = vmatprep.mubr.msk.bf16.mxu0 %vm9726_vm0, %v9725_v1 }
0x1a3f   :  { %8921 = vmatprep.subr.bf16.mxu0 %v9725_v1 }
0x1a40   :  { %v4691_v41 = vpop.permute.xlu0 %4690  ;;  %v4689_v24 = vpop.permute.xlu1 %4688 }
0x1a41   :  { %v4696_v62 = vsel %vm215_vm2, %v4691_v41, 0 }
0x1a44   :  { %v4803_v22 = vpop.permute.xlu0 %4802  ;;  %v4801_v35 = vpop.permute.xlu1 %4800 }
0x1a45   :  { %8912 = vmatmul.mubr.msk.bf16.vlgmr.msra.gmra.mrb[132].mxu0 %vm215_vm2, %v4340_v61  ;;  %v4808_v19 = vsel %vm215_vm2, %v4803_v22, 0 }
0x1a46   :  { %8922 = vmatpush3.bf16.xpose.msra.mxu0 %v4472_v12  ;;  %8923 = vmatprep.mubr.msk.bf16.mxu0 %vm9726_vm0, %v9725_v1 }
0x1a47   :  { %8933 = vmatprep.subr.bf16.mxu0 %v9725_v1 }
0x1a4d   :  { %8924 = vmatmul.mubr.msk.bf16.vlgmr.msra.gmra.mrb[136].mxu0 %vm215_vm2, %v4466_v8 }
0x1a4e   :  { %8934 = vmatpush3.bf16.xpose.msra.mxu0 %v4584_v17  ;;  %8935 = vmatprep.mubr.msk.bf16.mxu0 %vm9726_vm0, %v9725_v1 }
0x1a4f   :  { %8945 = vmatprep.subr.bf16.mxu0 %v9725_v1 }
0x1a55   :  { %8936 = vmatmul.mubr.msk.bf16.vlgmr.msra.gmra.mrb[140].mxu0 %vm215_vm2, %v4577_v18 }
0x1a56   :  { %8946 = vmatpush3.bf16.xpose.msra.mxu0 %v4696_v62  ;;  %8947 = vmatprep.mubr.msk.bf16.mxu0 %vm9726_vm0, %v9725_v1 }
0x1a57   :  { %8957 = vmatprep.subr.bf16.mxu0 %v9725_v1 }
0x1a5d   :  { %8948 = vmatmul.mubr.msk.bf16.vlgmr.msra.gmra.mrb[144].mxu0 %vm215_vm2, %v4689_v24 }
0x1a5e   :  { %8958 = vmatpush3.bf16.xpose.msra.mxu0 %v4808_v19  ;;  %8959 = vmatprep.mubr.msk.bf16.mxu0 %vm9726_vm0, %v9725_v1 }
0x1a5f   :  { %8969 = vmatprep.subr.bf16.mxu0 %v9725_v1 }
0x1a65   :  { %8960 = vmatmul.mubr.msk.bf16.vlgmr.msra.gmra.mrb[148].mxu0 %vm215_vm2, %v4801_v35 }
0x1a66   :  { %8973 = vmatprep.mubr.msk.bf16.mxu0 %vm9726_vm0, %v9725_v1 }
0x1a96   :  { %v4044_v4 = vpop.f32.mrb[120].mxu0 }
0x1a97   :  { %v4050_v21 = vmul.f32 0.35355338, %v4044_v4  ;;  %v8877_v23 = vpop.f32.mrb[121].mxu0 }
0x1a98   :  { %v4047_v27 = vpop.f32.mrb[122].mxu0 }
0x1a99   :  { %v4051_v29 = vadd.f32 %v4050_v21, %v2748_v20  ;;  %v8878_v3 = vpop.f32.mrb[123].mxu0 }
0x1a9b   :  { %v4053_v38 = vsel %vm4052_vm12, %v4051_v29, -inf }
0x1a9c   :  { %4054 = vmax.xlane.f32.xlu0 %v4053_v38 }
0x1b08   :  { %v4159_v25 = vpop.f32.mrb[124].mxu0 }
0x1b09   :  { %v4165_v36 = vmul.f32 0.35355338, %v4159_v25  ;;  %v8889_v44 = vpop.f32.mrb[125].mxu0 }
0x1b0a   :  { %v4162_v28 = vpop.f32.mrb[126].mxu0 }
0x1b0b   :  { %v10819_v45 = vadd.f32 %v4165_v36, %v2748_v20  ;;  %v8890_v46 = vpop.f32.mrb[127].mxu0 }
0x1b0d   :  { %v4167_v63 = vsel %vm4052_vm12, %v10819_v45, -inf }
0x1b0e   :  { %4168 = vmax.xlane.f32.xlu1 %v4167_v63 }
0x1b10   :  { %v4271_v32 = vpop.f32.mrb[128].mxu0 }
0x1b11   :  { %v4277_v50 = vmul.f32 0.35355338, %v4271_v32  ;;  %v8901_v52 = vpop.f32.mrb[129].mxu0 }
0x1b12   :  { %v4274_v53 = vpop.f32.mrb[130].mxu0 }
0x1b13   :  { %v4278_v54 = vadd.f32 %v4277_v50, %v2748_v20  ;;  %v8902_v56 = vpop.f32.mrb[131].mxu0 }
0x1b15   :  { %v4279_v57 = vsel %vm4052_vm12, %v4278_v54, -inf }
0x1b16   :  { %4280 = vmax.xlane.f32.xlu0 %v4279_v57 }
0x1b18   :  { %v4383_v58 = vpop.f32.mrb[132].mxu0 }
0x1b19   :  { %v4389_v60 = vmul.f32 0.35355338, %v4383_v58  ;;  %v8913_v42 = vpop.f32.mrb[133].mxu0 }
0x1b1a   :  { %v4386_v43 = vpop.f32.mrb[134].mxu0 }
0x1b1b   :  { %v10824_v37 = vadd.f32 %v4389_v60, %v2748_v20  ;;  %v8914_v39 = vpop.f32.mrb[135].mxu0 }
0x1b1d   :  { %v4391_v49 = vsel %vm4052_vm12, %v10824_v37, -inf }
0x1b1e   :  { %4392 = vmax.xlane.f32.xlu0 %v4391_v49 }
0x1b20   :  { %v4508_v55 = vpop.f32.mrb[136].mxu0 }
0x1b21   :  { %v4514_v2 = vmul.f32 0.35355338, %v4508_v55  ;;  %v8925_v5 = vpop.f32.mrb[137].mxu0 }
0x1b22   :  { %v4511_v7 = vpop.f32.mrb[138].mxu0 }
0x1b23   :  { %v10829_v8 = vadd.f32 %v4514_v2, %v2749_v13  ;;  %v8926_v40 = vpop.f32.mrb[139].mxu0 }
0x1b25   :  { %v4516_v0 = vsel %vm4052_vm12, %v10829_v8, -inf }
0x1b26   :  { %4517 = vmax.xlane.f32.xlu1 %v4516_v0 }
0x1b28   :  { %v4620_v9 = vpop.f32.mrb[140].mxu0 }
0x1b29   :  { %v4626_v10 = vmul.f32 0.35355338, %v4620_v9  ;;  %v8937_v11 = vpop.f32.mrb[141].mxu0  ;;  %v4055_v23 = vpop.xlane.xlu0 %4054 }
0x1b2a   :  { %v4623_v51 = vpop.f32.mrb[142].mxu0  ;;  %v4056_v27 = vsub.f32 %v4051_v29, %v4055_v23 }
0x1b2b   :  { %v4627_v61 = vadd.f32 %v4626_v10, %v2749_v13  ;;  %v8938_v12 = vpop.f32.mrb[143].mxu0 }
0x1b2c   :  { %v4057_v3 = vmul.f32 1.442695, %v4056_v27 }
0x1b2d   :  { %v4628_v15 = vsel %vm4052_vm12, %v4627_v61, -inf }
0x1b2e   :  { %4629 = vmax.xlane.f32.xlu0 %v4628_v15  ;;  %9548 = vpow2.f32 %v4057_v3 }
0x1b30   :  { %v4732_v17 = vpop.f32.mrb[144].mxu0 }
0x1b31   :  { %v4738_v41 = vmul.f32 0.35355338, %v4732_v17  ;;  %v8949_v18 = vpop.f32.mrb[145].mxu0 }
0x1b32   :  { %v4735_v62 = vpop.f32.mrb[146].mxu0 }
0x1b33   :  { %v4739_v22 = vadd.f32 %v4738_v41, %v2749_v13  ;;  %v8950_v24 = vpop.f32.mrb[147].mxu0 }
0x1b35   :  { %v4740_v19 = vsel %vm4052_vm12, %v4739_v22, -inf }
0x1b36   :  { %4741 = vmax.xlane.f32.xlu1 %v4740_v19 }
0x1b38   :  { %v4844_v35 = vpop.f32.mrb[148].mxu0  ;;  %v10840_v44 = vpop.eup %9548 }
0x1b39   :  { %v8961_v20 = vpop.f32.mrb[149].mxu0  ;;  %v4850_v38 = vmul.f32 0.35355338, %v4844_v35  ;;  %v4059_v28 = vsel %vm4052_vm12, %v10840_v44, 0.0 }
0x1b3a   :  { %v4847_v4 = vpop.f32.mrb[150].mxu0 }
0x1b3b   :  { %v8962_v21 = vpop.f32.mrb[151].mxu0  ;;  %v4851_v25 = vadd.f32 %v4850_v38, %v2749_v13 }
0x1b3d   :  { %v4852_v36 = vsel %vm4052_vm12, %v4851_v25, -inf }
0x1b44   :  { %4179 = vrot.lane.b32.xlu0 %v10751_v59, %s9730_s23 }
0x1b47   :  { %4066 = vrot.lane.b32.xlu1 %v10751_v59, %s9728_s5 }
0x1b63   :  { %4853 = vmax.xlane.f32.xlu0 %v4852_v36 }
0x1b6b   :  { %4060 = vadd.xlane.f32.xlu1 %v4059_v28 }
0x1b9b   :  { %v4169_v46 = vpop.xlane.xlu1 %4168 }
0x1b9c   :  { %v4170_v63 = vsub.f32 %v10819_v45, %v4169_v46 }
0x1b9e   :  { %v4171_v32 = vmul.f32 1.442695, %v4170_v63 }
0x1ba0   :  { %9550 = vpow2.f32 %v4171_v32 }
0x1ba3   :  { %v4281_v50 = vpop.xlane.xlu0 %4280 }
0x1ba4   :  { %v4282_v29 = vsub.f32 %v4278_v54, %v4281_v50 }
0x1ba6   :  { %v4283_v52 = vmul.f32 1.442695, %v4282_v29 }
0x1ba8   :  { %9552 = vpow2.f32 %v4283_v52 }
0x1baa   :  { %v10845_v53 = vpop.eup %9550 }
0x1bab   :  { %v4173_v56 = vsel %vm4052_vm12, %v10845_v53, 0.0  ;;  %v4393_v42 = vpop.xlane.xlu0 %4392 }
0x1bac   :  { %4174 = vadd.xlane.f32.xlu0 %v4173_v56  ;;  %v4394_v39 = vsub.f32 %v10824_v37, %v4393_v42 }
0x1bae   :  { %v4395_v49 = vmul.f32 1.442695, %v4394_v39 }
0x1bb0   :  { %9554 = vpow2.f32 %v4395_v49 }
0x1bb2   :  { %v10849_v57 = vpop.eup %9552 }
0x1bb3   :  { %v4285_v58 = vsel %vm4052_vm12, %v10849_v57, 0.0  ;;  %v4518_v60 = vpop.xlane.xlu1 %4517 }
0x1bb4   :  { %4286 = vadd.xlane.f32.xlu1 %v4285_v58  ;;  %v4519_v13 = vsub.f32 %v10829_v8, %v4518_v60 }
0x1bb6   :  { %v4520_v5 = vmul.f32 1.442695, %v4519_v13 }
0x1bb8   :  { %9556 = vpow2.f32 %v4520_v5 }
0x1bba   :  { %v9555_v0 = vpop.eup %9554 }
0x1bbb   :  { %v4630_v55 = vpop.xlane.xlu0 %4629  ;;  %v4397_v9 = vsel %vm4052_vm12, %v9555_v0, 0.0 }
0x1bbc   :  { %v4631_v2 = vsub.f32 %v4627_v61, %v4630_v55 }
0x1bbe   :  { %v4632_v40 = vmul.f32 1.442695, %v4631_v2 }
0x1bbf   :  { %v4180_v12 = vpop.permute.xlu0 %4179 }
0x1bc0   :  { %9558 = vpow2.f32 %v4632_v40  ;;  %v4185_v20 = vsel %vm281_vm3, %v4180_v12, 0 }
0x1bc2   :  { %4291 = vrot.lane.b32.xlu0 %v10751_v59, %s9729_s22  ;;  %v10862_v10 = vpop.eup %9556 }
0x1bc3   :  { %v4742_v45 = vpop.xlane.xlu1 %4741  ;;  %v4522_v8 = vsel %vm4052_vm12, %v10862_v10, 0.0 }
0x1bc4   :  { %v4743_v7 = vsub.f32 %v4739_v22, %v4742_v45 }
0x1bc5   :  { %4403 = vrot.lane.b32.xlu1 %v10751_v59, %s9731_s26 }
0x1bc6   :  { %v4744_v59 = vmul.f32 1.442695, %v4743_v7 }
0x1bc7   :  { %v4067_v54 = vpop.permute.xlu1 %4066 }
0x1bc8   :  { %v4072_v43 = vsel %vm281_vm3, %v4067_v54, 0  ;;  %9560 = vpow2.f32 %v4744_v59 }
0x1bc9   :  { %8880 = vmatpush3.bf16.msra.mxu1 %v4072_v43 }
0x1bca   :  { %8891 = vmatprep.subr.bf16.mxu1 %v9725_v1  ;;  %v10864_v37 = vpop.eup %9558 }
0x1bcb   :  { %v4634_v51 = vsel %vm4052_vm12, %v10864_v37, 0.0 }
0x1bd2   :  { %v10868_v11 = vpop.eup %9560 }
0x1bd3   :  { %v4746_v61 = vsel %vm4052_vm12, %v10868_v11, 0.0 }
0x1be1   :  { %4398 = vadd.xlane.f32.xlu0 %v4397_v9 }
0x1be5   :  { %4523 = vadd.xlane.f32.xlu0 %v4522_v8 }
0x1be9   :  { %4635 = vadd.xlane.f32.xlu1 %v4634_v51  ;;  %4747 = vadd.xlane.f32.xlu0 %v4746_v61 }
0x1bf0   :  { %v4854_v15 = vpop.xlane.xlu0 %4853 }
0x1bf1   :  { %v4855_v17 = vsub.f32 %v4851_v25, %v4854_v15 }
0x1bf3   :  { %v4856_v41 = vmul.f32 1.442695, %v4855_v17 }
0x1bf5   :  { %9562 = vpow2.f32 %v4856_v41 }
0x1bf8   :  { %v4061_v18 = vpop.xlane.xlu1 %4060 }
0x1bf9   :  { %9564 = vrcp.f32 %v4061_v18 }
0x1bfa   :  { %4640 = vrot.lane.b32.xlu1 %v10772_v6, %s9730_s23 }
0x1bfe   :  { %4752 = vrot.lane.b32.xlu1 %v10772_v6, %s9729_s22 }
0x1bff   :  { %v10878_v62 = vpop.eup %9562 }
0x1c00   :  { %v4858_v22 = vsel %vm4052_vm12, %v10878_v62, 0.0 }
0x1c01   :  { %4859 = vadd.xlane.f32.xlu0 %v4858_v22 }
0x1c02   :  { %4864 = vrot.lane.b32.xlu1 %v10772_v6, %s9731_s26 }
0x1c03   :  { %v9565_v24 = vpop.eup %9564 }
0x1c04   :  { %v4063_v19 = vmul.f32 %v9565_v24, %v10840_v44 }
0x1c06   :  { %v4064_v35 = vpack.c.bf16 %v4063_v19, %v4063_v19 }
0x1c08   :  { %8882 = vmatmul.mubr.msk.bf16.vlgmr.msra.gmra.mrb[120].mxu1 %vm215_vm2, %v4064_v35 }
0x1c09   :  { %8892 = vmatpush3.bf16.msra.mxu1 %v4185_v20  ;;  %8893 = vmatprep.mubr.msk.bf16.mxu1 %vm9726_vm0, %v9725_v1 }
0x1c0a   :  { %8903 = vmatprep.subr.bf16.mxu1 %v9725_v1 }
0x1c17   :  { %4528 = vrot.lane.b32.xlu0 %v10772_v6, %s9728_s5 }
0x1c39   :  { %v4175_v4 = vpop.xlane.xlu0 %4174 }
0x1c3a   :  { %9566 = vrcp.f32 %v4175_v4 }
0x1c3d   :  { %v4292_v3 = vpop.permute.xlu0 %4291 }
0x1c3e   :  { %v4297_v25 = vsel %vm281_vm3, %v4292_v3, 0 }
0x1c41   :  { %v4287_v21 = vpop.xlane.xlu1 %4286 }
0x1c42   :  { %9568 = vrcp.f32 %v4287_v21 }
0x1c44   :  { %v9567_v23 = vpop.eup %9566 }
0x1c45   :  { %v4177_v27 = vmul.f32 %v9567_v23, %v10845_v53  ;;  %v4404_v44 = vpop.permute.xlu1 %4403 }
0x1c46   :  { %v4409_v46 = vsel %vm281_vm3, %v4404_v44, 0 }
0x1c47   :  { %v4178_v38 = vpack.c.bf16 %v4177_v27, %v4177_v27 }
0x1c49   :  { %8894 = vmatmul.mubr.msk.bf16.vlgmr.msra.gmra.mrb[124].mxu1 %vm215_vm2, %v4178_v38 }
0x1c4a   :  { %8904 = vmatpush3.bf16.msra.mxu1 %v4297_v25  ;;  %8905 = vmatprep.mubr.msk.bf16.mxu1 %vm9726_vm0, %v9725_v1 }
0x1c4b   :  { %8915 = vmatprep.subr.bf16.mxu1 %v9725_v1 }
0x1c4c   :  { %v9569_v6 = vpop.eup %9568 }
0x1c4d   :  { %v4289_v36 = vmul.f32 %v9569_v6, %v10849_v57 }
0x1c4f   :  { %v4290_v28 = vpack.c.bf16 %v4289_v36, %v4289_v36 }
0x1c51   :  { %8906 = vmatmul.mubr.msk.bf16.vlgmr.msra.gmra.mrb[128].mxu1 %vm215_vm2, %v4290_v28  ;;  %v9406_v28 = vld [vmem:[%s11556_s24] sm:$0xff]  }
0x1c52   :  { %8916 = vmatpush3.bf16.msra.mxu1 %v4409_v46  ;;  %8917 = vmatprep.mubr.msk.bf16.mxu1 %vm9726_vm0, %v9725_v1 }
0x1c53   :  { %8927 = vmatprep.subr.bf16.mxu1 %v9725_v1  ;;  %8970 = vmatpush3.bf16.msra.mxu0 %v9406_v28 }
0x1c54   :  { %8971 = vmatprep.subr.bf16.mxu0 %v9725_v1 }
0x1c6e   :  { %v4399_v63 = vpop.xlane.xlu0 %4398 }
0x1c6f   :  { %9570 = vrcp.f32 %v4399_v63  ;;  %v9407_v63 = vld [vmem:[%s11556_s24 + $0x8] sm:$0xff]  }
0x1c70   :  { %8972 = vmatpush3.bf16.msra.mxu0 %v9407_v63 }
0x1c71   :  { %8985 = vmatprep.subr.bf16.mxu0 %v9725_v1 }
0x1c72   :  { %v4524_v52 = vpop.xlane.xlu0 %4523 }
0x1c73   :  { %9572 = vrcp.f32 %v4524_v52 }
0x1c76   :  { %v4636_v53 = vpop.xlane.xlu1 %4635  ;;  %v4748_v56 = vpop.xlane.xlu0 %4747 }
0x1c77   :  { %9574 = vrcp.f32 %v4636_v53 }
0x1c78   :  { %9576 = vrcp.f32 %v4748_v56 }
0x1c79   :  { %v9571_v32 = vpop.eup %9570 }
0x1c7a   :  { %v4401_v50 = vmul.f32 %v9571_v32, %v9555_v0  ;;  %v4641_v42 = vpop.permute.xlu1 %4640 }
0x1c7b   :  { %v4646_v49 = vsel %vm281_vm3, %v4641_v42, 0 }
0x1c7c   :  { %v4402_v29 = vpack.c.bf16 %v4401_v50, %v4401_v50 }
0x1c7d   :  { %v9573_v57 = vpop.eup %9572 }
0x1c7e   :  { %8918 = vmatmul.mubr.msk.bf16.vlgmr.msra.gmra.mrb[132].mxu1 %vm215_vm2, %v4402_v29  ;;  %v4526_v60 = vmul.f32 %v9573_v57, %v10862_v10  ;;  %v4753_v55 = vpop.permute.xlu1 %4752 }
0x1c7f   :  { %8929 = vmatprep.mubr.msk.bf16.mxu1 %vm9726_vm0, %v9725_v1  ;;  %v4758_v7 = vsel %vm281_vm3, %v4753_v55, 0 }
0x1c80   :  { %v4527_v43 = vpack.c.bf16 %v4526_v60, %v4526_v60 }
0x1c81   :  { %v9575_v39 = vpop.eup %9574 }
0x1c82   :  { %v4638_v13 = vmul.f32 %v9575_v39, %v10864_v37  ;;  %v9577_v5 = vpop.eup %9576  ;;  %v4865_v59 = vpop.permute.xlu1 %4864 }
0x1c83   :  { %v4750_v40 = vmul.f32 %v9577_v5, %v10868_v11  ;;  %v4870_v10 = vsel %vm281_vm3, %v4865_v59, 0 }
0x1c84   :  { %v4639_v2 = vpack.c.bf16 %v4638_v13, %v4638_v13 }
0x1c85   :  { %v4751_v0 = vpack.c.bf16 %v4750_v40, %v4750_v40 }
0x1c8e   :  { %v4860_v58 = vpop.xlane.xlu0 %4859 }
0x1c8f   :  { %9578 = vrcp.f32 %v4860_v58 }
0x1c92   :  { %v4529_v45 = vpop.permute.xlu0 %4528 }
0x1c93   :  { %v4534_v54 = vsel %vm281_vm3, %v4529_v45, 0 }
0x1c94   :  { %8928 = vmatpush3.bf16.msra.mxu1 %v4534_v54 }
0x1c95   :  { %8939 = vmatprep.subr.bf16.mxu1 %v9725_v1 }
0x1c97   :  { %8930 = vmatmul.mubr.msk.bf16.vlgmr.msra.gmra.mrb[136].mxu1 %vm215_vm2, %v4527_v43 }
0x1c98   :  { %8940 = vmatpush3.bf16.msra.mxu1 %v4646_v49  ;;  %8941 = vmatprep.mubr.msk.bf16.mxu1 %vm9726_vm0, %v9725_v1 }
0x1c99   :  { %8951 = vmatprep.subr.bf16.mxu1 %v9725_v1  ;;  %v9579_v9 = vpop.eup %9578 }
0x1c9a   :  { %v4862_v37 = vmul.f32 %v9579_v9, %v10878_v62 }
0x1c9c   :  { %v4863_v8 = vpack.c.bf16 %v4862_v37, %v4862_v37 }
0x1c9f   :  { %8942 = vmatmul.mubr.msk.bf16.vlgmr.msra.gmra.mrb[140].mxu1 %vm215_vm2, %v4639_v2 }
0x1ca0   :  { %8952 = vmatpush3.bf16.msra.mxu1 %v4758_v7  ;;  %8953 = vmatprep.mubr.msk.bf16.mxu1 %vm9726_vm0, %v9725_v1 }
0x1ca1   :  { %8963 = vmatprep.subr.bf16.mxu1 %v9725_v1 }
0x1ca7   :  { %8954 = vmatmul.mubr.msk.bf16.vlgmr.msra.gmra.mrb[144].mxu1 %vm215_vm2, %v4751_v0 }
0x1ca8   :  { %8964 = vmatpush3.bf16.msra.mxu1 %v4870_v10  ;;  %8965 = vmatprep.mubr.msk.bf16.mxu1 %vm9726_vm0, %v9725_v1 }
0x1ca9   :  { %8977 = vmatprep.subr.bf16.mxu1 %v9725_v1 }
0x1caf   :  { %8966 = vmatmul.mubr.msk.bf16.vlgmr.msra.gmra.mrb[148].mxu1 %vm215_vm2, %v4863_v8  ;;  %v8092_v8 = vld [vmem:[%s11557_s30] ss:$0 sm:$0xff] }
0x1cb0   :  { %8981 = vmatprep.mubr.msk.bf16.mxu1 %vm9726_vm0, %v9725_v1 }
0x1cdb   :  { %v4108_v11 = vpop.f32.mrb[120].mxu1 }
0x1cdc   :  { %v8883_v51 = vpop.f32.mrb[121].mxu1 }
0x1cdd   :  { %v4111_v61 = vpop.f32.mrb[122].mxu1 }
0x1cde   :  { %v8884_v12 = vpop.f32.mrb[123].mxu1 }
0x1d1c   :  { %v4221_v15 = vpop.f32.mrb[124].mxu1 }
0x1d1d   :  { %v8895_v17 = vpop.f32.mrb[125].mxu1 }
0x1d1e   :  { %v4224_v41 = vpop.f32.mrb[126].mxu1 }
0x1d1f   :  { %v8896_v18 = vpop.f32.mrb[127].mxu1 }
0x1d24   :  { %v4333_v22 = vpop.f32.mrb[128].mxu1 }
0x1d25   :  { %v8907_v24 = vpop.f32.mrb[129].mxu1 }
0x1d26   :  { %v4336_v62 = vpop.f32.mrb[130].mxu1 }
0x1d27   :  { %v8908_v19 = vpop.f32.mrb[131].mxu1 }
0x1d51   :  { %v4445_v35 = vpop.f32.mrb[132].mxu1 }
0x1d52   :  { %v8919_v20 = vpop.f32.mrb[133].mxu1 }
0x1d53   :  { %v4448_v4 = vpop.f32.mrb[134].mxu1 }
0x1d54   :  { %v8920_v21 = vpop.f32.mrb[135].mxu1 }
0x1d6a   :  { %v4570_v23 = vpop.f32.mrb[136].mxu1 }
0x1d6b   :  { %v8931_v27 = vpop.f32.mrb[137].mxu1 }
0x1d6c   :  { %v4573_v3 = vpop.f32.mrb[138].mxu1 }
0x1d6d   :  { %v8932_v38 = vpop.f32.mrb[139].mxu1  ;;  %v9408_v3 = vld [vmem:[%s11558_s6] sm:$0xff]  }
0x1d6e   :  { %8978 = vmatpush3.bf16.msra.mxu1 %v9408_v3  ;;  %v9409_v38 = vld [vmem:[%s11558_s6 + $0x8] sm:$0xff]  }
0x1d6f   :  { %8979 = vmatprep.subr.bf16.mxu1 %v9725_v1 }
0x1d72   :  { %v4682_v25 = vpop.f32.mrb[140].mxu1  ;;  %8980 = vmatpush3.bf16.msra.mxu1 %v9409_v38 }
0x1d73   :  { %v9348_v6 = vpack.i.bf16 %v4221_v15, %v4682_v25  ;;  %v8943_v36 = vpop.f32.mrb[141].mxu1  ;;  %8997 = vmatprep.subr.bf16.mxu1 %v9725_v1 }
0x1d74   :  { %v4685_v44 = vpop.f32.mrb[142].mxu1 }
0x1d75   :  { %9349 = vrot.lane.b32.xlu1 %v9348_v6, %s11532_s15  ;;  %v8944_v46 = vpop.f32.mrb[143].mxu1  ;;  %s11561_s15 = sld [smem:[#allocation18_spill]] }
0x1d7a   :  { %v4794_v32 = vpop.f32.mrb[144].mxu1 }
0x1d7b   :  { %v9353_v50 = vpack.i.bf16 %v4333_v22, %v4794_v32  ;;  %v8955_v29 = vpop.f32.mrb[145].mxu1 }
0x1d7c   :  { %v4797_v52 = vpop.f32.mrb[146].mxu1  ;;  %v5025_v29 = vrot.slane %v10735_v16, %v10208_v26 }
0x1d7d   :  { %9354 = vrot.lane.b32.xlu1 %v9353_v50, %s11530_s16  ;;  %v8956_v53 = vpop.f32.mrb[147].mxu1  ;;  %s11560_s16 = sld [smem:[#allocation16_spill]] }
0x1d81   :  { %4460 = vrot.lane.b32.xlu1 %v4445_v35, %s11528_s18 }
0x1d82   :  { %v4906_v56 = vpop.f32.mrb[148].mxu1 }
0x1d83   :  { %4921 = vrot.lane.b32.xlu0 %v4906_v56, %s11528_s18  ;;  %v8967_v57 = vpop.f32.mrb[149].mxu1  ;;  %s11559_s18 = sld [smem:[#allocation17_spill]] }
0x1d84   :  { %v4909_v58 = vpop.f32.mrb[150].mxu1 }
0x1d85   :  { %v8968_v60 = vpop.f32.mrb[151].mxu1  ;;  %v5031_v58 = vrot.slane %v10735_v16, %v10213_v14 }
0x1d89   :  { %v9410_v25 = vld [vmem:[%s11559_s18] sm:$0xff]   ;;  %v9411_v6 = vld [vmem:[%s11559_s18 + $0x8] sm:$0xff]  }
0x1de7   :  { %v9350_v45 = vpop.permute.xlu1 %9349 }
0x1de8   :  { %v9352_v42 = vunpack.i.h.bf16 %v9350_v45  ;;  %v9351_v43 = vunpack.i.l.bf16 %v9350_v45 }
0x1dea   :  { %v4463_v13 = vsel %vm215_vm2, %v4108_v11, %v9352_v42  ;;  %v4924_v55 = vsel %vm215_vm2, %v4570_v23, %v9351_v43  ;;  %v9412_v43 = vld [vmem:[%s11559_s18 + $0x10] sm:$0xff]  }
0x1def   :  { %v9355_v54 = vpop.permute.xlu1 %9354 }
0x1df0   :  { %v9357_v39 = vunpack.i.h.bf16 %v9355_v54  ;;  %v9356_v49 = vunpack.i.l.bf16 %v9355_v54 }
0x1df2   :  { %v4464_v5 = vsel %vm674_vm4, %v4463_v13, %v9357_v39  ;;  %v4925_v7 = vsel %vm674_vm4, %v4924_v55, %v9356_v49  ;;  %v9413_v39 = vld [vmem:[%s11559_s18 + $0x18] sm:$0xff]   ;;  %v8096_v49 = vld [vmem:[%s11560_s16] ss:$0 sm:$0xff] }
0x1df3   :  { %v4461_v2 = vpop.permute.xlu1 %4460 }
0x1df4   :  { %v4465_v9 = vsel %vm676_vm5, %v4464_v5, %v4461_v2 }
0x1df5   :  { %v4922_v40 = vpop.permute.xlu0 %4921 }
0x1df6   :  { %v4926_v59 = vsel %vm676_vm5, %v4925_v7, %v4922_v40 }
0x1df7   :  { %v4928_v0 = vrot.slane %v4926_v59, 2 }
0x1df9   :  { %v4930_v10 = vsel %vm3755_vm10, %v4465_v9, %v4928_v0 }
0x1dfa   :  { %v4931_v37 = vpack.c.bf16 %v4928_v0, %v4930_v10  ;;  %v8100_v10 = vld [vmem:[%s11561_s15] ss:$0 sm:$0xff] }
0x1dfc   :  { %8974 = vmatmul.mubr.msk.bf16.vlgmr.msra.gmra.mrb[152].mxu0 %vm166_vm1, %v4931_v37 }
0x1dfd   :  { %8993 = vmatprep.mubr.msk.bf16.mxu0 %vm9726_vm0, %v9725_v1  ;;  %8986 = vmatpush3.bf16.msra.mxu0 %v9410_v25 }
0x1dfe   :  { %8987 = vmatprep.subr.bf16.mxu0 %v9725_v1 }
0x1e01   :  { %8988 = vmatpush3.bf16.msra.mxu0 %v9411_v6 }
0x1e02   :  { %8989 = vmatprep.subr.bf16.mxu0 %v9725_v1 }
0x1e05   :  { %8990 = vmatpush3.bf16.msra.mxu0 %v9412_v43 }
0x1e06   :  { %8991 = vmatprep.subr.bf16.mxu0 %v9725_v1 }
0x1e09   :  { %8992 = vmatpush3.bf16.msra.mxu0 %v9413_v39 }
0x1e0a   :  { %9011 = vmatprep.subr.bf16.mxu0 %v9725_v1 }
0x1ecf   :  { %v4987_v11 = vpop.f32.mrb[152].mxu0 }
0x1ed0   :  { %v4988_v51 = vadd.f32 %v8092_v8, %v4987_v11  ;;  %v8975_v61 = vpop.f32.mrb[153].mxu0 }
0x1ed1   :  { %v4990_v12 = vpop.f32.mrb[154].mxu0 }
0x1ed2   :  { %v4994_v15 = vadd.f32 %v4988_v51, %v10741_v47  ;;  %v4991_v17 = vadd.f32 %v8092_v8, %v4990_v12  ;;  %v8976_v41 = vpop.f32.mrb[155].mxu0 }
0x1ed4   :  { %v4995_v18 = vadd.f32 %v4991_v17, %v10743_v48  ;;  %v4996_v22 = vsel %vm166_vm1, %v4994_v15, 0.0 }
0x1ed5   :  { %4997 = vadd.xlane.f32.xlu0 %v4996_v22 }
0x1ed6   :  { %v4999_v24 = vsel %vm3825_vm11, %v4995_v18, 0.0 }
0x1ed7   :  { %5000 = vadd.xlane.f32.xlu1 %v4999_v24 }
0x1f62   :  { %v4998_v62 = vpop.xlane.xlu0 %4997 }
0x1f63   :  { %v5002_v19 = vmul.f32 0.03125, %v4998_v62 }
0x1f64   :  { %v5001_v35 = vpop.xlane.xlu1 %5000 }
0x1f65   :  { %v5004_v20 = vsub.f32 %v4994_v15, %v5002_v19  ;;  %v5003_v4 = vmul.f32 0.03125, %v5001_v35 }
0x1f67   :  { %v5005_v47 = vsub.f32 %v4995_v18, %v5003_v4  ;;  %v5006_v21 = vmul.f32 %v5004_v20, %v5004_v20 }
0x1f69   :  { %v5008_v23 = vsel %vm166_vm1, %v5006_v21, 0.0  ;;  %v5007_v48 = vmul.f32 %v5005_v47, %v5005_v47 }
0x1f6a   :  { %5009 = vadd.xlane.f32.xlu0 %v5008_v23 }
0x1f6b   :  { %v5011_v27 = vsel %vm3825_vm11, %v5007_v48, 0.0  ;;  %v9414_v48 = vld [vmem:[%s9823_s12 + $0x10] sm:$0xff]  }
0x1f6e   :  { %5012 = vadd.xlane.f32.xlu0 %v5011_v27  ;;  %v9415_v27 = vld [vmem:[%s9823_s12 + $0x18] sm:$0xff]   ;;  %s11562_s12 = smov 8  }
0x1ff7   :  { %v5010_v36 = vpop.xlane.xlu0 %5009 }
0x1ff8   :  { %v5014_v44 = vmul.f32 0.03125, %v5010_v36 }
0x1ffa   :  { %v5016_v28 = vadd.f32 1e-05, %v5014_v44 }
0x1ffb   :  { %v5013_v46 = vpop.xlane.xlu0 %5012 }
0x1ffc   :  { %9580 = vrsqrt.f32 %v5016_v28  ;;  %v5015_v63 = vmul.f32 0.03125, %v5013_v46  ;;  %v5218_v28 = vsub.s32 4, %v10172_v30 }
0x1ffe   :  { %v5017_v32 = vadd.f32 1e-05, %v5015_v63  ;;  %v5219_v46 = vrot.slane %v10735_v16, %v5218_v28  ;;  %v5224_v63 = vsub.s32 5, %v10172_v30 }
0x2000   :  { %9582 = vrsqrt.f32 %v5017_v32 }
0x2006   :  { %v9581_v50 = vpop.eup %9580 }
0x2007   :  { %v5020_v52 = vmul.f32 %v9581_v50, %v5004_v20 }
0x2009   :  { %v5026_v56 = vmul.f32 %v5025_v29, %v5020_v52 }
0x200a   :  { %v9583_v53 = vpop.eup %9582 }
0x200b   :  { %v5021_v57 = vmul.f32 %v9583_v53, %v5005_v47  ;;  %v5032_v45 = vadd.f32 %v5031_v58, %v5026_v56  ;;  %v5225_v56 = vrot.slane %v10735_v16, %v5224_v63 }
0x200d   :  { %v5027_v60 = vmul.f32 %v5025_v29, %v5021_v57 }
0x200f   :  { %v5033_v54 = vadd.f32 %v5031_v58, %v5027_v60 }
0x2011   :  { %v5048_v42 = vpack.c.bf16 %v5033_v54, %v5032_v45 }
0x2013   :  { %8982 = vmatmul.mubr.msk.bf16.vlgmr.msra.gmra.mrb[152].mxu1 %vm166_vm1, %v5048_v42 }
0x2014   :  { %9001 = vmatprep.mubr.msk.bf16.mxu1 %vm9726_vm0, %v9725_v1  ;;  %8998 = vmatpush3.bf16.msra.mxu1 %v9414_v48 }
0x2015   :  { %8999 = vmatprep.subr.bf16.mxu1 %v9725_v1 }
0x2018   :  { %9000 = vmatpush3.bf16.msra.mxu1 %v9415_v27 }
0x2019   :  { %9005 = vmatprep.subr.bf16.mxu1 %v9725_v1 }
0x20e6   :  { %v5104_v13 = vpop.f32.mrb[152].mxu1 }
0x20e7   :  { %v5105_v55 = vadd.f32 %v8096_v49, %v5104_v13  ;;  %v8983_v2 = vpop.f32.mrb[153].mxu1 }
0x20e8   :  { %v5107_v5 = vpop.f32.mrb[154].mxu1 }
0x20e9   :  { %v5108_v7 = vadd.f32 %v8096_v49, %v5107_v5  ;;  %v8984_v40 = vpop.f32.mrb[155].mxu1  ;;  %v5111_v59 = vmax.f32 %v5105_v55, 0.0 }
0x20eb   :  { %v5112_v0 = vmax.f32 %v5108_v7, 0.0 }
0x20ed   :  { %v5113_v9 = vpack.c.bf16 %v5112_v0, %v5111_v59 }
0x20ef   :  { %8994 = vmatmul.mubr.msk.bf16.vlgmr.msra.gmra.mrb[156].mxu0 %vm1354_vm6, %v5113_v9 }
0x20f0   :  { %9013 = vmatprep.mubr.msk.bf16.mxu0 %vm9726_vm0, %v9725_v1 }
0x21c2   :  { %v5181_v37 = vpop.f32.mrb[156].mxu0 }
0x21c3   :  { %v5182_v8 = vadd.f32 %v8100_v10, %v5181_v37  ;;  %v8995_v11 = vpop.f32.mrb[157].mxu0 }
0x21c4   :  { %v5184_v51 = vpop.f32.mrb[158].mxu0 }
0x21c5   :  { %v5188_v61 = vadd.f32 %v5182_v8, %v5032_v45  ;;  %v5185_v12 = vadd.f32 %v8100_v10, %v5184_v51  ;;  %v8996_v15 = vpop.f32.mrb[159].mxu0 }
0x21c7   :  { %v5189_v17 = vadd.f32 %v5185_v12, %v5033_v54  ;;  %v5190_v41 = vsel %vm166_vm1, %v5188_v61, 0.0  ;;  %v8117_v54 = vld [vmem:[%s9828_s20 + $0x1] ss:$0 sm:$0xff]  ;;  %s11563_s20 = smov 16  }
0x21c8   :  { %5191 = vadd.xlane.f32.xlu1 %v5190_v41 }
0x21c9   :  { %v5193_v18 = vsel %vm3825_vm11, %v5189_v17, 0.0 }
0x21ca   :  { %5194 = vadd.xlane.f32.xlu0 %v5193_v18 }
0x2255   :  { %v5192_v22 = vpop.xlane.xlu1 %5191 }
0x2256   :  { %v5196_v24 = vmul.f32 0.03125, %v5192_v22 }
0x2257   :  { %v5195_v62 = vpop.xlane.xlu0 %5194 }
0x2258   :  { %v5198_v19 = vsub.f32 %v5188_v61, %v5196_v24  ;;  %v5197_v35 = vmul.f32 0.03125, %v5195_v62 }
0x225a   :  { %v5199_v20 = vsub.f32 %v5189_v17, %v5197_v35  ;;  %v5200_v4 = vmul.f32 %v5198_v19, %v5198_v19 }
0x225c   :  { %v5202_v47 = vsel %vm166_vm1, %v5200_v4, 0.0  ;;  %v5201_v21 = vmul.f32 %v5199_v20, %v5199_v20 }
0x225d   :  { %5203 = vadd.xlane.f32.xlu1 %v5202_v47 }
0x225e   :  { %v5205_v23 = vsel %vm3825_vm11, %v5201_v21, 0.0 }
0x225f   :  { %5206 = vadd.xlane.f32.xlu0 %v5205_v23  ;;  %v9666_v23 = vld [vmem:[%s11548_s9] sm:$0x3f] }
0x22ea   :  { %v5204_v3 = vpop.xlane.xlu1 %5203 }
0x22eb   :  { %v5208_v38 = vmul.f32 0.03125, %v5204_v3 }
0x22ec   :  { %v5207_v25 = vpop.xlane.xlu0 %5206 }
0x22ed   :  { %v5210_v6 = vadd.f32 1e-05, %v5208_v38  ;;  %v5209_v36 = vmul.f32 0.03125, %v5207_v25 }
0x22ef   :  { %9584 = vrsqrt.f32 %v5210_v6  ;;  %v5211_v44 = vadd.f32 1e-05, %v5209_v36 }
0x22f1   :  { %9586 = vrsqrt.f32 %v5211_v44 }
0x22f9   :  { %v9585_v32 = vpop.eup %9584 }
0x22fa   :  { %v5214_v50 = vmul.f32 %v9585_v32, %v5198_v19 }
0x22fb   :  { %v9587_v29 = vpop.eup %9586 }
0x22fc   :  { %v5220_v52 = vmul.f32 %v5219_v46, %v5214_v50  ;;  %v5215_v53 = vmul.f32 %v9587_v29, %v5199_v20 }
0x22fe   :  { %v5221_v57 = vmul.f32 %v5219_v46, %v5215_v53  ;;  %v10996_v58 = vadd.f32 %v5225_v56, %v5220_v52 }
0x2300   :  { %v10998_v60 = vadd.f32 %v5225_v56, %v5221_v57 }
0x2302   :  { %v5244_v45 = vpack.c.bf16 %v10998_v60, %v10996_v58 }
0x2304   :  { %9002 = vmatmul.mubr.msk.bf16.vlgmr.msra.gmra.mrb[156].mxu1 %vm166_vm1, %v5244_v45 }
0x2305   :  { %9007 = vmatprep.mubr.msk.bf16.mxu1 %vm9726_vm0, %v9725_v1 }
0x23d7   :  { %v5300_v42 = vpop.f32.mrb[156].mxu1 }
0x23d8   :  { %v9003_v43 = vpop.f32.mrb[157].mxu1  ;;  %v5301_v49 = vadd.f32 %v8117_v54, %v5300_v42 }
0x23d9   :  { %v5303_v39 = vpop.f32.mrb[158].mxu1 }
0x23da   :  { %v5304_v13 = vadd.f32 %v8117_v54, %v5303_v39  ;;  %v9004_v16 = vpop.f32.mrb[159].mxu1 }
0x23dc   :  { %v11006_v55 = vpack.c.bf16 %v5304_v13, %v5301_v49 }
0x23de   :  { %5421 = vrot.lane.b32.xlu0 %v11006_v55, %s9730_s23  ;;  %5309 = vrot.lane.b32.xlu1 %v11006_v55, %s9728_s5  ;;  %v11021_v2 = vrot.slane %v11006_v55, 3 }
0x23e2   :  { %5531 = vrot.lane.b32.xlu0 %v11006_v55, %s9732_s28  ;;  %5419 = vrot.lane.b32.xlu1 %v11006_v55, %s9727_s0 }
0x23e6   :  { %5643 = vrot.lane.b32.xlu0 %v11006_v55, %s9733_s1  ;;  %5533 = vrot.lane.b32.xlu1 %v11006_v55, %s9729_s22 }
0x23ea   :  { %5645 = vrot.lane.b32.xlu1 %v11006_v55, %s9731_s26  ;;  %5883 = vrot.lane.b32.xlu0 %v11021_v2, %s9730_s23 }
0x23ee   :  { %5995 = vrot.lane.b32.xlu0 %v11021_v2, %s9729_s22  ;;  %5771 = vrot.lane.b32.xlu1 %v11021_v2, %s9728_s5 }
0x23f2   :  { %6107 = vrot.lane.b32.xlu0 %v11021_v2, %s9731_s26  ;;  %5881 = vrot.lane.b32.xlu1 %v11021_v2, %s9727_s0 }
0x23f6   :  { %5993 = vrot.lane.b32.xlu1 %v11021_v2, %s9732_s28 }
0x23fa   :  { %6105 = vrot.lane.b32.xlu1 %v11021_v2, %s9733_s1 }
0x2450   :  { %v5310_v5 = vpop.permute.xlu1 %5309  ;;  %v5422_v40 = vpop.permute.xlu0 %5421 }
0x2451   :  { %v5315_v7 = vsel %vm215_vm2, %v5310_v5, 0  ;;  %v5427_v0 = vsel %vm215_vm2, %v5422_v40, 0 }
0x2452   :  { %9006 = vmatpush3.bf16.xpose.msra.mxu1 %v5315_v7 }
0x2453   :  { %9017 = vmatprep.subr.bf16.mxu1 %v9725_v1 }
0x2454   :  { %v5420_v59 = vpop.permute.xlu1 %5419  ;;  %v5532_v8 = vpop.permute.xlu0 %5531 }
0x2458   :  { %v5534_v9 = vpop.permute.xlu1 %5533  ;;  %v5644_v61 = vpop.permute.xlu0 %5643 }
0x2459   :  { %9008 = vmatmul.mubr.msk.bf16.vlgmr.msra.gmra.mrb[160].mxu1 %vm215_vm2, %v11006_v55  ;;  %v5539_v10 = vsel %vm215_vm2, %v5534_v9, 0 }
0x245a   :  { %9018 = vmatpush3.bf16.xpose.msra.mxu1 %v5427_v0  ;;  %9019 = vmatprep.mubr.msk.bf16.mxu1 %vm9726_vm0, %v9725_v1  ;;  %v9667_v0 = vld [vmem:[%s11548_s9 + $0x8] sm:$0x3f] }
0x245b   :  { %9029 = vmatprep.subr.bf16.mxu1 %v9725_v1 }
0x245c   :  { %v5646_v37 = vpop.permute.xlu1 %5645  ;;  %v5884_v15 = vpop.permute.xlu0 %5883 }
0x245d   :  { %v5651_v11 = vsel %vm215_vm2, %v5646_v37, 0  ;;  %v5889_v17 = vsel %vm215_vm2, %v5884_v15, 0 }
0x2460   :  { %v5772_v51 = vpop.permute.xlu1 %5771  ;;  %v5996_v41 = vpop.permute.xlu0 %5995 }
0x2461   :  { %9020 = vmatmul.mubr.msk.bf16.vlgmr.msra.gmra.mrb[164].mxu1 %vm215_vm2, %v5420_v59  ;;  %v5777_v12 = vsel %vm215_vm2, %v5772_v51, 0  ;;  %v6001_v22 = vsel %vm215_vm2, %v5996_v41, 0 }
0x2462   :  { %9030 = vmatpush3.bf16.xpose.msra.mxu1 %v5539_v10  ;;  %9031 = vmatprep.mubr.msk.bf16.mxu1 %vm9726_vm0, %v9725_v1 }
0x2463   :  { %9041 = vmatprep.subr.bf16.mxu1 %v9725_v1 }
0x2464   :  { %v5882_v18 = vpop.permute.xlu1 %5881  ;;  %v6108_v24 = vpop.permute.xlu0 %6107 }
0x2465   :  { %v6113_v19 = vsel %vm215_vm2, %v6108_v24, 0 }
0x2468   :  { %v5994_v62 = vpop.permute.xlu1 %5993 }
0x2469   :  { %9032 = vmatmul.mubr.msk.bf16.vlgmr.msra.gmra.mrb[168].mxu1 %vm215_vm2, %v5532_v8 }
0x246a   :  { %9042 = vmatpush3.bf16.xpose.msra.mxu1 %v5651_v11  ;;  %9043 = vmatprep.mubr.msk.bf16.mxu1 %vm9726_vm0, %v9725_v1 }
0x246b   :  { %9053 = vmatprep.subr.bf16.mxu1 %v9725_v1 }
0x246c   :  { %v6106_v35 = vpop.permute.xlu1 %6105 }
0x2471   :  { %9044 = vmatmul.mubr.msk.bf16.vlgmr.msra.gmra.mrb[172].mxu1 %vm215_vm2, %v5644_v61 }
0x2472   :  { %9054 = vmatpush3.bf16.xpose.msra.mxu1 %v5777_v12  ;;  %9055 = vmatprep.mubr.msk.bf16.mxu1 %vm9726_vm0, %v9725_v1 }
0x2473   :  { %9065 = vmatprep.subr.bf16.mxu1 %v9725_v1 }
0x2479   :  { %9056 = vmatmul.mubr.msk.bf16.vlgmr.msra.gmra.mrb[176].mxu1 %vm215_vm2, %v11021_v2 }
0x247a   :  { %9066 = vmatpush3.bf16.xpose.msra.mxu1 %v5889_v17  ;;  %9067 = vmatprep.mubr.msk.bf16.mxu1 %vm9726_vm0, %v9725_v1 }
0x247b   :  { %9077 = vmatprep.subr.bf16.mxu1 %v9725_v1 }
0x2481   :  { %9068 = vmatmul.mubr.msk.bf16.vlgmr.msra.gmra.mrb[180].mxu1 %vm215_vm2, %v5882_v18 }
0x2482   :  { %9078 = vmatpush3.bf16.xpose.msra.mxu1 %v6001_v22  ;;  %9079 = vmatprep.mubr.msk.bf16.mxu1 %vm9726_vm0, %v9725_v1 }
0x2483   :  { %9089 = vmatprep.subr.bf16.mxu1 %v9725_v1 }
0x2489   :  { %9080 = vmatmul.mubr.msk.bf16.vlgmr.msra.gmra.mrb[184].mxu1 %vm215_vm2, %v5994_v62 }
0x248a   :  { %9090 = vmatpush3.bf16.xpose.msra.mxu1 %v6113_v19  ;;  %9091 = vmatprep.mubr.msk.bf16.mxu1 %vm9726_vm0, %v9725_v1 }
0x248b   :  { %9101 = vmatprep.subr.bf16.mxu1 %v9725_v1 }
0x2491   :  { %9092 = vmatmul.mubr.msk.bf16.vlgmr.msra.gmra.mrb[188].mxu1 %vm215_vm2, %v6106_v35 }
0x2492   :  { %9105 = vmatprep.mubr.msk.bf16.mxu1 %vm9726_vm0, %v9725_v1 }
0x252c   :  { %v5351_v20 = vpop.f32.mrb[160].mxu1 }
0x252d   :  { %v5357_v4 = vmul.f32 0.35355338, %v5351_v20  ;;  %v9009_v47 = vpop.f32.mrb[161].mxu1 }
0x252e   :  { %v5354_v21 = vpop.f32.mrb[162].mxu1 }
0x252f   :  { %v11082_v48 = vadd.f32 %v9666_v23, %v5357_v4  ;;  %v9010_v27 = vpop.f32.mrb[163].mxu1 }
0x2531   :  { %v5359_v3 = vsel %vm2876_vm7, %v11082_v48, -inf }
0x2532   :  { %5360 = vmax.xlane.f32.xlu0 %v5359_v3 }
0x2534   :  { %v5463_v38 = vpop.f32.mrb[164].mxu1 }
0x2535   :  { %v5469_v25 = vmul.f32 0.35355338, %v5463_v38  ;;  %v9021_v6 = vpop.f32.mrb[165].mxu1 }
0x2536   :  { %v5466_v36 = vpop.f32.mrb[166].mxu1 }
0x2537   :  { %v5470_v44 = vadd.f32 %v9666_v23, %v5469_v25  ;;  %v9022_v46 = vpop.f32.mrb[167].mxu1 }
0x2539   :  { %v5471_v32 = vsel %vm2876_vm7, %v5470_v44, -inf }
0x253a   :  { %5472 = vmax.xlane.f32.xlu1 %v5471_v32 }
0x253c   :  { %v5575_v50 = vpop.f32.mrb[168].mxu1 }
0x253d   :  { %v5581_v29 = vmul.f32 0.35355338, %v5575_v50  ;;  %v9033_v52 = vpop.f32.mrb[169].mxu1 }
0x253e   :  { %v5578_v53 = vpop.f32.mrb[170].mxu1 }
0x253f   :  { %v5582_v56 = vadd.f32 %v9666_v23, %v5581_v29  ;;  %v9034_v57 = vpop.f32.mrb[171].mxu1 }
0x2541   :  { %v5583_v45 = vsel %vm2876_vm7, %v5582_v56, -inf }
0x2542   :  { %5584 = vmax.xlane.f32.xlu0 %v5583_v45 }
0x2544   :  { %v5687_v54 = vpop.f32.mrb[172].mxu1 }
0x2545   :  { %v5693_v42 = vmul.f32 0.35355338, %v5687_v54  ;;  %v9045_v43 = vpop.f32.mrb[173].mxu1 }
0x2546   :  { %v5690_v39 = vpop.f32.mrb[174].mxu1 }
0x2547   :  { %v11088_v49 = vadd.f32 %v9666_v23, %v5693_v42  ;;  %v9046_v13 = vpop.f32.mrb[175].mxu1 }
0x2549   :  { %v5695_v16 = vsel %vm2876_vm7, %v11088_v49, -inf }
0x254a   :  { %5696 = vmax.xlane.f32.xlu0 %v5695_v16 }
0x254c   :  { %v5813_v5 = vpop.f32.mrb[176].mxu1 }
0x254d   :  { %v5819_v7 = vmul.f32 0.35355338, %v5813_v5  ;;  %v9057_v40 = vpop.f32.mrb[177].mxu1 }
0x254e   :  { %v5816_v59 = vpop.f32.mrb[178].mxu1 }
0x254f   :  { %v11093_v9 = vadd.f32 %v9667_v0, %v5819_v7  ;;  %v9058_v10 = vpop.f32.mrb[179].mxu1 }
0x2551   :  { %v5821_v37 = vsel %vm2876_vm7, %v11093_v9, -inf }
0x2552   :  { %5822 = vmax.xlane.f32.xlu1 %v5821_v37 }
0x2554   :  { %v5925_v8 = vpop.f32.mrb[180].mxu1 }
0x2555   :  { %v5931_v11 = vmul.f32 0.35355338, %v5925_v8  ;;  %v9069_v51 = vpop.f32.mrb[181].mxu1 }
0x2556   :  { %v5928_v61 = vpop.f32.mrb[182].mxu1 }
0x2557   :  { %v5932_v12 = vadd.f32 %v9667_v0, %v5931_v11  ;;  %v9070_v15 = vpop.f32.mrb[183].mxu1 }
0x2559   :  { %v5933_v17 = vsel %vm2876_vm7, %v5932_v12, -inf }
0x255a   :  { %5934 = vmax.xlane.f32.xlu0 %v5933_v17 }
0x255c   :  { %v6037_v41 = vpop.f32.mrb[184].mxu1 }
0x255d   :  { %v6043_v18 = vmul.f32 0.35355338, %v6037_v41  ;;  %v9081_v22 = vpop.f32.mrb[185].mxu1 }
0x255e   :  { %v6040_v24 = vpop.f32.mrb[186].mxu1 }
0x255f   :  { %v6044_v62 = vadd.f32 %v9667_v0, %v6043_v18  ;;  %v9082_v19 = vpop.f32.mrb[187].mxu1 }
0x2561   :  { %v6045_v35 = vsel %vm2876_vm7, %v6044_v62, -inf }
0x2562   :  { %6046 = vmax.xlane.f32.xlu1 %v6045_v35 }
0x2564   :  { %v6149_v20 = vpop.f32.mrb[188].mxu1 }
0x2565   :  { %v9093_v4 = vpop.f32.mrb[189].mxu1  ;;  %v6155_v23 = vmul.f32 0.35355338, %v6149_v20 }
0x2566   :  { %v6152_v47 = vpop.f32.mrb[190].mxu1 }
0x2567   :  { %v9094_v21 = vpop.f32.mrb[191].mxu1  ;;  %v6156_v27 = vadd.f32 %v9667_v0, %v6155_v23 }
0x2569   :  { %v6157_v3 = vsel %vm2876_vm7, %v6156_v27, -inf }
0x2570   :  { %5483 = vrot.lane.b32.xlu0 %v11006_v55, %s9734_s2 }
0x2573   :  { %5371 = vrot.lane.b32.xlu1 %v11006_v55, %s9735_s7 }
0x258f   :  { %6158 = vmax.xlane.f32.xlu0 %v6157_v3 }
0x25bf   :  { %v5361_v38 = vpop.xlane.xlu0 %5360 }
0x25c0   :  { %v5362_v25 = vsub.f32 %v11082_v48, %v5361_v38 }
0x25c2   :  { %v5363_v6 = vmul.f32 1.442695, %v5362_v25 }
0x25c4   :  { %9588 = vpow2.f32 %v5363_v6 }
0x25c7   :  { %v5473_v36 = vpop.xlane.xlu1 %5472 }
0x25c8   :  { %v5474_v46 = vsub.f32 %v5470_v44, %v5473_v36 }
0x25ca   :  { %v5475_v32 = vmul.f32 1.442695, %v5474_v46 }
0x25cc   :  { %9590 = vpow2.f32 %v5475_v32 }
0x25ce   :  { %v11105_v50 = vpop.eup %9588 }
0x25cf   :  { %v5585_v29 = vpop.xlane.xlu0 %5584  ;;  %v5365_v52 = vsel %vm2876_vm7, %v11105_v50, 0.0 }
0x25d0   :  { %v5586_v53 = vsub.f32 %v5582_v56, %v5585_v29  ;;  %5366 = vadd.xlane.f32.xlu1 %v5365_v52 }
0x25d2   :  { %v5587_v57 = vmul.f32 1.442695, %v5586_v53 }
0x25d4   :  { %9592 = vpow2.f32 %v5587_v57 }
0x25d6   :  { %v11109_v45 = vpop.eup %9590 }
0x25d7   :  { %v5477_v48 = vsel %vm2876_vm7, %v11109_v45, 0.0  ;;  %v5697_v39 = vpop.xlane.xlu0 %5696 }
0x25d8   :  { %5478 = vadd.xlane.f32.xlu0 %v5477_v48  ;;  %v5698_v16 = vsub.f32 %v11088_v49, %v5697_v39 }
0x25da   :  { %v5699_v5 = vmul.f32 1.442695, %v5698_v16 }
0x25dc   :  { %9594 = vpow2.f32 %v5699_v5 }
0x25de   :  { %v11113_v54 = vpop.eup %9592 }
0x25df   :  { %v5589_v44 = vsel %vm2876_vm7, %v11113_v54, 0.0  ;;  %v5823_v42 = vpop.xlane.xlu1 %5822 }
0x25e0   :  { %5590 = vadd.xlane.f32.xlu1 %v5589_v44  ;;  %v5824_v7 = vsub.f32 %v11093_v9, %v5823_v42 }
0x25e2   :  { %v5825_v0 = vmul.f32 1.442695, %v5824_v7 }
0x25e4   :  { %9596 = vpow2.f32 %v5825_v0 }
0x25e6   :  { %v9595_v8 = vpop.eup %9594 }
0x25e7   :  { %v5935_v40 = vpop.xlane.xlu0 %5934  ;;  %v5701_v11 = vsel %vm2876_vm7, %v9595_v8, 0.0 }
0x25e8   :  { %v5936_v59 = vsub.f32 %v5932_v12, %v5935_v40 }
0x25ea   :  { %v5937_v37 = vmul.f32 1.442695, %v5936_v59 }
0x25eb   :  { %v5484_v17 = vpop.permute.xlu0 %5483 }
0x25ec   :  { %9598 = vpow2.f32 %v5937_v37  ;;  %v5489_v21 = vsel %vm2895_vm8, %v5484_v17, 0 }
0x25ee   :  { %5595 = vrot.lane.b32.xlu0 %v11006_v55, %s9736_s10  ;;  %v11126_v51 = vpop.eup %9596 }
0x25ef   :  { %v6047_v56 = vpop.xlane.xlu1 %6046  ;;  %v5827_v9 = vsel %vm2876_vm7, %v11126_v51, 0.0 }
0x25f0   :  { %v6048_v10 = vsub.f32 %v6044_v62, %v6047_v56 }
0x25f1   :  { %5707 = vrot.lane.b32.xlu1 %v11006_v55, %s9737_s11 }
0x25f2   :  { %v6049_v55 = vmul.f32 1.442695, %v6048_v10 }
0x25f3   :  { %v5372_v43 = vpop.permute.xlu1 %5371 }
0x25f4   :  { %v5377_v13 = vsel %vm2895_vm8, %v5372_v43, 0  ;;  %9600 = vpow2.f32 %v6049_v55 }
0x25f5   :  { %9012 = vmatpush3.bf16.msra.mxu0 %v5377_v13 }
0x25f6   :  { %9023 = vmatprep.subr.bf16.mxu0 %v9725_v1  ;;  %v11128_v49 = vpop.eup %9598 }
0x25f7   :  { %v5939_v12 = vsel %vm2876_vm7, %v11128_v49, 0.0 }
0x25fe   :  { %v11132_v61 = vpop.eup %9600 }
0x25ff   :  { %v6051_v15 = vsel %vm2876_vm7, %v11132_v61, 0.0 }
0x260d   :  { %5702 = vadd.xlane.f32.xlu0 %v5701_v11 }
0x2611   :  { %5828 = vadd.xlane.f32.xlu0 %v5827_v9 }
0x2615   :  { %5940 = vadd.xlane.f32.xlu1 %v5939_v12  ;;  %6052 = vadd.xlane.f32.xlu0 %v6051_v15 }
0x261c   :  { %v6159_v41 = vpop.xlane.xlu0 %6158 }
0x261d   :  { %v6160_v18 = vsub.f32 %v6156_v27, %v6159_v41 }
0x261f   :  { %v6161_v22 = vmul.f32 1.442695, %v6160_v18 }
0x2621   :  { %9602 = vpow2.f32 %v6161_v22 }
0x2626   :  { %5945 = vrot.lane.b32.xlu1 %v11021_v2, %s9734_s2  ;;  %s11564_s2 = smov 24  }
0x262a   :  { %6057 = vrot.lane.b32.xlu1 %v11021_v2, %s9736_s10 }
0x262b   :  { %v11142_v24 = vpop.eup %9602 }
0x262c   :  { %v6163_v62 = vsel %vm2876_vm7, %v11142_v24, 0.0 }
0x262d   :  { %6164 = vadd.xlane.f32.xlu0 %v6163_v62 }
0x262e   :  { %6169 = vrot.lane.b32.xlu1 %v11021_v2, %s9737_s11 }
0x2643   :  { %5833 = vrot.lane.b32.xlu0 %v11021_v2, %s9735_s7 }
0x265d   :  { %v5367_v19 = vpop.xlane.xlu1 %5366 }
0x265e   :  { %9604 = vrcp.f32 %v5367_v19 }
0x2665   :  { %v5479_v35 = vpop.xlane.xlu0 %5478 }
0x2666   :  { %9606 = vrcp.f32 %v5479_v35 }
0x2668   :  { %v9605_v20 = vpop.eup %9604 }
0x2669   :  { %v5369_v4 = vmul.f32 %v9605_v20, %v11105_v50  ;;  %v5596_v3 = vpop.permute.xlu0 %5595 }
0x266a   :  { %v5601_v25 = vsel %vm2895_vm8, %v5596_v3, 0 }
0x266b   :  { %v5370_v47 = vpack.c.bf16 %v5369_v4, %v5369_v4 }
0x266d   :  { %9014 = vmatmul.mubr.msk.bf16.vlgmr.msra.gmra.mrb[160].mxu0 %vm2891_vm9, %v5370_v47  ;;  %v5591_v23 = vpop.xlane.xlu1 %5590 }
0x266e   :  { %9024 = vmatpush3.bf16.msra.mxu0 %v5489_v21  ;;  %9608 = vrcp.f32 %v5591_v23  ;;  %9025 = vmatprep.mubr.msk.bf16.mxu0 %vm9726_vm0, %v9725_v1 }
0x266f   :  { %9035 = vmatprep.subr.bf16.mxu0 %v9725_v1 }
0x2670   :  { %v9607_v2 = vpop.eup %9606 }
0x2671   :  { %v5481_v27 = vmul.f32 %v9607_v2, %v11109_v45  ;;  %v5708_v46 = vpop.permute.xlu1 %5707 }
0x2672   :  { %v5713_v50 = vsel %vm2895_vm8, %v5708_v46, 0 }
0x2673   :  { %v5482_v38 = vpack.c.bf16 %v5481_v27, %v5481_v27 }
0x2675   :  { %9026 = vmatmul.mubr.msk.bf16.vlgmr.msra.gmra.mrb[164].mxu0 %vm2891_vm9, %v5482_v38 }
0x2676   :  { %9036 = vmatpush3.bf16.msra.mxu0 %v5601_v25  ;;  %9037 = vmatprep.mubr.msk.bf16.mxu0 %vm9726_vm0, %v9725_v1 }
0x2677   :  { %9047 = vmatprep.subr.bf16.mxu0 %v9725_v1 }
0x2678   :  { %v9609_v6 = vpop.eup %9608 }
0x2679   :  { %v5593_v36 = vmul.f32 %v9609_v6, %v11113_v54 }
0x267b   :  { %v5594_v32 = vpack.c.bf16 %v5593_v36, %v5593_v36 }
0x267d   :  { %9038 = vmatmul.mubr.msk.bf16.vlgmr.msra.gmra.mrb[168].mxu0 %vm2891_vm9, %v5594_v32 }
0x267e   :  { %9048 = vmatpush3.bf16.msra.mxu0 %v5713_v50  ;;  %9049 = vmatprep.mubr.msk.bf16.mxu0 %vm9726_vm0, %v9725_v1  ;;  %v9416_v50 = vld [vmem:[%s11549_s13 + $0x10] sm:$0xff]  }
0x267f   :  { %9059 = vmatprep.subr.bf16.mxu0 %v9725_v1  ;;  %9102 = vmatpush3.bf16.msra.mxu1 %v9416_v50 }
0x2680   :  { %9103 = vmatprep.subr.bf16.mxu1 %v9725_v1 }
0x269a   :  { %v5703_v29 = vpop.xlane.xlu0 %5702 }
0x269b   :  { %9610 = vrcp.f32 %v5703_v29 }
0x269e   :  { %v5829_v45 = vpop.xlane.xlu0 %5828 }
0x269f   :  { %9612 = vrcp.f32 %v5829_v45 }
0x26a2   :  { %v5941_v48 = vpop.xlane.xlu1 %5940  ;;  %v6053_v54 = vpop.xlane.xlu0 %6052 }
0x26a3   :  { %9614 = vrcp.f32 %v5941_v48 }
0x26a4   :  { %9616 = vrcp.f32 %v6053_v54 }
0x26a5   :  { %v9611_v52 = vpop.eup %9610 }
0x26a6   :  { %v5705_v53 = vmul.f32 %v9611_v52, %v9595_v8  ;;  %v5946_v13 = vpop.permute.xlu1 %5945  ;;  %v9417_v52 = vld [vmem:[%s11549_s13 + $0x18] sm:$0xff]  }
0x26a7   :  { %v5951_v7 = vsel %vm2895_vm8, %v5946_v13, 0  ;;  %9104 = vmatpush3.bf16.msra.mxu1 %v9417_v52 }
0x26a8   :  { %v5706_v57 = vpack.c.bf16 %v5705_v53, %v5705_v53  ;;  %9117 = vmatprep.subr.bf16.mxu1 %v9725_v1 }
0x26a9   :  { %v9613_v44 = vpop.eup %9612 }
0x26aa   :  { %9050 = vmatmul.mubr.msk.bf16.vlgmr.msra.gmra.mrb[172].mxu0 %vm2891_vm9, %v5706_v57  ;;  %v5831_v56 = vmul.f32 %v9613_v44, %v11126_v51  ;;  %v6058_v59 = vpop.permute.xlu1 %6057 }
0x26ab   :  { %9061 = vmatprep.mubr.msk.bf16.mxu0 %vm9726_vm0, %v9725_v1  ;;  %v6063_v37 = vsel %vm2895_vm8, %v6058_v59, 0 }
0x26ac   :  { %v5832_v16 = vpack.c.bf16 %v5831_v56, %v5831_v56 }
0x26ad   :  { %v9615_v5 = vpop.eup %9614 }
0x26ae   :  { %v5943_v40 = vmul.f32 %v9615_v5, %v11128_v49  ;;  %v9617_v10 = vpop.eup %9616  ;;  %v6170_v8 = vpop.permute.xlu1 %6169 }
0x26af   :  { %v6055_v55 = vmul.f32 %v9617_v10, %v11132_v61  ;;  %v6175_v49 = vsel %vm2895_vm8, %v6170_v8, 0 }
0x26b0   :  { %v5944_v0 = vpack.c.bf16 %v5943_v40, %v5943_v40 }
0x26b1   :  { %v6056_v11 = vpack.c.bf16 %v6055_v55, %v6055_v55 }
0x26ba   :  { %v6165_v42 = vpop.xlane.xlu0 %6164 }
0x26bb   :  { %9618 = vrcp.f32 %v6165_v42 }
0x26be   :  { %v5834_v43 = vpop.permute.xlu0 %5833 }
0x26bf   :  { %v5839_v39 = vsel %vm2895_vm8, %v5834_v43, 0 }
0x26c0   :  { %9060 = vmatpush3.bf16.msra.mxu0 %v5839_v39 }
0x26c1   :  { %9071 = vmatprep.subr.bf16.mxu0 %v9725_v1 }
0x26c3   :  { %9062 = vmatmul.mubr.msk.bf16.vlgmr.msra.gmra.mrb[176].mxu0 %vm2891_vm9, %v5832_v16 }
0x26c4   :  { %9072 = vmatpush3.bf16.msra.mxu0 %v5951_v7  ;;  %9073 = vmatprep.mubr.msk.bf16.mxu0 %vm9726_vm0, %v9725_v1 }
0x26c5   :  { %9083 = vmatprep.subr.bf16.mxu0 %v9725_v1  ;;  %v9619_v51 = vpop.eup %9618 }
0x26c6   :  { %v6167_v9 = vmul.f32 %v9619_v51, %v11142_v24 }
0x26c8   :  { %v6168_v12 = vpack.c.bf16 %v6167_v9, %v6167_v9 }
0x26cb   :  { %9074 = vmatmul.mubr.msk.bf16.vlgmr.msra.gmra.mrb[180].mxu0 %vm2891_vm9, %v5944_v0 }
0x26cc   :  { %9084 = vmatpush3.bf16.msra.mxu0 %v6063_v37  ;;  %9085 = vmatprep.mubr.msk.bf16.mxu0 %vm9726_vm0, %v9725_v1 }
0x26cd   :  { %9095 = vmatprep.subr.bf16.mxu0 %v9725_v1 }
0x26d3   :  { %9086 = vmatmul.mubr.msk.bf16.vlgmr.msra.gmra.mrb[184].mxu0 %vm2891_vm9, %v6056_v11 }
0x26d4   :  { %9096 = vmatpush3.bf16.msra.mxu0 %v6175_v49  ;;  %9097 = vmatprep.mubr.msk.bf16.mxu0 %vm9726_vm0, %v9725_v1 }
0x26d5   :  { %9109 = vmatprep.subr.bf16.mxu0 %v9725_v1 }
0x26db   :  { %9098 = vmatmul.mubr.msk.bf16.vlgmr.msra.gmra.mrb[188].mxu0 %vm2891_vm9, %v6168_v12  ;;  %v9418_v12 = vld [vmem:[%s11551_s29 + $0x10] sm:$0xff]  }
0x26dc   :  { %9113 = vmatprep.mubr.msk.bf16.mxu0 %vm9726_vm0, %v9725_v1 }
0x2740   :  { %v5413_v61 = vpop.f32.mrb[160].mxu0 }
0x2741   :  { %v9015_v15 = vpop.f32.mrb[161].mxu0 }
0x2742   :  { %v5416_v17 = vpop.f32.mrb[162].mxu0 }
0x2743   :  { %v9016_v41 = vpop.f32.mrb[163].mxu0  ;;  %v8137_v17 = vld [vmem:[%s11550_s25 + $0x1] ss:$0 sm:$0xff] }
0x2748   :  { %v5525_v18 = vpop.f32.mrb[164].mxu0 }
0x2749   :  { %v9027_v22 = vpop.f32.mrb[165].mxu0 }
0x274a   :  { %v5528_v62 = vpop.f32.mrb[166].mxu0 }
0x274b   :  { %v9028_v19 = vpop.f32.mrb[167].mxu0 }
0x2750   :  { %v5637_v35 = vpop.f32.mrb[168].mxu0 }
0x2751   :  { %v9039_v20 = vpop.f32.mrb[169].mxu0 }
0x2752   :  { %v5640_v24 = vpop.f32.mrb[170].mxu0 }
0x2753   :  { %v9040_v4 = vpop.f32.mrb[171].mxu0 }
0x277d   :  { %v5749_v47 = vpop.f32.mrb[172].mxu0 }
0x277e   :  { %v9051_v21 = vpop.f32.mrb[173].mxu0 }
0x277f   :  { %v5752_v23 = vpop.f32.mrb[174].mxu0 }
0x2780   :  { %v9052_v2 = vpop.f32.mrb[175].mxu0 }
0x2796   :  { %v5875_v27 = vpop.f32.mrb[176].mxu0 }
0x2797   :  { %v9063_v3 = vpop.f32.mrb[177].mxu0 }
0x2798   :  { %v5878_v38 = vpop.f32.mrb[178].mxu0 }
0x2799   :  { %v9064_v25 = vpop.f32.mrb[179].mxu0 }
0x279e   :  { %v5987_v6 = vpop.f32.mrb[180].mxu0 }
0x279f   :  { %v9358_v36 = vpack.i.bf16 %v5525_v18, %v5987_v6  ;;  %v9075_v46 = vpop.f32.mrb[181].mxu0 }
0x27a0   :  { %v5990_v32 = vpop.f32.mrb[182].mxu0 }
0x27a1   :  { %9359 = vrot.lane.b32.xlu1 %v9358_v36, %s11562_s12  ;;  %v9076_v29 = vpop.f32.mrb[183].mxu0 }
0x27a6   :  { %v6099_v53 = vpop.f32.mrb[184].mxu0 }
0x27a7   :  { %v9363_v57 = vpack.i.bf16 %v5637_v35, %v6099_v53  ;;  %v9087_v45 = vpop.f32.mrb[185].mxu0 }
0x27a8   :  { %v6102_v48 = vpop.f32.mrb[186].mxu0  ;;  %v9421_v45 = vld [vmem:[%s11552_s3 + $0x18] sm:$0xff]  }
0x27a9   :  { %9364 = vrot.lane.b32.xlu1 %v9363_v57, %s11563_s20  ;;  %v9088_v54 = vpop.f32.mrb[187].mxu0  ;;  %v9420_v57 = vld [vmem:[%s11552_s3 + $0x10] sm:$0xff]  }
0x27aa   :  { %9110 = vmatpush3.bf16.msra.mxu0 %v9420_v57 }
0x27ab   :  { %9111 = vmatprep.subr.bf16.mxu0 %v9725_v1 }
0x27ad   :  { %5764 = vrot.lane.b32.xlu1 %v5749_v47, %s11564_s2 }
0x27ae   :  { %v6211_v44 = vpop.f32.mrb[188].mxu0  ;;  %9112 = vmatpush3.bf16.msra.mxu0 %v9421_v45 }
0x27af   :  { %6226 = vrot.lane.b32.xlu0 %v6211_v44, %s11564_s2  ;;  %v9099_v42 = vpop.f32.mrb[189].mxu0  ;;  %9125 = vmatprep.subr.bf16.mxu0 %v9725_v1 }
0x27b0   :  { %v6214_v56 = vpop.f32.mrb[190].mxu0 }
0x27b1   :  { %v9100_v43 = vpop.f32.mrb[191].mxu0 }
0x2813   :  { %v9360_v39 = vpop.permute.xlu1 %9359 }
0x2814   :  { %v9362_v16 = vunpack.i.h.bf16 %v9360_v39  ;;  %v9361_v5 = vunpack.i.l.bf16 %v9360_v39  ;;  %v11240_v39 = vld [vmem:[%s9893_s27 + $0x8] sm:$0x3f] }
0x2816   :  { %v5767_v59 = vsel %vm215_vm2, %v5413_v61, %v9362_v16  ;;  %v6229_v0 = vsel %vm215_vm2, %v5875_v27, %v9361_v5  ;;  %v9419_v61 = vld [vmem:[%s11551_s29 + $0x18] sm:$0xff]   ;;  %v6330_v16 = vrot.slane %v11240_v39, %v10175_v31 }
0x281b   :  { %v9365_v13 = vpop.permute.xlu1 %9364 }
0x281c   :  { %v9367_v7 = vunpack.i.h.bf16 %v9365_v13  ;;  %v9366_v40 = vunpack.i.l.bf16 %v9365_v13 }
0x281e   :  { %v5768_v37 = vsel %vm674_vm4, %v5767_v59, %v9367_v7  ;;  %v6230_v55 = vsel %vm674_vm4, %v6229_v0, %v9366_v40  ;;  %v6336_v0 = vrot.slane %v11240_v39, %v10183_v34  ;;  %v8156_v34 = vld [vmem:[%s11554_s14 + $0x1] ss:$0 sm:$0xff] }
0x281f   :  { %v5765_v10 = vpop.permute.xlu1 %5764 }
0x2820   :  { %v5769_v49 = vsel %vm676_vm5, %v5768_v37, %v5765_v10 }
0x2821   :  { %v6227_v8 = vpop.permute.xlu0 %6226 }
0x2822   :  { %v6231_v11 = vsel %vm676_vm5, %v6230_v55, %v6227_v8 }
0x2823   :  { %v6233_v51 = vrot.slane %v6231_v11, 2 }
0x2825   :  { %v6235_v9 = vsel %vm3755_vm10, %v5769_v49, %v6233_v51 }
0x2826   :  { %v6236_v15 = vpack.c.bf16 %v6233_v51, %v6235_v9 }
0x2828   :  { %9106 = vmatmul.mubr.msk.bf16.vlgmr.msra.gmra.mrb[192].mxu1 %vm166_vm1, %v6236_v15 }
0x2829   :  { %9118 = vmatpush3.bf16.msra.mxu1 %v9418_v12  ;;  %9121 = vmatprep.mubr.msk.bf16.mxu1 %vm9726_vm0, %v9725_v1 }
0x282a   :  { %9119 = vmatprep.subr.bf16.mxu1 %v9725_v1 }
0x282d   :  { %9120 = vmatpush3.bf16.msra.mxu1 %v9419_v61 }
0x282e   :  { %9131 = vmatprep.subr.bf16.mxu1 %v9725_v1 }
0x2830   :  { %9122 = vmatmul.mubr.msk.bf16.vlgmr.msra.gmra.mrb[196].mxu1 %vm166_vm1, %v10724_v33  ;;  %v8160_v33 = vld [vmem:[%s11553_s8 + $0x1] ss:$0 sm:$0xff] }
0x2831   :  { %9133 = vmatprep.mubr.msk.bf16.mxu1 %vm9726_vm0, %v9725_v1 }
0x28fb   :  { %v6292_v41 = vpop.f32.mrb[192].mxu1 }
0x28fc   :  { %v6293_v18 = vadd.f32 %v8137_v17, %v6292_v41  ;;  %v9107_v22 = vpop.f32.mrb[193].mxu1 }
0x28fd   :  { %v6295_v62 = vpop.f32.mrb[194].mxu1 }
0x28fe   :  { %v6299_v19 = vadd.f32 %v6293_v18, %v10996_v58  ;;  %v6296_v35 = vadd.f32 %v8137_v17, %v6295_v62  ;;  %v9108_v20 = vpop.f32.mrb[195].mxu1 }
0x2900   :  { %v6300_v24 = vadd.f32 %v6296_v35, %v10998_v60  ;;  %v6301_v4 = vsel %vm166_vm1, %v6299_v19, 0.0 }
0x2901   :  { %6302 = vadd.xlane.f32.xlu0 %v6301_v4 }
0x2902   :  { %v6304_v47 = vsel %vm3825_vm11, %v6300_v24, 0.0 }
0x2903   :  { %6305 = vadd.xlane.f32.xlu1 %v6304_v47  ;;  %v6475_v21 = vpop.f32.mrb[196].mxu1 }
0x2904   :  { %v9123_v23 = vpop.f32.mrb[197].mxu1  ;;  %v6476_v27 = vadd.f32 %v8160_v33, %v6475_v21 }
0x2905   :  { %v6478_v2 = vpop.f32.mrb[198].mxu1 }
0x2906   :  { %v6479_v3 = vadd.f32 %v8160_v33, %v6478_v2  ;;  %v9124_v38 = vpop.f32.mrb[199].mxu1 }
0x2908   :  { %v11227_v25 = vpack.c.bf16 %v6479_v3, %v6476_v27 }
0x290a   :  { %v6488_v11 = vsel %vm215_vm2, %v11227_v25, 0  ;;  %v11270_v22 = vrot.slane %v11227_v25, 4 }
0x290c   :  { %v6951_v21 = vsel %vm215_vm2, %v11270_v22, 0 }
0x2914   :  { %6596 = vrot.lane.b32.xlu1 %v11227_v25, %s9727_s0 }
0x2918   :  { %6708 = vrot.lane.b32.xlu1 %v11227_v25, %s9732_s28 }
0x298e   :  { %v6303_v58 = vpop.xlane.xlu0 %6302 }
0x298f   :  { %v6307_v60 = vmul.f32 0.03125, %v6303_v58 }
0x2990   :  { %v6306_v6 = vpop.xlane.xlu1 %6305 }
0x2991   :  { %v6309_v36 = vsub.f32 %v6299_v19, %v6307_v60  ;;  %v6308_v46 = vmul.f32 0.03125, %v6306_v6 }
0x2993   :  { %v6310_v32 = vsub.f32 %v6300_v24, %v6308_v46  ;;  %v6311_v50 = vmul.f32 %v6309_v36, %v6309_v36 }
0x2994   :  { %v6597_v17 = vpop.permute.xlu1 %6596 }
0x2995   :  { %v6313_v29 = vsel %vm166_vm1, %v6311_v50, 0.0  ;;  %v6312_v52 = vmul.f32 %v6310_v32, %v6310_v32  ;;  %v6602_v18 = vsel %vm215_vm2, %v6597_v17, 0 }
0x2996   :  { %6314 = vadd.xlane.f32.xlu0 %v6313_v29 }
0x2997   :  { %v6316_v53 = vsel %vm3825_vm11, %v6312_v52, 0.0  ;;  %v9668_v52 = vld [vmem:[%s11555_s19] sm:$0x3f] }
0x2998   :  { %v6709_v19 = vpop.permute.xlu1 %6708 }
0x2999   :  { %v6714_v20 = vsel %vm215_vm2, %v6709_v19, 0 }
0x299a   :  { %6317 = vadd.xlane.f32.xlu0 %v6316_v53 }
0x2a23   :  { %v6315_v48 = vpop.xlane.xlu0 %6314 }
0x2a24   :  { %v6319_v54 = vmul.f32 0.03125, %v6315_v48 }
0x2a26   :  { %v6321_v44 = vadd.f32 1e-05, %v6319_v54 }
0x2a27   :  { %v6318_v42 = vpop.xlane.xlu0 %6317 }
0x2a28   :  { %9620 = vrsqrt.f32 %v6321_v44  ;;  %v6320_v56 = vmul.f32 0.03125, %v6318_v42 }
0x2a2a   :  { %v6322_v43 = vadd.f32 1e-05, %v6320_v56 }
0x2a2c   :  { %9622 = vrsqrt.f32 %v6322_v43 }
0x2a32   :  { %v9621_v13 = vpop.eup %9620 }
0x2a33   :  { %v6325_v5 = vmul.f32 %v9621_v13, %v6309_v36 }
0x2a35   :  { %v6331_v40 = vmul.f32 %v6330_v16, %v6325_v5 }
0x2a36   :  { %v9623_v7 = vpop.eup %9622 }
0x2a37   :  { %v6326_v59 = vmul.f32 %v9623_v7, %v6310_v32  ;;  %v11246_v37 = vadd.f32 %v6336_v0, %v6331_v40 }
0x2a39   :  { %v6332_v10 = vmul.f32 %v6330_v16, %v6326_v59 }
0x2a3b   :  { %v11248_v55 = vadd.f32 %v6336_v0, %v6332_v10 }
0x2a3d   :  { %v6360_v8 = vpack.c.bf16 %v11248_v55, %v11246_v37 }
0x2a3f   :  { %9114 = vmatmul.mubr.msk.bf16.vlgmr.msra.gmra.mrb[192].mxu0 %vm166_vm1, %v6360_v8 }
0x2a40   :  { %9126 = vmatpush3.bf16.xpose.msra.mxu0 %v6488_v11  ;;  %9127 = vmatprep.mubr.msk.bf16.mxu0 %vm9726_vm0, %v9725_v1 }
0x2a41   :  { %9137 = vmatprep.subr.bf16.mxu0 %v9725_v1 }
0x2b12   :  { %v6416_v51 = vpop.f32.mrb[192].mxu0 }
0x2b13   :  { %v9115_v49 = vpop.f32.mrb[193].mxu0  ;;  %v6417_v12 = vadd.f32 %v8156_v34, %v6416_v51 }
0x2b14   :  { %v6419_v9 = vpop.f32.mrb[194].mxu0 }
0x2b15   :  { %v6420_v15 = vadd.f32 %v8156_v34, %v6419_v9  ;;  %v9116_v61 = vpop.f32.mrb[195].mxu0 }
0x2b17   :  { %v6482_v41 = vpack.c.bf16 %v6420_v15, %v6417_v12 }
0x2b19   :  { %6706 = vrot.lane.b32.xlu1 %v6482_v41, %s9732_s28  ;;  %6594 = vrot.lane.b32.xlu0 %v6482_v41, %s9727_s0  ;;  %v6945_v62 = vrot.slane %v6482_v41, 3 }
0x2b1a   :  { %9128 = vmatmul.mubr.msk.bf16.vlgmr.msra.gmra.mrb[196].mxu0 %vm215_vm2, %v6482_v41 }
0x2b1b   :  { %9138 = vmatpush3.bf16.xpose.msra.mxu0 %v6602_v18  ;;  %9139 = vmatprep.mubr.msk.bf16.mxu0 %vm9726_vm0, %v9725_v1  ;;  %v9669_v18 = vld [vmem:[%s11555_s19 + $0x8] sm:$0x3f] }
0x2b1c   :  { %9149 = vmatprep.subr.bf16.mxu0 %v9725_v1 }
0x2b1d   :  { %6818 = vrot.lane.b32.xlu1 %v6482_v41, %s9733_s1  ;;  %6820 = vrot.lane.b32.xlu0 %v11227_v25, %s9733_s1 }
0x2b21   :  { %7057 = vrot.lane.b32.xlu0 %v11270_v22, %s9727_s0  ;;  %7055 = vrot.lane.b32.xlu1 %v6945_v62, %s9727_s0 }
0x2b25   :  { %7169 = vrot.lane.b32.xlu0 %v11270_v22, %s9732_s28  ;;  %7167 = vrot.lane.b32.xlu1 %v6945_v62, %s9732_s28 }
0x2b29   :  { %7281 = vrot.lane.b32.xlu0 %v11270_v22, %s9733_s1  ;;  %7279 = vrot.lane.b32.xlu1 %v6945_v62, %s9733_s1 }
0x2b8b   :  { %v6595_v35 = vpop.permute.xlu0 %6594  ;;  %v6707_v4 = vpop.permute.xlu1 %6706 }
0x2b8c   :  { %9140 = vmatmul.mubr.msk.bf16.vlgmr.msra.gmra.mrb[200].mxu0 %vm215_vm2, %v6595_v35 }
0x2b8d   :  { %9150 = vmatpush3.bf16.xpose.msra.mxu0 %v6714_v20  ;;  %9151 = vmatprep.mubr.msk.bf16.mxu0 %vm9726_vm0, %v9725_v1 }
0x2b8e   :  { %9161 = vmatprep.subr.bf16.mxu0 %v9725_v1 }
0x2b8f   :  { %v6821_v24 = vpop.permute.xlu0 %6820  ;;  %v6819_v33 = vpop.permute.xlu1 %6818 }
0x2b90   :  { %v6826_v47 = vsel %vm215_vm2, %v6821_v24, 0 }
0x2b93   :  { %v7058_v23 = vpop.permute.xlu0 %7057  ;;  %v7056_v3 = vpop.permute.xlu1 %7055 }
0x2b94   :  { %9152 = vmatmul.mubr.msk.bf16.vlgmr.msra.gmra.mrb[204].mxu0 %vm215_vm2, %v6707_v4  ;;  %v7063_v2 = vsel %vm215_vm2, %v7058_v23, 0 }
0x2b95   :  { %9162 = vmatpush3.bf16.xpose.msra.mxu0 %v6826_v47  ;;  %9163 = vmatprep.mubr.msk.bf16.mxu0 %vm9726_vm0, %v9725_v1 }
0x2b96   :  { %9173 = vmatprep.subr.bf16.mxu0 %v9725_v1 }
0x2b97   :  { %v7170_v27 = vpop.permute.xlu0 %7169  ;;  %v7168_v60 = vpop.permute.xlu1 %7167 }
0x2b98   :  { %v7175_v38 = vsel %vm215_vm2, %v7170_v27, 0 }
0x2b9b   :  { %v7282_v58 = vpop.permute.xlu0 %7281  ;;  %v7280_v36 = vpop.permute.xlu1 %7279 }
0x2b9c   :  { %9164 = vmatmul.mubr.msk.bf16.vlgmr.msra.gmra.mrb[208].mxu0 %vm215_vm2, %v6819_v33  ;;  %v7287_v6 = vsel %vm215_vm2, %v7282_v58, 0 }
0x2b9d   :  { %9174 = vmatpush3.bf16.xpose.msra.mxu0 %v6951_v21  ;;  %9175 = vmatprep.mubr.msk.bf16.mxu0 %vm9726_vm0, %v9725_v1 }
0x2b9e   :  { %9185 = vmatprep.subr.bf16.mxu0 %v9725_v1 }
0x2ba4   :  { %9176 = vmatmul.mubr.msk.bf16.vlgmr.msra.gmra.mrb[212].mxu0 %vm215_vm2, %v6945_v62 }
0x2ba5   :  { %9186 = vmatpush3.bf16.xpose.msra.mxu0 %v7063_v2  ;;  %9187 = vmatprep.mubr.msk.bf16.mxu0 %vm9726_vm0, %v9725_v1 }
0x2ba6   :  { %9197 = vmatprep.subr.bf16.mxu0 %v9725_v1 }
0x2bac   :  { %9188 = vmatmul.mubr.msk.bf16.vlgmr.msra.gmra.mrb[216].mxu0 %vm215_vm2, %v7056_v3 }
0x2bad   :  { %9198 = vmatpush3.bf16.xpose.msra.mxu0 %v7175_v38  ;;  %9199 = vmatprep.mubr.msk.bf16.mxu0 %vm9726_vm0, %v9725_v1 }
0x2bae   :  { %9209 = vmatprep.subr.bf16.mxu0 %v9725_v1 }
0x2bb4   :  { %9200 = vmatmul.mubr.msk.bf16.vlgmr.msra.gmra.mrb[220].mxu0 %vm215_vm2, %v7168_v60 }
0x2bb5   :  { %9210 = vmatpush3.bf16.xpose.msra.mxu0 %v7287_v6  ;;  %9211 = vmatprep.mubr.msk.bf16.mxu0 %vm9726_vm0, %v9725_v1 }
0x2bb6   :  { %9221 = vmatprep.subr.bf16.mxu0 %v9725_v1 }
0x2bbc   :  { %9212 = vmatmul.mubr.msk.bf16.vlgmr.msra.gmra.mrb[224].mxu0 %vm215_vm2, %v7280_v36 }
0x2bbd   :  { %9225 = vmatprep.mubr.msk.bf16.mxu0 %vm9726_vm0, %v9725_v1 }
0x2bed   :  { %v6524_v46 = vpop.f32.mrb[196].mxu0 }
0x2bee   :  { %v6530_v32 = vmul.f32 0.35355338, %v6524_v46  ;;  %v9129_v50 = vpop.f32.mrb[197].mxu0 }
0x2bef   :  { %v6527_v29 = vpop.f32.mrb[198].mxu0 }
0x2bf0   :  { %v6531_v53 = vadd.f32 %v9668_v52, %v6530_v32  ;;  %v9130_v57 = vpop.f32.mrb[199].mxu0 }
0x2bf2   :  { %v6532_v45 = vsel %vm4052_vm12, %v6531_v53, -inf }
0x2bf3   :  { %6533 = vmax.xlane.f32.xlu0 %v6532_v45 }
0x2c5f   :  { %v6638_v48 = vpop.f32.mrb[200].mxu0 }
0x2c60   :  { %v6644_v54 = vmul.f32 0.35355338, %v6638_v48  ;;  %v9141_v44 = vpop.f32.mrb[201].mxu0 }
0x2c61   :  { %v6641_v42 = vpop.f32.mrb[202].mxu0 }
0x2c62   :  { %v11317_v56 = vadd.f32 %v9668_v52, %v6644_v54  ;;  %v9142_v43 = vpop.f32.mrb[203].mxu0 }
0x2c64   :  { %v6646_v13 = vsel %vm4052_vm12, %v11317_v56, -inf }
0x2c65   :  { %6647 = vmax.xlane.f32.xlu1 %v6646_v13 }
0x2c67   :  { %v6750_v16 = vpop.f32.mrb[204].mxu0 }
0x2c68   :  { %v6756_v5 = vmul.f32 0.35355338, %v6750_v16  ;;  %v9153_v7 = vpop.f32.mrb[205].mxu0 }
0x2c69   :  { %v6753_v40 = vpop.f32.mrb[206].mxu0 }
0x2c6a   :  { %v6757_v59 = vadd.f32 %v9668_v52, %v6756_v5  ;;  %v9154_v0 = vpop.f32.mrb[207].mxu0 }
0x2c6c   :  { %v6758_v10 = vsel %vm4052_vm12, %v6757_v59, -inf }
0x2c6d   :  { %6759 = vmax.xlane.f32.xlu0 %v6758_v10 }
0x2c6f   :  { %v6862_v8 = vpop.f32.mrb[208].mxu0 }
0x2c70   :  { %v6868_v11 = vmul.f32 0.35355338, %v6862_v8  ;;  %v9165_v34 = vpop.f32.mrb[209].mxu0 }
0x2c71   :  { %v6865_v51 = vpop.f32.mrb[210].mxu0 }
0x2c72   :  { %v11322_v49 = vadd.f32 %v9668_v52, %v6868_v11  ;;  %v9166_v9 = vpop.f32.mrb[211].mxu0 }
0x2c74   :  { %v6870_v12 = vsel %vm4052_vm12, %v11322_v49, -inf }
0x2c75   :  { %6871 = vmax.xlane.f32.xlu0 %v6870_v12 }
0x2c77   :  { %v6987_v15 = vpop.f32.mrb[212].mxu0 }
0x2c78   :  { %v6993_v61 = vmul.f32 0.35355338, %v6987_v15  ;;  %v9177_v17 = vpop.f32.mrb[213].mxu0 }
0x2c79   :  { %v6990_v41 = vpop.f32.mrb[214].mxu0 }
0x2c7a   :  { %v11327_v62 = vadd.f32 %v9669_v18, %v6993_v61  ;;  %v9178_v19 = vpop.f32.mrb[215].mxu0 }
0x2c7c   :  { %v6995_v35 = vsel %vm4052_vm12, %v11327_v62, -inf }
0x2c7d   :  { %6996 = vmax.xlane.f32.xlu1 %v6995_v35 }
0x2c7f   :  { %v7099_v20 = vpop.f32.mrb[216].mxu0 }
0x2c80   :  { %v7105_v24 = vmul.f32 0.35355338, %v7099_v20  ;;  %v9189_v4 = vpop.f32.mrb[217].mxu0  ;;  %v6534_v29 = vpop.xlane.xlu0 %6533 }
0x2c81   :  { %v7102_v47 = vpop.f32.mrb[218].mxu0  ;;  %v6535_v52 = vsub.f32 %v6531_v53, %v6534_v29 }
0x2c82   :  { %v7106_v33 = vadd.f32 %v9669_v18, %v7105_v24  ;;  %v9190_v21 = vpop.f32.mrb[219].mxu0 }
0x2c83   :  { %v6536_v57 = vmul.f32 1.442695, %v6535_v52 }
0x2c84   :  { %v7107_v23 = vsel %vm4052_vm12, %v7106_v33, -inf }
0x2c85   :  { %7108 = vmax.xlane.f32.xlu0 %v7107_v23  ;;  %9624 = vpow2.f32 %v6536_v57 }
0x2c87   :  { %v7211_v2 = vpop.f32.mrb[220].mxu0 }
0x2c88   :  { %v7217_v27 = vmul.f32 0.35355338, %v7211_v2  ;;  %v9201_v3 = vpop.f32.mrb[221].mxu0 }
0x2c89   :  { %v7214_v38 = vpop.f32.mrb[222].mxu0 }
0x2c8a   :  { %v7218_v58 = vadd.f32 %v9669_v18, %v7217_v27  ;;  %v9202_v60 = vpop.f32.mrb[223].mxu0 }
0x2c8c   :  { %v7219_v6 = vsel %vm4052_vm12, %v7218_v58, -inf }
0x2c8d   :  { %7220 = vmax.xlane.f32.xlu1 %v7219_v6 }
0x2c8f   :  { %v7323_v36 = vpop.f32.mrb[224].mxu0  ;;  %v11338_v44 = vpop.eup %9624 }
0x2c90   :  { %v9213_v46 = vpop.f32.mrb[225].mxu0  ;;  %v7329_v45 = vmul.f32 0.35355338, %v7323_v36  ;;  %v6538_v42 = vsel %vm4052_vm12, %v11338_v44, 0.0 }
0x2c91   :  { %v7326_v32 = vpop.f32.mrb[226].mxu0 }
0x2c92   :  { %v9214_v50 = vpop.f32.mrb[227].mxu0  ;;  %v7330_v48 = vadd.f32 %v9669_v18, %v7329_v45 }
0x2c94   :  { %v7331_v54 = vsel %vm4052_vm12, %v7330_v48, -inf }
0x2c9b   :  { %6658 = vrot.lane.b32.xlu0 %v11227_v25, %s9730_s23 }
0x2c9e   :  { %6545 = vrot.lane.b32.xlu1 %v11227_v25, %s9728_s5 }
0x2cba   :  { %7332 = vmax.xlane.f32.xlu0 %v7331_v54 }
0x2cc2   :  { %6539 = vadd.xlane.f32.xlu1 %v6538_v42 }
0x2cf2   :  { %v6648_v43 = vpop.xlane.xlu1 %6647 }
0x2cf3   :  { %v6649_v13 = vsub.f32 %v11317_v56, %v6648_v43 }
0x2cf5   :  { %v6650_v16 = vmul.f32 1.442695, %v6649_v13 }
0x2cf7   :  { %9626 = vpow2.f32 %v6650_v16 }
0x2cfa   :  { %v6760_v5 = vpop.xlane.xlu0 %6759 }
0x2cfb   :  { %v6761_v53 = vsub.f32 %v6757_v59, %v6760_v5 }
0x2cfd   :  { %v6762_v7 = vmul.f32 1.442695, %v6761_v53 }
0x2cff   :  { %9628 = vpow2.f32 %v6762_v7 }
0x2d01   :  { %v11343_v40 = vpop.eup %9626 }
0x2d02   :  { %v6652_v0 = vsel %vm4052_vm12, %v11343_v40, 0.0  ;;  %v6872_v34 = vpop.xlane.xlu0 %6871 }
0x2d03   :  { %6653 = vadd.xlane.f32.xlu0 %v6652_v0  ;;  %v6873_v9 = vsub.f32 %v11322_v49, %v6872_v34 }
0x2d05   :  { %v6874_v12 = vmul.f32 1.442695, %v6873_v9 }
0x2d07   :  { %9630 = vpow2.f32 %v6874_v12 }
0x2d09   :  { %v11347_v10 = vpop.eup %9628 }
0x2d0a   :  { %v6764_v8 = vsel %vm4052_vm12, %v11347_v10, 0.0  ;;  %v6997_v11 = vpop.xlane.xlu1 %6996 }
0x2d0b   :  { %6765 = vadd.xlane.f32.xlu1 %v6764_v8  ;;  %v6998_v15 = vsub.f32 %v11327_v62, %v6997_v11 }
0x2d0d   :  { %v6999_v41 = vmul.f32 1.442695, %v6998_v15 }
0x2d0f   :  { %9632 = vpow2.f32 %v6999_v41 }
0x2d11   :  { %v9631_v35 = vpop.eup %9630 }
0x2d12   :  { %v7109_v61 = vpop.xlane.xlu0 %7108  ;;  %v6876_v20 = vsel %vm4052_vm12, %v9631_v35, 0.0 }
0x2d13   :  { %v7110_v17 = vsub.f32 %v7106_v33, %v7109_v61 }
0x2d15   :  { %v7111_v19 = vmul.f32 1.442695, %v7110_v17 }
0x2d16   :  { %v6659_v21 = vpop.permute.xlu0 %6658 }
0x2d17   :  { %9634 = vpow2.f32 %v7111_v19  ;;  %v6664_v46 = vsel %vm281_vm3, %v6659_v21, 0 }
0x2d19   :  { %6770 = vrot.lane.b32.xlu0 %v11227_v25, %s9729_s22  ;;  %v11360_v24 = vpop.eup %9632 }
0x2d1a   :  { %v7221_v56 = vpop.xlane.xlu1 %7220  ;;  %v7001_v62 = vsel %vm4052_vm12, %v11360_v24, 0.0 }
0x2d1b   :  { %v7222_v18 = vsub.f32 %v7218_v58, %v7221_v56 }
0x2d1c   :  { %6882 = vrot.lane.b32.xlu1 %v11227_v25, %s9731_s26 }
0x2d1d   :  { %v7223_v25 = vmul.f32 1.442695, %v7222_v18 }
0x2d1e   :  { %v6546_v59 = vpop.permute.xlu1 %6545 }
0x2d1f   :  { %v6551_v51 = vsel %vm281_vm3, %v6546_v59, 0  ;;  %9636 = vpow2.f32 %v7223_v25 }
0x2d20   :  { %9132 = vmatpush3.bf16.msra.mxu1 %v6551_v51 }
0x2d21   :  { %9143 = vmatprep.subr.bf16.mxu1 %v9725_v1  ;;  %v11362_v49 = vpop.eup %9634 }
0x2d22   :  { %v7113_v47 = vsel %vm4052_vm12, %v11362_v49, 0.0 }
0x2d29   :  { %v11366_v4 = vpop.eup %9636 }
0x2d2a   :  { %v7225_v33 = vsel %vm4052_vm12, %v11366_v4, 0.0 }
0x2d38   :  { %6877 = vadd.xlane.f32.xlu0 %v6876_v20 }
0x2d3c   :  { %7002 = vadd.xlane.f32.xlu0 %v7001_v62 }
0x2d40   :  { %7114 = vadd.xlane.f32.xlu1 %v7113_v47  ;;  %7226 = vadd.xlane.f32.xlu0 %v7225_v33 }
0x2d47   :  { %v7333_v23 = vpop.xlane.xlu0 %7332 }
0x2d48   :  { %v7334_v2 = vsub.f32 %v7330_v48, %v7333_v23 }
0x2d4a   :  { %v7335_v27 = vmul.f32 1.442695, %v7334_v2 }
0x2d4c   :  { %9638 = vpow2.f32 %v7335_v27 }
0x2d4f   :  { %v6540_v3 = vpop.xlane.xlu1 %6539 }
0x2d50   :  { %9640 = vrcp.f32 %v6540_v3 }
0x2d51   :  { %7119 = vrot.lane.b32.xlu1 %v11270_v22, %s9730_s23 }
0x2d55   :  { %7231 = vrot.lane.b32.xlu1 %v11270_v22, %s9729_s22 }
0x2d56   :  { %v11376_v38 = vpop.eup %9638 }
0x2d57   :  { %v7337_v58 = vsel %vm4052_vm12, %v11376_v38, 0.0 }
0x2d58   :  { %7338 = vadd.xlane.f32.xlu0 %v7337_v58 }
0x2d59   :  { %7343 = vrot.lane.b32.xlu1 %v11270_v22, %s9731_s26 }
0x2d5a   :  { %v9641_v60 = vpop.eup %9640 }
0x2d5b   :  { %v6542_v6 = vmul.f32 %v9641_v60, %v11338_v44 }
0x2d5d   :  { %v6543_v36 = vpack.c.bf16 %v6542_v6, %v6542_v6 }
0x2d5f   :  { %9134 = vmatmul.mubr.msk.bf16.vlgmr.msra.gmra.mrb[200].mxu1 %vm215_vm2, %v6543_v36 }
0x2d60   :  { %9144 = vmatpush3.bf16.msra.mxu1 %v6664_v46  ;;  %9145 = vmatprep.mubr.msk.bf16.mxu1 %vm9726_vm0, %v9725_v1 }
0x2d61   :  { %9155 = vmatprep.subr.bf16.mxu1 %v9725_v1 }
0x2d6e   :  { %7007 = vrot.lane.b32.xlu0 %v11270_v22, %s9728_s5 }
0x2d90   :  { %v6654_v32 = vpop.xlane.xlu0 %6653 }
0x2d91   :  { %9642 = vrcp.f32 %v6654_v32 }
0x2d94   :  { %v6771_v57 = vpop.permute.xlu0 %6770 }
0x2d95   :  { %v6776_v48 = vsel %vm281_vm3, %v6771_v57, 0 }
0x2d98   :  { %v6766_v50 = vpop.xlane.xlu1 %6765 }
0x2d99   :  { %9644 = vrcp.f32 %v6766_v50 }
0x2d9b   :  { %v9643_v29 = vpop.eup %9642 }
0x2d9c   :  { %v6656_v52 = vmul.f32 %v9643_v29, %v11343_v40  ;;  %v6883_v44 = vpop.permute.xlu1 %6882 }
0x2d9d   :  { %v6888_v43 = vsel %vm281_vm3, %v6883_v44, 0 }
0x2d9e   :  { %v6657_v45 = vpack.c.bf16 %v6656_v52, %v6656_v52 }
0x2da0   :  { %9146 = vmatmul.mubr.msk.bf16.vlgmr.msra.gmra.mrb[204].mxu1 %vm215_vm2, %v6657_v45 }
0x2da1   :  { %9156 = vmatpush3.bf16.msra.mxu1 %v6776_v48  ;;  %9157 = vmatprep.mubr.msk.bf16.mxu1 %vm9726_vm0, %v9725_v1 }
0x2da2   :  { %9167 = vmatprep.subr.bf16.mxu1 %v9725_v1 }
0x2da3   :  { %v9645_v22 = vpop.eup %9644 }
0x2da4   :  { %v6768_v54 = vmul.f32 %v9645_v22, %v11347_v10 }
0x2da6   :  { %v6769_v42 = vpack.c.bf16 %v6768_v54, %v6768_v54 }
0x2da8   :  { %9158 = vmatmul.mubr.msk.bf16.vlgmr.msra.gmra.mrb[208].mxu1 %vm215_vm2, %v6769_v42  ;;  %v9422_v42 = vld [vmem:[%s11556_s24 + $0x10] sm:$0xff]  }
0x2da9   :  { %9168 = vmatpush3.bf16.msra.mxu1 %v6888_v43  ;;  %9169 = vmatprep.mubr.msk.bf16.mxu1 %vm9726_vm0, %v9725_v1 }
0x2daa   :  { %9179 = vmatprep.subr.bf16.mxu1 %v9725_v1  ;;  %9222 = vmatpush3.bf16.msra.mxu0 %v9422_v42 }
0x2dab   :  { %9223 = vmatprep.subr.bf16.mxu0 %v9725_v1 }
0x2dc5   :  { %v6878_v13 = vpop.xlane.xlu0 %6877 }
0x2dc6   :  { %9646 = vrcp.f32 %v6878_v13  ;;  %v9423_v13 = vld [vmem:[%s11556_s24 + $0x18] sm:$0xff]  }
0x2dc7   :  { %9224 = vmatpush3.bf16.msra.mxu0 %v9423_v13 }
0x2dc8   :  { %9237 = vmatprep.subr.bf16.mxu0 %v9725_v1 }
0x2dc9   :  { %v7003_v7 = vpop.xlane.xlu0 %7002 }
0x2dca   :  { %9648 = vrcp.f32 %v7003_v7 }
0x2dcd   :  { %v7115_v40 = vpop.xlane.xlu1 %7114  ;;  %v7227_v0 = vpop.xlane.xlu0 %7226 }
0x2dce   :  { %9650 = vrcp.f32 %v7115_v40 }
0x2dcf   :  { %9652 = vrcp.f32 %v7227_v0 }
0x2dd0   :  { %v9647_v16 = vpop.eup %9646 }
0x2dd1   :  { %v6880_v5 = vmul.f32 %v9647_v16, %v9631_v35  ;;  %v7120_v34 = vpop.permute.xlu1 %7119 }
0x2dd2   :  { %v7125_v12 = vsel %vm281_vm3, %v7120_v34, 0 }
0x2dd3   :  { %v6881_v53 = vpack.c.bf16 %v6880_v5, %v6880_v5 }
0x2dd4   :  { %v9649_v10 = vpop.eup %9648 }
0x2dd5   :  { %9170 = vmatmul.mubr.msk.bf16.vlgmr.msra.gmra.mrb[212].mxu1 %vm215_vm2, %v6881_v53  ;;  %v7005_v11 = vmul.f32 %v9649_v10, %v11360_v24  ;;  %v7232_v61 = vpop.permute.xlu1 %7231 }
0x2dd6   :  { %9181 = vmatprep.mubr.msk.bf16.mxu1 %vm9726_vm0, %v9725_v1  ;;  %v7237_v18 = vsel %vm281_vm3, %v7232_v61, 0 }
0x2dd7   :  { %v7006_v51 = vpack.c.bf16 %v7005_v11, %v7005_v11 }
0x2dd8   :  { %v9651_v9 = vpop.eup %9650 }
0x2dd9   :  { %v7117_v15 = vmul.f32 %v9651_v9, %v11362_v49  ;;  %v9653_v41 = vpop.eup %9652  ;;  %v7344_v25 = vpop.permute.xlu1 %7343 }
0x2dda   :  { %v7229_v19 = vmul.f32 %v9653_v41, %v11366_v4  ;;  %v7349_v24 = vsel %vm281_vm3, %v7344_v25, 0 }
0x2ddb   :  { %v7118_v17 = vpack.c.bf16 %v7117_v15, %v7117_v15 }
0x2ddc   :  { %v7230_v35 = vpack.c.bf16 %v7229_v19, %v7229_v19 }
0x2de5   :  { %v7339_v8 = vpop.xlane.xlu0 %7338 }
0x2de6   :  { %9654 = vrcp.f32 %v7339_v8 }
0x2de9   :  { %v7008_v56 = vpop.permute.xlu0 %7007 }
0x2dea   :  { %v7013_v59 = vsel %vm281_vm3, %v7008_v56, 0 }
0x2deb   :  { %9180 = vmatpush3.bf16.msra.mxu1 %v7013_v59 }
0x2dec   :  { %9191 = vmatprep.subr.bf16.mxu1 %v9725_v1 }
0x2dee   :  { %9182 = vmatmul.mubr.msk.bf16.vlgmr.msra.gmra.mrb[216].mxu1 %vm215_vm2, %v7006_v51 }
0x2def   :  { %9192 = vmatpush3.bf16.msra.mxu1 %v7125_v12  ;;  %9193 = vmatprep.mubr.msk.bf16.mxu1 %vm9726_vm0, %v9725_v1 }
0x2df0   :  { %9203 = vmatprep.subr.bf16.mxu1 %v9725_v1  ;;  %v9655_v20 = vpop.eup %9654 }
0x2df1   :  { %v7341_v49 = vmul.f32 %v9655_v20, %v11376_v38 }
0x2df3   :  { %v7342_v62 = vpack.c.bf16 %v7341_v49, %v7341_v49 }
0x2df6   :  { %9194 = vmatmul.mubr.msk.bf16.vlgmr.msra.gmra.mrb[220].mxu1 %vm215_vm2, %v7118_v17 }
0x2df7   :  { %9204 = vmatpush3.bf16.msra.mxu1 %v7237_v18  ;;  %9205 = vmatprep.mubr.msk.bf16.mxu1 %vm9726_vm0, %v9725_v1 }
0x2df8   :  { %9215 = vmatprep.subr.bf16.mxu1 %v9725_v1 }
0x2dfe   :  { %9206 = vmatmul.mubr.msk.bf16.vlgmr.msra.gmra.mrb[224].mxu1 %vm215_vm2, %v7230_v35 }
0x2dff   :  { %9216 = vmatpush3.bf16.msra.mxu1 %v7349_v24  ;;  %9217 = vmatprep.mubr.msk.bf16.mxu1 %vm9726_vm0, %v9725_v1 }
0x2e00   :  { %9229 = vmatprep.subr.bf16.mxu1 %v9725_v1 }
0x2e06   :  { %9218 = vmatmul.mubr.msk.bf16.vlgmr.msra.gmra.mrb[228].mxu1 %vm215_vm2, %v7342_v62  ;;  %v8180_v62 = vld [vmem:[%s11557_s30 + $0x1] ss:$0 sm:$0xff] }
0x2e07   :  { %9233 = vmatprep.mubr.msk.bf16.mxu1 %vm9726_vm0, %v9725_v1 }
0x2e32   :  { %v6587_v4 = vpop.f32.mrb[200].mxu1 }
0x2e33   :  { %v9135_v47 = vpop.f32.mrb[201].mxu1 }
0x2e34   :  { %v6590_v33 = vpop.f32.mrb[202].mxu1 }
0x2e35   :  { %v9136_v21 = vpop.f32.mrb[203].mxu1 }
0x2e73   :  { %v6700_v23 = vpop.f32.mrb[204].mxu1 }
0x2e74   :  { %v9147_v2 = vpop.f32.mrb[205].mxu1 }
0x2e75   :  { %v6703_v27 = vpop.f32.mrb[206].mxu1 }
0x2e76   :  { %v9148_v3 = vpop.f32.mrb[207].mxu1 }
0x2e7b   :  { %v6812_v58 = vpop.f32.mrb[208].mxu1 }
0x2e7c   :  { %v9159_v60 = vpop.f32.mrb[209].mxu1 }
0x2e7d   :  { %v6815_v38 = vpop.f32.mrb[210].mxu1 }
0x2e7e   :  { %v9160_v6 = vpop.f32.mrb[211].mxu1 }
0x2ea8   :  { %v6924_v36 = vpop.f32.mrb[212].mxu1 }
0x2ea9   :  { %v9171_v46 = vpop.f32.mrb[213].mxu1 }
0x2eaa   :  { %v6927_v32 = vpop.f32.mrb[214].mxu1 }
0x2eab   :  { %v9172_v50 = vpop.f32.mrb[215].mxu1 }
0x2ec1   :  { %v7049_v29 = vpop.f32.mrb[216].mxu1 }
0x2ec2   :  { %v9183_v52 = vpop.f32.mrb[217].mxu1 }
0x2ec3   :  { %v7052_v57 = vpop.f32.mrb[218].mxu1 }
0x2ec4   :  { %v9184_v45 = vpop.f32.mrb[219].mxu1  ;;  %v9424_v57 = vld [vmem:[%s11558_s6 + $0x10] sm:$0xff]  }
0x2ec5   :  { %9230 = vmatpush3.bf16.msra.mxu1 %v9424_v57  ;;  %v9425_v45 = vld [vmem:[%s11558_s6 + $0x18] sm:$0xff]  }
0x2ec6   :  { %9231 = vmatprep.subr.bf16.mxu1 %v9725_v1 }
0x2ec9   :  { %v7161_v48 = vpop.f32.mrb[220].mxu1  ;;  %9232 = vmatpush3.bf16.msra.mxu1 %v9425_v45 }
0x2eca   :  { %v9368_v22 = vpack.i.bf16 %v6700_v23, %v7161_v48  ;;  %v9195_v54 = vpop.f32.mrb[221].mxu1  ;;  %v9426_v48 = vld [vmem:[%s11559_s18 + $0x20] sm:$0xff]   ;;  %9249 = vmatprep.subr.bf16.mxu1 %v9725_v1 }
0x2ecb   :  { %v7164_v44 = vpop.f32.mrb[222].mxu1 }
0x2ecc   :  { %9369 = vrot.lane.b32.xlu1 %v9368_v22, %s11562_s12  ;;  %v9196_v43 = vpop.f32.mrb[223].mxu1  ;;  %v9427_v22 = vld [vmem:[%s11559_s18 + $0x28] sm:$0xff]  }
0x2ed1   :  { %v7273_v16 = vpop.f32.mrb[224].mxu1 }
0x2ed2   :  { %v9373_v5 = vpack.i.bf16 %v6812_v58, %v7273_v16  ;;  %v9207_v53 = vpop.f32.mrb[225].mxu1 }
0x2ed3   :  { %v7276_v7 = vpop.f32.mrb[226].mxu1  ;;  %v7504_v53 = vrot.slane %v11240_v39, %v10208_v26  ;;  %v9429_v26 = vld [vmem:[%s11559_s18 + $0x38] sm:$0xff]  }
0x2ed4   :  { %9374 = vrot.lane.b32.xlu1 %v9373_v5, %s11563_s20  ;;  %v9208_v40 = vpop.f32.mrb[227].mxu1 }
0x2ed8   :  { %6939 = vrot.lane.b32.xlu1 %v6924_v36, %s11564_s2 }
0x2ed9   :  { %v7385_v0 = vpop.f32.mrb[228].mxu1 }
0x2eda   :  { %7400 = vrot.lane.b32.xlu0 %v7385_v0, %s11564_s2  ;;  %v9219_v10 = vpop.f32.mrb[229].mxu1 }
0x2edb   :  { %v7388_v8 = vpop.f32.mrb[230].mxu1 }
0x2edc   :  { %v9220_v11 = vpop.f32.mrb[231].mxu1  ;;  %v7510_v8 = vrot.slane %v11240_v39, %v10213_v14 }
0x2f3e   :  { %v9370_v56 = vpop.permute.xlu1 %9369 }
0x2f3f   :  { %v9372_v34 = vunpack.i.h.bf16 %v9370_v56  ;;  %v9371_v51 = vunpack.i.l.bf16 %v9370_v56 }
0x2f41   :  { %v6942_v15 = vsel %vm215_vm2, %v6587_v4, %v9372_v34  ;;  %v7403_v61 = vsel %vm215_vm2, %v7049_v29, %v9371_v51  ;;  %v9428_v51 = vld [vmem:[%s11559_s18 + $0x30] sm:$0xff]  }
0x2f46   :  { %v9375_v59 = vpop.permute.xlu1 %9374 }
0x2f47   :  { %v9377_v9 = vunpack.i.h.bf16 %v9375_v59  ;;  %v9376_v12 = vunpack.i.l.bf16 %v9375_v59 }
0x2f49   :  { %v6943_v41 = vsel %vm674_vm4, %v6942_v15, %v9377_v9  ;;  %v7404_v18 = vsel %vm674_vm4, %v7403_v61, %v9376_v12  ;;  %v8198_v9 = vld [vmem:[%s11560_s16 + $0x1] ss:$0 sm:$0xff] }
0x2f4a   :  { %v6940_v17 = vpop.permute.xlu1 %6939 }
0x2f4b   :  { %v6944_v20 = vsel %vm676_vm5, %v6943_v41, %v6940_v17 }
0x2f4c   :  { %v7401_v19 = vpop.permute.xlu0 %7400 }
0x2f4d   :  { %v7405_v25 = vsel %vm676_vm5, %v7404_v18, %v7401_v19 }
0x2f4e   :  { %v7407_v35 = vrot.slane %v7405_v25, 2 }
0x2f50   :  { %v7409_v24 = vsel %vm3755_vm10, %v6944_v20, %v7407_v35 }
0x2f51   :  { %v7410_v49 = vpack.c.bf16 %v7407_v35, %v7409_v24  ;;  %v8202_v35 = vld [vmem:[%s11561_s15 + $0x1] ss:$0 sm:$0xff] }
0x2f53   :  { %9226 = vmatmul.mubr.msk.bf16.vlgmr.msra.gmra.mrb[228].mxu0 %vm166_vm1, %v7410_v49 }
0x2f54   :  { %9245 = vmatprep.mubr.msk.bf16.mxu0 %vm9726_vm0, %v9725_v1  ;;  %9238 = vmatpush3.bf16.msra.mxu0 %v9426_v48 }
0x2f55   :  { %9239 = vmatprep.subr.bf16.mxu0 %v9725_v1 }
0x2f58   :  { %9240 = vmatpush3.bf16.msra.mxu0 %v9427_v22 }
0x2f59   :  { %9241 = vmatprep.subr.bf16.mxu0 %v9725_v1 }
0x2f5c   :  { %9242 = vmatpush3.bf16.msra.mxu0 %v9428_v51 }
0x2f5d   :  { %9243 = vmatprep.subr.bf16.mxu0 %v9725_v1 }
0x2f60   :  { %9244 = vmatpush3.bf16.msra.mxu0 %v9429_v26 }
0x3026   :  { %v7466_v4 = vpop.f32.mrb[228].mxu0 }
0x3027   :  { %v7467_v47 = vadd.f32 %v8180_v62, %v7466_v4  ;;  %v9227_v33 = vpop.f32.mrb[229].mxu0 }
0x3028   :  { %v7469_v21 = vpop.f32.mrb[230].mxu0 }
0x3029   :  { %v7473_v23 = vadd.f32 %v7467_v47, %v11246_v37  ;;  %v7470_v2 = vadd.f32 %v8180_v62, %v7469_v21  ;;  %v9228_v27 = vpop.f32.mrb[231].mxu0 }
0x302b   :  { %v7474_v3 = vadd.f32 %v7470_v2, %v11248_v55  ;;  %v7475_v58 = vsel %vm166_vm1, %v7473_v23, 0.0 }
0x302c   :  { %7476 = vadd.xlane.f32.xlu0 %v7475_v58 }
0x302d   :  { %v7478_v60 = vsel %vm3825_vm11, %v7474_v3, 0.0 }
0x302e   :  { %7479 = vadd.xlane.f32.xlu1 %v7478_v60 }
0x30b9   :  { %v7477_v38 = vpop.xlane.xlu0 %7476 }
0x30ba   :  { %v7481_v6 = vmul.f32 0.03125, %v7477_v38 }
0x30bb   :  { %v7480_v36 = vpop.xlane.xlu1 %7479 }
0x30bc   :  { %v7483_v46 = vsub.f32 %v7473_v23, %v7481_v6  ;;  %v7482_v32 = vmul.f32 0.03125, %v7480_v36 }
0x30be   :  { %v7484_v37 = vsub.f32 %v7474_v3, %v7482_v32  ;;  %v7485_v50 = vmul.f32 %v7483_v46, %v7483_v46 }
0x30c0   :  { %v7487_v29 = vsel %vm166_vm1, %v7485_v50, 0.0  ;;  %v7486_v55 = vmul.f32 %v7484_v37, %v7484_v37  ;;  %v9430_v50 = vld [vmem:[%s9898_s4] sm:$0xff]  }
0x30c1   :  { %7488 = vadd.xlane.f32.xlu0 %v7487_v29  ;;  %v9431_v29 = vld [vmem:[%s9898_s4 + $0x8] sm:$0xff]  }
0x30c2   :  { %v7490_v52 = vsel %vm3825_vm11, %v7486_v55, 0.0 }
0x30c5   :  { %7491 = vadd.xlane.f32.xlu0 %v7490_v52 }
0x314e   :  { %v7489_v54 = vpop.xlane.xlu0 %7488 }
0x314f   :  { %v7493_v44 = vmul.f32 0.03125, %v7489_v54  ;;  %v7702_v54 = vrot.slane %v11240_v39, %v5218_v28 }
0x3151   :  { %v7495_v42 = vadd.f32 1e-05, %v7493_v44 }
0x3152   :  { %v7492_v43 = vpop.xlane.xlu0 %7491 }
0x3153   :  { %9656 = vrsqrt.f32 %v7495_v42  ;;  %v7494_v13 = vmul.f32 0.03125, %v7492_v43 }
0x3155   :  { %v7496_v16 = vadd.f32 1e-05, %v7494_v13 }
0x3157   :  { %9658 = vrsqrt.f32 %v7496_v16 }
0x315d   :  { %v9657_v5 = vpop.eup %9656 }
0x315e   :  { %v7499_v7 = vmul.f32 %v9657_v5, %v7483_v46 }
0x3160   :  { %v7505_v0 = vmul.f32 %v7504_v53, %v7499_v7 }
0x3161   :  { %v9659_v40 = vpop.eup %9658 }
0x3162   :  { %v7500_v10 = vmul.f32 %v9659_v40, %v7484_v37  ;;  %v7511_v56 = vadd.f32 %v7510_v8, %v7505_v0  ;;  %v9741_v0 = vmov 1966171168  }
0x3164   :  { %v7506_v11 = vmul.f32 %v7504_v53, %v7500_v10  ;;  %v7782_v10 = vunpack.c.l.s4 %v9741_v0 }
0x3166   :  { %v7512_v59 = vadd.f32 %v7510_v8, %v7506_v11  ;;  %v7783_v8 = vunpack.c.0.s8 %v7782_v10  ;;  %v8208_v11 = vld [vmem:[%s9903_s21] ss:$0 sm:$0xff]  ;;  %s9742_s21 = smov [#allocation2]  }
0x3167   :  { %s7909_s27 = sshll.u32 %s9742_s21, 4  ;;  %s7910_s27 = int_to_ptr.vmem [resolvable:$true] %s7909_s27 }
0x3168   :  { %v7531_v34 = vpack.c.bf16 %v7512_v59, %v7511_v56  ;;  %v7786_v28 = vsub.s32 %v7783_v8, %v10172_v30  ;;  %s9670_s4 = scalar_lea.vmem %s7910_s27, 192  ;;  %p9675_p1 = scmp.lt.s32.totalorder %s7910_s27, %s7910_s27 }
0x3169   :  { %p9671_p0 = scmp.ne.s32.totalorder %s7910_s27, %s9670_s4  ;;  %p9676_p2 = scmp.lt.s32.totalorder %s9670_s4, %s9670_s4 }
0x316a   :  { %9234 = vmatmul.mubr.msk.bf16.vlgmr.msra.gmra.mrb[232].mxu1 %vm166_vm1, %v7531_v34 }
0x316b   :  { %9253 = vmatprep.mubr.msk.bf16.mxu1 %vm9726_vm0, %v9725_v1  ;;  %9250 = vmatpush3.bf16.msra.mxu1 %v9430_v50  ;;  %p9677_p3 = por %p9676_p2, %p9675_p1 }
0x316c   :  { %9251 = vmatprep.subr.bf16.mxu1 %v9725_v1  ;;  %v7708_v1 = vrot.slane %v11240_v39, %v5224_v63 }
0x316d   :  { %p9678_p4 = pnand %p9677_p3, %p9671_p0 }
0x316f   :  { %9252 = vmatpush3.bf16.msra.mxu1 %v9431_v29 }
0x323d   :  { %v7587_v12 = vpop.f32.mrb[232].mxu1 }
0x323e   :  { %v7588_v15 = vadd.f32 %v8198_v9, %v7587_v12  ;;  %v9235_v14 = vpop.f32.mrb[233].mxu1 }
0x323f   :  { %v7590_v61 = vpop.f32.mrb[234].mxu1 }
0x3240   :  { %v7591_v17 = vadd.f32 %v8198_v9, %v7590_v61  ;;  %v9236_v41 = vpop.f32.mrb[235].mxu1  ;;  %v7594_v18 = vmax.f32 %v7588_v15, 0.0 }
0x3242   :  { %v7595_v19 = vmax.f32 %v7591_v17, 0.0 }
0x3244   :  { %v7596_v25 = vpack.c.bf16 %v7595_v19, %v7594_v18 }
0x3246   :  { %9246 = vmatmul.mubr.msk.bf16.vlgmr.msra.gmra.mrb[232].mxu0 %vm1354_vm6, %v7596_v25 }
0x3319   :  { %v7664_v20 = vpop.f32.mrb[232].mxu0 }
0x331a   :  { %v7665_v24 = vadd.f32 %v8202_v35, %v7664_v20  ;;  %v9247_v49 = vpop.f32.mrb[233].mxu0 }
0x331b   :  { %v7667_v62 = vpop.f32.mrb[234].mxu0 }
0x331c   :  { %v7671_v4 = vadd.f32 %v7665_v24, %v7511_v56  ;;  %v7668_v47 = vadd.f32 %v8202_v35, %v7667_v62  ;;  %v9248_v33 = vpop.f32.mrb[235].mxu0 }
0x331e   :  { %v7672_v21 = vadd.f32 %v7668_v47, %v7512_v59  ;;  %v7673_v23 = vsel %vm166_vm1, %v7671_v4, 0.0 }
0x331f   :  { %7674 = vadd.xlane.f32.xlu1 %v7673_v23 }
0x3320   :  { %v7676_v2 = vsel %vm3825_vm11, %v7672_v21, 0.0 }
0x3321   :  { %7677 = vadd.xlane.f32.xlu0 %v7676_v2 }
0x33ac   :  { %v7675_v27 = vpop.xlane.xlu1 %7674 }
0x33ad   :  { %v7679_v3 = vmul.f32 0.03125, %v7675_v27 }
0x33ae   :  { %v7678_v58 = vpop.xlane.xlu0 %7677 }
0x33af   :  { %v7681_v60 = vsub.f32 %v7671_v4, %v7679_v3  ;;  %v7680_v38 = vmul.f32 0.03125, %v7678_v58 }
0x33b1   :  { %v7682_v6 = vsub.f32 %v7672_v21, %v7680_v38  ;;  %v7683_v36 = vmul.f32 %v7681_v60, %v7681_v60 }
0x33b3   :  { %v7685_v46 = vsel %vm166_vm1, %v7683_v36, 0.0  ;;  %v7684_v32 = vmul.f32 %v7682_v6, %v7682_v6 }
0x33b4   :  { %7686 = vadd.xlane.f32.xlu1 %v7685_v46 }
0x33b5   :  { %v7688_v37 = vsel %vm3825_vm11, %v7684_v32, 0.0 }
0x33b6   :  { %7689 = vadd.xlane.f32.xlu0 %v7688_v37 }
0x3441   :  { %v7687_v55 = vpop.xlane.xlu1 %7686 }
0x3442   :  { %v7691_v52 = vmul.f32 0.03125, %v7687_v55 }
0x3443   :  { %v7690_v57 = vpop.xlane.xlu0 %7689 }
0x3444   :  { %v7693_v45 = vadd.f32 1e-05, %v7691_v52  ;;  %v7692_v48 = vmul.f32 0.03125, %v7690_v57 }
0x3446   :  { %9660 = vrsqrt.f32 %v7693_v45  ;;  %v7694_v22 = vadd.f32 1e-05, %v7692_v48 }
0x3448   :  { %9662 = vrsqrt.f32 %v7694_v22 }
0x3450   :  { %v9661_v44 = vpop.eup %9660 }
0x3451   :  { %v7697_v42 = vmul.f32 %v9661_v44, %v7681_v60 }
0x3452   :  { %v9663_v43 = vpop.eup %9662 }
0x3453   :  { %v7703_v13 = vmul.f32 %v7702_v54, %v7697_v42  ;;  %v7698_v16 = vmul.f32 %v9663_v43, %v7682_v6 }
0x3455   :  { %v7704_v5 = vmul.f32 %v7702_v54, %v7698_v16  ;;  %v7709_v53 = vadd.f32 %v7708_v1, %v7703_v13 }
0x3457   :  { %v7710_v7 = vadd.f32 %v7708_v1, %v7704_v5 }
0x3459   :  { %v7711_v40 = vpack.c.bf16 %v7710_v7, %v7709_v53 }
0x345b   :  { %9254 = vmatmul.mubr.msk.bf16.vlgmr.msra.gmra.mrb[236].mxu1 %vm166_vm1, %v7711_v40 }
0x352e   :  { %v7772_v56 = vpop.f32.mrb[236].mxu1 }
0x352f   :  { %v7773_v59 = vadd.f32 %v8208_v11, %v7772_v56  ;;  %v9255_v34 = vpop.f32.mrb[237].mxu1 }
0x3530   :  { %v7775_v51 = vpop.f32.mrb[238].mxu1 }
0x3531   :  { %v7780_v26 = vcombine.high %v7773_v59, %v7773_v59  ;;  %v7787_v9 = vrot.slane %v7773_v59, %v7786_v28  ;;  %v7776_v12 = vadd.f32 %v8208_v11, %v7775_v51  ;;  %v9256_v63 = vpop.f32.mrb[239].mxu1 }
0x3533   :  { %v7794_v39 = vrot.slane %v7780_v26, %v7786_v28  ;;  %v7795_v15 = vcombine.high %v7787_v9, %v7787_v9  ;;  %v7842_v14 = vrot.slane %v7776_v12, %v7786_v28  ;;  %v7803_v61 = vrot.slane %v7787_v9, %v7786_v28 }
0x3535   :  { %v7796_v17 = vcombine.high %v7794_v39, %v7794_v39  ;;  %v7810_v41 = vrot.slane %v7794_v39, %v7786_v28  ;;  %v7817_v18 = vrot.slane %v7795_v15, %v7786_v28  ;;  %v7843_v19 = vcombine.high %v7842_v14, %v7842_v14 }
0x3536   :  { %v7850_v25 = vrot.slane %v7842_v14, %v7786_v28  ;;  %v7825_v30 = vcombine.high %v7803_v61, %v7803_v61 }
0x3537   :  { %v7824_v35 = vrot.slane %v7796_v17, %v7786_v28  ;;  %v7834_v20 = vcombine.high %v7810_v41, %v7810_v41  ;;  %v7857_v24 = vrot.slane %v7843_v19, %v7786_v28  ;;  %v7826_v4 = vcombine.high %v7817_v18, %v7817_v18 }
0x3538   :  { %v7858_v49 = vcombine.high %v7850_v25, %v7850_v25  ;;  %v7871_v62 = vrot.slane %v7850_v25, %v10175_v31 }
0x3539   :  { %v7835_v47 = vcombine.high %v7824_v35, %v7824_v35  ;;  %v7863_v33 = vrot.slane %v7834_v20, %v10175_v31  ;;  %v7859_v21 = vcombine.high %v7857_v24, %v7857_v24  ;;  %v7875_v23 = vrot.slane %v7857_v24, %v10175_v31 }
0x353a   :  { %v7879_v2 = vrot.slane %v7858_v49, %v10175_v31  ;;  %v7893_v27 = vsel %vm7890_vm13, %v7825_v30, %v7871_v62 }
0x353b   :  { %v7867_v3 = vrot.slane %v7835_v47, %v10175_v31  ;;  %v7891_v58 = vsel %vm7890_vm13, %v7803_v61, %v7863_v33  ;;  %7900 = vst.msk [vmem:[#allocation2 + $0x4] sm:$0x3] %vm7897_vm14, %v7893_v27  ;;  %v7883_v60 = vrot.slane %v7859_v21, %v10175_v31  ;;  %v7894_v38 = vsel %vm7890_vm13, %v7826_v4, %v7875_v23 }
0x353c   :  { %7898 = vst.msk [vmem:[#allocation2] sm:$0x3] %vm7897_vm14, %v7891_v58  ;;  %v7895_v6 = vsel %vm7890_vm13, %v7810_v41, %v7879_v2  ;;  %7901 = vst.msk [vmem:[#allocation2 + $0x6] sm:$0x3] %vm7897_vm14, %v7894_v38 }
0x353d   :  { %v7892_v36 = vsel %vm7890_vm13, %v7817_v18, %v7867_v3  ;;  %7902 = vst.msk [vmem:[#allocation2 + $0x8] sm:$0x3] %vm7897_vm14, %v7895_v6  ;;  %v7896_v46 = vsel %vm7890_vm13, %v7824_v35, %v7883_v60 }
0x353e   :  { %7899 = vst.msk [vmem:[#allocation2 + $0x2] sm:$0x3] %vm7897_vm14, %v7892_v36  ;;  %7903 = vst.msk [vmem:[#allocation2 + $0xa] sm:$0x3] %vm7897_vm14, %v7896_v46 }
0x353f   :  { %9681 = shalt.err (!%p9678_p4)
}
0x3540   :  { %s9682_s0 = scalar_lea.hbm %s9908_s17, 192 }
0x3541   :  { %p9683_p5 = scmp.ne.s32.totalorder %s9908_s17, %s9682_s0  ;;  %p9686_p6 = scmp.lt.u32.totalorder %s9682_s0, %s9908_s17 }
0x3543   :  { %p9688_p7 = pnand %p9686_p6, %p9683_p5 }
0x3545   :  { %9691 = shalt.err (!%p9688_p7)
}
0x3546   :  { %s9743_s5 = smov 32   ;;  %s9744_s22 = smov 2  }
0x3547   :  { %7915 = dma.vmem_to_hbm [thread:$0]  %s7910_s27, 192, %s9908_s17, [#allocation3], %s9743_s5, %s9743_s5, %s9744_s22  }
0x3548   :  { %9692 = dma.done.wait [#allocation3], 192  }
0x3549   :  { %9693 = vsyncadd [#allocation3], 4294967104 }
0x354a   :  { %7919 = vsyncpa [#allocation3], 1 }

</bundles_post_ra>
